<compile_context>
chip_gen: v5e
topology: v5e:2x2
jax: 0.10.0
libtpu: 0.0.40
codegen_flags: <defaults>
</compile_context>

<pallas_src>
import functools

import jax
import jax.numpy as jnp
from jax.experimental import pallas as pl
from jax.experimental.pallas import tpu as pltpu


# ----------------------------------------------------------------------------
# helpers
# ----------------------------------------------------------------------------
def _round_up(x, m):
    return (x + m - 1) // m * m


def _pick_tile(m, bytes_per_col, budget=4 << 20):
    """Largest lane tile (multiple of 128) dividing m within a VMEM budget,
    preferring >=2 grid steps so the pipeline overlaps DMA with compute."""
    cands = [t for t in (2048, 1024, 512, 256, 128)
             if m % t == 0 and t * bytes_per_col <= budget]
    for t in cands:
        if 2 * t <= m:
            return t
    return cands[-1] if cands else m


def _cparams(sem, streamed_bytes):
    # Scoped-VMEM limit: >=32 MiB (above v5e's 16 MiB default, harmless on
    # v6e), capped at 48 MiB so v7x's 64 MiB physical VMEM is never exceeded.
    limit = int(min(48 << 20, max(32 << 20, 3 * streamed_bytes)))
    return pltpu.CompilerParams(dimension_semantics=sem, vmem_limit_bytes=limit)


def _pad_vec(v, new, fill=0.0):
    if v.shape[0] == new:
        return v
    return jnp.concatenate([v, jnp.full((new - v.shape[0],), fill, v.dtype)])


def _pad2d(w, rows, cols):
    return jnp.pad(w, ((0, rows - w.shape[0]), (0, cols - w.shape[1])))


def _silu(v):
    # exp and the approximate reciprocal both run on the EUP slot.
    return v * pl.reciprocal(1.0 + jnp.exp(-v), approx=True)


def _leaky(v):
    return jnp.where(v >= 0.0, v, 0.1 * v)


# ----------------------------------------------------------------------------
# Kernel 1 (stem): cv1 (1x1 + BN + SiLU)  and  cv2 (1x1) + concat-BN half +
#                  LeakyReLU.  Reads x exactly once; NCHW -> channels-major
#                  happens via the BlockSpecs.
# ----------------------------------------------------------------------------
def _stem_kernel(x_ref, w1_ref, s1_ref, b1_ref, wc2_ref, s2_ref, b2_ref,
                 y_ref, z2_ref):
    x = x_ref[0].astype(jnp.bfloat16)                            # (c1, tm)
    a1 = jnp.dot(w1_ref[...], x, preferred_element_type=jnp.float32)
    y_ref[0] = _silu(a1 * s1_ref[...] + b1_ref[...]).astype(y_ref.dtype)
    a2 = jnp.dot(wc2_ref[...], x, preferred_element_type=jnp.float32)
    z2_ref[0] = _leaky(a2 * s2_ref[...] + b2_ref[...]).astype(z2_ref.dtype)


# ----------------------------------------------------------------------------
# Kernel 2 (chain): n x Bottleneck fused into one call; per grid step one
#                   image stays resident in VMEM across all n layers.
# ----------------------------------------------------------------------------
def _chain_kernel(y_ref, w1_ref, s1_ref, b1_ref, w2_ref, s2_ref, b2_ref,
                  o_ref, pad_ref, patch_ref, *, n, shortcut, H, W):
    cp = o_ref.shape[1]
    HWp = o_ref.shape[2]
    HW = H * W
    y = y_ref[0].astype(jnp.float32)                             # (cp, HWp)
    pad_ref[...] = jnp.zeros(pad_ref.shape, pad_ref.dtype)       # zero halo
    for i in range(n):
        # 1x1 conv + BN + SiLU
        t = jnp.dot(w1_ref[i], y.astype(jnp.bfloat16),
                    preferred_element_type=jnp.float32)
        t = _silu(t * s1_ref[i] + b1_ref[i])
        # 3x3 conv (pad=1) as one big-K matmul: zero-padded image tile in a
        # VMEM scratch, 9 shifted taps copied into a (9*cp, HW) VMEM patch.
        pad_ref[:, 1:H + 1, 1:W + 1] = (
            t[:, :HW].reshape(cp, H, W).astype(jnp.bfloat16))
        for ky in range(3):
            for kx in range(3):
                tap = ky * 3 + kx
                patch_ref[tap * cp:(tap + 1) * cp, :] = (
                    pad_ref[:, ky:ky + H, kx:kx + W].reshape(cp, HW))
        u = jnp.dot(w2_ref[i], patch_ref[...],
                    preferred_element_type=jnp.float32)          # (cp, HW)
        if HWp > HW:  # not traced when HW is already a multiple of 128
            u = jnp.pad(u, ((0, 0), (0, HWp - HW)))
        u = _silu(u * s2_ref[i] + b2_ref[i])
        y = y + u if shortcut else u
    o_ref[0] = y.astype(o_ref.dtype)


# ----------------------------------------------------------------------------
# Kernel 3 (tail): cv3 + concat-BN half + LeakyReLU, concat fused away,
#                  cv4 + BN + SiLU.  Output written directly in NCHW-ish
#                  (N, c2p, HWp) layout.
# ----------------------------------------------------------------------------
def _tail_kernel(y_ref, z2_ref, w3_ref, s1_ref, b1_ref, w4_ref, s4_ref,
                 b4_ref, o_ref):
    y1 = jnp.dot(w3_ref[...], y_ref[0], preferred_element_type=jnp.float32)
    z1 = _leaky(y1 * s1_ref[...] + b1_ref[...])
    # concat(y1, y2) fused: stack the halves on the sublane axis and do one
    # MXU dot against the pre-concatenated (c2p, 2*cp) cv4 weight.
    z = jnp.concatenate([z1.astype(jnp.bfloat16), z2_ref[0]], axis=0)
    acc = jnp.dot(w4_ref[...], z, preferred_element_type=jnp.float32)
    o_ref[0] = _silu(acc * s4_ref[...] + b4_ref[...]).astype(o_ref.dtype)


# ----------------------------------------------------------------------------
# full BottleneckCSP forward (3 pallas_calls)
# ----------------------------------------------------------------------------
def bottleneck_csp_forward(x, params, *, n, c2, shortcut=True):
    N, c1, H, W = x.shape
    HW = H * W
    HWp = _round_up(HW, 128)                 # lane-dense spatial axis
    cp = params["cv1_w"].shape[0]
    c2p = params["cv4_w"].shape[0]

    x3 = x.reshape(N, c1, HW)                # free reshape (no transpose)
    if HWp > HW:
        x3 = jnp.pad(x3, ((0, 0), (0, 0), (0, HWp - HW)))

    act_shape = jax.ShapeDtypeStruct((N, cp, HWp), jnp.bfloat16)

    # ---------------- stem -------------------------------------------------
    tm = _pick_tile(HWp, c1 * 4 + 2 * cp * 2)
    y0, z2 = pl.pallas_call(
        _stem_kernel,
        grid=(N, HWp // tm),
        in_specs=[
            pl.BlockSpec((1, c1, tm), lambda b, j: (b, 0, j)),
            pl.BlockSpec((cp, c1), lambda b, j: (0, 0)),
            pl.BlockSpec((cp, 1), lambda b, j: (0, 0)),
            pl.BlockSpec((cp, 1), lambda b, j: (0, 0)),
            pl.BlockSpec((cp, c1), lambda b, j: (0, 0)),
            pl.BlockSpec((cp, 1), lambda b, j: (0, 0)),
            pl.BlockSpec((cp, 1), lambda b, j: (0, 0)),
        ],
        out_specs=[
            pl.BlockSpec((1, cp, tm), lambda b, j: (b, 0, j)),
            pl.BlockSpec((1, cp, tm), lambda b, j: (b, 0, j)),
        ],
        out_shape=(act_shape, act_shape),
        compiler_params=_cparams(("parallel", "parallel"),
                                 tm * (c1 * 4 + 2 * cp * 2)),
    )(x3, params["cv1_w"], params["cv1_scale"], params["cv1_bias"],
      params["cv2_w"], params["bn_scale_y2"], params["bn_bias_y2"])

    # ---------------- fused bottleneck chain -------------------------------
    chain = functools.partial(_chain_kernel, n=n, shortcut=shortcut, H=H, W=W)
    chain_bytes = (cp * HWp * (2 * 2 + 2 * 2 + 4 + 4)
                   + 9 * cp * HW * 2 + (cp + 2) * (W + 2) * (H + 2) * 2
                   + n * cp * (cp + 9 * cp) * 2)
    y = pl.pallas_call(
        chain,
        grid=(N,),
        in_specs=[
            pl.BlockSpec((1, cp, HWp), lambda b: (b, 0, 0)),
            pl.BlockSpec((n, cp, cp), lambda b: (0, 0, 0)),
            pl.BlockSpec((n, cp, 1), lambda b: (0, 0, 0)),
            pl.BlockSpec((n, cp, 1), lambda b: (0, 0, 0)),
            pl.BlockSpec((n, cp, 9 * cp), lambda b: (0, 0, 0)),
            pl.BlockSpec((n, cp, 1), lambda b: (0, 0, 0)),
            pl.BlockSpec((n, cp, 1), lambda b: (0, 0, 0)),
        ],
        out_specs=pl.BlockSpec((1, cp, HWp), lambda b: (b, 0, 0)),
        out_shape=act_shape,
        scratch_shapes=[pltpu.VMEM((cp, H + 2, W + 2), jnp.bfloat16),
                        pltpu.VMEM((9 * cp, HW), jnp.bfloat16)],
        compiler_params=_cparams(("parallel",), chain_bytes),
    )(y0, params["m_w1"], params["m_s1"], params["m_b1"],
      params["m_w2"], params["m_s2"], params["m_b2"])

    # ---------------- tail --------------------------------------------------
    tm2 = _pick_tile(HWp, 2 * cp * 2 + c2p * 4)
    out3 = pl.pallas_call(
        _tail_kernel,
        grid=(N, HWp // tm2),
        in_specs=[
            pl.BlockSpec((1, cp, tm2), lambda b, j: (b, 0, j)),
            pl.BlockSpec((1, cp, tm2), lambda b, j: (b, 0, j)),
            pl.BlockSpec((cp, cp), lambda b, j: (0, 0)),
            pl.BlockSpec((cp, 1), lambda b, j: (0, 0)),
            pl.BlockSpec((cp, 1), lambda b, j: (0, 0)),
            pl.BlockSpec((c2p, 2 * cp), lambda b, j: (0, 0)),
            pl.BlockSpec((c2p, 1), lambda b, j: (0, 0)),
            pl.BlockSpec((c2p, 1), lambda b, j: (0, 0)),
        ],
        out_specs=pl.BlockSpec((1, c2p, tm2), lambda b, j: (b, 0, j)),
        out_shape=jax.ShapeDtypeStruct((N, c2p, HWp), jnp.float32),
        compiler_params=_cparams(("parallel", "parallel"),
                                 tm2 * (2 * cp * 2 + c2p * 4)),
    )(y, z2, params["cv3_w"], params["bn_scale_y1"], params["bn_bias_y1"],
      params["cv4_w"], params["cv4_scale"], params["cv4_bias"])

    # valid channels / valid spatial columns only (no-op when already aligned)
    return out3[:, :c2, :HW].reshape(N, c2, H, W)


# ----------------------------------------------------------------------------
# parameter construction (deterministic) + BN folding / padding / bf16 cast
# ----------------------------------------------------------------------------
def _make_bn(key, c):
    kg, kb, km, kv = jax.random.split(key, 4)
    gamma = jax.random.uniform(kg, (c,), jnp.float32, 0.5, 1.5)
    beta = jax.random.normal(kb, (c,), jnp.float32) * 0.1
    mean = jax.random.normal(km, (c,), jnp.float32) * 0.1
    var = jax.random.uniform(kv, (c,), jnp.float32, 0.5, 1.5)
    return gamma, beta, mean, var


def make_raw_params(key, c1, c2, n, e=0.5):
    c_ = int(c2 * e)
    keys = iter(jax.random.split(key, 8 + 4 * n))

    def w1x1(k, cout, cin):
        return jax.random.normal(k, (cout, cin), jnp.float32) * (cin ** -0.5)

    raw = {"cv1_w": w1x1(next(keys), c_, c1), "cv1_bn": _make_bn(next(keys), c_)}
    mlist = []
    for _ in range(n):
        mlist.append({
            "cv1_w": w1x1(next(keys), c_, c_),
            "cv1_bn": _make_bn(next(keys), c_),
            "cv2_w": jax.random.normal(next(keys), (c_, c_, 3, 3), jnp.float32)
                     * ((9 * c_) ** -0.5),
            "cv2_bn": _make_bn(next(keys), c_),
        })
    raw["m"] = mlist
    raw["cv2_w"] = w1x1(next(keys), c_, c1)
    raw["cv3_w"] = w1x1(next(keys), c_, c_)
    raw["bn"] = _make_bn(next(keys), 2 * c_)
    raw["cv4_w"] = w1x1(next(keys), c2, 2 * c_)
    raw["cv4_bn"] = _make_bn(next(keys), c2)
    return raw


def fold_params(raw, eps=1e-5):
    c_, c1 = raw["cv1_w"].shape
    c2 = raw["cv4_w"].shape[0]
    cp, c2p = _round_up(c_, 8), _round_up(c2, 8)
    wdt = jnp.bfloat16

    def fold(bn, cout_p):
        g, b, m, v = bn
        s = g / jnp.sqrt(v + eps)
        return (_pad_vec(s, cout_p, 1.0).reshape(cout_p, 1),
                _pad_vec(b - m * s, cout_p, 0.0).reshape(cout_p, 1))

    p = {"cv1_w": _pad2d(raw["cv1_w"], cp, c1).astype(wdt)}
    p["cv1_scale"], p["cv1_bias"] = fold(raw["cv1_bn"], cp)

    w1s, s1s, b1s, w2s, s2s, b2s = [], [], [], [], [], []
    for rp in raw["m"]:
        w1s.append(_pad2d(rp["cv1_w"], cp, cp))
        s1, b1 = fold(rp["cv1_bn"], cp)
        s1s.append(s1); b1s.append(b1)
        w2p = jnp.pad(rp["cv2_w"],
                      ((0, cp - c_), (0, cp - c_), (0, 0), (0, 0)))
        # (O,I,kh,kw) -> (O,kh,kw,I) -> (O, 9*I): matches the in-kernel patch
        # ordering [(ky,kx) major, channel minor].
        w2s.append(jnp.transpose(w2p, (0, 2, 3, 1)).reshape(cp, 9 * cp))
        s2, b2 = fold(rp["cv2_bn"], cp)
        s2s.append(s2); b2s.append(b2)
    p["m_w1"] = jnp.stack(w1s).astype(wdt)
    p["m_s1"] = jnp.stack(s1s)
    p["m_b1"] = jnp.stack(b1s)
    p["m_w2"] = jnp.stack(w2s).astype(wdt)
    p["m_s2"] = jnp.stack(s2s)
    p["m_b2"] = jnp.stack(b2s)

    p["cv2_w"] = _pad2d(raw["cv2_w"], cp, c1).astype(wdt)
    p["cv3_w"] = _pad2d(raw["cv3_w"], cp, cp).astype(wdt)

    g, b, m, v = raw["bn"]
    s_cat = g / jnp.sqrt(v + eps)
    b_cat = b - m * s_cat
    p["bn_scale_y1"] = _pad_vec(s_cat[:c_], cp, 1.0).reshape(cp, 1)
    p["bn_bias_y1"] = _pad_vec(b_cat[:c_], cp, 0.0).reshape(cp, 1)
    p["bn_scale_y2"] = _pad_vec(s_cat[c_:], cp, 1.0).reshape(cp, 1)
    p["bn_bias_y2"] = _pad_vec(b_cat[c_:], cp, 0.0).reshape(cp, 1)

    w4 = raw["cv4_w"]
    w4a = _pad2d(w4[:, :c_], c2p, cp)
    w4b = _pad2d(w4[:, c_:], c2p, cp)
    p["cv4_w"] = jnp.concatenate([w4a, w4b], axis=1).astype(wdt)
    p["cv4_scale"], p["cv4_bias"] = fold(raw["cv4_bn"], c2p)
    return p


# ----------------------------------------------------------------------------
# pure-JAX reference (un-fused, f32, NCHW) for validation
# ----------------------------------------------------------------------------
def bottleneck_csp_ref(x, raw, *, n, shortcut=True, eps=1e-5):
    P = jax.lax.Precision.HIGHEST

    def conv1x1(inp, w):
        return jnp.einsum("oc,nchw->nohw", w, inp, precision=P)

    def conv3x3(inp, w):
        return jax.lax.conv_general_dilated(
            inp, w, (1, 1), ((1, 1), (1, 1)),
            dimension_numbers=("NCHW", "OIHW", "NCHW"), precision=P)

    def bn(inp, g, b, m, v):
        g, b, m, v = (a[None, :, None, None] for a in (g, b, m, v))
        return (inp - m) / jnp.sqrt(v + eps) * g + b

    silu = lambda t: t * jax.nn.sigmoid(t)
    leaky = lambda t: jnp.where(t >= 0, t, 0.1 * t)

    y = silu(bn(conv1x1(x, raw["cv1_w"]), *raw["cv1_bn"]))
    for i in range(n):
        p = raw["m"][i]
        t = silu(bn(conv1x1(y, p["cv1_w"]), *p["cv1_bn"]))
        u = silu(bn(conv3x3(t, p["cv2_w"]), *p["cv2_bn"]))
        y = y + u if shortcut else u
    y1 = conv1x1(y, raw["cv3_w"])
    y2 = conv1x1(x, raw["cv2_w"])
    cat = jnp.concatenate([y1, y2], axis=1)
    z = leaky(bn(cat, *raw["bn"]))
    return silu(bn(conv1x1(z, raw["cv4_w"]), *raw["cv4_bn"]))


# ----------------------------------------------------------------------------
if __name__ == "__main__":
    N, c1, c2, H, W = 2, 8, 8, 16, 16
    n = 2
    shortcut = True

    key = jax.random.PRNGKey(0)
    kx, kp = jax.random.split(key)
    x = jax.random.normal(kx, (N, c1, H, W), dtype=jnp.float32)

    raw = make_raw_params(kp, c1, c2, n)
    params = fold_params(raw)

    fwd = jax.jit(functools.partial(bottleneck_csp_forward,
                                    n=n, c2=c2, shortcut=shortcut))
    out = jax.block_until_ready(fwd(x, params))

    ref = bottleneck_csp_ref(x, raw, n=n, shortcut=shortcut)
    assert out.shape == ref.shape == (N, c2, H, W)
    max_err = float(jnp.max(jnp.abs(out - ref)))
    # bf16 weights/activations vs. f32 reference -> relaxed tolerance.
    assert jnp.allclose(out, ref, atol=8e-2, rtol=8e-2), f"max abs err = {max_err}"
    print("KERNEL_OK")
</pallas_src>

<mosaic_0001>
module attributes {stable_mosaic.version = 11 : i64} {
  func.func @_stem_kernel(%arg0: i32, %arg1: i32, %arg2: memref<1x8x128xf32, #tpu.memory_space<vmem>>, %arg3: memref<8x8xbf16, #tpu.memory_space<vmem>>, %arg4: memref<8x1xf32, #tpu.memory_space<vmem>>, %arg5: memref<8x1xf32, #tpu.memory_space<vmem>>, %arg6: memref<8x8xbf16, #tpu.memory_space<vmem>>, %arg7: memref<8x1xf32, #tpu.memory_space<vmem>>, %arg8: memref<8x1xf32, #tpu.memory_space<vmem>>, %arg9: memref<1x8x128xbf16, #tpu.memory_space<vmem>>, %arg10: memref<1x8x128xbf16, #tpu.memory_space<vmem>>) attributes {dimension_semantics = [#tpu.dimension_semantics<parallel>, #tpu.dimension_semantics<parallel>], iteration_bounds = array<i64: 2, 2>, scalar_prefetch = 0 : i64, scratch_operands = 0 : i64, tpu.core_type = #tpu.core_type<tc>, window_params = [{transform_indices = @transform_0, window_bounds = array<i64: 1, 8, 128>}, {pipeline_mode = #tpu.pipeline_mode<synchronous>, transform_indices = @transform_1, window_bounds = array<i64: 8, 8>}, {pipeline_mode = #tpu.pipeline_mode<synchronous>, transform_indices = @transform_2, window_bounds = array<i64: 8, 1>}, {pipeline_mode = #tpu.pipeline_mode<synchronous>, transform_indices = @transform_3, window_bounds = array<i64: 8, 1>}, {pipeline_mode = #tpu.pipeline_mode<synchronous>, transform_indices = @transform_4, window_bounds = array<i64: 8, 8>}, {pipeline_mode = #tpu.pipeline_mode<synchronous>, transform_indices = @transform_5, window_bounds = array<i64: 8, 1>}, {pipeline_mode = #tpu.pipeline_mode<synchronous>, transform_indices = @transform_6, window_bounds = array<i64: 8, 1>}, {transform_indices = @transform_7, window_bounds = array<i64: 1, 8, 128>}, {transform_indices = @transform_8, window_bounds = array<i64: 1, 8, 128>}]} {
    %c0 = arith.constant 0 : index
    %c0_0 = arith.constant 0 : index
    %c0_1 = arith.constant 0 : index
    %0 = vector.load %arg2[%c0, %c0_0, %c0_1] : memref<1x8x128xf32, #tpu.memory_space<vmem>>, vector<1x8x128xf32>
    %1 = vector.shape_cast %0 : vector<1x8x128xf32> to vector<8x128xf32>
    %2 = arith.truncf %1 : vector<8x128xf32> to vector<8x128xbf16>
    %c0_2 = arith.constant 0 : index
    %c0_3 = arith.constant 0 : index
    %3 = vector.load %arg3[%c0_2, %c0_3] : memref<8x8xbf16, #tpu.memory_space<vmem>>, vector<8x8xbf16>
    %cst = arith.constant dense<0.000000e+00> : vector<8x128xf32>
    %4 = tpu.matmul %3, %2, %cst {dimension_numbers = #tpu.dot_dimension_numbers<[1], [0], [0], [1], [0, 0, 1, 1], [], []>} : vector<8x8xbf16>, vector<8x128xbf16>, vector<8x128xf32> -> vector<8x128xf32>
    %c0_4 = arith.constant 0 : index
    %c0_5 = arith.constant 0 : index
    %5 = vector.load %arg4[%c0_4, %c0_5] : memref<8x1xf32, #tpu.memory_space<vmem>>, vector<8x1xf32>
    %6 = vector.broadcast %5 : vector<8x1xf32> to vector<8x128xf32>
    %7 = arith.mulf %4, %6 : vector<8x128xf32>
    %c0_6 = arith.constant 0 : index
    %c0_7 = arith.constant 0 : index
    %8 = vector.load %arg5[%c0_6, %c0_7] : memref<8x1xf32, #tpu.memory_space<vmem>>, vector<8x1xf32>
    %9 = vector.broadcast %8 : vector<8x1xf32> to vector<8x128xf32>
    %10 = arith.addf %7, %9 : vector<8x128xf32>
    %cst_8 = arith.constant 0.000000e+00 : f32
    %11 = vector.broadcast %cst_8 : f32 to vector<8x128xf32>
    %12 = arith.subf %11, %10 : vector<8x128xf32>
    %13 = math.exp %12 : vector<8x128xf32>
    %cst_9 = arith.constant 1.000000e+00 : f32
    %14 = vector.broadcast %cst_9 : f32 to vector<8x128xf32>
    %15 = arith.addf %14, %13 : vector<8x128xf32>
    %16 = tpu.reciprocal %15 {approx = true} : vector<8x128xf32> -> vector<8x128xf32>
    %17 = arith.mulf %10, %16 : vector<8x128xf32>
    %18 = arith.truncf %17 : vector<8x128xf32> to vector<8x128xbf16>
    %c0_10 = arith.constant 0 : index
    %c0_11 = arith.constant 0 : index
    %c0_12 = arith.constant 0 : index
    %19 = vector.load %arg9[%c0_10, %c0_11, %c0_12] : memref<1x8x128xbf16, #tpu.memory_space<vmem>>, vector<1x8x128xbf16>
    %20 = vector.shape_cast %19 : vector<1x8x128xbf16> to vector<8x128xbf16>
    %21 = vector.shape_cast %18 : vector<8x128xbf16> to vector<1x8x128xbf16>
    tpu.vector_store %arg9[%c0_10, %c0_11, %c0_12], %21 {strides = array<i32>} : memref<1x8x128xbf16, #tpu.memory_space<vmem>>, vector<1x8x128xbf16>,
    %c0_13 = arith.constant 0 : index
    %c0_14 = arith.constant 0 : index
    %22 = vector.load %arg6[%c0_13, %c0_14] : memref<8x8xbf16, #tpu.memory_space<vmem>>, vector<8x8xbf16>
    %cst_15 = arith.constant dense<0.000000e+00> : vector<8x128xf32>
    %23 = tpu.matmul %22, %2, %cst_15 {dimension_numbers = #tpu.dot_dimension_numbers<[1], [0], [0], [1], [0, 0, 1, 1], [], []>} : vector<8x8xbf16>, vector<8x128xbf16>, vector<8x128xf32> -> vector<8x128xf32>
    %c0_16 = arith.constant 0 : index
    %c0_17 = arith.constant 0 : index
    %24 = vector.load %arg7[%c0_16, %c0_17] : memref<8x1xf32, #tpu.memory_space<vmem>>, vector<8x1xf32>
    %25 = vector.broadcast %24 : vector<8x1xf32> to vector<8x128xf32>
    %26 = arith.mulf %23, %25 : vector<8x128xf32>
    %c0_18 = arith.constant 0 : index
    %c0_19 = arith.constant 0 : index
    %27 = vector.load %arg8[%c0_18, %c0_19] : memref<8x1xf32, #tpu.memory_space<vmem>>, vector<8x1xf32>
    %28 = vector.broadcast %27 : vector<8x1xf32> to vector<8x128xf32>
    %29 = arith.addf %26, %28 : vector<8x128xf32>
    %cst_20 = arith.constant 0.000000e+00 : f32
    %30 = vector.broadcast %cst_20 : f32 to vector<8x128xf32>
    %31 = arith.cmpf oge, %29, %30 : vector<8x128xf32>
    %cst_21 = arith.constant 1.000000e-01 : f32
    %32 = vector.broadcast %cst_21 : f32 to vector<8x128xf32>
    %33 = arith.mulf %32, %29 : vector<8x128xf32>
    %34 = arith.select %31, %29, %33 : vector<8x128xi1>, vector<8x128xf32>
    %35 = arith.truncf %34 : vector<8x128xf32> to vector<8x128xbf16>
    %c0_22 = arith.constant 0 : index
    %c0_23 = arith.constant 0 : index
    %c0_24 = arith.constant 0 : index
    %36 = vector.load %arg10[%c0_22, %c0_23, %c0_24] : memref<1x8x128xbf16, #tpu.memory_space<vmem>>, vector<1x8x128xbf16>
    %37 = vector.shape_cast %36 : vector<1x8x128xbf16> to vector<8x128xbf16>
    %38 = vector.shape_cast %35 : vector<8x128xbf16> to vector<1x8x128xbf16>
    tpu.vector_store %arg10[%c0_22, %c0_23, %c0_24], %38 {strides = array<i32>} : memref<1x8x128xbf16, #tpu.memory_space<vmem>>, vector<1x8x128xbf16>,
    return
  }
  func.func @transform_0(%arg0: i32, %arg1: i32) -> (i32, i32, i32) {
    %c0_i32 = arith.constant 0 : i32
    %c0_i32_0 = arith.constant 0 : i32
    return %arg0, %c0_i32, %arg1 : i32, i32, i32
  }
  func.func @transform_1(%arg0: i32, %arg1: i32) -> (i32, i32) {
    %c0_i32 = arith.constant 0 : i32
    %c0_i32_0 = arith.constant 0 : i32
    %c0_i32_1 = arith.constant 0 : i32
    return %c0_i32, %c0_i32_0 : i32, i32
  }
  func.func @transform_2(%arg0: i32, %arg1: i32) -> (i32, i32) {
    %c0_i32 = arith.constant 0 : i32
    %c0_i32_0 = arith.constant 0 : i32
    %c0_i32_1 = arith.constant 0 : i32
    return %c0_i32, %c0_i32_0 : i32, i32
  }
  func.func @transform_3(%arg0: i32, %arg1: i32) -> (i32, i32) {
    %c0_i32 = arith.constant 0 : i32
    %c0_i32_0 = arith.constant 0 : i32
    %c0_i32_1 = arith.constant 0 : i32
    return %c0_i32, %c0_i32_0 : i32, i32
  }
  func.func @transform_4(%arg0: i32, %arg1: i32) -> (i32, i32) {
    %c0_i32 = arith.constant 0 : i32
    %c0_i32_0 = arith.constant 0 : i32
    %c0_i32_1 = arith.constant 0 : i32
    return %c0_i32, %c0_i32_0 : i32, i32
  }
  func.func @transform_5(%arg0: i32, %arg1: i32) -> (i32, i32) {
    %c0_i32 = arith.constant 0 : i32
    %c0_i32_0 = arith.constant 0 : i32
    %c0_i32_1 = arith.constant 0 : i32
    return %c0_i32, %c0_i32_0 : i32, i32
  }
  func.func @transform_6(%arg0: i32, %arg1: i32) -> (i32, i32) {
    %c0_i32 = arith.constant 0 : i32
    %c0_i32_0 = arith.constant 0 : i32
    %c0_i32_1 = arith.constant 0 : i32
    return %c0_i32, %c0_i32_0 : i32, i32
  }
  func.func @transform_7(%arg0: i32, %arg1: i32) -> (i32, i32, i32) {
    %c0_i32 = arith.constant 0 : i32
    %c0_i32_0 = arith.constant 0 : i32
    return %arg0, %c0_i32, %arg1 : i32, i32, i32
  }
  func.func @transform_8(%arg0: i32, %arg1: i32) -> (i32, i32, i32) {
    %c0_i32 = arith.constant 0 : i32
    %c0_i32_0 = arith.constant 0 : i32
    return %arg0, %c0_i32, %arg1 : i32, i32, i32
  }
}

module attributes {stable_mosaic.version = 11 : i64} {
  func.func @_tail_kernel(%arg0: i32, %arg1: i32, %arg2: memref<1x8x128xbf16, #tpu.memory_space<vmem>>, %arg3: memref<1x8x128xbf16, #tpu.memory_space<vmem>>, %arg4: memref<8x8xbf16, #tpu.memory_space<vmem>>, %arg5: memref<8x1xf32, #tpu.memory_space<vmem>>, %arg6: memref<8x1xf32, #tpu.memory_space<vmem>>, %arg7: memref<8x16xbf16, #tpu.memory_space<vmem>>, %arg8: memref<8x1xf32, #tpu.memory_space<vmem>>, %arg9: memref<8x1xf32, #tpu.memory_space<vmem>>, %arg10: memref<1x8x128xf32, #tpu.memory_space<vmem>>) attributes {dimension_semantics = [#tpu.dimension_semantics<parallel>, #tpu.dimension_semantics<parallel>], iteration_bounds = array<i64: 2, 2>, scalar_prefetch = 0 : i64, scratch_operands = 0 : i64, tpu.core_type = #tpu.core_type<tc>, window_params = [{transform_indices = @transform_0, window_bounds = array<i64: 1, 8, 128>}, {transform_indices = @transform_1, window_bounds = array<i64: 1, 8, 128>}, {pipeline_mode = #tpu.pipeline_mode<synchronous>, transform_indices = @transform_2, window_bounds = array<i64: 8, 8>}, {pipeline_mode = #tpu.pipeline_mode<synchronous>, transform_indices = @transform_3, window_bounds = array<i64: 8, 1>}, {pipeline_mode = #tpu.pipeline_mode<synchronous>, transform_indices = @transform_4, window_bounds = array<i64: 8, 1>}, {pipeline_mode = #tpu.pipeline_mode<synchronous>, transform_indices = @transform_5, window_bounds = array<i64: 8, 16>}, {pipeline_mode = #tpu.pipeline_mode<synchronous>, transform_indices = @transform_6, window_bounds = array<i64: 8, 1>}, {pipeline_mode = #tpu.pipeline_mode<synchronous>, transform_indices = @transform_7, window_bounds = array<i64: 8, 1>}, {transform_indices = @transform_8, window_bounds = array<i64: 1, 8, 128>}]} {
    %c0 = arith.constant 0 : index
    %c0_0 = arith.constant 0 : index
    %0 = vector.load %arg4[%c0, %c0_0] : memref<8x8xbf16, #tpu.memory_space<vmem>>, vector<8x8xbf16>
    %c0_1 = arith.constant 0 : index
    %c0_2 = arith.constant 0 : index
    %c0_3 = arith.constant 0 : index
    %1 = vector.load %arg2[%c0_1, %c0_2, %c0_3] : memref<1x8x128xbf16, #tpu.memory_space<vmem>>, vector<1x8x128xbf16>
    %2 = vector.shape_cast %1 : vector<1x8x128xbf16> to vector<8x128xbf16>
    %cst = arith.constant dense<0.000000e+00> : vector<8x128xf32>
    %3 = tpu.matmul %0, %2, %cst {dimension_numbers = #tpu.dot_dimension_numbers<[1], [0], [0], [1], [0, 0, 1, 1], [], []>} : vector<8x8xbf16>, vector<8x128xbf16>, vector<8x128xf32> -> vector<8x128xf32>
    %c0_4 = arith.constant 0 : index
    %c0_5 = arith.constant 0 : index
    %4 = vector.load %arg5[%c0_4, %c0_5] : memref<8x1xf32, #tpu.memory_space<vmem>>, vector<8x1xf32>
    %5 = vector.broadcast %4 : vector<8x1xf32> to vector<8x128xf32>
    %6 = arith.mulf %3, %5 : vector<8x128xf32>
    %c0_6 = arith.constant 0 : index
    %c0_7 = arith.constant 0 : index
    %7 = vector.load %arg6[%c0_6, %c0_7] : memref<8x1xf32, #tpu.memory_space<vmem>>, vector<8x1xf32>
    %8 = vector.broadcast %7 : vector<8x1xf32> to vector<8x128xf32>
    %9 = arith.addf %6, %8 : vector<8x128xf32>
    %cst_8 = arith.constant 0.000000e+00 : f32
    %10 = vector.broadcast %cst_8 : f32 to vector<8x128xf32>
    %11 = arith.cmpf oge, %9, %10 : vector<8x128xf32>
    %cst_9 = arith.constant 1.000000e-01 : f32
    %12 = vector.broadcast %cst_9 : f32 to vector<8x128xf32>
    %13 = arith.mulf %12, %9 : vector<8x128xf32>
    %14 = arith.select %11, %9, %13 : vector<8x128xi1>, vector<8x128xf32>
    %15 = arith.truncf %14 : vector<8x128xf32> to vector<8x128xbf16>
    %c0_10 = arith.constant 0 : index
    %c0_11 = arith.constant 0 : index
    %c0_12 = arith.constant 0 : index
    %16 = vector.load %arg3[%c0_10, %c0_11, %c0_12] : memref<1x8x128xbf16, #tpu.memory_space<vmem>>, vector<1x8x128xbf16>
    %17 = vector.shape_cast %16 : vector<1x8x128xbf16> to vector<8x128xbf16>
    %18 = tpu.concatenate %15, %17 in 0 : vector<8x128xbf16>, vector<8x128xbf16> -> vector<16x128xbf16>
    %c0_13 = arith.constant 0 : index
    %c0_14 = arith.constant 0 : index
    %19 = vector.load %arg7[%c0_13, %c0_14] : memref<8x16xbf16, #tpu.memory_space<vmem>>, vector<8x16xbf16>
    %cst_15 = arith.constant dense<0.000000e+00> : vector<8x128xf32>
    %20 = tpu.matmul %19, %18, %cst_15 {dimension_numbers = #tpu.dot_dimension_numbers<[1], [0], [0], [1], [0, 0, 1, 1], [], []>} : vector<8x16xbf16>, vector<16x128xbf16>, vector<8x128xf32> -> vector<8x128xf32>
    %c0_16 = arith.constant 0 : index
    %c0_17 = arith.constant 0 : index
    %21 = vector.load %arg8[%c0_16, %c0_17] : memref<8x1xf32, #tpu.memory_space<vmem>>, vector<8x1xf32>
    %22 = vector.broadcast %21 : vector<8x1xf32> to vector<8x128xf32>
    %23 = arith.mulf %20, %22 : vector<8x128xf32>
    %c0_18 = arith.constant 0 : index
    %c0_19 = arith.constant 0 : index
    %24 = vector.load %arg9[%c0_18, %c0_19] : memref<8x1xf32, #tpu.memory_space<vmem>>, vector<8x1xf32>
    %25 = vector.broadcast %24 : vector<8x1xf32> to vector<8x128xf32>
    %26 = arith.addf %23, %25 : vector<8x128xf32>
    %cst_20 = arith.constant 0.000000e+00 : f32
    %27 = vector.broadcast %cst_20 : f32 to vector<8x128xf32>
    %28 = arith.subf %27, %26 : vector<8x128xf32>
    %29 = math.exp %28 : vector<8x128xf32>
    %cst_21 = arith.constant 1.000000e+00 : f32
    %30 = vector.broadcast %cst_21 : f32 to vector<8x128xf32>
    %31 = arith.addf %30, %29 : vector<8x128xf32>
    %32 = tpu.reciprocal %31 {approx = true} : vector<8x128xf32> -> vector<8x128xf32>
    %33 = arith.mulf %26, %32 : vector<8x128xf32>
    %c0_22 = arith.constant 0 : index
    %c0_23 = arith.constant 0 : index
    %c0_24 = arith.constant 0 : index
    %34 = vector.load %arg10[%c0_22, %c0_23, %c0_24] : memref<1x8x128xf32, #tpu.memory_space<vmem>>, vector<1x8x128xf32>
    %35 = vector.shape_cast %34 : vector<1x8x128xf32> to vector<8x128xf32>
    %36 = vector.shape_cast %33 : vector<8x128xf32> to vector<1x8x128xf32>
    tpu.vector_store %arg10[%c0_22, %c0_23, %c0_24], %36 {strides = array<i32>} : memref<1x8x128xf32, #tpu.memory_space<vmem>>, vector<1x8x128xf32>,
    return
  }
  func.func @transform_0(%arg0: i32, %arg1: i32) -> (i32, i32, i32) {
    %c0_i32 = arith.constant 0 : i32
    %c0_i32_0 = arith.constant 0 : i32
    return %arg0, %c0_i32, %arg1 : i32, i32, i32
  }
  func.func @transform_1(%arg0: i32, %arg1: i32) -> (i32, i32, i32) {
    %c0_i32 = arith.constant 0 : i32
    %c0_i32_0 = arith.constant 0 : i32
    return %arg0, %c0_i32, %arg1 : i32, i32, i32
  }
  func.func @transform_2(%arg0: i32, %arg1: i32) -> (i32, i32) {
    %c0_i32 = arith.constant 0 : i32
    %c0_i32_0 = arith.constant 0 : i32
    %c0_i32_1 = arith.constant 0 : i32
    return %c0_i32, %c0_i32_0 : i32, i32
  }
  func.func @transform_3(%arg0: i32, %arg1: i32) -> (i32, i32) {
    %c0_i32 = arith.constant 0 : i32
    %c0_i32_0 = arith.constant 0 : i32
    %c0_i32_1 = arith.constant 0 : i32
    return %c0_i32, %c0_i32_0 : i32, i32
  }
  func.func @transform_4(%arg0: i32, %arg1: i32) -> (i32, i32) {
    %c0_i32 = arith.constant 0 : i32
    %c0_i32_0 = arith.constant 0 : i32
    %c0_i32_1 = arith.constant 0 : i32
    return %c0_i32, %c0_i32_0 : i32, i32
  }
  func.func @transform_5(%arg0: i32, %arg1: i32) -> (i32, i32) {
    %c0_i32 = arith.constant 0 : i32
    %c0_i32_0 = arith.constant 0 : i32
    %c0_i32_1 = arith.constant 0 : i32
    return %c0_i32, %c0_i32_0 : i32, i32
  }
  func.func @transform_6(%arg0: i32, %arg1: i32) -> (i32, i32) {
    %c0_i32 = arith.constant 0 : i32
    %c0_i32_0 = arith.constant 0 : i32
    %c0_i32_1 = arith.constant 0 : i32
    return %c0_i32, %c0_i32_0 : i32, i32
  }
  func.func @transform_7(%arg0: i32, %arg1: i32) -> (i32, i32) {
    %c0_i32 = arith.constant 0 : i32
    %c0_i32_0 = arith.constant 0 : i32
    %c0_i32_1 = arith.constant 0 : i32
    return %c0_i32, %c0_i32_0 : i32, i32
  }
  func.func @transform_8(%arg0: i32, %arg1: i32) -> (i32, i32, i32) {
    %c0_i32 = arith.constant 0 : i32
    %c0_i32_0 = arith.constant 0 : i32
    return %arg0, %c0_i32, %arg1 : i32, i32, i32
  }
}

module attributes {stable_mosaic.version = 11 : i64} {
  func.func @_chain_kernel(%arg0: i32, %arg1: memref<1x8x256xbf16, #tpu.memory_space<vmem>>, %arg2: memref<2x8x8xbf16, #tpu.memory_space<vmem>>, %arg3: memref<2x8x1xf32, #tpu.memory_space<vmem>>, %arg4: memref<2x8x1xf32, #tpu.memory_space<vmem>>, %arg5: memref<2x8x72xbf16, #tpu.memory_space<vmem>>, %arg6: memref<2x8x1xf32, #tpu.memory_space<vmem>>, %arg7: memref<2x8x1xf32, #tpu.memory_space<vmem>>, %arg8: memref<1x8x256xbf16, #tpu.memory_space<vmem>>, %arg9: memref<8x18x18xbf16, #tpu.memory_space<vmem>>, %arg10: memref<72x256xbf16, #tpu.memory_space<vmem>>) attributes {dimension_semantics = [#tpu.dimension_semantics<parallel>], iteration_bounds = array<i64: 2>, scalar_prefetch = 0 : i64, scratch_operands = 2 : i64, tpu.core_type = #tpu.core_type<tc>, window_params = [{transform_indices = @transform_0, window_bounds = array<i64: 1, 8, 256>}, {pipeline_mode = #tpu.pipeline_mode<synchronous>, transform_indices = @transform_1, window_bounds = array<i64: 2, 8, 8>}, {pipeline_mode = #tpu.pipeline_mode<synchronous>, transform_indices = @transform_2, window_bounds = array<i64: 2, 8, 1>}, {pipeline_mode = #tpu.pipeline_mode<synchronous>, transform_indices = @transform_3, window_bounds = array<i64: 2, 8, 1>}, {pipeline_mode = #tpu.pipeline_mode<synchronous>, transform_indices = @transform_4, window_bounds = array<i64: 2, 8, 72>}, {pipeline_mode = #tpu.pipeline_mode<synchronous>, transform_indices = @transform_5, window_bounds = array<i64: 2, 8, 1>}, {pipeline_mode = #tpu.pipeline_mode<synchronous>, transform_indices = @transform_6, window_bounds = array<i64: 2, 8, 1>}, {transform_indices = @transform_7, window_bounds = array<i64: 1, 8, 256>}]} {
    %c0 = arith.constant 0 : index
    %c0_0 = arith.constant 0 : index
    %c0_1 = arith.constant 0 : index
    %0 = vector.load %arg1[%c0, %c0_0, %c0_1] : memref<1x8x256xbf16, #tpu.memory_space<vmem>>, vector<1x8x256xbf16>
    %1 = vector.shape_cast %0 : vector<1x8x256xbf16> to vector<8x256xbf16>
    %2 = arith.extf %1 : vector<8x256xbf16> to vector<8x256xf32>
    %cst = arith.constant 0.000000e+00 : bf16
    %3 = vector.broadcast %cst : bf16 to vector<8x18x18xbf16>
    %c0_2 = arith.constant 0 : index
    %c0_3 = arith.constant 0 : index
    %c0_4 = arith.constant 0 : index
    %4 = vector.load %arg9[%c0_2, %c0_3, %c0_4] : memref<8x18x18xbf16, #tpu.memory_space<vmem>>, vector<8x18x18xbf16>
    tpu.vector_store %arg9[%c0_2, %c0_3, %c0_4], %3 {strides = array<i32>} : memref<8x18x18xbf16, #tpu.memory_space<vmem>>, vector<8x18x18xbf16>,
    %c0_5 = arith.constant 0 : index
    %c0_6 = arith.constant 0 : index
    %c0_7 = arith.constant 0 : index
    %5 = vector.load %arg2[%c0_5, %c0_6, %c0_7] : memref<2x8x8xbf16, #tpu.memory_space<vmem>>, vector<1x8x8xbf16>
    %6 = vector.shape_cast %5 : vector<1x8x8xbf16> to vector<8x8xbf16>
    %7 = arith.truncf %2 : vector<8x256xf32> to vector<8x256xbf16>
    %cst_8 = arith.constant dense<0.000000e+00> : vector<8x256xf32>
    %8 = tpu.matmul %6, %7, %cst_8 {dimension_numbers = #tpu.dot_dimension_numbers<[1], [0], [0], [1], [0, 0, 1, 1], [], []>} : vector<8x8xbf16>, vector<8x256xbf16>, vector<8x256xf32> -> vector<8x256xf32>
    %c0_9 = arith.constant 0 : index
    %c0_10 = arith.constant 0 : index
    %c0_11 = arith.constant 0 : index
    %9 = vector.load %arg3[%c0_9, %c0_10, %c0_11] : memref<2x8x1xf32, #tpu.memory_space<vmem>>, vector<1x8x1xf32>
    %10 = vector.shape_cast %9 : vector<1x8x1xf32> to vector<8x1xf32>
    %11 = vector.broadcast %10 : vector<8x1xf32> to vector<8x256xf32>
    %12 = arith.mulf %8, %11 : vector<8x256xf32>
    %c0_12 = arith.constant 0 : index
    %c0_13 = arith.constant 0 : index
    %c0_14 = arith.constant 0 : index
    %13 = vector.load %arg4[%c0_12, %c0_13, %c0_14] : memref<2x8x1xf32, #tpu.memory_space<vmem>>, vector<1x8x1xf32>
    %14 = vector.shape_cast %13 : vector<1x8x1xf32> to vector<8x1xf32>
    %15 = vector.broadcast %14 : vector<8x1xf32> to vector<8x256xf32>
    %16 = arith.addf %12, %15 : vector<8x256xf32>
    %cst_15 = arith.constant 0.000000e+00 : f32
    %17 = vector.broadcast %cst_15 : f32 to vector<8x256xf32>
    %18 = arith.subf %17, %16 : vector<8x256xf32>
    %19 = math.exp %18 : vector<8x256xf32>
    %cst_16 = arith.constant 1.000000e+00 : f32
    %20 = vector.broadcast %cst_16 : f32 to vector<8x256xf32>
    %21 = arith.addf %20, %19 : vector<8x256xf32>
    %22 = tpu.reciprocal %21 {approx = true} : vector<8x256xf32> -> vector<8x256xf32>
    %23 = arith.mulf %16, %22 : vector<8x256xf32>
    %24 = vector.shape_cast %23 : vector<8x256xf32> to vector<8x16x16xf32>
    %25 = arith.truncf %24 : vector<8x16x16xf32> to vector<8x16x16xbf16>
    %c0_17 = arith.constant 0 : index
    %c1 = arith.constant 1 : index
    %c1_18 = arith.constant 1 : index
    %26 = vector.load %arg9[%c0_17, %c1, %c1_18] : memref<8x18x18xbf16, #tpu.memory_space<vmem>>, vector<8x16x16xbf16>
    tpu.vector_store %arg9[%c0_17, %c1, %c1_18], %25 {strides = array<i32>} : memref<8x18x18xbf16, #tpu.memory_space<vmem>>, vector<8x16x16xbf16>,
    %c0_19 = arith.constant 0 : index
    %c0_20 = arith.constant 0 : index
    %c0_21 = arith.constant 0 : index
    %27 = vector.load %arg9[%c0_19, %c0_20, %c0_21] : memref<8x18x18xbf16, #tpu.memory_space<vmem>>, vector<8x16x16xbf16>
    %28 = vector.shape_cast %27 : vector<8x16x16xbf16> to vector<8x256xbf16>
    %c0_22 = arith.constant 0 : index
    %c0_23 = arith.constant 0 : index
    %29 = vector.load %arg10[%c0_22, %c0_23] : memref<72x256xbf16, #tpu.memory_space<vmem>>, vector<8x256xbf16>
    tpu.vector_store %arg10[%c0_22, %c0_23], %28 {strides = array<i32>} : memref<72x256xbf16, #tpu.memory_space<vmem>>, vector<8x256xbf16>,
    %c0_24 = arith.constant 0 : index
    %c0_25 = arith.constant 0 : index
    %c1_26 = arith.constant 1 : index
    %30 = vector.load %arg9[%c0_24, %c0_25, %c1_26] : memref<8x18x18xbf16, #tpu.memory_space<vmem>>, vector<8x16x16xbf16>
    %31 = vector.shape_cast %30 : vector<8x16x16xbf16> to vector<8x256xbf16>
    %c8 = arith.constant 8 : index
    %c0_27 = arith.constant 0 : index
    %32 = vector.load %arg10[%c8, %c0_27] : memref<72x256xbf16, #tpu.memory_space<vmem>>, vector<8x256xbf16>
    tpu.vector_store %arg10[%c8, %c0_27], %31 {strides = array<i32>} : memref<72x256xbf16, #tpu.memory_space<vmem>>, vector<8x256xbf16>,
    %c0_28 = arith.constant 0 : index
    %c0_29 = arith.constant 0 : index
    %c2 = arith.constant 2 : index
    %33 = vector.load %arg9[%c0_28, %c0_29, %c2] : memref<8x18x18xbf16, #tpu.memory_space<vmem>>, vector<8x16x16xbf16>
    %34 = vector.shape_cast %33 : vector<8x16x16xbf16> to vector<8x256xbf16>
    %c16 = arith.constant 16 : index
    %c0_30 = arith.constant 0 : index
    %35 = vector.load %arg10[%c16, %c0_30] : memref<72x256xbf16, #tpu.memory_space<vmem>>, vector<8x256xbf16>
    tpu.vector_store %arg10[%c16, %c0_30], %34 {strides = array<i32>} : memref<72x256xbf16, #tpu.memory_space<vmem>>, vector<8x256xbf16>,
    %c0_31 = arith.constant 0 : index
    %c1_32 = arith.constant 1 : index
    %c0_33 = arith.constant 0 : index
    %36 = vector.load %arg9[%c0_31, %c1_32, %c0_33] : memref<8x18x18xbf16, #tpu.memory_space<vmem>>, vector<8x16x16xbf16>
    %37 = vector.shape_cast %36 : vector<8x16x16xbf16> to vector<8x256xbf16>
    %c24 = arith.constant 24 : index
    %c0_34 = arith.constant 0 : index
    %38 = vector.load %arg10[%c24, %c0_34] : memref<72x256xbf16, #tpu.memory_space<vmem>>, vector<8x256xbf16>
    tpu.vector_store %arg10[%c24, %c0_34], %37 {strides = array<i32>} : memref<72x256xbf16, #tpu.memory_space<vmem>>, vector<8x256xbf16>,
    %c0_35 = arith.constant 0 : index
    %c1_36 = arith.constant 1 : index
    %c1_37 = arith.constant 1 : index
    %39 = vector.load %arg9[%c0_35, %c1_36, %c1_37] : memref<8x18x18xbf16, #tpu.memory_space<vmem>>, vector<8x16x16xbf16>
    %40 = vector.shape_cast %39 : vector<8x16x16xbf16> to vector<8x256xbf16>
    %c32 = arith.constant 32 : index
    %c0_38 = arith.constant 0 : index
    %41 = vector.load %arg10[%c32, %c0_38] : memref<72x256xbf16, #tpu.memory_space<vmem>>, vector<8x256xbf16>
    tpu.vector_store %arg10[%c32, %c0_38], %40 {strides = array<i32>} : memref<72x256xbf16, #tpu.memory_space<vmem>>, vector<8x256xbf16>,
    %c0_39 = arith.constant 0 : index
    %c1_40 = arith.constant 1 : index
    %c2_41 = arith.constant 2 : index
    %42 = vector.load %arg9[%c0_39, %c1_40, %c2_41] : memref<8x18x18xbf16, #tpu.memory_space<vmem>>, vector<8x16x16xbf16>
    %43 = vector.shape_cast %42 : vector<8x16x16xbf16> to vector<8x256xbf16>
    %c40 = arith.constant 40 : index
    %c0_42 = arith.constant 0 : index
    %44 = vector.load %arg10[%c40, %c0_42] : memref<72x256xbf16, #tpu.memory_space<vmem>>, vector<8x256xbf16>
    tpu.vector_store %arg10[%c40, %c0_42], %43 {strides = array<i32>} : memref<72x256xbf16, #tpu.memory_space<vmem>>, vector<8x256xbf16>,
    %c0_43 = arith.constant 0 : index
    %c2_44 = arith.constant 2 : index
    %c0_45 = arith.constant 0 : index
    %45 = vector.load %arg9[%c0_43, %c2_44, %c0_45] : memref<8x18x18xbf16, #tpu.memory_space<vmem>>, vector<8x16x16xbf16>
    %46 = vector.shape_cast %45 : vector<8x16x16xbf16> to vector<8x256xbf16>
    %c48 = arith.constant 48 : index
    %c0_46 = arith.constant 0 : index
    %47 = vector.load %arg10[%c48, %c0_46] : memref<72x256xbf16, #tpu.memory_space<vmem>>, vector<8x256xbf16>
    tpu.vector_store %arg10[%c48, %c0_46], %46 {strides = array<i32>} : memref<72x256xbf16, #tpu.memory_space<vmem>>, vector<8x256xbf16>,
    %c0_47 = arith.constant 0 : index
    %c2_48 = arith.constant 2 : index
    %c1_49 = arith.constant 1 : index
    %48 = vector.load %arg9[%c0_47, %c2_48, %c1_49] : memref<8x18x18xbf16, #tpu.memory_space<vmem>>, vector<8x16x16xbf16>
    %49 = vector.shape_cast %48 : vector<8x16x16xbf16> to vector<8x256xbf16>
    %c56 = arith.constant 56 : index
    %c0_50 = arith.constant 0 : index
    %50 = vector.load %arg10[%c56, %c0_50] : memref<72x256xbf16, #tpu.memory_space<vmem>>, vector<8x256xbf16>
    tpu.vector_store %arg10[%c56, %c0_50], %49 {strides = array<i32>} : memref<72x256xbf16, #tpu.memory_space<vmem>>, vector<8x256xbf16>,
    %c0_51 = arith.constant 0 : index
    %c2_52 = arith.constant 2 : index
    %c2_53 = arith.constant 2 : index
    %51 = vector.load %arg9[%c0_51, %c2_52, %c2_53] : memref<8x18x18xbf16, #tpu.memory_space<vmem>>, vector<8x16x16xbf16>
    %52 = vector.shape_cast %51 : vector<8x16x16xbf16> to vector<8x256xbf16>
    %c64 = arith.constant 64 : index
    %c0_54 = arith.constant 0 : index
    %53 = vector.load %arg10[%c64, %c0_54] : memref<72x256xbf16, #tpu.memory_space<vmem>>, vector<8x256xbf16>
    tpu.vector_store %arg10[%c64, %c0_54], %52 {strides = array<i32>} : memref<72x256xbf16, #tpu.memory_space<vmem>>, vector<8x256xbf16>,
    %c0_55 = arith.constant 0 : index
    %c0_56 = arith.constant 0 : index
    %c0_57 = arith.constant 0 : index
    %54 = vector.load %arg5[%c0_55, %c0_56, %c0_57] : memref<2x8x72xbf16, #tpu.memory_space<vmem>>, vector<1x8x72xbf16>
    %55 = vector.shape_cast %54 : vector<1x8x72xbf16> to vector<8x72xbf16>
    %c0_58 = arith.constant 0 : index
    %c0_59 = arith.constant 0 : index
    %56 = vector.load %arg10[%c0_58, %c0_59] : memref<72x256xbf16, #tpu.memory_space<vmem>>, vector<72x256xbf16>
    %cst_60 = arith.constant dense<0.000000e+00> : vector<8x256xf32>
    %57 = tpu.matmul %55, %56, %cst_60 {dimension_numbers = #tpu.dot_dimension_numbers<[1], [0], [0], [1], [0, 0, 1, 1], [], []>} : vector<8x72xbf16>, vector<72x256xbf16>, vector<8x256xf32> -> vector<8x256xf32>
    %c0_61 = arith.constant 0 : index
    %c0_62 = arith.constant 0 : index
    %c0_63 = arith.constant 0 : index
    %58 = vector.load %arg6[%c0_61, %c0_62, %c0_63] : memref<2x8x1xf32, #tpu.memory_space<vmem>>, vector<1x8x1xf32>
    %59 = vector.shape_cast %58 : vector<1x8x1xf32> to vector<8x1xf32>
    %60 = vector.broadcast %59 : vector<8x1xf32> to vector<8x256xf32>
    %61 = arith.mulf %57, %60 : vector<8x256xf32>
    %c0_64 = arith.constant 0 : index
    %c0_65 = arith.constant 0 : index
    %c0_66 = arith.constant 0 : index
    %62 = vector.load %arg7[%c0_64, %c0_65, %c0_66] : memref<2x8x1xf32, #tpu.memory_space<vmem>>, vector<1x8x1xf32>
    %63 = vector.shape_cast %62 : vector<1x8x1xf32> to vector<8x1xf32>
    %64 = vector.broadcast %63 : vector<8x1xf32> to vector<8x256xf32>
    %65 = arith.addf %61, %64 : vector<8x256xf32>
    %cst_67 = arith.constant 0.000000e+00 : f32
    %66 = vector.broadcast %cst_67 : f32 to vector<8x256xf32>
    %67 = arith.subf %66, %65 : vector<8x256xf32>
    %68 = math.exp %67 : vector<8x256xf32>
    %cst_68 = arith.constant 1.000000e+00 : f32
    %69 = vector.broadcast %cst_68 : f32 to vector<8x256xf32>
    %70 = arith.addf %69, %68 : vector<8x256xf32>
    %71 = tpu.reciprocal %70 {approx = true} : vector<8x256xf32> -> vector<8x256xf32>
    %72 = arith.mulf %65, %71 : vector<8x256xf32>
    %73 = arith.addf %2, %72 : vector<8x256xf32>
    %c1_69 = arith.constant 1 : index
    %c0_70 = arith.constant 0 : index
    %c0_71 = arith.constant 0 : index
    %74 = vector.load %arg2[%c1_69, %c0_70, %c0_71] : memref<2x8x8xbf16, #tpu.memory_space<vmem>>, vector<1x8x8xbf16>
    %75 = vector.shape_cast %74 : vector<1x8x8xbf16> to vector<8x8xbf16>
    %76 = arith.truncf %73 : vector<8x256xf32> to vector<8x256xbf16>
    %cst_72 = arith.constant dense<0.000000e+00> : vector<8x256xf32>
    %77 = tpu.matmul %75, %76, %cst_72 {dimension_numbers = #tpu.dot_dimension_numbers<[1], [0], [0], [1], [0, 0, 1, 1], [], []>} : vector<8x8xbf16>, vector<8x256xbf16>, vector<8x256xf32> -> vector<8x256xf32>
    %c1_73 = arith.constant 1 : index
    %c0_74 = arith.constant 0 : index
    %c0_75 = arith.constant 0 : index
    %78 = vector.load %arg3[%c1_73, %c0_74, %c0_75] : memref<2x8x1xf32, #tpu.memory_space<vmem>>, vector<1x8x1xf32>
    %79 = vector.shape_cast %78 : vector<1x8x1xf32> to vector<8x1xf32>
    %80 = vector.broadcast %79 : vector<8x1xf32> to vector<8x256xf32>
    %81 = arith.mulf %77, %80 : vector<8x256xf32>
    %c1_76 = arith.constant 1 : index
    %c0_77 = arith.constant 0 : index
    %c0_78 = arith.constant 0 : index
    %82 = vector.load %arg4[%c1_76, %c0_77, %c0_78] : memref<2x8x1xf32, #tpu.memory_space<vmem>>, vector<1x8x1xf32>
    %83 = vector.shape_cast %82 : vector<1x8x1xf32> to vector<8x1xf32>
    %84 = vector.broadcast %83 : vector<8x1xf32> to vector<8x256xf32>
    %85 = arith.addf %81, %84 : vector<8x256xf32>
    %cst_79 = arith.constant 0.000000e+00 : f32
    %86 = vector.broadcast %cst_79 : f32 to vector<8x256xf32>
    %87 = arith.subf %86, %85 : vector<8x256xf32>
    %88 = math.exp %87 : vector<8x256xf32>
    %cst_80 = arith.constant 1.000000e+00 : f32
    %89 = vector.broadcast %cst_80 : f32 to vector<8x256xf32>
    %90 = arith.addf %89, %88 : vector<8x256xf32>
    %91 = tpu.reciprocal %90 {approx = true} : vector<8x256xf32> -> vector<8x256xf32>
    %92 = arith.mulf %85, %91 : vector<8x256xf32>
    %93 = vector.shape_cast %92 : vector<8x256xf32> to vector<8x16x16xf32>
    %94 = arith.truncf %93 : vector<8x16x16xf32> to vector<8x16x16xbf16>
    %c0_81 = arith.constant 0 : index
    %c1_82 = arith.constant 1 : index
    %c1_83 = arith.constant 1 : index
    %95 = vector.load %arg9[%c0_81, %c1_82, %c1_83] : memref<8x18x18xbf16, #tpu.memory_space<vmem>>, vector<8x16x16xbf16>
    tpu.vector_store %arg9[%c0_81, %c1_82, %c1_83], %94 {strides = array<i32>} : memref<8x18x18xbf16, #tpu.memory_space<vmem>>, vector<8x16x16xbf16>,
    %c0_84 = arith.constant 0 : index
    %c0_85 = arith.constant 0 : index
    %c0_86 = arith.constant 0 : index
    %96 = vector.load %arg9[%c0_84, %c0_85, %c0_86] : memref<8x18x18xbf16, #tpu.memory_space<vmem>>, vector<8x16x16xbf16>
    %97 = vector.shape_cast %96 : vector<8x16x16xbf16> to vector<8x256xbf16>
    %c0_87 = arith.constant 0 : index
    %c0_88 = arith.constant 0 : index
    %98 = vector.load %arg10[%c0_87, %c0_88] : memref<72x256xbf16, #tpu.memory_space<vmem>>, vector<8x256xbf16>
    tpu.vector_store %arg10[%c0_87, %c0_88], %97 {strides = array<i32>} : memref<72x256xbf16, #tpu.memory_space<vmem>>, vector<8x256xbf16>,
    %c0_89 = arith.constant 0 : index
    %c0_90 = arith.constant 0 : index
    %c1_91 = arith.constant 1 : index
    %99 = vector.load %arg9[%c0_89, %c0_90, %c1_91] : memref<8x18x18xbf16, #tpu.memory_space<vmem>>, vector<8x16x16xbf16>
    %100 = vector.shape_cast %99 : vector<8x16x16xbf16> to vector<8x256xbf16>
    %c8_92 = arith.constant 8 : index
    %c0_93 = arith.constant 0 : index
    %101 = vector.load %arg10[%c8_92, %c0_93] : memref<72x256xbf16, #tpu.memory_space<vmem>>, vector<8x256xbf16>
    tpu.vector_store %arg10[%c8_92, %c0_93], %100 {strides = array<i32>} : memref<72x256xbf16, #tpu.memory_space<vmem>>, vector<8x256xbf16>,
    %c0_94 = arith.constant 0 : index
    %c0_95 = arith.constant 0 : index
    %c2_96 = arith.constant 2 : index
    %102 = vector.load %arg9[%c0_94, %c0_95, %c2_96] : memref<8x18x18xbf16, #tpu.memory_space<vmem>>, vector<8x16x16xbf16>
    %103 = vector.shape_cast %102 : vector<8x16x16xbf16> to vector<8x256xbf16>
    %c16_97 = arith.constant 16 : index
    %c0_98 = arith.constant 0 : index
    %104 = vector.load %arg10[%c16_97, %c0_98] : memref<72x256xbf16, #tpu.memory_space<vmem>>, vector<8x256xbf16>
    tpu.vector_store %arg10[%c16_97, %c0_98], %103 {strides = array<i32>} : memref<72x256xbf16, #tpu.memory_space<vmem>>, vector<8x256xbf16>,
    %c0_99 = arith.constant 0 : index
    %c1_100 = arith.constant 1 : index
    %c0_101 = arith.constant 0 : index
    %105 = vector.load %arg9[%c0_99, %c1_100, %c0_101] : memref<8x18x18xbf16, #tpu.memory_space<vmem>>, vector<8x16x16xbf16>
    %106 = vector.shape_cast %105 : vector<8x16x16xbf16> to vector<8x256xbf16>
    %c24_102 = arith.constant 24 : index
    %c0_103 = arith.constant 0 : index
    %107 = vector.load %arg10[%c24_102, %c0_103] : memref<72x256xbf16, #tpu.memory_space<vmem>>, vector<8x256xbf16>
    tpu.vector_store %arg10[%c24_102, %c0_103], %106 {strides = array<i32>} : memref<72x256xbf16, #tpu.memory_space<vmem>>, vector<8x256xbf16>,
    %c0_104 = arith.constant 0 : index
    %c1_105 = arith.constant 1 : index
    %c1_106 = arith.constant 1 : index
    %108 = vector.load %arg9[%c0_104, %c1_105, %c1_106] : memref<8x18x18xbf16, #tpu.memory_space<vmem>>, vector<8x16x16xbf16>
    %109 = vector.shape_cast %108 : vector<8x16x16xbf16> to vector<8x256xbf16>
    %c32_107 = arith.constant 32 : index
    %c0_108 = arith.constant 0 : index
    %110 = vector.load %arg10[%c32_107, %c0_108] : memref<72x256xbf16, #tpu.memory_space<vmem>>, vector<8x256xbf16>
    tpu.vector_store %arg10[%c32_107, %c0_108], %109 {strides = array<i32>} : memref<72x256xbf16, #tpu.memory_space<vmem>>, vector<8x256xbf16>,
    %c0_109 = arith.constant 0 : index
    %c1_110 = arith.constant 1 : index
    %c2_111 = arith.constant 2 : index
    %111 = vector.load %arg9[%c0_109, %c1_110, %c2_111] : memref<8x18x18xbf16, #tpu.memory_space<vmem>>, vector<8x16x16xbf16>
    %112 = vector.shape_cast %111 : vector<8x16x16xbf16> to vector<8x256xbf16>
    %c40_112 = arith.constant 40 : index
    %c0_113 = arith.constant 0 : index
    %113 = vector.load %arg10[%c40_112, %c0_113] : memref<72x256xbf16, #tpu.memory_space<vmem>>, vector<8x256xbf16>
    tpu.vector_store %arg10[%c40_112, %c0_113], %112 {strides = array<i32>} : memref<72x256xbf16, #tpu.memory_space<vmem>>, vector<8x256xbf16>,
    %c0_114 = arith.constant 0 : index
    %c2_115 = arith.constant 2 : index
    %c0_116 = arith.constant 0 : index
    %114 = vector.load %arg9[%c0_114, %c2_115, %c0_116] : memref<8x18x18xbf16, #tpu.memory_space<vmem>>, vector<8x16x16xbf16>
    %115 = vector.shape_cast %114 : vector<8x16x16xbf16> to vector<8x256xbf16>
    %c48_117 = arith.constant 48 : index
    %c0_118 = arith.constant 0 : index
    %116 = vector.load %arg10[%c48_117, %c0_118] : memref<72x256xbf16, #tpu.memory_space<vmem>>, vector<8x256xbf16>
    tpu.vector_store %arg10[%c48_117, %c0_118], %115 {strides = array<i32>} : memref<72x256xbf16, #tpu.memory_space<vmem>>, vector<8x256xbf16>,
    %c0_119 = arith.constant 0 : index
    %c2_120 = arith.constant 2 : index
    %c1_121 = arith.constant 1 : index
    %117 = vector.load %arg9[%c0_119, %c2_120, %c1_121] : memref<8x18x18xbf16, #tpu.memory_space<vmem>>, vector<8x16x16xbf16>
    %118 = vector.shape_cast %117 : vector<8x16x16xbf16> to vector<8x256xbf16>
    %c56_122 = arith.constant 56 : index
    %c0_123 = arith.constant 0 : index
    %119 = vector.load %arg10[%c56_122, %c0_123] : memref<72x256xbf16, #tpu.memory_space<vmem>>, vector<8x256xbf16>
    tpu.vector_store %arg10[%c56_122, %c0_123], %118 {strides = array<i32>} : memref<72x256xbf16, #tpu.memory_space<vmem>>, vector<8x256xbf16>,
    %c0_124 = arith.constant 0 : index
    %c2_125 = arith.constant 2 : index
    %c2_126 = arith.constant 2 : index
    %120 = vector.load %arg9[%c0_124, %c2_125, %c2_126] : memref<8x18x18xbf16, #tpu.memory_space<vmem>>, vector<8x16x16xbf16>
    %121 = vector.shape_cast %120 : vector<8x16x16xbf16> to vector<8x256xbf16>
    %c64_127 = arith.constant 64 : index
    %c0_128 = arith.constant 0 : index
    %122 = vector.load %arg10[%c64_127, %c0_128] : memref<72x256xbf16, #tpu.memory_space<vmem>>, vector<8x256xbf16>
    tpu.vector_store %arg10[%c64_127, %c0_128], %121 {strides = array<i32>} : memref<72x256xbf16, #tpu.memory_space<vmem>>, vector<8x256xbf16>,
    %c1_129 = arith.constant 1 : index
    %c0_130 = arith.constant 0 : index
    %c0_131 = arith.constant 0 : index
    %123 = vector.load %arg5[%c1_129, %c0_130, %c0_131] : memref<2x8x72xbf16, #tpu.memory_space<vmem>>, vector<1x8x72xbf16>
    %124 = vector.shape_cast %123 : vector<1x8x72xbf16> to vector<8x72xbf16>
    %c0_132 = arith.constant 0 : index
    %c0_133 = arith.constant 0 : index
    %125 = vector.load %arg10[%c0_132, %c0_133] : memref<72x256xbf16, #tpu.memory_space<vmem>>, vector<72x256xbf16>
    %cst_134 = arith.constant dense<0.000000e+00> : vector<8x256xf32>
    %126 = tpu.matmul %124, %125, %cst_134 {dimension_numbers = #tpu.dot_dimension_numbers<[1], [0], [0], [1], [0, 0, 1, 1], [], []>} : vector<8x72xbf16>, vector<72x256xbf16>, vector<8x256xf32> -> vector<8x256xf32>
    %c1_135 = arith.constant 1 : index
    %c0_136 = arith.constant 0 : index
    %c0_137 = arith.constant 0 : index
    %127 = vector.load %arg6[%c1_135, %c0_136, %c0_137] : memref<2x8x1xf32, #tpu.memory_space<vmem>>, vector<1x8x1xf32>
    %128 = vector.shape_cast %127 : vector<1x8x1xf32> to vector<8x1xf32>
    %129 = vector.broadcast %128 : vector<8x1xf32> to vector<8x256xf32>
    %130 = arith.mulf %126, %129 : vector<8x256xf32>
    %c1_138 = arith.constant 1 : index
    %c0_139 = arith.constant 0 : index
    %c0_140 = arith.constant 0 : index
    %131 = vector.load %arg7[%c1_138, %c0_139, %c0_140] : memref<2x8x1xf32, #tpu.memory_space<vmem>>, vector<1x8x1xf32>
    %132 = vector.shape_cast %131 : vector<1x8x1xf32> to vector<8x1xf32>
    %133 = vector.broadcast %132 : vector<8x1xf32> to vector<8x256xf32>
    %134 = arith.addf %130, %133 : vector<8x256xf32>
    %cst_141 = arith.constant 0.000000e+00 : f32
    %135 = vector.broadcast %cst_141 : f32 to vector<8x256xf32>
    %136 = arith.subf %135, %134 : vector<8x256xf32>
    %137 = math.exp %136 : vector<8x256xf32>
    %cst_142 = arith.constant 1.000000e+00 : f32
    %138 = vector.broadcast %cst_142 : f32 to vector<8x256xf32>
    %139 = arith.addf %138, %137 : vector<8x256xf32>
    %140 = tpu.reciprocal %139 {approx = true} : vector<8x256xf32> -> vector<8x256xf32>
    %141 = arith.mulf %134, %140 : vector<8x256xf32>
    %142 = arith.addf %73, %141 : vector<8x256xf32>
    %143 = arith.truncf %142 : vector<8x256xf32> to vector<8x256xbf16>
    %c0_143 = arith.constant 0 : index
    %c0_144 = arith.constant 0 : index
    %c0_145 = arith.constant 0 : index
    %144 = vector.load %arg8[%c0_143, %c0_144, %c0_145] : memref<1x8x256xbf16, #tpu.memory_space<vmem>>, vector<1x8x256xbf16>
    %145 = vector.shape_cast %144 : vector<1x8x256xbf16> to vector<8x256xbf16>
    %146 = vector.shape_cast %143 : vector<8x256xbf16> to vector<1x8x256xbf16>
    tpu.vector_store %arg8[%c0_143, %c0_144, %c0_145], %146 {strides = array<i32>} : memref<1x8x256xbf16, #tpu.memory_space<vmem>>, vector<1x8x256xbf16>,
    return
  }
  func.func @transform_0(%arg0: i32) -> (i32, i32, i32) {
    %c0_i32 = arith.constant 0 : i32
    %c0_i32_0 = arith.constant 0 : i32
    %c0_i32_1 = arith.constant 0 : i32
    return %arg0, %c0_i32, %c0_i32_0 : i32, i32, i32
  }
  func.func @transform_1(%arg0: i32) -> (i32, i32, i32) {
    %c0_i32 = arith.constant 0 : i32
    %c0_i32_0 = arith.constant 0 : i32
    %c0_i32_1 = arith.constant 0 : i32
    %c0_i32_2 = arith.constant 0 : i32
    return %c0_i32, %c0_i32_0, %c0_i32_1 : i32, i32, i32
  }
  func.func @transform_2(%arg0: i32) -> (i32, i32, i32) {
    %c0_i32 = arith.constant 0 : i32
    %c0_i32_0 = arith.constant 0 : i32
    %c0_i32_1 = arith.constant 0 : i32
    %c0_i32_2 = arith.constant 0 : i32
    return %c0_i32, %c0_i32_0, %c0_i32_1 : i32, i32, i32
  }
  func.func @transform_3(%arg0: i32) -> (i32, i32, i32) {
    %c0_i32 = arith.constant 0 : i32
    %c0_i32_0 = arith.constant 0 : i32
    %c0_i32_1 = arith.constant 0 : i32
    %c0_i32_2 = arith.constant 0 : i32
    return %c0_i32, %c0_i32_0, %c0_i32_1 : i32, i32, i32
  }
  func.func @transform_4(%arg0: i32) -> (i32, i32, i32) {
    %c0_i32 = arith.constant 0 : i32
    %c0_i32_0 = arith.constant 0 : i32
    %c0_i32_1 = arith.constant 0 : i32
    %c0_i32_2 = arith.constant 0 : i32
    return %c0_i32, %c0_i32_0, %c0_i32_1 : i32, i32, i32
  }
  func.func @transform_5(%arg0: i32) -> (i32, i32, i32) {
    %c0_i32 = arith.constant 0 : i32
    %c0_i32_0 = arith.constant 0 : i32
    %c0_i32_1 = arith.constant 0 : i32
    %c0_i32_2 = arith.constant 0 : i32
    return %c0_i32, %c0_i32_0, %c0_i32_1 : i32, i32, i32
  }
  func.func @transform_6(%arg0: i32) -> (i32, i32, i32) {
    %c0_i32 = arith.constant 0 : i32
    %c0_i32_0 = arith.constant 0 : i32
    %c0_i32_1 = arith.constant 0 : i32
    %c0_i32_2 = arith.constant 0 : i32
    return %c0_i32, %c0_i32_0, %c0_i32_1 : i32, i32, i32
  }
  func.func @transform_7(%arg0: i32) -> (i32, i32, i32) {
    %c0_i32 = arith.constant 0 : i32
    %c0_i32_0 = arith.constant 0 : i32
    %c0_i32_1 = arith.constant 0 : i32
    return %arg0, %c0_i32, %c0_i32_0 : i32, i32, i32
  }
}

</mosaic_0001>

<bundles_post_ra>
// kernel: bottleneck_csp_forward.3
= control target key start
LH: loop header
LB: loop body
LE: loop exit
PB: predicated region body
PF: predicated region fallthrough
CT: control target
= control target key end

     0   :  { %s722_s27 = smov 0   ;;  %s724_s28 = smov 0   ;;  %s798_s0 = inlined_call_operand.vmem [shape: f32[2,8,256], index: 0, kind: input, shape index: {}]   ;;  %s799_s1 = inlined_call_operand.vmem [shape: bf16[8,8], index: 1, kind: input, shape index: {}]   ;;  %s800_s2 = inlined_call_operand.vmem [shape: f32[8,1], index: 2, kind: input, shape index: {}]   ;;  %s801_s3 = inlined_call_operand.vmem [shape: f32[8,1], index: 3, kind: input, shape index: {}]   ;;  %s802_s4 = inlined_call_operand.vmem [shape: bf16[8,8], index: 4, kind: input, shape index: {}]   ;;  %s803_s5 = inlined_call_operand.vmem [shape: f32[8,1], index: 5, kind: input, shape index: {}]   ;;  %s804_s6 = inlined_call_operand.vmem [shape: f32[8,1], index: 6, kind: input, shape index: {}]   ;;  %s805_s7 = inlined_call_operand.vmem [shape: bf16[2,8,256], index: 7, kind: output, shape index: {0}]   ;;  %s806_s8 = inlined_call_operand.vmem [shape: bf16[2,8,256], index: 8, kind: output, shape index: {1}]  }
   0x1   :  { %s726_s29 = smov 0   ;;  %s728_s30 = smov 0  }
   0x2   :  { %s730_s9 = smov 0  }
   0x3 LB: > { %s28_s10 = sadd.s32 1, %s666_s29  ;;  %s31_s11 = sadd.s32 1, %s670_s30  ;;  %s674_s9 = sphi %s730_s9, %s19_s9   ;;  %s670_s30 = sphi %s728_s30, %s810_s30   ;;  %s666_s29 = sphi %s726_s29, %s809_s29   ;;  %s662_s28 = sphi %s724_s28, %s808_s28   ;;  %s658_s27 = sphi %s722_s27, %s807_s27  }
   0x4   : > { %p29_p0 = scmp.ge.s32.totalorder %s28_s10, 2  ;;  %p578_p1 = scmp.ge.s32.totalorder %s674_s9, 1 }
   0x5   : > { %p286_p2 = scmp.lt.s32.totalorder %s674_s9, 5 }
   0x6   : > { %s812_s10 = smov (%p29_p0, %s28_s10), 0  ;;  %s814_s11 = smov (!%p29_p0, %s31_s11), %s670_s30 }
   0x7   : > { %p287_p3 = pnand %p578_p1, %p286_p2  ;;  %p33_p4 = scmp.ge.s32.totalorder %s814_s11, 2 }
   0x8   : > { %p334_p5 = scmp.lt.s32.totalorder (!%p287_p3), %s662_s28, 1  ;;  %p336_p6 = scmp.lt.s32.totalorder (!%p287_p3), %s658_s27, 1 }
   0x9   : > { %s816_s11 = smov (%p33_p4, %s814_s11), 0  ;;  %290 = sbr.rel (%p287_p3) target bundleno = 181 (0xb5), region = 48 }
   0xe   : > { %v383_v0 = vld [vmem:[%s800_s2] sm:$0xff]  ;;  %v676_v1 = vmov 0   ;;  %s818_s28 = smov (!%p334_p5, %s662_s28), 1  ;;  %s820_s27 = smov (!%p336_p6, %s658_s27), 1  ;;  %vm366_vm0 = vcmask 1043456   ;;  %vm362_vm1 = vcmask 64512  }
   0xf   : > { %630 = vset.pattern.permute.xlu0 %v676_v1  ;;  %631 = vset.pattern.permute.xlu1 %v676_v1  ;;  %v422_v2 = vld [vmem:[%s803_s5] sm:$0xff]  ;;  %s579_s16 = sshll.u32 %s818_s28, 1 }
  0x10   : > { %386 = vperm.xlu0 %630, %v383_v0   ;;  %425 = vperm.xlu1 %631, %v422_v2   ;;  %s758_s17 = sadd.s32 %s579_s16, %s820_s27  ;;  %v390_v3 = vld [vmem:[%s801_s3] sm:$0xff] }
  0x11   : > { %s580_s18 = sshll.u32 %s758_s17, 3  ;;  %v429_v5 = vld [vmem:[%s804_s6] sm:$0xff]  ;;  %s582_s13 = sshll.u32 %s758_s17, 2 }
  0x12   : > { %s341_s21 = scalar_lea.vmem %s798_s0, %s580_s18  ;;  %v361_v8 = vld [vmem:[%s799_s1] sm:$0xf]  ;;  %s357_s16 = scalar_lea.vmem %s806_s8, %s582_s13 }
  0x13   : > { %v359_v4 = vld [vmem:[%s341_s21] sm:$0xff]  ;;  %s349_s19 = scalar_lea.vmem %s805_s7, %s582_s13 }
  0x14   : > { %v360_v6 = vpack.c.bf16 %v359_v4, %v359_v4  ;;  %v405_v9 = vld [vmem:[%s802_s4] sm:$0xf] }
  0x16   : > { %v368_v7 = vsel %vm366_vm0, %v360_v6, 0 }
  0x17   : > { %377 = vmatpush.bf16.msra.mxu0 %v368_v7  ;;  %416 = vmatpush.bf16.msra.mxu1 %v368_v7 }
  0x18   : > { %393 = vperm.xlu0 %630, %v390_v3   ;;  %432 = vperm.xlu1 %631, %v429_v5  }
  0x1a   : > { %585 = vmatmul.msk.bf16.vlgmr.msra.gmra.mxu0 %vm362_vm1, %v361_v8  ;;  %586 = vmatmul.msk.bf16.vlgmr.msra.gmra.mxu1 %vm362_vm1, %v405_v9 }
  0x82   : > { %v426_v10 = vpop.permute.xlu1 %425  ;;  %v387_v11 = vpop.permute.xlu0 %386 }
  0x8a   : > { %v433_v12 = vpop.permute.xlu1 %432  ;;  %v394_v17 = vpop.permute.xlu0 %393 }
  0x97   : > { %v379_v13 = vpop.f32.mrf.mxu0  ;;  %v418_v14 = vpop.f32.mrf.mxu1 }
  0x98   : > { %v389_v15 = vmul.f32 %v387_v11, %v379_v13  ;;  %v428_v16 = vmul.f32 %v426_v10, %v418_v14 }
  0x9a   : > { %v396_v18 = vadd.f32 %v394_v17, %v389_v15  ;;  %v435_v19 = vadd.f32 %v433_v12, %v428_v16 }
  0x9c   : > { %v397_v20 = vsub.f32 0.0, %v396_v18  ;;  %vm436_vm2 = vcmp.ge.f32.partialorder %v435_v19, 0.0  ;;  %v437_v21 = vmul.f32 0.1, %v435_v19 }
  0x9e   : > { %v398_v22 = vmul.f32 1.442695, %v397_v20  ;;  %v438_v23 = vsel %vm436_vm2, %v435_v19, %v437_v21 }
  0x9f   : > { %v381_v24 = vpop.f32.mrf.mxu0  ;;  %v439_v25 = vpack.c.bf16 %v438_v23, %v438_v23  ;;  %v420_v26 = vpop.f32.mrf.mxu1 }
  0xa0   : > { %632 = vpow2.f32 %v398_v22 }
  0xa1   : > { %440 = vst [vmem:[%s357_s16] sm:$0xf] %v439_v25 }
  0xa6   : > { %v633_v27 = vpop.eup %632 }
  0xa7   : > { %v400_v28 = vadd.f32 1.0, %v633_v27 }
  0xa9   : > { %634 = vrcp.f32 %v400_v28 }
  0xaf   : > { %v635_v29 = vpop.eup %634 }
  0xb0   : > { %v402_v30 = vmul.f32 %v635_v29, %v396_v18 }
  0xb2   : > { %v403_v31 = vpack.c.bf16 %v402_v30, %v402_v30 }
  0xb4   : > { %404 = vst [vmem:[%s349_s19] sm:$0xf] %v403_v31 }
  0xb5 PF: > { %s19_s9 = sadd.s32 1, %s674_s9   ;;  %s807_s27 = smov %s666_s29 }
  0xb6   : > { %p16_p7 = scmp.ge.s32.totalorder %s19_s9, 6   ;;  %s808_s28 = smov %s670_s30 }
  0xb7   : > { %s809_s29 = smov %s812_s10  ;;  %s810_s30 = smov %s816_s11 }
  0xb8   :  { %18 = sbr.rel (!%p16_p7) target bundleno = 3 (0x3), region = 90 }

// kernel: bottleneck_csp_forward.5
= control target key start
LH: loop header
LB: loop body
LE: loop exit
PB: predicated region body
PF: predicated region fallthrough
CT: control target
= control target key end

     0   :  { %s709_s27 = smov 0   ;;  %s711_s28 = smov 0   ;;  %s787_s0 = inlined_call_operand.vmem [shape: bf16[2,8,256], index: 0, kind: input, shape index: {}]   ;;  %s788_s1 = inlined_call_operand.vmem [shape: bf16[2,8,256], index: 1, kind: input, shape index: {}]   ;;  %s789_s2 = inlined_call_operand.vmem [shape: bf16[8,8], index: 2, kind: input, shape index: {}]   ;;  %s790_s3 = inlined_call_operand.vmem [shape: f32[8,1], index: 3, kind: input, shape index: {}]   ;;  %s791_s4 = inlined_call_operand.vmem [shape: f32[8,1], index: 4, kind: input, shape index: {}]   ;;  %s792_s5 = inlined_call_operand.vmem [shape: bf16[8,16], index: 5, kind: input, shape index: {}]   ;;  %s793_s6 = inlined_call_operand.vmem [shape: f32[8,1], index: 6, kind: input, shape index: {}]   ;;  %s794_s7 = inlined_call_operand.vmem [shape: f32[8,1], index: 7, kind: input, shape index: {}]   ;;  %s795_s8 = inlined_call_operand.vmem [shape: f32[2,8,256], index: 8, kind: output, shape index: {}]  }
   0x1   :  { %s713_s29 = smov 0   ;;  %s715_s30 = smov 0  }
   0x2   :  { %s717_s9 = smov 0  }
   0x3 LB: > { %s27_s10 = sadd.s32 1, %s653_s29  ;;  %s30_s11 = sadd.s32 1, %s657_s30  ;;  %s661_s9 = sphi %s717_s9, %s18_s9   ;;  %s657_s30 = sphi %s715_s30, %s799_s30   ;;  %s653_s29 = sphi %s713_s29, %s798_s29   ;;  %s649_s28 = sphi %s711_s28, %s797_s28   ;;  %s645_s27 = sphi %s709_s27, %s796_s27  }
   0x4   : > { %p28_p0 = scmp.ge.s32.totalorder %s27_s10, 2  ;;  %p565_p1 = scmp.ge.s32.totalorder %s661_s9, 1 }
   0x5   : > { %p296_p2 = scmp.lt.s32.totalorder %s661_s9, 5 }
   0x6   : > { %s801_s10 = smov (%p28_p0, %s27_s10), 0  ;;  %s803_s11 = smov (!%p28_p0, %s30_s11), %s657_s30 }
   0x7   : > { %p297_p3 = pnand %p565_p1, %p296_p2  ;;  %p32_p4 = scmp.ge.s32.totalorder %s803_s11, 2 }
   0x8   : > { %p344_p5 = scmp.lt.s32.totalorder (!%p297_p3), %s649_s28, 1  ;;  %p346_p6 = scmp.lt.s32.totalorder (!%p297_p3), %s645_s27, 1 }
   0x9   : > { %s805_s11 = smov (%p32_p4, %s803_s11), 0  ;;  %300 = sbr.rel (%p297_p3) target bundleno = 316 (0x13c), region = 52 }
   0xe   : > { %v392_v0 = vld [vmem:[%s790_s3] sm:$0xff]  ;;  %v663_v1 = vmov 0   ;;  %s807_s28 = smov (!%p344_p5, %s649_s28), 1  ;;  %s809_s27 = smov (!%p346_p6, %s645_s27), 1  ;;  %vm375_vm0 = vcmask 1043456   ;;  %vm371_vm1 = vcmask 64512  }
   0xf   : > { %617 = vset.pattern.permute.xlu0 %v663_v1  ;;  %618 = vset.pattern.permute.xlu1 %v663_v1  ;;  %s566_s14 = sshll.u32 %s807_s28, 1  ;;  %v399_v2 = vld [vmem:[%s791_s4] sm:$0xff]  ;;  %vm419_vm3 = vcmask 130048  }
  0x10   : > { %395 = vperm.xlu0 %617, %v392_v0   ;;  %s742_s15 = sadd.s32 %s566_s14, %s809_s27  ;;  %v369_v5 = vld [vmem:[%s789_s2] sm:$0xf] }
  0x11   : > { %s567_s16 = sshll.u32 %s742_s15, 2  ;;  %v436_v6 = vld [vmem:[%s793_s6] sm:$0xff] }
  0x12   : > { %s351_s19 = scalar_lea.vmem %s787_s0, %s567_s16  ;;  %439 = vperm.xlu1 %618, %v436_v6   ;;  %v443_v7 = vld [vmem:[%s794_s7] sm:$0xff]  ;;  %s359_s13 = scalar_lea.vmem %s788_s1, %s567_s16 }
  0x13   : > { %v370_v3 = vld [vmem:[%s351_s19] sm:$0xf]  ;;  %s571_s16 = sshll.u32 %s742_s15, 3 }
  0x14   : > { %v377_v4 = vsel %vm375_vm0, %v370_v3, 0  ;;  %v410_v9 = vld [vmem:[%s359_s13] sm:$0xf]  ;;  %s367_s20 = scalar_lea.vmem %s795_s8, %s571_s16 }
  0x15   : > { %386 = vmatpush.bf16.msra.mxu0 %v377_v4  ;;  %v412_v12 = vunpack.c.l.b16 %v410_v9  ;;  %v418_v21 = vld [vmem:[%s792_s5] sm:$0xf] }
  0x17   : > { %v413_v16 = vpack.c.b16 %v412_v12, %v412_v12 }
  0x18   : > { %402 = vperm.xlu0 %617, %v399_v2   ;;  %572 = vmatmul.msk.bf16.vlgmr.msra.gmra.mxu0 %vm371_vm1, %v369_v5 }
  0x1a   : > { %446 = vperm.xlu1 %618, %v443_v7  }
  0x82   : > { %v396_v8 = vpop.permute.xlu0 %395 }
  0x84   : > { %v440_v22 = vpop.permute.xlu1 %439 }
  0x8a   : > { %v403_v13 = vpop.permute.xlu0 %402 }
  0x8c   : > { %v447_v25 = vpop.permute.xlu1 %446 }
  0x95   : > { %v388_v10 = vpop.f32.mrf.mxu0 }
  0x96   : > { %v398_v11 = vmul.f32 %v396_v8, %v388_v10 }
  0x98   : > { %v405_v14 = vadd.f32 %v403_v13, %v398_v11 }
  0x9a   : > { %v407_v15 = vmul.f32 0.1, %v405_v14  ;;  %vm406_vm2 = vcmp.ge.f32.partialorder %v405_v14, 0.0 }
  0x9c   : > { %v408_v17 = vsel %vm406_vm2, %v405_v14, %v407_v15 }
  0x9d   : > { %v390_v18 = vpop.f32.mrf.mxu0  ;;  %v409_v19 = vpack.c.bf16 %v408_v17, %v408_v17 }
  0x9f   : > { %v416_v20 = vsel %vm375_vm0, %v409_v19, %v413_v16 }
  0xa0   : > { %430 = vmatpush.bf16.msra.mxu1 %v416_v20 }
  0xa3   : > { %573 = vmatmul.msk.bf16.vlgmr.msra.gmra.mxu1 %vm419_vm3, %v418_v21 }
 0x120   : > { %v432_v23 = vpop.f32.mrf.mxu1 }
 0x121   : > { %v442_v24 = vmul.f32 %v440_v22, %v432_v23 }
 0x123   : > { %v449_v26 = vadd.f32 %v447_v25, %v442_v24 }
 0x125   : > { %v450_v27 = vsub.f32 0.0, %v449_v26 }
 0x127   : > { %v451_v28 = vmul.f32 1.442695, %v450_v27 }
 0x128   : > { %v434_v29 = vpop.f32.mrf.mxu1 }
 0x129   : > { %619 = vpow2.f32 %v451_v28 }
 0x12f   : > { %v620_v30 = vpop.eup %619 }
 0x130   : > { %v453_v31 = vadd.f32 1.0, %v620_v30 }
 0x132   : > { %621 = vrcp.f32 %v453_v31 }
 0x138   : > { %v622_v32 = vpop.eup %621 }
 0x139   : > { %v455_v33 = vmul.f32 %v622_v32, %v449_v26 }
 0x13b   : > { %456 = vst [vmem:[%s367_s20] sm:$0xff] %v455_v33 }
 0x13c PF: > { %s18_s9 = sadd.s32 1, %s661_s9   ;;  %s796_s27 = smov %s653_s29 }
 0x13d   : > { %p15_p7 = scmp.ge.s32.totalorder %s18_s9, 6   ;;  %s797_s28 = smov %s657_s30 }
 0x13e   : > { %s798_s29 = smov %s801_s10  ;;  %s799_s30 = smov %s805_s11 }
 0x13f   :  { %17 = sbr.rel (!%p15_p7) target bundleno = 3 (0x3), region = 85 }

// kernel: bottleneck_csp_forward.4
= control target key start
LH: loop header
LB: loop body
LE: loop exit
PB: predicated region body
PF: predicated region fallthrough
CT: control target
= control target key end

     0   :  { %s9495_s24 = smov 0   ;;  %s15407_s0 = inlined_call_operand.vmem [shape: bf16[2,8,256], index: 0, kind: input, shape index: {}]   ;;  %s15408_s1 = inlined_call_operand.vmem [shape: bf16[2,8,8], index: 1, kind: input, shape index: {}]   ;;  %s15409_s2 = inlined_call_operand.vmem [shape: f32[2,8,1], index: 2, kind: input, shape index: {}]   ;;  %s15410_s3 = inlined_call_operand.vmem [shape: f32[2,8,1], index: 3, kind: input, shape index: {}]   ;;  %s15411_s4 = inlined_call_operand.vmem [shape: bf16[2,8,72], index: 4, kind: input, shape index: {}]   ;;  %s15412_s5 = inlined_call_operand.vmem [shape: f32[2,8,1], index: 5, kind: input, shape index: {}]   ;;  %s15413_s6 = inlined_call_operand.vmem [shape: f32[2,8,1], index: 6, kind: input, shape index: {}]   ;;  %s15414_s7 = inlined_call_operand.vmem [shape: bf16[2,8,256], index: 7, kind: output, shape index: {}]  }
   0x1 LB: > { %s9144_s25 = sadd.s32 4294967295, %s9440_s24   ;;  %p9148_p0 = scmp.ge.s32.totalorder %s9440_s24, 1  ;;  %s9440_s24 = sphi %s9495_s24, %s17_s24  }
   0x2   : > { %p237_p1 = scmp.lt.s32.totalorder %s9440_s24, 3 }
   0x4   : > { %p238_p2 = pnand %p9148_p0, %p237_p1 }
   0x6   : > { %241 = sbr.rel (%p238_p2) target bundleno = 2873 (0xb39), region = 48 }
   0xb   : > { %p269_p3 = scmp.lt.s32.totalorder %s9144_s25, 1  ;;  %v9442_v0 = vmov 0   ;;  %v352_v1 = vld [vmem:[%s15409_s2] sm:$0xff]  ;;  %vm319_vm0 = vcmask 1043456   ;;  %vm315_vm1 = vcmask 64512   ;;  %s9443_s13 = smov 48  }
   0xc   : > { %9320 = vset.pattern.permute.xlu0 %v9442_v0  ;;  %9356 = vset.pattern.permute.xlu1 %v9442_v0  ;;  %v360_v5 = vld [vmem:[%s15410_s3] sm:$0xff]  ;;  %s9444_s14 = smov 80   ;;  %s9445_s15 = smov 112   ;;  %v9450_v40 = vmov 1983009808   ;;  %vm425_vm2 = vcmask 1047556  }
   0xd   : > { %s16038_s25 = smov (!%p269_p3, %s9144_s25), 1  ;;  %355 = vperm.xlu0 %9320, %v352_v1   ;;  %9357 = vset.pattern.permute.xlu2 %v9442_v0  ;;  %v309_v10 = vld [vmem:[%s15408_s1] sm:$0xf]  ;;  %s9446_s16 = smov 64   ;;  %v430_v41 = vunpack.c.l.s4 %v9450_v40  ;;  %v9451_v45 = vmov 1934713408  }
   0xe   : > { %s9281_s28 = sshll.u32 %s16038_s25, 3  ;;  %s9447_s17 = smov 96   ;;  %v478_v46 = vunpack.c.l.s4 %v9451_v45  ;;  %vm665_vm3 = vsmask.f32 256  ;;  %vm666_vm4 = vsmask.f32 4368 }
   0xf   : > { %s9517_s8 = scalar_lea.vmem %s15407_s0, %s9281_s28  ;;  %s9448_s18 = smov 16   ;;  %v9548_v56 = vunpack.c.0.s8 %v430_v41  ;;  %vm9677_vm5 = vmor %vm665_vm3, %vm666_vm4  ;;  %vm286_vm6 = vcmask 139264   ;;  %vm283_vm7 = vcmask 142336   ;;  %vm884_vm8 = vcmask 131080  }
  0x10   : > { %v280_v2 = vld [vmem:[%s9517_s8] sm:$0xff]  ;;  %s9449_s19 = smov 32   ;;  %v9551_v61 = vunpack.c.0.s8 %v478_v46  ;;  %s9452_s20 = smov 1   ;;  %308 = vst.msk [vmem:[#allocation2 + $0x5c] sm:$0x1] %vm286_vm6, %v9442_v0  ;;  %vm9784_vm9 = vmand %vm884_vm8, %vm665_vm3  ;;  %vm876_vm10 = vcmask 134152  }
  0x11   : > { %v311_v3 = vunpack.c.l.b16 %v280_v2  ;;  %v312_v4 = vunpack.c.h.b16 %v280_v2  ;;  %287 = vst.msk [vmem:[#allocation2 + $0x8] sm:$0x1] %vm286_vm6, %v9442_v0  ;;  %vm877_vm11 = vsmask.f32 7938  ;;  %s9453_s21 = smov 127   ;;  %s9454_s22 = smov 126  }
  0x12   : > { %15503 = vst [vmem:[#allocation4_spill] sm:$0xff] %v9551_v61  ;;  %vm9821_vm12 = vmand %vm876_vm10, %vm877_vm11  ;;  %vm3451_vm13 = vcmask 1042432   ;;  %vm3452_vm14 = vcmask 1046532   ;;  %vm1905_vm3 = vsmask.f32 3328  ;;  %vm1175_vm8 = vcmask 261120  }
  0x13   : > { %v313_v6 = vpack.c.b16 %v311_v3, %v311_v3  ;;  %v314_v7 = vpack.c.b16 %v312_v4, %v312_v4  ;;  %290 = vst.msk [vmem:[#allocation2 + $0x14] sm:$0x1] %vm286_vm6, %v9442_v0  ;;  %vm9890_vm15 = vmor %vm3451_vm13, %vm3452_vm14  ;;  %vm1906_vm4 = vsmask.f32 7440  ;;  %vm1178_vm11 = vcmask 392192  }
  0x14   : > { %293 = vst.msk [vmem:[#allocation2 + $0x20] sm:$0x1] %vm286_vm6, %v9442_v0  ;;  %vm1181_vm13 = vcmask 523264   ;;  %vm1184_vm14 = vcmask 654336  }
  0x15   : > { %363 = vperm.xlu0 %9320, %v360_v5   ;;  %v321_v8 = vsel %vm319_vm0, %v313_v6, 0  ;;  %v324_v9 = vsel %vm319_vm0, %v314_v7, 0  ;;  %296 = vst.msk [vmem:[#allocation2 + $0x2c] sm:$0x1] %vm286_vm6, %v9442_v0 }
  0x16   : > { %333 = vmatpush.bf16.msra.mxu2 %v321_v8  ;;  %346 = vmatpush.bf16.msra.mxu3 %v324_v9  ;;  %299 = vst.msk [vmem:[#allocation2 + $0x38] sm:$0x1] %vm286_vm6, %v9442_v0 }
  0x17   : > { %302 = vst.msk [vmem:[#allocation2 + $0x44] sm:$0x1] %vm286_vm6, %v9442_v0 }
  0x18   : > { %305 = vst.msk [vmem:[#allocation2 + $0x50] sm:$0x1] %vm286_vm6, %v9442_v0  ;;  %vm9958_vm6 = vmor %vm1905_vm3, %vm1906_vm4  ;;  %vm1187_vm3 = vcmask 785408   ;;  %vm15471_vm4 = vcmask 916480  }
  0x19   : > { %9153 = vmatmul.msk.bf16.vlgmr.msra.gmra.mxu2 %vm315_vm1, %v309_v10  ;;  %9154 = vmatmul.msk.bf16.vlgmr.msra.gmra.mxu3 %vm315_vm1, %v309_v10  ;;  %306 = vst.msk [vmem:[#allocation2 + $0x54] sm:$0xf] %vm283_vm7, %v9442_v0 }
  0x1a   : > { %284 = vst.msk [vmem:[#allocation2] sm:$0xf] %vm283_vm7, %v9442_v0 }
  0x1b   : > { %285 = vst.msk [vmem:[#allocation2 + $0x4] sm:$0xf] %vm283_vm7, %v9442_v0 }
  0x1c   : > { %288 = vst.msk [vmem:[#allocation2 + $0xc] sm:$0xf] %vm283_vm7, %v9442_v0 }
  0x1d   : > { %289 = vst.msk [vmem:[#allocation2 + $0x10] sm:$0xf] %vm283_vm7, %v9442_v0 }
  0x1e   : > { %291 = vst.msk [vmem:[#allocation2 + $0x18] sm:$0xf] %vm283_vm7, %v9442_v0 }
  0x1f   : > { %292 = vst.msk [vmem:[#allocation2 + $0x1c] sm:$0xf] %vm283_vm7, %v9442_v0 }
  0x20   : > { %294 = vst.msk [vmem:[#allocation2 + $0x24] sm:$0xf] %vm283_vm7, %v9442_v0 }
  0x21   : > { %295 = vst.msk [vmem:[#allocation2 + $0x28] sm:$0xf] %vm283_vm7, %v9442_v0 }
  0x22   : > { %297 = vst.msk [vmem:[#allocation2 + $0x30] sm:$0xf] %vm283_vm7, %v9442_v0 }
  0x23   : > { %298 = vst.msk [vmem:[#allocation2 + $0x34] sm:$0xf] %vm283_vm7, %v9442_v0 }
  0x24   : > { %300 = vst.msk [vmem:[#allocation2 + $0x3c] sm:$0xf] %vm283_vm7, %v9442_v0 }
  0x25   : > { %301 = vst.msk [vmem:[#allocation2 + $0x40] sm:$0xf] %vm283_vm7, %v9442_v0 }
  0x26   : > { %303 = vst.msk [vmem:[#allocation2 + $0x48] sm:$0xf] %vm283_vm7, %v9442_v0 }
  0x27   : > { %304 = vst.msk [vmem:[#allocation2 + $0x4c] sm:$0xf] %vm283_vm7, %v9442_v0 }
  0x28   : > { %307 = vst.msk [vmem:[#allocation2 + $0x58] sm:$0xf] %vm283_vm7, %v9442_v0  ;;  %vm1171_vm7 = vcmask 130048  }
  0x7f   : > { %v356_v11 = vpop.permute.xlu0 %355 }
  0x87   : > { %v364_v16 = vpop.permute.xlu0 %363 }
  0x9c   : > { %v335_v12 = vpop.f32.mrf.mxu2  ;;  %v348_v13 = vpop.f32.mrf.mxu3 }
  0x9d   : > { %v358_v14 = vmul.f32 %v356_v11, %v335_v12  ;;  %v359_v15 = vmul.f32 %v356_v11, %v348_v13 }
  0x9f   : > { %v366_v17 = vadd.f32 %v364_v16, %v358_v14  ;;  %v367_v18 = vadd.f32 %v364_v16, %v359_v15 }
  0xa1   : > { %v368_v19 = vsub.f32 0.0, %v366_v17  ;;  %v369_v20 = vsub.f32 0.0, %v367_v18 }
  0xa3   : > { %v370_v21 = vmul.f32 1.442695, %v368_v19  ;;  %v372_v22 = vmul.f32 1.442695, %v369_v20 }
  0xa4   : > { %v337_v23 = vpop.f32.mrf.mxu2  ;;  %v350_v24 = vpop.f32.mrf.mxu3 }
  0xa5   : > { %9393 = vpow2.f32 %v370_v21 }
  0xa6   : > { %9395 = vpow2.f32 %v372_v22 }
  0xab   : > { %v9394_v25 = vpop.eup %9393 }
  0xac   : > { %v9396_v26 = vpop.eup %9395  ;;  %v374_v27 = vadd.f32 1.0, %v9394_v25 }
  0xad   : > { %v375_v28 = vadd.f32 1.0, %v9396_v26 }
  0xae   : > { %9397 = vrcp.f32 %v374_v27 }
  0xaf   : > { %9399 = vrcp.f32 %v375_v28 }
  0xb4   : > { %v9398_v29 = vpop.eup %9397 }
  0xb5   : > { %v9400_v30 = vpop.eup %9399  ;;  %v9530_v31 = vmul.f32 %v9398_v29, %v366_v17 }
  0xb6   : > { %v9532_v32 = vmul.f32 %v9400_v30, %v367_v18 }
  0xb7   : > { %v427_v49 = vrot.slane %v9530_v31, 4 }
  0xb8   : > { %v9341_v33 = vpack.i.bf16 %v9532_v32, %v9530_v31  ;;  %v539_v53 = vrot.slane %v9532_v32, 4 }
  0xba   : > { %9342 = vrot.lane.b32.xlu0 %v9341_v33, %s9443_s13  ;;  %9332 = vrot.lane.b32.xlu2 %v9341_v33, %s9444_s14 }
  0xbb   : > { %9322 = vrot.lane.b32.xlu1 %v9341_v33, %s9445_s15 }
  0xc2   : > { %9337 = vrot.lane.b32.xlu2 %v9341_v33, %s9446_s16 }
  0xc3   : > { %9327 = vrot.lane.b32.xlu1 %v9341_v33, %s9447_s17 }
  0xca   : > { %9352 = vrot.lane.b32.xlu2 %v9341_v33, %s9448_s18 }
  0xcb   : > { %9347 = vrot.lane.b32.xlu1 %v9341_v33, %s9449_s19 }
 0x114   : > { %v9333_v34 = vpop.permute.xlu2 %9332 }
 0x115   : > { %v9335_v38 = vunpack.i.h.bf16 %v9333_v34  ;;  %v9334_v39 = vunpack.i.l.bf16 %v9333_v34 }
 0x117   : > { %v549_v54 = vrot.slane %v9335_v38, 4  ;;  %v437_v55 = vrot.slane %v9334_v39, 4 }
 0x11c   : > { %v9543_v35 = vpop.permute.xlu2 %9337 }
 0x11d   : > { %v9340_v47 = vunpack.i.h.bf16 %v9543_v35  ;;  %v9339_v57 = vunpack.i.l.bf16 %v9543_v35 }
 0x11f   : > { %v563_v62 = vrot.slane %v9340_v47, 4  ;;  %v451_v15 = vrot.slane %v9339_v57, 4 }
 0x124   : > { %v9353_v37 = vpop.permute.xlu2 %9352 }
 0x125   : > { %v9354_v43 = vunpack.i.l.bf16 %v9353_v37  ;;  %v9355_v50 = vunpack.i.h.bf16 %v9353_v37 }
 0x127   : > { %v461_v58 = vrot.slane %v9354_v43, 4  ;;  %v573_v3 = vrot.slane %v9355_v50, 4 }
 0x12c   : > { %v9343_v42 = vpop.permute.xlu0 %9342 }
 0x12d   : > { %v9323_v36 = vpop.permute.xlu1 %9322  ;;  %v9345_v51 = vunpack.i.h.bf16 %v9343_v42  ;;  %v9344_v52 = vunpack.i.l.bf16 %v9343_v42 }
 0x12e   : > { %v9325_v44 = vunpack.i.h.bf16 %v9323_v36  ;;  %v9324_v48 = vunpack.i.l.bf16 %v9323_v36 }
 0x12f   : > { %v575_v4 = vrot.slane %v9345_v51, 4  ;;  %v462_v5 = vsel %vm425_vm2, %v461_v58, %v9344_v52  ;;  %v463_v6 = vrot.slane %v9344_v52, 4  ;;  %v574_v11 = vsel %vm425_vm2, %v573_v3, %v9345_v51 }
 0x130   : > { %v551_v59 = vrot.slane %v9325_v44, 4  ;;  %v439_v63 = vrot.slane %v9324_v48, 4  ;;  %v550_v7 = vsel %vm425_vm2, %v549_v54, %v9325_v44  ;;  %v438_v16 = vsel %vm425_vm2, %v437_v55, %v9324_v48 }
 0x131   : > { %v9570_v19 = vperm.slane %v462_v5, %v9548_v56  ;;  %v9573_v20 = vperm.slane %v550_v7, %v9548_v56  ;;  %v9579_v23 = vperm.slane %v574_v11, %v9548_v56  ;;  %v464_v27 = vsel %vm425_vm2, %v9354_v43, %v463_v6 }
 0x132   : > { %v552_v12 = vsel %vm425_vm2, %v9335_v38, %v551_v59  ;;  %v440_v17 = vsel %vm425_vm2, %v9334_v39, %v439_v63  ;;  %v576_v28 = vsel %vm425_vm2, %v9355_v50, %v575_v4  ;;  %v9590_v29 = vperm.slane %v438_v16, %v9548_v56 }
 0x133   : > { %v9582_v24 = vperm.slane %v552_v12, %v9548_v56  ;;  %v9593_v30 = vperm.slane %v440_v17, %v9548_v56  ;;  %v497_v37 = vrot.slane %v9570_v19, 4  ;;  %v585_v38 = vrot.slane %v9573_v20, 4 }
 0x134   : > { %v473_v45 = vrot.slane %v9590_v29, 4  ;;  %v609_v54 = vrot.slane %v9579_v23, 4  ;;  %v9635_v35 = vperm.slane %v464_v27, %v9548_v56 }
 0x135   : > { %v9328_v60 = vpop.permute.xlu1 %9327 }
 0x136   : > { %v9330_v1 = vunpack.i.h.bf16 %v9328_v60  ;;  %v9329_v2 = vunpack.i.l.bf16 %v9328_v60 }
 0x138   : > { %v537_v8 = vrot.slane %v9330_v1, 4  ;;  %v540_v9 = vsel %vm425_vm2, %v9330_v1, %v539_v53  ;;  %v424_v10 = vrot.slane %v9329_v2, 4  ;;  %v428_v14 = vsel %vm425_vm2, %v9329_v2, %v427_v49 }
 0x139   : > { %v9561_v13 = vperm.slane %v540_v9, %v9548_v56  ;;  %v9567_v18 = vperm.slane %v428_v14, %v9548_v56 }
 0x13a   : > { %v538_v21 = vsel %vm425_vm2, %v537_v8, %v9532_v32  ;;  %v426_v25 = vsel %vm425_vm2, %v424_v10, %v9530_v31 }
 0x13b   : > { %v599_v22 = vrot.slane %v9561_v13, 4  ;;  %v487_v26 = vrot.slane %v9567_v18, 4  ;;  %v9596_v33 = vperm.slane %v538_v21, %v9548_v56  ;;  %v9603_v39 = vperm.slane %v426_v25, %v9548_v56 }
 0x13d   : > { %v9348_v32 = vpop.permute.xlu1 %9347  ;;  %v600_v34 = vsel %vm425_vm2, %v9582_v24, %v599_v22  ;;  %v488_v40 = vsel %vm425_vm2, %v9593_v30, %v487_v26  ;;  %v586_v53 = vsel %vm425_vm2, %v585_v38, %v9596_v33  ;;  %v474_v60 = vsel %vm425_vm2, %v473_v45, %v9603_v39 }
 0x13e   : > { %v9350_v31 = vunpack.i.h.bf16 %v9348_v32  ;;  %v9349_v36 = vunpack.i.l.bf16 %v9348_v32  ;;  %v9617_v49 = vperm.slane %v600_v34, %v9551_v61  ;;  %v9624_v52 = vperm.slane %v488_v40, %v9551_v61 }
 0x13f   : > { %v592_v2 = vperm.slane %v586_v53, %v9551_v61  ;;  %v480_v9 = vperm.slane %v474_v60, %v9551_v61  ;;  %v587_v32 = vrot.slane %v9596_v33, 4  ;;  %v475_v45 = vrot.slane %v9603_v39, 4 }
 0x140   : > { %v561_v41 = vrot.slane %v9350_v31, 4  ;;  %v564_v42 = vsel %vm425_vm2, %v9350_v31, %v563_v62  ;;  %v449_v43 = vrot.slane %v9349_v36, 4  ;;  %v452_v44 = vsel %vm425_vm2, %v9349_v36, %v451_v15 }
 0x141   : > { %v9611_v46 = vperm.slane %v564_v42, %v9548_v56  ;;  %v9614_v48 = vperm.slane %v452_v44, %v9548_v56  ;;  %v647_v1 = vrot.slane %v9617_v49, 4  ;;  %v535_v5 = vrot.slane %v9624_v52, 4 }
 0x142   : > { %v562_v50 = vsel %vm425_vm2, %v561_v41, %v9340_v47  ;;  %v450_v51 = vsel %vm425_vm2, %v449_v43, %v9339_v57  ;;  %v9638_v47 = vperm.slane %v576_v28, %v9548_v56  ;;  %v635_v22 = vrot.slane %v592_v2, 4 }
 0x143   : > { %v568_v55 = vperm.slane %v562_v50, %v9548_v56  ;;  %v623_v58 = vrot.slane %v9611_v46, 4  ;;  %v9632_v59 = vperm.slane %v450_v51, %v9548_v56  ;;  %v511_v57 = vrot.slane %v9614_v48, 4 }
 0x144   : > { %v523_v28 = vrot.slane %v480_v9, 4  ;;  %v588_v39 = vsel %vm425_vm2, %v9573_v20, %v587_v32 }
 0x145   : > { %v610_v62 = vsel %vm425_vm2, %v609_v54, %v568_v55  ;;  %v498_v63 = vsel %vm425_vm2, %v497_v37, %v9632_v59  ;;  %v624_v3 = vsel %vm425_vm2, %v9638_v47, %v623_v58  ;;  %v512_v4 = vsel %vm425_vm2, %v9635_v35, %v511_v57 }
 0x146   : > { %v616_v6 = vperm.slane %v610_v62, %v9551_v61  ;;  %v9655_v7 = vperm.slane %v624_v3, %v9551_v61  ;;  %v9658_v8 = vperm.slane %v512_v4, %v9551_v61  ;;  %v504_v10 = vperm.slane %v498_v63, %v9551_v61 }
 0x147   : > { %v611_v25 = vrot.slane %v568_v55, 4  ;;  %v499_v50 = vrot.slane %v9632_v59, 4  ;;  %v15504_v57 = vmov 0  ;;  %v476_v4 = vsel %vm425_vm2, %v9590_v29, %v475_v45 }
 0x148   : > { %v633_v11 = vrot.slane %v616_v6, 4  ;;  %v648_v12 = vsel %vm425_vm2, %v9655_v7, %v647_v1  ;;  %v536_v14 = vsel %vm425_vm2, %v9658_v8, %v535_v5  ;;  %v521_v15 = vrot.slane %v504_v10, 4 }
 0x149   : > { %v664_v16 = vpack.c.bf16 %v648_v12, %v648_v12  ;;  %v663_v17 = vpack.c.bf16 %v536_v14, %v536_v14  ;;  %v636_v38 = vsel %vm425_vm2, %v616_v6, %v635_v22  ;;  %v524_v40 = vsel %vm425_vm2, %v504_v10, %v523_v28 }
 0x14a   : > { %v634_v21 = vsel %vm425_vm2, %v633_v11, %v592_v2  ;;  %v522_v27 = vsel %vm425_vm2, %v521_v15, %v480_v9  ;;  %v612_v33 = vsel %vm425_vm2, %v9579_v23, %v611_v25  ;;  %v15505_v57 = vsel %vm9677_vm5, 4294967295, %v15504_v57 }
 0x14b   : > { %v650_v26 = vpack.c.bf16 %v634_v21, %v634_v21  ;;  %v796_v34 = vshrl.u32 %v664_v16, 16  ;;  %v788_v31 = vshrl.u32 %v663_v17, 16  ;;  %v791_v36 = vshll.u32 %v663_v17, 16  ;;  %15506 = vst [vmem:[#allocation5_spill] sm:$0xff] %v15505_v57 }
 0x14c   : > { %v649_v37 = vpack.c.bf16 %v522_v27, %v522_v27  ;;  %v799_v43 = vshll.u32 %v664_v16, 16  ;;  %v652_v60 = vpack.c.bf16 %v636_v38, %v636_v38  ;;  %v651_v62 = vpack.c.bf16 %v524_v40, %v524_v40 }
 0x14d   : > { %v798_v41 = vrot.slane %v796_v34, 7  ;;  %v790_v42 = vrot.slane %v788_v31, 7  ;;  %v677_v44 = vshrl.u32 %v650_v26, 16  ;;  %v620_v1 = vperm.slane %v612_v33, %v9551_v61 }
 0x14e   : > { %v669_v51 = vshrl.u32 %v649_v37, 16  ;;  %v680_v2 = vshll.u32 %v650_v26, 16  ;;  %v500_v20 = vsel %vm425_vm2, %v9570_v19, %v499_v50  ;;  %v694_v5 = vshrl.u32 %v652_v60, 16 }
 0x14f   : > { %v803_v53 = vrot.slane %v798_v41, 4  ;;  %v793_v54 = vor.u32 %v791_v36, %v790_v42  ;;  %v794_v55 = vrot.slane %v790_v42, 4  ;;  %v801_v58 = vor.u32 %v799_v43, %v798_v41 }
 0x150   : > { %v679_v59 = vrot.slane %v677_v44, 7  ;;  %v671_v63 = vrot.slane %v669_v51, 7  ;;  %v637_v3 = vrot.slane %v620_v1, 4  ;;  %v686_v6 = vshrl.u32 %v651_v62, 16 }
 0x151   : > { %850 = vrot.lane.b32.xlu2 %v803_v53, %s9452_s20  ;;  %846 = vrot.lane.b32.xlu0 %v793_v54, %s9452_s20  ;;  %v802_v23 = vsel %vm9677_vm5, %v794_v55, %v801_v58  ;;  %v596_v9 = vperm.slane %v588_v39, %v9551_v61  ;;  %v508_v10 = vperm.slane %v500_v20, %v9551_v61  ;;  %v621_v11 = vrot.slane %v9638_v47, 4 }
 0x152   : > { %848 = vrot.lane.b32.xlu1 %v802_v23, %s9452_s20  ;;  %v672_v12 = vshll.u32 %v649_v37, 16  ;;  %v675_v14 = vrot.slane %v671_v63, 4  ;;  %v682_v15 = vor.u32 %v680_v2, %v679_v59  ;;  %v509_v16 = vrot.slane %v9635_v35, 4 }
 0x153   : > { %v638_v17 = vsel %vm425_vm2, %v637_v3, %v596_v9  ;;  %v484_v29 = vperm.slane %v476_v4, %v9551_v61  ;;  %v525_v21 = vrot.slane %v508_v10, 4  ;;  %v622_v19 = vsel %vm425_vm2, %v621_v11, %v9611_v46 }
 0x154   : > { %v684_v22 = vrot.slane %v679_v59, 4  ;;  %v674_v25 = vor.u32 %v672_v12, %v671_v63  ;;  %v510_v26 = vsel %vm425_vm2, %v509_v16, %v9614_v48  ;;  %v696_v27 = vrot.slane %v694_v5, 7 }
 0x155   : > { %v688_v47 = vrot.slane %v686_v6, 7  ;;  %v526_v28 = vsel %vm425_vm2, %v525_v21, %v484_v29  ;;  %v683_v35 = vsel %vm9677_vm5, %v675_v14, %v682_v15  ;;  %v654_v32 = vpack.c.bf16 %v638_v17, %v638_v17 }
 0x156   : > { %v653_v34 = vpack.c.bf16 %v526_v28, %v526_v28  ;;  %v697_v46 = vshll.u32 %v652_v60, 16  ;;  %v597_v31 = vrot.slane %v9582_v24, 4  ;;  %v628_v48 = vperm.slane %v622_v19, %v9551_v61 }
 0x157   : > { %v639_v36 = vrot.slane %v596_v9, 4  ;;  %v527_v37 = vrot.slane %v484_v29, 4  ;;  %v516_v38 = vperm.slane %v510_v26, %v9551_v61  ;;  %v689_v40 = vshll.u32 %v651_v62, 16 }
 0x158   : > { %v692_v41 = vrot.slane %v688_v47, 4  ;;  %v699_v42 = vor.u32 %v697_v46, %v696_v27  ;;  %v711_v43 = vshrl.u32 %v654_v32, 16  ;;  %v703_v44 = vshrl.u32 %v653_v34, 16 }
 0x159   : > { %808 = vrot.lane.b32.xlu2 %v684_v22, %s9452_s20  ;;  %804 = vrot.lane.b32.xlu0 %v674_v25, %s9452_s20  ;;  %v640_v45 = vsel %vm425_vm2, %v620_v1, %v639_v36  ;;  %v528_v50 = vsel %vm425_vm2, %v508_v10, %v527_v37  ;;  %v485_v51 = vrot.slane %v9593_v30, 4  ;;  %v598_v24 = vsel %vm425_vm2, %v597_v31, %v9561_v13 }
 0x15a   : > { %806 = vrot.lane.b32.xlu1 %v683_v35, %s9452_s20  ;;  %v701_v33 = vrot.slane %v696_v27, 4  ;;  %v691_v53 = vor.u32 %v689_v40, %v688_v47  ;;  %v656_v55 = vpack.c.bf16 %v640_v45, %v640_v45  ;;  %v655_v58 = vpack.c.bf16 %v528_v50, %v528_v50 }
 0x15b   : > { %v486_v54 = vsel %vm425_vm2, %v485_v51, %v9567_v18  ;;  %v641_v60 = vrot.slane %v628_v48, 4  ;;  %v700_v62 = vsel %vm9677_vm5, %v692_v41, %v699_v42  ;;  %v713_v39 = vrot.slane %v711_v43, 7 }
 0x15c   : > { %v705_v30 = vrot.slane %v703_v44, 7  ;;  %v529_v23 = vrot.slane %v516_v38, 4  ;;  %v604_v13 = vperm.slane %v598_v24, %v9551_v61  ;;  %v714_v59 = vshll.u32 %v654_v32, 16 }
 0x15d   : > { %v492_v18 = vperm.slane %v486_v54, %v9551_v61  ;;  %v728_v63 = vshrl.u32 %v656_v55, 16  ;;  %v720_v1 = vshrl.u32 %v655_v58, 16  ;;  %v706_v3 = vshll.u32 %v653_v34, 16 }
 0x15e   : > { %v642_v2 = vsel %vm425_vm2, %v641_v60, %v604_v13  ;;  %v709_v4 = vrot.slane %v705_v30, 4  ;;  %v716_v20 = vor.u32 %v714_v59, %v713_v39  ;;  %v718_v6 = vrot.slane %v713_v39, 4 }
 0x15f   : > { %v530_v5 = vsel %vm425_vm2, %v529_v23, %v492_v18  ;;  %v708_v9 = vor.u32 %v706_v3, %v705_v30  ;;  %v658_v10 = vpack.c.bf16 %v642_v2, %v642_v2  ;;  %v730_v14 = vrot.slane %v728_v63, 7 }
 0x160   : > { %v657_v11 = vpack.c.bf16 %v530_v5, %v530_v5  ;;  %v717_v12 = vsel %vm9677_vm5, %v709_v4, %v716_v20  ;;  %v722_v15 = vrot.slane %v720_v1, 7  ;;  %v731_v16 = vshll.u32 %v656_v55, 16 }
 0x161   : > { %814 = vrot.lane.b32.xlu2 %v701_v33, %s9452_s20  ;;  %810 = vrot.lane.b32.xlu0 %v691_v53, %s9452_s20  ;;  %v745_v17 = vshrl.u32 %v658_v10, 16  ;;  %v643_v21 = vrot.slane %v604_v13, 4  ;;  %v531_v19 = vrot.slane %v492_v18, 4  ;;  %v723_v22 = vshll.u32 %v655_v58, 16 }
 0x162   : > { %812 = vrot.lane.b32.xlu1 %v700_v62, %s9452_s20  ;;  %v737_v29 = vshrl.u32 %v657_v11, 16  ;;  %v726_v25 = vrot.slane %v722_v15, 4  ;;  %v733_v26 = vor.u32 %v731_v16, %v730_v14  ;;  %v735_v28 = vrot.slane %v730_v14, 4 }
 0x163   : > { %v644_v27 = vsel %vm425_vm2, %v628_v48, %v643_v21  ;;  %v532_v47 = vsel %vm425_vm2, %v516_v38, %v531_v19  ;;  %v725_v35 = vor.u32 %v723_v22, %v722_v15  ;;  %v747_v32 = vrot.slane %v745_v17, 7  ;;  %v893_v15 = vld [vmem:[#allocation2 + $0x14] sm:$0x1] }
 0x164   : > { %v739_v34 = vrot.slane %v737_v29, 7  ;;  %v734_v46 = vsel %vm9677_vm5, %v726_v25, %v733_v26  ;;  %v660_v31 = vpack.c.bf16 %v644_v27, %v644_v27  ;;  %v659_v48 = vpack.c.bf16 %v532_v47, %v532_v47  ;;  %v900_v29 = vld [vmem:[#allocation2 + $0x20] sm:$0x1]  ;;  %v931_v19 = vld [vmem:[#allocation2 + $0x54] sm:$0xf] }
 0x165   : > { %v748_v36 = vshll.u32 %v658_v10, 16  ;;  %v645_v37 = vrot.slane %v9655_v7, 4  ;;  %v533_v38 = vrot.slane %v9658_v8, 4  ;;  %v740_v42 = vshll.u32 %v657_v11, 16  ;;  %v886_v11 = vld [vmem:[#allocation2 + $0x8] sm:$0x1] }
 0x166   : > { %v743_v40 = vrot.slane %v739_v34, 4  ;;  %v762_v43 = vshrl.u32 %v660_v31, 16  ;;  %v754_v44 = vshrl.u32 %v659_v48, 16  ;;  %v752_v7 = vrot.slane %v747_v32, 4  ;;  %v907_v47 = vld [vmem:[#allocation2 + $0x2c] sm:$0x1] }
 0x167   : > { %v750_v41 = vor.u32 %v748_v36, %v747_v32  ;;  %v646_v45 = vsel %vm425_vm2, %v645_v37, %v9617_v49  ;;  %v534_v50 = vsel %vm425_vm2, %v533_v38, %v9624_v52  ;;  %v742_v51 = vor.u32 %v740_v42, %v739_v34  ;;  %v914_v37 = vld [vmem:[#allocation2 + $0x38] sm:$0x1]  ;;  %v889_v38 = vld [vmem:[#allocation2 + $0xc] sm:$0xf] }
 0x168   : > { %v764_v24 = vrot.slane %v762_v43, 7  ;;  %v756_v33 = vrot.slane %v754_v44, 7  ;;  %v662_v53 = vpack.c.bf16 %v646_v45, %v646_v45  ;;  %v661_v54 = vpack.c.bf16 %v534_v50, %v534_v50 }
 0x169   : > { %820 = vrot.lane.b32.xlu2 %v718_v6, %s9452_s20  ;;  %816 = vrot.lane.b32.xlu0 %v708_v9, %s9452_s20  ;;  %v751_v8 = vsel %vm9677_vm5, %v743_v40, %v750_v41  ;;  %v765_v55 = vshll.u32 %v660_v31, 16  ;;  %v757_v49 = vshll.u32 %v659_v48, 16  ;;  %v15507_v5 = vmov 0  ;;  %v935_v6 = vld [vmem:[#allocation2 + $0x5c] sm:$0x1] }
 0x16a   : > { %818 = vrot.lane.b32.xlu1 %v717_v12, %s9452_s20  ;;  %v760_v58 = vrot.slane %v756_v33, 4  ;;  %v779_v52 = vshrl.u32 %v662_v53, 16  ;;  %v771_v62 = vshrl.u32 %v661_v54, 16  ;;  %v769_v39 = vrot.slane %v764_v24, 4 }
 0x16b   : > { %v767_v60 = vor.u32 %v765_v55, %v764_v24  ;;  %v759_v30 = vor.u32 %v757_v49, %v756_v33  ;;  %v782_v18 = vshll.u32 %v662_v53, 16  ;;  %v774_v63 = vshll.u32 %v661_v54, 16 }
 0x16c   : > { %v781_v13 = vrot.slane %v779_v52, 7  ;;  %v773_v59 = vrot.slane %v771_v62, 7  ;;  %v15508_v5 = vsel %vm9784_vm9, 4294967295, %v15507_v5  ;;  %v15510_v21 = vmov 0  ;;  %v903_v52 = vld [vmem:[#allocation2 + $0x24] sm:$0xf] }
 0x16d   : > { %v768_v23 = vsel %vm9677_vm5, %v760_v58, %v767_v60  ;;  %15509 = vst [vmem:[#allocation6_spill] sm:$0xff] %v15508_v5  ;;  %v15511_v21 = vsel %vm9821_vm12, 4294967295, %v15510_v21  ;;  %v928_v60 = vld [vmem:[#allocation2 + $0x50] sm:$0x1] }
 0x16e   : > { %v777_v1 = vrot.slane %v773_v59, 4  ;;  %v784_v2 = vor.u32 %v782_v18, %v781_v13  ;;  %v786_v3 = vrot.slane %v781_v13, 4  ;;  %v776_v4 = vor.u32 %v774_v63, %v773_v59  ;;  %15512 = vst [vmem:[#allocation7_spill] sm:$0xff] %v15511_v21 }
 0x170   : > { %v785_v20 = vsel %vm9677_vm5, %v777_v1, %v784_v2  ;;  %v910_v1 = vld [vmem:[#allocation2 + $0x30] sm:$0xf] }
 0x171   : > { %826 = vrot.lane.b32.xlu2 %v735_v28, %s9452_s20  ;;  %822 = vrot.lane.b32.xlu0 %v725_v35, %s9452_s20  ;;  %v879_v28 = vld [vmem:[#allocation2] sm:$0xf] }
 0x172   : > { %824 = vrot.lane.b32.xlu1 %v734_v46, %s9452_s20 }
 0x179   : > { %832 = vrot.lane.b32.xlu2 %v752_v7, %s9452_s20  ;;  %828 = vrot.lane.b32.xlu0 %v742_v51, %s9452_s20  ;;  %v921_v51 = vld [vmem:[#allocation2 + $0x44] sm:$0x1] }
 0x17a   : > { %830 = vrot.lane.b32.xlu1 %v751_v8, %s9452_s20  ;;  %v896_v8 = vld [vmem:[#allocation2 + $0x18] sm:$0xf] }
 0x181   : > { %838 = vrot.lane.b32.xlu2 %v769_v39, %s9452_s20  ;;  %834 = vrot.lane.b32.xlu0 %v759_v30, %s9452_s20 }
 0x182   : > { %836 = vrot.lane.b32.xlu1 %v768_v23, %s9452_s20 }
 0x189   : > { %844 = vrot.lane.b32.xlu2 %v786_v3, %s9452_s20  ;;  %840 = vrot.lane.b32.xlu0 %v776_v4, %s9452_s20 }
 0x18a   : > { %842 = vrot.lane.b32.xlu1 %v785_v20, %s9452_s20 }
 0x1ab   : > { %v851_v9 = vpop.permute.xlu2 %850 }
 0x1ac   : > { %v936_v10 = vsel %vm9784_vm9, %v851_v9, %v935_v6  ;;  %v917_v9 = vld [vmem:[#allocation2 + $0x3c] sm:$0xf] }
 0x1ad   : > { %937 = vst [vmem:[#allocation2 + $0x5c] sm:$0x1] %v936_v10 }
 0x1b3   : > { %v809_v12 = vpop.permute.xlu2 %808 }
 0x1b4   : > { %v887_v14 = vsel %vm9784_vm9, %v809_v12, %v886_v11 }
 0x1b5   : > { %888 = vst [vmem:[#allocation2 + $0x8] sm:$0x1] %v887_v14 }
 0x1bb   : > { %v815_v16 = vpop.permute.xlu2 %814 }
 0x1bc   : > { %v894_v17 = vsel %vm9784_vm9, %v815_v16, %v893_v15  ;;  %v924_v16 = vld [vmem:[#allocation2 + $0x48] sm:$0xf] }
 0x1bd   : > { %895 = vst [vmem:[#allocation2 + $0x14] sm:$0x1] %v894_v17 }
 0x1c3   : > { %v821_v22 = vpop.permute.xlu2 %820  ;;  %v847_v25 = vpop.permute.xlu0 %846 }
 0x1c4   : > { %v901_v0 = vsel %vm9784_vm9, %v821_v22, %v900_v29  ;;  %v932_v26 = vsel %vm9821_vm12, %v847_v25, %v931_v19  ;;  %v849_v27 = vpop.permute.xlu1 %848 }
 0x1c5   : > { %902 = vst [vmem:[#allocation2 + $0x20] sm:$0x1] %v901_v0 }
 0x1c6   : > { %933 = vst [vmem:[#allocation2 + $0x54] sm:$0xf] %v932_v26 }
 0x1c7   : > { %934 = vst.msk [vmem:[#allocation2 + $0x58] sm:$0xf] %vm876_vm10, %v849_v27 }
 0x1cb   : > { %v827_v35 = vpop.permute.xlu2 %826  ;;  %v805_v32 = vpop.permute.xlu0 %804 }
 0x1cc   : > { %v908_v34 = vsel %vm9784_vm9, %v827_v35, %v907_v47  ;;  %v880_v46 = vsel %vm9821_vm12, %v805_v32, %v879_v28  ;;  %v807_v31 = vpop.permute.xlu1 %806 }
 0x1cd   : > { %909 = vst [vmem:[#allocation2 + $0x2c] sm:$0x1] %v908_v34  ;;  %v1229_v48 = vld [vmem:[#allocation2 + $0x54] sm:$0xf] }
 0x1ce   : > { %881 = vst [vmem:[#allocation2] sm:$0xf] %v880_v46  ;;  %v1230_v36 = vld [vmem:[#allocation2 + $0x58] sm:$0xf]  ;;  %1275 = vrot.lane.b32.xlu1 %v1229_v48, %s9453_s21  ;;  %v1562_v45 = vld [vmem:[#allocation2 + $0x54] sm:$0xf] }
 0x1cf   : > { %883 = vst.msk [vmem:[#allocation2 + $0x4] sm:$0xf] %vm876_vm10, %v807_v31  ;;  %1277 = vrot.lane.b32.xlu2 %v1230_v36, %s9453_s21  ;;  %v1563_v50 = vld [vmem:[#allocation2 + $0x58] sm:$0xf] }
 0x1d3   : > { %v833_v40 = vpop.permute.xlu2 %832  ;;  %v811_v41 = vpop.permute.xlu0 %810 }
 0x1d4   : > { %v915_v42 = vsel %vm9784_vm9, %v833_v40, %v914_v37  ;;  %v890_v43 = vsel %vm9821_vm12, %v811_v41, %v889_v38  ;;  %v813_v44 = vpop.permute.xlu1 %812 }
 0x1d5   : > { %916 = vst [vmem:[#allocation2 + $0x38] sm:$0x1] %v915_v42  ;;  %v1215_v58 = vld [vmem:[#allocation2] sm:$0xf]  ;;  %v2392_v42 = vld [vmem:[#allocation2 + $0x5c] sm:$0x1] }
 0x1d6   : > { %891 = vst [vmem:[#allocation2 + $0xc] sm:$0xf] %v890_v43  ;;  %1608 = vrot.lane.b32.xlu1 %v1562_v45, %s9454_s22  ;;  %v1216_v7 = vld [vmem:[#allocation2 + $0x4] sm:$0xf]  ;;  %v1548_v47 = vld [vmem:[#allocation2] sm:$0xf] }
 0x1d7   : > { %892 = vst.msk [vmem:[#allocation2 + $0x10] sm:$0xf] %vm876_vm10, %v813_v44  ;;  %1610 = vrot.lane.b32.xlu2 %v1563_v50, %s9454_s22  ;;  %1249 = vrot.lane.b32.xlu0 %v1216_v7, %s9453_s21  ;;  %v1549_v35 = vld [vmem:[#allocation2 + $0x4] sm:$0xf]  ;;  %v2909_v43 = vld [vmem:[#allocation2 + $0x5c] sm:$0x1] }
 0x1d8   : > { %v15513_v44 = vmov 0  ;;  %v2391_v50 = vld [vmem:[#allocation2 + $0x58] sm:$0xf] }
 0x1d9   : > { %v15514_v44 = vsel %vm9890_vm15, 4294967295, %v15513_v44 }
 0x1da   : > { %15515 = vst [vmem:[#allocation8_spill] sm:$0xff] %v15514_v44 }
 0x1db   : > { %v839_v24 = vpop.permute.xlu2 %838  ;;  %v817_v33 = vpop.permute.xlu0 %816 }
 0x1dc   : > { %v922_v53 = vsel %vm9784_vm9, %v839_v24, %v921_v51  ;;  %v897_v54 = vsel %vm9821_vm12, %v817_v33, %v896_v8  ;;  %v819_v55 = vpop.permute.xlu1 %818  ;;  %v2581_v8 = vshll.u32 %v2392_v42, 16  ;;  %v9899_v24 = vld [vmem:[#allocation2 + $0x5c] sm:$0x1]  ;;  %v3098_v33 = vshll.u32 %v2909_v43, 16 }
 0x1dd   : > { %923 = vst [vmem:[#allocation2 + $0x44] sm:$0x1] %v922_v53  ;;  %v1217_v49 = vld [vmem:[#allocation2 + $0xc] sm:$0xf] }
 0x1de   : > { %898 = vst [vmem:[#allocation2 + $0x18] sm:$0xf] %v897_v54  ;;  %1251 = vrot.lane.b32.xlu1 %v1217_v49, %s9453_s21  ;;  %v1218_v18 = vld [vmem:[#allocation2 + $0x10] sm:$0xf]  ;;  %v1550_v26 = vld [vmem:[#allocation2 + $0xc] sm:$0xf] }
 0x1df   : > { %899 = vst.msk [vmem:[#allocation2 + $0x1c] sm:$0xf] %vm876_vm10, %v819_v55  ;;  %1247 = vrot.lane.b32.xlu2 %v1215_v58, %s9453_s21  ;;  %v1551_v32 = vld [vmem:[#allocation2 + $0x10] sm:$0xf]  ;;  %v9905_v55 = vld [vmem:[#allocation2 + $0x8] sm:$0x1] }
 0x1e0   : > { %v2571_v49 = vshll.u32 %v2391_v50, 16  ;;  %v2575_v58 = vshrl.u32 %v2391_v50, 16  ;;  %v2390_v50 = vld [vmem:[#allocation2 + $0x54] sm:$0xf] }
 0x1e3   : > { %v845_v62 = vpop.permute.xlu2 %844  ;;  %v823_v39 = vpop.permute.xlu0 %822 }
 0x1e4   : > { %v929_v30 = vsel %vm9784_vm9, %v845_v62, %v928_v60  ;;  %v904_v23 = vsel %vm9821_vm12, %v823_v39, %v903_v52  ;;  %v825_v13 = vpop.permute.xlu1 %824  ;;  %v2371_v60 = vld [vmem:[#allocation2 + $0x8] sm:$0x1]  ;;  %v3881_v52 = vrot.slane %v9899_v24, 5  ;;  %v2908_v62 = vld [vmem:[#allocation2 + $0x58] sm:$0xf] }
 0x1e5   : > { %930 = vst [vmem:[#allocation2 + $0x50] sm:$0x1] %v929_v30  ;;  %v1219_v59 = vld [vmem:[#allocation2 + $0x18] sm:$0xf]  ;;  %v2380_v24 = vld [vmem:[#allocation2 + $0x2c] sm:$0x1] }
 0x1e6   : > { %905 = vst [vmem:[#allocation2 + $0x24] sm:$0xf] %v904_v23  ;;  %v1220_v63 = vld [vmem:[#allocation2 + $0x1c] sm:$0xf]  ;;  %1255 = vrot.lane.b32.xlu0 %v1219_v59, %s9453_s21  ;;  %v1552_v46 = vld [vmem:[#allocation2 + $0x18] sm:$0xf] }
 0x1e7   : > { %906 = vst.msk [vmem:[#allocation2 + $0x28] sm:$0xf] %vm876_vm10, %v825_v13  ;;  %1253 = vrot.lane.b32.xlu2 %v1218_v18, %s9453_s21  ;;  %1257 = vrot.lane.b32.xlu1 %v1220_v63, %s9453_s21  ;;  %v1553_v28 = vld [vmem:[#allocation2 + $0x1c] sm:$0xf]  ;;  %v3785_v37 = vld [vmem:[#allocation2 + $0x18] sm:$0xe] }
 0x1e8   : > { %v9887_v38 = vld [vmem:[#allocation2 + $0x1c] sm:$0xf]  ;;  %v9165_v40 = vrot.slane %v3785_v37, 9  ;;  %v9911_v13 = vrot.slane %v2581_v8, 5  ;;  %v9913_v59 = vrot.slane %v3098_v33, 5 }
 0x1e9   : > { %v3843_v41 = vrot.slane %v9887_v38, 5  ;;  %v2369_v18 = vld [vmem:[#allocation2] sm:$0xf]  ;;  %v3780_v63 = vld [vmem:[#allocation2 + $0x4] sm:$0xf] }
 0x1ea   : > { %v3783_v33 = vld [vmem:[#allocation2 + $0x10] sm:$0xf] }
 0x1eb   : > { %v829_v2 = vpop.permute.xlu0 %828  ;;  %v3844_v7 = vsel %vm9890_vm15, %v9165_v40, %v3843_v41 }
 0x1ec   : > { %v911_v3 = vsel %vm9821_vm12, %v829_v2, %v910_v1  ;;  %v831_v4 = vpop.permute.xlu1 %830  ;;  %v3832_v1 = vrot.slane %v9905_v55, 5  ;;  %v2413_v2 = vshll.u32 %v2371_v60, 16 }
 0x1ed   : > { %912 = vst [vmem:[#allocation2 + $0x30] sm:$0xf] %v911_v3  ;;  %v1221_v20 = vld [vmem:[#allocation2 + $0x24] sm:$0xf]  ;;  %v2374_v3 = vld [vmem:[#allocation2 + $0x14] sm:$0x1] }
 0x1ee   : > { %913 = vst.msk [vmem:[#allocation2 + $0x34] sm:$0xf] %vm876_vm10, %v831_v4  ;;  %v1222_v6 = vld [vmem:[#allocation2 + $0x28] sm:$0xf]  ;;  %v1554_v31 = vld [vmem:[#allocation2 + $0x24] sm:$0xf] }
 0x1ef   : > { %1259 = vrot.lane.b32.xlu2 %v1221_v20, %s9453_s21  ;;  %1261 = vrot.lane.b32.xlu0 %v1222_v6, %s9453_s21  ;;  %v1555_v36 = vld [vmem:[#allocation2 + $0x28] sm:$0xf]  ;;  %v3800_v4 = vld [vmem:[#allocation2 + $0x54] sm:$0xe]  ;;  %v9916_v20 = vrot.slane %v2571_v49, 5  ;;  %v2577_v6 = vrot.slane %v2575_v58, 4 }
 0x1f3   : > { %v835_v10 = vpop.permute.xlu0 %834 }
 0x1f4   : > { %v918_v11 = vsel %vm9821_vm12, %v835_v10, %v917_v9  ;;  %v837_v12 = vpop.permute.xlu1 %836  ;;  %v1223_v14 = vld [vmem:[#allocation2 + $0x30] sm:$0xf]  ;;  %v3088_v9 = vshll.u32 %v2908_v62, 16  ;;  %v3092_v10 = vshrl.u32 %v2908_v62, 16 }
 0x1f5   : > { %919 = vst [vmem:[#allocation2 + $0x3c] sm:$0xf] %v918_v11  ;;  %v1224_v15 = vld [vmem:[#allocation2 + $0x34] sm:$0xf]  ;;  %1263 = vrot.lane.b32.xlu1 %v1223_v14, %s9453_s21  ;;  %v1556_v34 = vld [vmem:[#allocation2 + $0x30] sm:$0xf] }
 0x1f6   : > { %920 = vst.msk [vmem:[#allocation2 + $0x40] sm:$0xf] %vm876_vm10, %v837_v12  ;;  %v1557_v45 = vld [vmem:[#allocation2 + $0x34] sm:$0xf]  ;;  %v2370_v12 = vld [vmem:[#allocation2 + $0x4] sm:$0xf] }
 0x1f7   : > { %1265 = vrot.lane.b32.xlu2 %v1224_v15, %s9453_s21  ;;  %v2394_v14 = vshrl.u32 %v2369_v18, 16  ;;  %v2397_v15 = vshll.u32 %v2369_v18, 16 }
 0x1fb   : > { %v841_v17 = vpop.permute.xlu0 %840 }
 0x1fc   : > { %v925_v29 = vsel %vm9821_vm12, %v841_v17, %v924_v16  ;;  %v843_v19 = vpop.permute.xlu1 %842  ;;  %v1225_v22 = vld [vmem:[#allocation2 + $0x3c] sm:$0xf] }
 0x1fd   : > { %926 = vst [vmem:[#allocation2 + $0x48] sm:$0xf] %v925_v29  ;;  %v1226_v25 = vld [vmem:[#allocation2 + $0x40] sm:$0xf]  ;;  %1267 = vrot.lane.b32.xlu0 %v1225_v22, %s9453_s21  ;;  %v1558_v51 = vld [vmem:[#allocation2 + $0x3c] sm:$0xf] }
 0x1fe   : > { %927 = vst.msk [vmem:[#allocation2 + $0x4c] sm:$0xf] %vm876_vm10, %v843_v19  ;;  %1269 = vrot.lane.b32.xlu1 %v1226_v25, %s9453_s21  ;;  %v1559_v48 = vld [vmem:[#allocation2 + $0x40] sm:$0xf]  ;;  %v3794_v53 = vld [vmem:[#allocation2 + $0x3c] sm:$0xe] }
 0x1ff   : > { %v9903_v54 = vld [vmem:[#allocation2 + $0x40] sm:$0xf]  ;;  %v9168_v30 = vrot.slane %v3794_v53, 9  ;;  %v3829_v29 = vrot.slane %v3780_v63, 5  ;;  %v3801_v19 = vld [vmem:[#allocation2 + $0x58] sm:$0xf] }
 0x200   : > { %v15415_v23 = vrot.slane %v9903_v54, 5  ;;  %v2437_v22 = vshll.u32 %v2374_v3, 16  ;;  %v3779_v25 = vld [vmem:[#allocation2] sm:$0xe]  ;;  %v2375_v63 = vld [vmem:[#allocation2 + $0x18] sm:$0xf] }
 0x201   : > { %v3831_v40 = vrot.slane %v3829_v29, 4  ;;  %v9163_v42 = vrot.slane %v3779_v25, 9 }
 0x202   : > { %v3865_v16 = vsel %vm9890_vm15, %v9168_v30, %v15415_v23  ;;  %v9946_v30 = vld [vmem:[#allocation2 + $0x20] sm:$0x1] }
 0x203   : > { %v3830_v3 = vsel %vm9890_vm15, %v9163_v42, %v3829_v29 }
 0x204   : > { %v1227_v0 = vld [vmem:[#allocation2 + $0x48] sm:$0xf] }
 0x205   : > { %v1228_v27 = vld [vmem:[#allocation2 + $0x4c] sm:$0xf]  ;;  %1271 = vrot.lane.b32.xlu2 %v1227_v0, %s9453_s21  ;;  %v1560_v11 = vld [vmem:[#allocation2 + $0x48] sm:$0xf]  ;;  %v9170_v0 = vrot.slane %v3800_v4, 9 }
 0x206   : > { %1584 = vrot.lane.b32.xlu1 %v1550_v26, %s9454_s22  ;;  %1273 = vrot.lane.b32.xlu0 %v1228_v27, %s9453_s21  ;;  %v1561_v17 = vld [vmem:[#allocation2 + $0x4c] sm:$0xf]  ;;  %v9925_v26 = vld [vmem:[#allocation2 + $0x14] sm:$0x1]  ;;  %v9927_v27 = vrot.slane %v2413_v2, 5  ;;  %v3833_v2 = vsel %vm9890_vm15, %v3831_v40, %v3832_v1  ;;  %v15518_v1 = vmov 0 }
 0x207   : > { %v3839_v43 = vrot.slane %v9925_v26, 5  ;;  %v3790_v4 = vld [vmem:[#allocation2 + $0x2c] sm:$0x1]  ;;  %v15519_v1 = vsel %vm9958_vm6, 4294967295, %v15518_v1  ;;  %v2378_v40 = vld [vmem:[#allocation2 + $0x24] sm:$0xf] }
 0x208   : > { %15520 = vst [vmem:[#allocation11_spill] sm:$0xff] %v15519_v1  ;;  %v3853_v25 = vrot.slane %v3790_v4, 5  ;;  %v9984_v42 = vld [vmem:[#allocation2 + $0x4c] sm:$0xf] }
 0x209   : > { %v2372_v26 = vld [vmem:[#allocation2 + $0xc] sm:$0xf] }
 0x20a   : > { %v2418_v38 = vshrl.u32 %v2372_v26, 16 }
 0x20d   : > { %1580 = vrot.lane.b32.xlu2 %v1548_v47, %s9454_s22  ;;  %v9929_v47 = vrot.slane %v3088_v9, 5  ;;  %v3782_v9 = vld [vmem:[#allocation2 + $0xc] sm:$0xe] }
 0x20e   : > { %1590 = vrot.lane.b32.xlu1 %v1553_v28, %s9454_s22  ;;  %1582 = vrot.lane.b32.xlu0 %v1549_v35, %s9454_s22  ;;  %v3094_v28 = vrot.slane %v3092_v10, 4  ;;  %v2403_v35 = vshll.u32 %v2370_v12, 16  ;;  %v2562_v10 = vshrl.u32 %v2390_v50, 16 }
 0x210   : > { %v3095_v53 = vor.u32 %v3094_v28, %v9929_v47  ;;  %v9940_v55 = vrot.slane %v2403_v35, 5  ;;  %v2886_v28 = vld [vmem:[#allocation2] sm:$0xf] }
 0x215   : > { %1586 = vrot.lane.b32.xlu2 %v1551_v32, %s9454_s22  ;;  %v2407_v32 = vshrl.u32 %v2370_v12, 16  ;;  %v3836_v12 = vrot.slane %v3783_v33, 5  ;;  %v2907_v33 = vld [vmem:[#allocation2 + $0x54] sm:$0xf] }
 0x216   : > { %1596 = vrot.lane.b32.xlu1 %v1556_v34, %s9454_s22  ;;  %1588 = vrot.lane.b32.xlu0 %v1552_v46, %s9454_s22  ;;  %v2373_v34 = vld [vmem:[#allocation2 + $0x10] sm:$0xf]  ;;  %v3878_v46 = vrot.slane %v3801_v19, 5  ;;  %v2442_v19 = vshrl.u32 %v2375_v63, 16 }
 0x217   : > { %v2431_v8 = vshrl.u32 %v2373_v34, 16  ;;  %v2409_v49 = vrot.slane %v2407_v32, 4 }
 0x218   : > { %v3879_v58 = vsel %vm9890_vm15, %v9170_v0, %v3878_v46  ;;  %v3880_v62 = vrot.slane %v3878_v46, 4  ;;  %v9164_v0 = vrot.slane %v3782_v9, 9 }
 0x219   : > { %v2410_v29 = vor.u32 %v2409_v49, %v9940_v55  ;;  %v2444_v49 = vrot.slane %v2442_v19, 4 }
 0x21d   : > { %1592 = vrot.lane.b32.xlu2 %v1554_v31, %s9454_s22  ;;  %v2578_v31 = vor.u32 %v2577_v6, %v9916_v20 }
 0x21e   : > { %1602 = vrot.lane.b32.xlu1 %v1559_v48, %s9454_s22  ;;  %1594 = vrot.lane.b32.xlu0 %v1555_v36, %s9454_s22  ;;  %v2396_v48 = vrot.slane %v2394_v14, 4  ;;  %v2399_v36 = vrot.slane %v2397_v15, 5  ;;  %v2433_v15 = vrot.slane %v2431_v8, 4 }
 0x21f   : > { %v9944_v60 = vrot.slane %v2578_v31, 4  ;;  %v2384_v31 = vld [vmem:[#allocation2 + $0x3c] sm:$0xf] }
 0x220   : > { %v2400_v18 = vor.u32 %v2399_v36, %v2396_v48  ;;  %v9980_v48 = vsel %vm9890_vm15, %v3880_v62, %v3881_v52  ;;  %v9982_v36 = vld [vmem:[#allocation2 + $0x38] sm:$0x1]  ;;  %v9993_v52 = vld [vmem:[#allocation2 + $0x1c] sm:$0xf]  ;;  %v3837_v62 = vsel %vm9890_vm15, %v9164_v0, %v3836_v12 }
 0x222   : > { %v9968_v35 = vrot.slane %v2400_v18, 4  ;;  %v9997_v18 = vld [vmem:[#allocation2 + $0x44] sm:$0x1] }
 0x225   : > { %1598 = vrot.lane.b32.xlu2 %v1557_v45, %s9454_s22  ;;  %v9935_v45 = vrot.slane %v2437_v22, 5  ;;  %v2445_v22 = vshll.u32 %v2375_v63, 16  ;;  %v2382_v63 = vld [vmem:[#allocation2 + $0x34] sm:$0xf] }
 0x226   : > { %3891 = vrot.lane.b32.xlu1 %v3844_v7, %s9453_s21  ;;  %1600 = vrot.lane.b32.xlu0 %v1558_v51, %s9454_s22  ;;  %v9937_v7 = vld [vmem:[#allocation2 + $0x28] sm:$0xf]  ;;  %v2427_v51 = vshll.u32 %v2373_v34, 16 }
 0x227   : > { %v3850_v6 = vrot.slane %v9937_v7, 5 }
 0x228   : > { %v9962_v14 = vrot.slane %v2427_v51, 5  ;;  %v2564_v51 = vrot.slane %v2562_v10, 4  ;;  %v3871_v10 = vrot.slane %v9984_v42, 5 }
 0x229   : > { %v9908_v39 = vpop.permute.xlu2 %1277  ;;  %v3852_v34 = vrot.slane %v3850_v6, 4 }
 0x22a   : > { %15516 = vst [vmem:[#allocation9_spill] sm:$0xff] %v9908_v39  ;;  %v2434_v7 = vor.u32 %v2433_v15, %v9962_v14  ;;  %v10006_v15 = vld [vmem:[#allocation2 + $0x34] sm:$0xf]  ;;  %v2900_v39 = vld [vmem:[#allocation2 + $0x38] sm:$0x1] }
 0x22b   : > { %v3854_v4 = vsel %vm9890_vm15, %v3852_v34, %v3853_v25  ;;  %v3799_v25 = vld [vmem:[#allocation2 + $0x50] sm:$0x1] }
 0x22c   : > { %v3874_v0 = vrot.slane %v3799_v25, 5 }
 0x22d   : > { %1604 = vrot.lane.b32.xlu2 %v1560_v11, %s9454_s22  ;;  %v3788_v11 = vld [vmem:[#allocation2 + $0x24] sm:$0xe] }
 0x22e   : > { %3903 = vrot.lane.b32.xlu1 %v3865_v16, %s9453_s21  ;;  %1606 = vrot.lane.b32.xlu0 %v1561_v17, %s9454_s22  ;;  %v2565_v16 = vshll.u32 %v2390_v50, 16  ;;  %v9964_v17 = vrot.slane %v3095_v53, 4  ;;  %v9166_v46 = vrot.slane %v3788_v11, 9  ;;  %v3838_v50 = vrot.slane %v3836_v12, 4  ;;  %v3791_v11 = vld [vmem:[#allocation2 + $0x30] sm:$0xe] }
 0x22f   : > { %v9991_v53 = vrot.slane %v2410_v29, 4  ;;  %v10020_v29 = vrot.slane %v2434_v7, 4  ;;  %v9167_v42 = vrot.slane %v3791_v11, 9  ;;  %v3082_v12 = vshll.u32 %v2907_v33, 16 }
 0x230   : > { %v2567_v8 = vrot.slane %v2565_v16, 5  ;;  %v3851_v9 = vsel %vm9890_vm15, %v9166_v46, %v3850_v6  ;;  %v3797_v16 = vld [vmem:[#allocation2 + $0x48] sm:$0xe]  ;;  %v10018_v6 = vsel %vm9890_vm15, %v3838_v50, %v3839_v43  ;;  %v15416_v43 = vrot.slane %v10006_v15, 5 }
 0x231   : > { %v9932_v37 = vpop.permute.xlu2 %1610  ;;  %v2379_v50 = vld [vmem:[#allocation2 + $0x28] sm:$0xf] }
 0x232   : > { %15517 = vst [vmem:[#allocation10_spill] sm:$0xff] %v9932_v37  ;;  %v2568_v19 = vor.u32 %v2567_v8, %v2564_v51  ;;  %v3873_v8 = vrot.slane %v3871_v10, 4  ;;  %v2475_v34 = vshll.u32 %v2379_v50, 16 }
 0x235   : > { %3911 = vrot.lane.b32.xlu2 %v3879_v58, %s9453_s21  ;;  %v2447_v58 = vrot.slane %v2445_v22, 5  ;;  %v2451_v22 = vshll.u32 %v9993_v52, 16 }
 0x236   : > { %3885 = vrot.lane.b32.xlu1 %v3833_v2, %s9453_s21  ;;  %3883 = vrot.lane.b32.xlu0 %v3830_v3, %s9453_s21  ;;  %v2466_v2 = vshrl.u32 %v2378_v40, 16  ;;  %v2469_v3 = vshll.u32 %v2378_v40, 16  ;;  %v3079_v40 = vshrl.u32 %v2907_v33, 16  ;;  %v3858_v33 = vsel %vm9890_vm15, %v9167_v42, %v15416_v43 }
 0x237   : > { %v2448_v46 = vor.u32 %v2447_v58, %v2444_v49  ;;  %v10037_v58 = vrot.slane %v2568_v19, 4  ;;  %v10039_v11 = vrot.slane %v2451_v22, 5  ;;  %v3875_v22 = vsel %vm9890_vm15, %v3873_v8, %v3874_v0 }
 0x238   : > { %v2468_v7 = vrot.slane %v2466_v2, 4  ;;  %v2383_v2 = vld [vmem:[#allocation2 + $0x38] sm:$0x1]  ;;  %v3081_v19 = vrot.slane %v3079_v40, 4  ;;  %v2499_v42 = vshll.u32 %v2382_v63, 16  ;;  %v2503_v40 = vshrl.u32 %v2382_v63, 16 }
 0x239   : > { %v9970_v32 = vpop.permute.xlu2 %1247  ;;  %v10047_v25 = vrot.slane %v2448_v46, 4  ;;  %v2485_v46 = vshll.u32 %v2380_v24, 16  ;;  %v2420_v8 = vrot.slane %v2418_v38, 4  ;;  %v2914_v43 = vshll.u32 %v2886_v28, 16  ;;  %v2377_v38 = vld [vmem:[#allocation2 + $0x20] sm:$0x1] }
 0x23a   : > { %15521 = vst [vmem:[#allocation12_spill] sm:$0xff] %v9970_v32  ;;  %v2388_v32 = vld [vmem:[#allocation2 + $0x4c] sm:$0xf] }
 0x23b   : > { %v2916_v63 = vrot.slane %v2914_v43, 5  ;;  %v15528_v43 = vsel %vm9958_vm6, %v9944_v60, %v9911_v13 }
 0x23d   : > { %3887 = vrot.lane.b32.xlu2 %v3837_v62, %s9453_s21  ;;  %v2471_v62 = vrot.slane %v2469_v3, 5 }
 0x23e   : > { %3897 = vrot.lane.b32.xlu1 %v3854_v4, %s9453_s21  ;;  %3895 = vrot.lane.b32.xlu0 %v3851_v9, %s9453_s21  ;;  %v9169_v4 = vrot.slane %v3797_v16, 9  ;;  %v3845_v9 = vrot.slane %v3843_v41, 4  ;;  %v2479_v16 = vshrl.u32 %v2379_v50, 16  ;;  %v2421_v41 = vshll.u32 %v2372_v26, 16 }
 0x23f   : > { %v2472_v49 = vor.u32 %v2471_v62, %v2468_v7  ;;  %v3084_v50 = vrot.slane %v3082_v12, 5  ;;  %v2455_v26 = vshrl.u32 %v9993_v52, 16  ;;  %v2509_v7 = vshll.u32 %v2383_v2, 16 }
 0x240   : > { %v10029_v51 = vpop.permute.xlu1 %1275  ;;  %v3872_v23 = vsel %vm9890_vm15, %v9169_v4, %v3871_v10  ;;  %v10057_v62 = vrot.slane %v2475_v34, 5  ;;  %v2481_v0 = vrot.slane %v2479_v16, 4  ;;  %v2423_v10 = vrot.slane %v2421_v41, 5  ;;  %v2381_v41 = vld [vmem:[#allocation2 + $0x30] sm:$0xf] }
 0x241   : > { %15522 = vst [vmem:[#allocation13_spill] sm:$0xff] %v10029_v51  ;;  %v10041_v3 = vpop.permute.xlu2 %1253  ;;  %v2514_v4 = vshrl.u32 %v2384_v31, 16  ;;  %v2911_v12 = vshrl.u32 %v2886_v28, 16  ;;  %v15524_v52 = vrot.slane %v9946_v30, 5  ;;  %v10063_v5 = vrot.slane %v2472_v49, 4 }
 0x242   : > { %15523 = vst [vmem:[#allocation14_spill] sm:$0xff] %v10041_v3  ;;  %v2457_v24 = vrot.slane %v2455_v26, 4  ;;  %v10073_v28 = vrot.slane %v2499_v42, 5  ;;  %v2505_v30 = vrot.slane %v2503_v40, 4  ;;  %v10078_v49 = vrot.slane %v2485_v46, 5 }
 0x243   : > { %v10080_v2 = vrot.slane %v2509_v7, 5  ;;  %v2424_v16 = vor.u32 %v2423_v10, %v2420_v8  ;;  %v2887_v26 = vld [vmem:[#allocation2 + $0x4] sm:$0xf]  ;;  %v15527_v42 = vrot.slane %v10006_v15, 5  ;;  %v2389_v8 = vld [vmem:[#allocation2 + $0x50] sm:$0x1] }
 0x244   : > { %v2506_v15 = vor.u32 %v2505_v30, %v10073_v28  ;;  %v10103_v10 = vld [vmem:[#allocation2 + $0x40] sm:$0xf]  ;;  %v15529_v46 = vrot.slane %v9903_v54, 5  ;;  %v2888_v54 = vld [vmem:[#allocation2 + $0x8] sm:$0x1] }
 0x245   : > { %3899 = vrot.lane.b32.xlu2 %v3858_v33, %s9453_s21  ;;  %v2517_v33 = vshll.u32 %v2384_v31, 16  ;;  %v3859_v40 = vrot.slane %v15527_v42, 4  ;;  %v2924_v42 = vshrl.u32 %v2887_v26, 16 }
 0x246   : > { %3909 = vrot.lane.b32.xlu1 %v3875_v22, %s9453_s21  ;;  %3907 = vrot.lane.b32.xlu0 %v3872_v23, %s9453_s21  ;;  %v3847_v22 = vsel %vm9890_vm15, %v3845_v9, %v15524_v52  ;;  %v3085_v23 = vor.u32 %v3084_v50, %v3081_v19  ;;  %v2482_v9 = vor.u32 %v2481_v0, %v10057_v62  ;;  %v2516_v19 = vrot.slane %v2514_v4, 4 }
 0x247   : > { %v2519_v50 = vrot.slane %v2517_v33, 5  ;;  %v2913_v52 = vrot.slane %v2911_v12, 4  ;;  %v2458_v0 = vor.u32 %v2457_v24, %v10039_v11  ;;  %v2461_v4 = vshll.u32 %v2377_v38, 16 }
 0x248   : > { %v10075_v34 = vpop.permute.xlu1 %1608  ;;  %v10091_v7 = vrot.slane %v3085_v23, 4  ;;  %v2490_v33 = vshrl.u32 %v2381_v41, 16  ;;  %v2493_v12 = vshll.u32 %v2381_v41, 16  ;;  %v10107_v23 = vrot.slane %v2424_v16, 4 }
 0x249   : > { %15525 = vst [vmem:[#allocation15_spill] sm:$0xff] %v10075_v34  ;;  %v10082_v31 = vpop.permute.xlu2 %1259  ;;  %v2920_v24 = vshll.u32 %v2887_v26, 16  ;;  %v3866_v13 = vrot.slane %v15529_v46, 4  ;;  %v2520_v60 = vor.u32 %v2519_v50, %v2516_v19  ;;  %v2917_v21 = vor.u32 %v2916_v63, %v2913_v52  ;;  %v2890_v50 = vld [vmem:[#allocation2 + $0x10] sm:$0xf] }
 0x24a   : > { %15526 = vst [vmem:[#allocation16_spill] sm:$0xff] %v10082_v31  ;;  %v2523_v16 = vshll.u32 %v10103_v10, 16  ;;  %v10122_v38 = vrot.slane %v2458_v0, 4  ;;  %v10124_v41 = vrot.slane %v2506_v15, 4  ;;  %v10126_v19 = vrot.slane %v2461_v4, 5  ;;  %v10138_v15 = vpop.permute.xlu0 %1249 }
 0x24b   : > { %v2492_v63 = vrot.slane %v2490_v33, 4  ;;  %v2926_v46 = vrot.slane %v2924_v42, 4  ;;  %v2892_v0 = vld [vmem:[#allocation2 + $0x18] sm:$0xf]  ;;  %15532 = vst [vmem:[#allocation18_spill] sm:$0xff] %v10138_v15  ;;  %v15533_v4 = vrot.slane %v9997_v18, 5  ;;  %v15536_v18 = vsel %vm9958_vm6, %v9964_v17, %v9913_v59 }
 0x24c   : > { %v2930_v42 = vshll.u32 %v2888_v54, 16  ;;  %v2944_v52 = vshll.u32 %v2890_v50, 16  ;;  %v2948_v57 = vshrl.u32 %v2890_v50, 16  ;;  %v2893_v34 = vld [vmem:[#allocation2 + $0x1c] sm:$0xf] }
 0x24d   : > { %3893 = vrot.lane.b32.xlu2 %v3847_v22, %s9453_s21  ;;  %v10105_v22 = vrot.slane %v2482_v9, 4  ;;  %v3868_v33 = vsel %vm9890_vm15, %v3866_v13, %v15533_v4  ;;  %v10148_v9 = vrot.slane %v2917_v21, 4  ;;  %v2891_v21 = vld [vmem:[#allocation2 + $0x14] sm:$0x1]  ;;  %v2959_v13 = vshrl.u32 %v2892_v0, 16 }
 0x24e   : > { %2615 = vrot.lane.b32.xlu1 %v15528_v43, %s9453_s21  ;;  %3913 = vrot.lane.b32.xlu0 %v9980_v48, %s9453_s21  ;;  %v2557_v43 = vshll.u32 %v2389_v8, 16  ;;  %v15530_v48 = vrot.slane %v9982_v36, 5  ;;  %v2495_v36 = vrot.slane %v2493_v12, 5  ;;  %v2889_v8 = vld [vmem:[#allocation2 + $0xc] sm:$0xf]  ;;  %v10144_v12 = vrot.slane %v2520_v60, 4 }
 0x24f   : > { %15534 = vst [vmem:[#allocation19_spill] sm:$0xff] %v10148_v9  ;;  %v2962_v60 = vshll.u32 %v2892_v0, 16  ;;  %v2387_v0 = vld [vmem:[#allocation2 + $0x48] sm:$0xf]  ;;  %v2894_v54 = vld [vmem:[#allocation2 + $0x20] sm:$0x1] }
 0x250   : > { %v10115_v30 = vsel %vm9890_vm15, %v3859_v40, %v15530_v48  ;;  %v10136_v40 = vrot.slane %v2920_v24, 5  ;;  %v10146_v48 = vrot.slane %v2557_v43, 5  ;;  %v10150_v26 = vpop.permute.xlu1 %1251  ;;  %v10153_v24 = vrot.slane %v2523_v16, 5 }
 0x251   : > { %15535 = vst [vmem:[#allocation20_spill] sm:$0xff] %v10150_v26  ;;  %v2935_v43 = vshrl.u32 %v2889_v8, 16  ;;  %v2938_v16 = vshll.u32 %v2889_v8, 16  ;;  %v10163_v4 = vpop.permute.xlu2 %1265  ;;  %v2496_v17 = vor.u32 %v2495_v36, %v2492_v63  ;;  %v2972_v26 = vshrl.u32 %v2893_v34, 16 }
 0x252   : > { %15531 = vst [vmem:[#allocation17_spill] sm:$0xff] %v10136_v40  ;;  %v10182_v59 = vrot.slane %v2930_v42, 5  ;;  %v10184_v63 = vrot.slane %v2944_v52, 5  ;;  %v2950_v36 = vrot.slane %v2948_v57, 4  ;;  %v2961_v37 = vrot.slane %v2959_v13, 4 }
 0x253   : > { %15537 = vst [vmem:[#allocation21_spill] sm:$0xff] %v10163_v4  ;;  %v2964_v3 = vrot.slane %v2962_v60, 5  ;;  %v2937_v50 = vrot.slane %v2935_v43, 4  ;;  %v2940_v31 = vrot.slane %v2938_v16, 5  ;;  %v2538_v15 = vshrl.u32 %v2387_v0, 16 }
 0x254   : > { %15538 = vst [vmem:[#allocation22_spill] sm:$0xff] %v10184_v63  ;;  %v2541_v51 = vshll.u32 %v2387_v0, 16  ;;  %v10186_v4 = vrot.slane %v2496_v17, 4  ;;  %v2547_v42 = vshll.u32 %v2388_v32, 16  ;;  %v2551_v9 = vshrl.u32 %v2388_v32, 16 }
 0x255   : > { %3905 = vrot.lane.b32.xlu2 %v3868_v33, %s9453_s21  ;;  %v2968_v33 = vshll.u32 %v2893_v34, 16  ;;  %v2896_v57 = vld [vmem:[#allocation2 + $0x28] sm:$0xf]  ;;  %v15540_v13 = vsel %vm9958_vm6, %v9991_v53, %v9927_v27  ;;  %v2386_v60 = vld [vmem:[#allocation2 + $0x44] sm:$0x1]  ;;  %v2951_v43 = vor.u32 %v2950_v36, %v10184_v63  ;;  %v2978_v17 = vshll.u32 %v2894_v54, 16 }
 0x256   : > { %3132 = vrot.lane.b32.xlu1 %v15536_v18, %s9454_s22  ;;  %3889 = vrot.lane.b32.xlu0 %v10018_v6, %s9453_s21  ;;  %v2927_v6 = vor.u32 %v2926_v46, %v10136_v40  ;;  %v2897_v18 = vld [vmem:[#allocation2 + $0x2c] sm:$0x1]  ;;  %v2954_v46 = vshll.u32 %v2891_v21, 16  ;;  %v2895_v40 = vld [vmem:[#allocation2 + $0x24] sm:$0xf]  ;;  %v2974_v21 = vrot.slane %v2972_v26, 4  ;;  %v15541_v32 = vsel %vm9958_vm6, %v9968_v35, %v9940_v55 }
 0x257   : > { %v10192_v52 = vrot.slane %v2968_v33, 5  ;;  %v3002_v16 = vshll.u32 %v2897_v18, 16  ;;  %v2965_v26 = vor.u32 %v2964_v3, %v2961_v37  ;;  %v2941_v0 = vor.u32 %v2940_v31, %v2937_v50 }
 0x258   : > { %v10188_v8 = vrot.slane %v2927_v6, 4  ;;  %v10190_v34 = vpop.permute.xlu0 %1255  ;;  %v3026_v6 = vshll.u32 %v2900_v39, 16  ;;  %v2983_v27 = vshrl.u32 %v2895_v40, 16  ;;  %v2986_v53 = vshll.u32 %v2895_v40, 16  ;;  %v2903_v40 = vld [vmem:[#allocation2 + $0x44] sm:$0x1] }
 0x259   : > { %15539 = vst [vmem:[#allocation23_spill] sm:$0xff] %v10190_v34  ;;  %v10209_v33 = vpop.permute.xlu1 %1257  ;;  %v2540_v54 = vrot.slane %v2538_v15, 4  ;;  %v2543_v39 = vrot.slane %v2541_v51, 5  ;;  %v2992_v18 = vshll.u32 %v2896_v57, 16  ;;  %v10213_v34 = vrot.slane %v2547_v42, 5 }
 0x25a   : > { %15542 = vst [vmem:[#allocation24_spill] sm:$0xff] %v10209_v33  ;;  %v2553_v61 = vrot.slane %v2551_v9, 4  ;;  %v2533_v55 = vshll.u32 %v2386_v60, 16  ;;  %v2975_v35 = vor.u32 %v2974_v21, %v10192_v52  ;;  %v10218_v37 = vrot.slane %v2954_v46, 5  ;;  %v952_v9 = vld [vmem:[#allocation2 + $0x54] sm:$0xf] }
 0x25b   : > { %v10220_v3 = vrot.slane %v3002_v16, 5  ;;  %v10222_v31 = vrot.slane %v2978_v17, 5  ;;  %v10224_v15 = vrot.slane %v2941_v0, 4  ;;  %v2985_v51 = vrot.slane %v2983_v27, 4  ;;  %v2899_v46 = vld [vmem:[#allocation2 + $0x34] sm:$0xf] }
 0x25c   : > { %v2988_v50 = vrot.slane %v2986_v53, 5  ;;  %v10226_v42 = vrot.slane %v3026_v6, 5  ;;  %v10228_v60 = vrot.slane %v2965_v26, 4  ;;  %v10230_v21 = vrot.slane %v2992_v18, 5  ;;  %v10237_v0 = vld [vmem:[#allocation2 + $0x50] sm:$0x1] }
 0x25d   : > { %2587 = vrot.lane.b32.xlu2 %v15540_v13, %s9453_s21  ;;  %v2996_v13 = vshrl.u32 %v2896_v57, 16  ;;  %15544 = vst [vmem:[#allocation26_spill] sm:$0xff] %v10222_v31  ;;  %v2544_v57 = vor.u32 %v2543_v39, %v2540_v54  ;;  %v2554_v16 = vor.u32 %v2553_v61, %v10213_v34  ;;  %v10233_v33 = vrot.slane %v2533_v55, 5  ;;  %v945_v53 = vld [vmem:[#allocation2 + $0x28] sm:$0xf] }
 0x25e   : > { %2585 = vrot.lane.b32.xlu1 %v15541_v32, %s9453_s21  ;;  %3901 = vrot.lane.b32.xlu0 %v10115_v30, %s9453_s21  ;;  %v953_v32 = vld [vmem:[#allocation2 + $0x58] sm:$0xf]  ;;  %v10216_v30 = vrot.slane %v2951_v43, 4  ;;  %15545 = vst [vmem:[#allocation27_spill] sm:$0xff] %v10224_v15  ;;  %v10235_v17 = vrot.slane %v2975_v35, 4  ;;  %v3050_v27 = vshll.u32 %v2903_v40, 16  ;;  %v15548_v6 = vsel %vm9958_vm6, %v10047_v25, %v10039_v11 }
 0x25f   : > { %v10211_v36 = vpop.permute.xlu2 %1271  ;;  %15546 = vst [vmem:[#allocation28_spill] sm:$0xff] %v10230_v21  ;;  %v2998_v43 = vrot.slane %v2996_v13, 4  ;;  %v1045_v54 = vrot.slane %v953_v32, 4  ;;  %v944_v39 = vld [vmem:[#allocation2 + $0x24] sm:$0xf]  ;;  %v989_v18 = vrot.slane %v952_v9, 4  ;;  %v15550_v11 = vsel %vm9958_vm6, %v10020_v29, %v9935_v45 }
 0x260   : > { %15543 = vst [vmem:[#allocation25_spill] sm:$0xff] %v10211_v36  ;;  %v15551_v25 = vsel %vm9958_vm6, %v10037_v58, %v9916_v20  ;;  %v2989_v35 = vor.u32 %v2988_v50, %v2985_v51  ;;  %v3016_v32 = vshll.u32 %v2899_v46, 16  ;;  %v3020_v40 = vshrl.u32 %v2899_v46, 16  ;;  %v2898_v9 = vld [vmem:[#allocation2 + $0x30] sm:$0xf] }
 0x261   : > { %15547 = vst [vmem:[#allocation29_spill] sm:$0xff] %v10235_v17  ;;  %v10253_v13 = vpop.permute.xlu0 %1261  ;;  %v10275_v29 = vrot.slane %v2544_v57, 4  ;;  %v2999_v51 = vor.u32 %v2998_v43, %v10230_v21  ;;  %v3403_v50 = vld [vmem:[#allocation2] sm:$0xe]  ;;  %v10286_v46 = vrot.slane %v2554_v16, 4  ;;  %v3007_v61 = vshrl.u32 %v2898_v9, 16 }
 0x262   : > { %15549 = vst [vmem:[#allocation30_spill] sm:$0xff] %v10253_v13  ;;  %v10294_v55 = vld [vmem:[#allocation2 + $0x4] sm:$0xf]  ;;  %v3406_v20 = vld [vmem:[#allocation2 + $0xc] sm:$0xe]  ;;  %v3074_v58 = vshll.u32 %v10237_v0, 16  ;;  %v15557_v31 = vsel %vm9958_vm6, %v10063_v5, %v10057_v62 }
 0x263   : > { %15554 = vst [vmem:[#allocation33_spill] sm:$0xff] %v10294_v55  ;;  %v10299_v16 = vrot.slane %v2989_v35, 4  ;;  %v10301_v13 = vrot.slane %v3016_v32, 5  ;;  %v3022_v36 = vrot.slane %v3020_v40, 4  ;;  %v10303_v57 = vrot.slane %v3050_v27, 5 }
 0x264   : > { %v949_v32 = vld [vmem:[#allocation2 + $0x40] sm:$0xf]  ;;  %v9155_v27 = vrot.slane %v3403_v50, 9  ;;  %v948_v40 = vld [vmem:[#allocation2 + $0x3c] sm:$0xf]  ;;  %v15562_v17 = vrot.slane %v10294_v55, 5 }
 0x265   : > { %2593 = vrot.lane.b32.xlu2 %v15548_v6, %s9453_s21  ;;  %v947_v6 = vld [vmem:[#allocation2 + $0x34] sm:$0xf]  ;;  %15555 = vst [vmem:[#allocation34_spill] sm:$0xff] %v10299_v16  ;;  %v940_v16 = vld [vmem:[#allocation2 + $0xc] sm:$0xf] }
 0x266   : > { %2591 = vrot.lane.b32.xlu1 %v15550_v11, %s9453_s21  ;;  %2613 = vrot.lane.b32.xlu0 %v15551_v25, %s9453_s21  ;;  %v1046_v11 = vsel %vm425_vm2, %v1045_v54, %v945_v53  ;;  %v990_v25 = vsel %vm425_vm2, %v989_v18, %v944_v39  ;;  %v1011_v43 = vrot.slane %v947_v6, 4  ;;  %v10309_v54 = vrot.slane %v2999_v51, 4  ;;  %v939_v39 = vld [vmem:[#allocation2 + $0x4] sm:$0xf]  ;;  %v946_v18 = vld [vmem:[#allocation2 + $0x30] sm:$0xf] }
 0x267   : > { %v10271_v26 = vpop.permute.xlu1 %1263  ;;  %v10273_v45 = vpop.permute.xlu2 %1580  ;;  %v10312_v0 = vperm.slane %v1046_v11, %v9548_v56  ;;  %v10315_v35 = vperm.slane %v990_v25, %v9548_v56  ;;  %v9156_v6 = vrot.slane %v3406_v20, 9  ;;  %v15556_v51 = vsel %vm9958_vm6, %v10105_v22, %v10078_v49  ;;  %v10332_v20 = vld [vmem:[#allocation2 + $0x1c] sm:$0xf]  ;;  %v941_v11 = vld [vmem:[#allocation2 + $0x10] sm:$0xf] }
 0x268   : > { %15552 = vst [vmem:[#allocation31_spill] sm:$0xff] %v10271_v26  ;;  %v10297_v26 = vld [vmem:[#allocation2 + $0x10] sm:$0xf]  ;;  %v3009_v25 = vrot.slane %v3007_v61, 4  ;;  %v1012_v50 = vsel %vm425_vm2, %v1011_v43, %v939_v39  ;;  %v15558_v49 = vsel %vm9958_vm6, %v10091_v7, %v9929_v47  ;;  %v3023_v61 = vor.u32 %v3022_v36, %v10301_v13  ;;  %v951_v43 = vld [vmem:[#allocation2 + $0x4c] sm:$0xf] }
 0x269   : > { %15553 = vst [vmem:[#allocation32_spill] sm:$0xff] %v10273_v45  ;;  %v3010_v45 = vshll.u32 %v2898_v9, 16  ;;  %v10317_v9 = vld [vmem:[#allocation2 + $0x18] sm:$0xe]  ;;  %v950_v39 = vld [vmem:[#allocation2 + $0x48] sm:$0xf] }
 0x26a   : > { %v954_v5 = vrot.slane %v946_v18, 4  ;;  %v1039_v7 = vrot.slane %v949_v32, 4  ;;  %v2901_v18 = vld [vmem:[#allocation2 + $0x3c] sm:$0xf]  ;;  %v10374_v32 = vsel %vm9890_vm15, %v9155_v27, %v15562_v17  ;;  %v15564_v47 = vrot.slane %v10297_v26, 5 }
 0x26b   : > { %v3012_v53 = vrot.slane %v3010_v45, 5  ;;  %v10351_v45 = vrot.slane %v3074_v58, 5  ;;  %v10363_v58 = vld [vmem:[#allocation2 + $0x24] sm:$0xe]  ;;  %15563 = vst [vmem:[#allocation38_spill] sm:$0xff] %v10374_v32  ;;  %v1017_v21 = vrot.slane %v951_v43, 4 }
 0x26c   : > { %v10380_v36 = vsel %vm9890_vm15, %v9156_v6, %v15564_v47  ;;  %v961_v63 = vrot.slane %v950_v39, 4  ;;  %v943_v15 = vld [vmem:[#allocation2 + $0x1c] sm:$0xf]  ;;  %v10386_v17 = vld [vmem:[#allocation2 + $0x28] sm:$0xf]  ;;  %v15434_v27 = vrot.slane %v10332_v20, 5  ;;  %v1040_v43 = vsel %vm425_vm2, %v1039_v7, %v941_v11 }
 0x26d   : > { %2599 = vrot.lane.b32.xlu2 %v15556_v51, %s9453_s21  ;;  %v938_v51 = vld [vmem:[#allocation2] sm:$0xf]  ;;  %15565 = vst [vmem:[#allocation39_spill] sm:$0xff] %v10380_v36  ;;  %v9158_v32 = vrot.slane %v10363_v58, 9  ;;  %v2527_v6 = vshrl.u32 %v10103_v10, 16  ;;  %v3031_v47 = vshrl.u32 %v2901_v18, 16  ;;  %v1018_v58 = vsel %vm425_vm2, %v1017_v21, %v943_v15 }
 0x26e   : > { %2597 = vrot.lane.b32.xlu1 %v15557_v31, %s9453_s21  ;;  %3130 = vrot.lane.b32.xlu0 %v15558_v49, %s9454_s22  ;;  %v2902_v49 = vld [vmem:[#allocation2 + $0x40] sm:$0xf]  ;;  %v956_v55 = vsel %vm425_vm2, %v954_v5, %v938_v51  ;;  %v942_v36 = vld [vmem:[#allocation2 + $0x18] sm:$0xf]  ;;  %v15566_v51 = vsel %vm9958_vm6, %v10144_v12, %v10153_v24  ;;  %v15568_v12 = vsel %vm9958_vm6, %v10107_v23, %v9962_v14 }
 0x26f   : > { %v10353_v62 = vpop.permute.xlu2 %1586  ;;  %v10355_v31 = vpop.permute.xlu0 %1267  ;;  %v3040_v39 = vshll.u32 %v2902_v49, 16  ;;  %v960_v11 = vperm.slane %v956_v55, %v9548_v56  ;;  %v962_v7 = vsel %vm425_vm2, %v961_v63, %v942_v36  ;;  %v1044_v55 = vperm.slane %v1040_v43, %v9548_v56 }
 0x270   : > { %15559 = vst [vmem:[#allocation35_spill] sm:$0xff] %v10353_v62  ;;  %v10365_v22 = vpop.permute.xlu1 %1269  ;;  %v10368_v62 = vperm.slane %v1012_v50, %v9548_v56  ;;  %v9157_v50 = vrot.slane %v10317_v9, 9  ;;  %v3044_v9 = vshrl.u32 %v2902_v49, 16  ;;  %v2529_v49 = vrot.slane %v2527_v6, 4 }
 0x271   : > { %15560 = vst [vmem:[#allocation36_spill] sm:$0xff] %v10355_v31  ;;  %v983_v31 = vrot.slane %v948_v40, 4  ;;  %v10383_v40 = vrot.slane %v3023_v61, 4  ;;  %v3033_v36 = vrot.slane %v3031_v47, 4  ;;  %v10426_v14 = vrot.slane %v3040_v39, 5 }
 0x272   : > { %15561 = vst [vmem:[#allocation37_spill] sm:$0xff] %v10365_v22  ;;  %v3013_v22 = vor.u32 %v3012_v53, %v3009_v25  ;;  %v3034_v53 = vshll.u32 %v2901_v18, 16  ;;  %v2904_v25 = vld [vmem:[#allocation2 + $0x48] sm:$0xf]  ;;  %v1025_v61 = vrot.slane %v10368_v62, 4  ;;  %v3046_v23 = vrot.slane %v3044_v9, 4 }
 0x273   : > { %v984_v5 = vsel %vm425_vm2, %v983_v31, %v940_v16  ;;  %v15567_v16 = vsel %vm9958_vm6, %v10124_v41, %v10080_v2  ;;  %v3055_v15 = vshrl.u32 %v2904_v25, 16  ;;  %v3058_v21 = vshll.u32 %v2904_v25, 16 }
 0x274   : > { %v10400_v10 = vrot.slane %v3013_v22, 4  ;;  %v2905_v22 = vld [vmem:[#allocation2 + $0x4c] sm:$0xf]  ;;  %v3036_v2 = vrot.slane %v3034_v53, 5  ;;  %v988_v41 = vperm.slane %v984_v5, %v9548_v56  ;;  %v1022_v25 = vperm.slane %v1018_v58, %v9548_v56 }
 0x275   : > { %2605 = vrot.lane.b32.xlu2 %v15566_v51, %s9453_s21  ;;  %v966_v43 = vperm.slane %v962_v7, %v9548_v56  ;;  %v3064_v47 = vshll.u32 %v2905_v22, 16  ;;  %v3068_v53 = vshrl.u32 %v2905_v22, 16  ;;  %v10438_v5 = vsel %vm9890_vm15, %v9157_v50, %v15434_v27 }
 0x276   : > { %2603 = vrot.lane.b32.xlu1 %v15567_v16, %s9453_s21  ;;  %2589 = vrot.lane.b32.xlu0 %v15568_v12, %s9453_s21  ;;  %v3057_v9 = vrot.slane %v3055_v15, 4  ;;  %v3060_v58 = vrot.slane %v3058_v21, 5  ;;  %v1053_v7 = vrot.slane %v1044_v55, 4  ;;  %v3415_v16 = vld [vmem:[#allocation2 + $0x30] sm:$0xe]  ;;  %v2530_v12 = vor.u32 %v2529_v49, %v10153_v24 }
 0x277   : > { %v10419_v31 = vpop.permute.xlu2 %1592  ;;  %v3037_v6 = vor.u32 %v3036_v2, %v3033_v36  ;;  %v969_v63 = vrot.slane %v960_v11, 4  ;;  %v997_v22 = vrot.slane %v988_v41, 4  ;;  %v1023_v50 = vrot.slane %v1022_v25, 4 }
 0x278   : > { %15569 = vst [vmem:[#allocation40_spill] sm:$0xff] %v10419_v31  ;;  %v10422_v18 = vpop.permute.xlu1 %1584  ;;  %v10424_v51 = vpop.permute.xlu0 %1273  ;;  %v10445_v31 = vld [vmem:[#allocation2 + $0x34] sm:$0xf]  ;;  %v967_v27 = vrot.slane %v966_v43, 4  ;;  %v15573_v24 = vsel %vm9958_vm6, %v10286_v46, %v10146_v48  ;;  %v10460_v15 = vrot.slane %v3064_v47, 5  ;;  %v3070_v21 = vrot.slane %v3068_v53, 4 }
 0x279   : > { %15570 = vst [vmem:[#allocation41_spill] sm:$0xff] %v10422_v18  ;;  %v3047_v18 = vor.u32 %v3046_v23, %v10426_v14  ;;  %v970_v49 = vsel %vm425_vm2, %v966_v43, %v969_v63  ;;  %v9159_v36 = vrot.slane %v3415_v16, 9  ;;  %v15575_v48 = vsel %vm9958_vm6, %v10275_v29, %v10213_v34  ;;  %v10502_v16 = vld [vmem:[#allocation2 + $0x40] sm:$0xf] }
 0x27a   : > { %15571 = vst [vmem:[#allocation42_spill] sm:$0xff] %v10424_v51  ;;  %v15572_v51 = vrot.slane %v10386_v17, 5  ;;  %v3061_v46 = vor.u32 %v3060_v58, %v3057_v9  ;;  %v1026_v2 = vsel %vm425_vm2, %v1022_v25, %v1025_v61  ;;  %v1054_v63 = vsel %vm425_vm2, %v10312_v0, %v1053_v7  ;;  %v15580_v9 = vld [vmem:[#allocation4_spill] sm:$0xff] }
 0x27b   : > { %v15435_v23 = vrot.slane %v10445_v31, 5  ;;  %v998_v34 = vsel %vm425_vm2, %v10315_v35, %v997_v22  ;;  %v15577_v29 = vrot.slane %v10312_v0, 4  ;;  %v10496_v53 = vrot.slane %v3047_v18, 4 }
 0x27c   : > { %v10452_v39 = vsel %vm9890_vm15, %v9158_v32, %v15572_v51  ;;  %v15574_v32 = vsel %vm9958_vm6, %v10122_v38, %v10126_v19  ;;  %v10478_v51 = vld [vmem:[#allocation2 + $0x3c] sm:$0xe]  ;;  %v10483_v38 = vrot.slane %v2530_v12, 4  ;;  %v10485_v19 = vrot.slane %v3037_v6, 4 }
 0x27d   : > { %2611 = vrot.lane.b32.xlu2 %v15573_v24, %s9453_s21  ;;  %v1052_v61 = vsel %vm425_vm2, %v15577_v29, %v1044_v55  ;;  %v978_v58 = vperm.slane %v970_v49, %v15580_v9  ;;  %v1024_v7 = vsel %vm425_vm2, %v1023_v50, %v10368_v62  ;;  %v968_v6 = vsel %vm425_vm2, %v967_v27, %v960_v11  ;;  %v15588_v29 = vld [vmem:[#allocation19_spill] sm:$0xff] }
 0x27e   : > { %2595 = vrot.lane.b32.xlu0 %v15574_v32, %s9453_s21  ;;  %2609 = vrot.lane.b32.xlu1 %v15575_v48, %s9453_s21  ;;  %v3071_v12 = vor.u32 %v3070_v21, %v10460_v15  ;;  %v1034_v0 = vperm.slane %v1026_v2, %v15580_v9  ;;  %v1062_v55 = vperm.slane %v1054_v63, %v15580_v9  ;;  %v10508_v24 = vrot.slane %v3061_v46, 4 }
 0x27f   : > { %v10481_v43 = vpop.permute.xlu2 %1598  ;;  %v1006_v18 = vperm.slane %v998_v34, %v15580_v9  ;;  %v10512_v49 = vperm.slane %v1052_v61, %v15580_v9  ;;  %v15582_v62 = vrot.slane %v10315_v35, 4  ;;  %v10518_v11 = vperm.slane %v1024_v7, %v15580_v9 }
 0x280   : > { %15576 = vst [vmem:[#allocation43_spill] sm:$0xff] %v10481_v43  ;;  %v10492_v25 = vpop.permute.xlu1 %1590  ;;  %v10494_v47 = vpop.permute.xlu0 %1582  ;;  %v10521_v50 = vperm.slane %v968_v6, %v15580_v9  ;;  %v10527_v21 = vsel %vm9890_vm15, %v9159_v36, %v15435_v23  ;;  %v2536_v35 = vsel %vm9958_vm6, %v10483_v38, %v10233_v33  ;;  %v981_v46 = vrot.slane %v978_v58, 4  ;;  %v10703_v43 = vld [vmem:[#allocation2 + $0x2c] sm:$0x1] }
 0x281   : > { %15578 = vst [vmem:[#allocation44_spill] sm:$0xff] %v10492_v25  ;;  %v996_v27 = vsel %vm425_vm2, %v15582_v62, %v988_v41  ;;  %v15585_v36 = vsel %vm9958_vm6, %v10188_v8, %v10182_v59  ;;  %v10548_v2 = vrot.slane %v3071_v12, 4  ;;  %v1106_v33 = vshrl.u32 %v1034_v0, 16  ;;  %v15589_v59 = vld [vmem:[#allocation17_spill] sm:$0xff] }
 0x282   : > { %15579 = vst [vmem:[#allocation45_spill] sm:$0xff] %v10494_v47  ;;  %v1107_v63 = vshrl.u32 %v1062_v55, 16  ;;  %v10551_v38 = vperm.slane %v996_v27, %v15580_v9  ;;  %v15587_v34 = vsel %vm9958_vm6, %v10186_v4, %v10073_v28  ;;  %v15590_v8 = vsel %vm9958_vm6, %v15588_v29, %v15589_v59 }
 0x283   : > { %15581 = vst [vmem:[#allocation4_spill] sm:$0xff] %v10512_v49  ;;  %v1082_v7 = vshrl.u32 %v978_v58, 16  ;;  %v1009_v6 = vrot.slane %v1006_v18, 4  ;;  %v1063_v12 = vrot.slane %v10512_v49, 4  ;;  %v1083_v28 = vshrl.u32 %v1006_v18, 16 }
 0x284   : > { %15583 = vst [vmem:[#allocation46_spill] sm:$0xff] %v10518_v11  ;;  %v1094_v4 = vshrl.u32 %v10518_v11, 16  ;;  %v1095_v27 = vshrl.u32 %v10512_v49, 16  ;;  %v1105_v59 = vpack.i.b16 %v1062_v55, %v1034_v0  ;;  %v1035_v48 = vrot.slane %v10518_v11, 4 }
 0x285   : > { %15584 = vst [vmem:[#allocation47_spill] sm:$0xff] %v10521_v50  ;;  %3104 = vrot.lane.b32.xlu2 %v15585_v36, %s9454_s22  ;;  %v979_v36 = vrot.slane %v10521_v50, 4  ;;  %v1037_v23 = vrot.slane %v1034_v0, 4  ;;  %v1108_v61 = vpack.i.b16 %v1107_v63, %v1106_v33  ;;  %v1081_v41 = vpack.i.b16 %v1006_v18, %v978_v58 }
 0x286   : > { %15586 = vst [vmem:[#allocation48_spill] sm:$0xff] %v10551_v38  ;;  %2601 = vrot.lane.b32.xlu0 %v15587_v34, %s9453_s21  ;;  %3102 = vrot.lane.b32.xlu1 %v15590_v8, %s9454_s22  ;;  %v982_v8 = vsel %vm425_vm2, 0, %v981_v46  ;;  %v1070_v22 = vshrl.u32 %v10521_v50, 16  ;;  %v1007_v32 = vrot.slane %v10551_v38, 4  ;;  %v1010_v49 = vsel %vm425_vm2, 0, %v1009_v6 }
 0x287   : > { %v10570_v62 = vpop.permute.xlu2 %1604  ;;  %v10585_v25 = vsel %vm425_vm2, 0, %v1063_v12  ;;  %v1096_v47 = vpack.i.b16 %v1095_v27, %v1094_v4  ;;  %v1071_v46 = vshrl.u32 %v10551_v38, 16  ;;  %v980_v11 = vsel %vm425_vm2, 0, %v979_v36  ;;  %v3424_v4 = vld [vmem:[#allocation2 + $0x54] sm:$0xe] }
 0x288   : > { %15591 = vst [vmem:[#allocation19_spill] sm:$0xff] %v10570_v62  ;;  %v10575_v34 = vpop.permute.xlu1 %1596  ;;  %v10577_v29 = vpop.permute.xlu0 %1588  ;;  %v1084_v62 = vpack.i.b16 %v1083_v28, %v1082_v7  ;;  %v10589_v0 = vunpack.c.l.b16 %v1105_v59  ;;  %v10592_v58 = vsel %vm425_vm2, 0, %v1035_v48  ;;  %v10595_v18 = vsel %vm425_vm2, 0, %v1037_v23 }
 0x289   : > { %15592 = vst [vmem:[#allocation17_spill] sm:$0xff] %v10575_v34  ;;  %v1065_v34 = vrot.slane %v1062_v55, 4  ;;  %v1088_v33 = vshrl.u32 %v982_v8, 16  ;;  %v15595_v55 = vsel %vm9958_vm6, %v10228_v60, %v10192_v52  ;;  %v1159_v63 = vunpack.c.l.b16 %v1108_v61 }
 0x28a   : > { %15593 = vst [vmem:[#allocation49_spill] sm:$0xff] %v10577_v29  ;;  %v1087_v29 = vpack.i.b16 %v1010_v49, %v982_v8  ;;  %v10603_v7 = vunpack.c.l.b16 %v1081_v41  ;;  %v1072_v6 = vpack.i.b16 %v1071_v46, %v1070_v22  ;;  %v1008_v12 = vsel %vm425_vm2, 0, %v1007_v32  ;;  %v3421_v46 = vld [vmem:[#allocation2 + $0x48] sm:$0xe] }
 0x28b   : > { %15594 = vst [vmem:[#allocation50_spill] sm:$0xff] %v10595_v18  ;;  %v15596_v23 = vsel %vm9958_vm6, %v10216_v30, %v10218_v37  ;;  %v1131_v48 = vunpack.c.l.b16 %v1084_v62  ;;  %v10614_v28 = vsel %vm425_vm2, 0, %v1065_v34  ;;  %v1076_v52 = vshrl.u32 %v980_v11, 16  ;;  %v3425_v30 = vld [vmem:[#allocation2 + $0x58] sm:$0xf] }
 0x28c   : > { %15597 = vst [vmem:[#allocation51_spill] sm:$0xff] %v10614_v28  ;;  %v1089_v60 = vshrl.u32 %v1010_v49, 16  ;;  %v10618_v22 = vunpack.c.l.b16 %v1087_v29  ;;  %v1143_v32 = vunpack.c.l.b16 %v1096_v47  ;;  %v1111_v61 = vpack.i.b16 %v10614_v28, %v10595_v18 }
 0x28d   : > { %3110 = vrot.lane.b32.xlu2 %v15595_v55, %s9454_s22  ;;  %v1077_v27 = vshrl.u32 %v1008_v12, 16  ;;  %v1075_v36 = vpack.i.b16 %v1008_v12, %v980_v11  ;;  %v10634_v29 = vpack.c.b16 %v1159_v63, %v1159_v63  ;;  %v1115_v8 = vunpack.c.l.b16 %v1072_v6  ;;  %v10638_v55 = vld [vmem:[#allocation2 + $0x4c] sm:$0xf] }
 0x28e   : > { %2607 = vrot.lane.b32.xlu0 %v2536_v35, %s9453_s21  ;;  %3108 = vrot.lane.b32.xlu1 %v15596_v23, %s9454_s22  ;;  %v1099_v35 = vpack.i.b16 %v10585_v25, %v10592_v58  ;;  %v1090_v47 = vpack.i.b16 %v1089_v60, %v1088_v33  ;;  %v10640_v23 = vpack.c.b16 %v1131_v48, %v1131_v48  ;;  %v9162_v50 = vrot.slane %v3424_v4, 9  ;;  %v1902_v60 = vld [vmem:[#allocation2 + $0x54] sm:$0xf] }
 0x28f   : > { %v10616_v41 = vpop.permute.xlu2 %3911  ;;  %v1078_v38 = vpack.i.b16 %v1077_v27, %v1076_v52  ;;  %v3505_v49 = vrot.slane %v3425_v30, 5  ;;  %v10644_v33 = vpack.c.b16 %v1143_v32, %v1143_v32  ;;  %v10648_v12 = vunpack.c.l.b16 %v1111_v61  ;;  %v3405_v52 = vld [vmem:[#allocation2 + $0x8] sm:$0x1]  ;;  %v15604_v61 = vld [vmem:[#allocation33_spill] sm:$0xff] }
 0x290   : > { %15598 = vst [vmem:[#allocation52_spill] sm:$0xff] %v10616_v41  ;;  %v10624_v37 = vpop.permute.xlu1 %1602  ;;  %v10626_v62 = vpop.permute.xlu0 %1594  ;;  %v1881_v41 = vld [vmem:[#allocation2] sm:$0xf]  ;;  %v10646_v63 = vunpack.c.l.b16 %v1099_v35  ;;  %v10650_v6 = vunpack.c.l.b16 %v1075_v36  ;;  %v1139_v59 = vunpack.c.l.b16 %v1090_v47  ;;  %v9161_v34 = vrot.slane %v3421_v46, 9  ;;  %v3408_v35 = vld [vmem:[#allocation2 + $0x14] sm:$0x1] }
 0x291   : > { %15599 = vst [vmem:[#allocation53_spill] sm:$0xff] %v10624_v37  ;;  %v15603_v4 = vsel %vm9958_vm6, %v10309_v54, %v10220_v3  ;;  %v10659_v32 = vpack.c.b16 %v1115_v8, %v1115_v8  ;;  %v15605_v30 = vrot.slane %v15604_v61, 5  ;;  %v1909_v36 = vshrl.u32 %v1881_v41, 16  ;;  %v15606_v47 = vld [vmem:[#allocation27_spill] sm:$0xff]  ;;  %v15607_v46 = vld [vmem:[#allocation22_spill] sm:$0xff]  ;;  %v15610_v54 = vld [vmem:[#allocation28_spill] sm:$0xff] }
 0x292   : > { %15600 = vst [vmem:[#allocation54_spill] sm:$0xff] %v10626_v62  ;;  %v1912_v11 = vshll.u32 %v1881_v41, 16  ;;  %v15608_v48 = vsel %vm9958_vm6, %v15606_v47, %v15607_v46  ;;  %v15609_v3 = vld [vmem:[#allocation34_spill] sm:$0xff]  ;;  %v3506_v61 = vsel %vm9890_vm15, %v9162_v50, %v3505_v49  ;;  %v2080_v41 = vshll.u32 %v1902_v60, 16 }
 0x293   : > { %15601 = vst [vmem:[#allocation55_spill] sm:$0xff] %v10648_v12  ;;  %v3458_v27 = vrot.slane %v15605_v30, 4  ;;  %v15611_v8 = vsel %vm9958_vm6, %v15609_v3, %v15610_v54  ;;  %v2077_v30 = vshrl.u32 %v1902_v60, 16  ;;  %v15613_v47 = vrot.slane %v10502_v16, 5  ;;  %v10689_v3 = vld [vmem:[#allocation2 + $0x20] sm:$0x1] }
 0x294   : > { %15602 = vst [vmem:[#allocation56_spill] sm:$0xff] %v10650_v6  ;;  %v15614_v46 = vrot.slane %v10478_v51, 9  ;;  %v3426_v50 = vld [vmem:[#allocation2 + $0x5c] sm:$0x1]  ;;  %v3459_v54 = vrot.slane %v3405_v52, 5  ;;  %v3560_v52 = vrot.slane %v3506_v61, 4 }
 0x295   : > { %3116 = vrot.lane.b32.xlu2 %v15603_v4, %s9454_s22  ;;  %v1123_v4 = vunpack.c.l.b16 %v1078_v38  ;;  %v1911_v12 = vrot.slane %v1909_v36, 4  ;;  %v1914_v37 = vrot.slane %v1912_v11, 5  ;;  %v10713_v6 = vld [vmem:[#allocation2 + $0x58] sm:$0xf]  ;;  %v2079_v28 = vrot.slane %v2077_v30, 4 }
 0x296   : > { %3106 = vrot.lane.b32.xlu0 %v15608_v48, %s9454_s22  ;;  %3114 = vrot.lane.b32.xlu1 %v15611_v8, %s9454_s22  ;;  %v3492_v38 = vsel %vm9890_vm15, %v15614_v46, %v15613_v47  ;;  %v15618_v48 = vrot.slane %v10638_v55, 5  ;;  %v10705_v47 = vld [vmem:[#allocation2 + $0x38] sm:$0x1]  ;;  %v3466_v46 = vrot.slane %v3408_v35, 5  ;;  %15620 = vst [vmem:[#allocation57_spill] sm:$0xff] %v10713_v6  ;;  %v15621_v35 = vrot.slane %v10297_v26, 5 }
 0x297   : > { %v10677_v62 = vpop.permute.xlu2 %3887  ;;  %v3473_v18 = vrot.slane %v10689_v3, 5  ;;  %v3526_v36 = vrot.slane %v10527_v21, 4  ;;  %v3554_v11 = vrot.slane %v3492_v38, 4  ;;  %v2086_v3 = vshll.u32 %v10713_v6, 16  ;;  %v15623_v21 = vld [vmem:[#allocation29_spill] sm:$0xff]  ;;  %v15624_v38 = vld [vmem:[#allocation26_spill] sm:$0xff] }
 0x298   : > { %15612 = vst [vmem:[#allocation33_spill] sm:$0xff] %v10677_v62  ;;  %v10691_v60 = vpop.permute.xlu1 %3891  ;;  %v10693_v8 = vpop.permute.xlu0 %1600  ;;  %v10697_v62 = vpack.c.b16 %v1139_v59, %v1139_v59  ;;  %v3499_v51 = vsel %vm9890_vm15, %v9161_v34, %v15618_v48  ;;  %v10711_v59 = vpack.c.b16 %v1123_v4, %v1123_v4  ;;  %v2082_v34 = vrot.slane %v2080_v41, 5  ;;  %v10721_v4 = vld [vmem:[#allocation2 + $0x44] sm:$0x1]  ;;  %v1887_v30 = vld [vmem:[#allocation2 + $0x18] sm:$0xf] }
 0x299   : > { %15615 = vst [vmem:[#allocation27_spill] sm:$0xff] %v10691_v60  ;;  %v10709_v60 = vsel %vm9890_vm15, %v3458_v27, %v3459_v54  ;;  %v3561_v48 = vsel %vm425_vm2, %v3560_v52, %v10452_v39  ;;  %v3465_v61 = vrot.slane %v15621_v35, 4  ;;  %v3508_v27 = vrot.slane %v3426_v50, 5  ;;  %v1884_v54 = vld [vmem:[#allocation2 + $0xc] sm:$0xf] }
 0x29a   : > { %15616 = vst [vmem:[#allocation22_spill] sm:$0xff] %v10693_v8  ;;  %v1882_v8 = vld [vmem:[#allocation2 + $0x4] sm:$0xf]  ;;  %v15622_v39 = vsel %vm9958_vm6, %v10485_v19, %v10426_v14  ;;  %v1915_v41 = vor.u32 %v1914_v37, %v1911_v12  ;;  %v15625_v50 = vsel %vm9958_vm6, %v15623_v21, %v15624_v38  ;;  %v15626_v14 = vsel %vm9958_vm6, %v10383_v40, %v10226_v42  ;;  %v1883_v40 = vld [vmem:[#allocation2 + $0x8] sm:$0x1] }
 0x29b   : > { %15617 = vst [vmem:[#allocation34_spill] sm:$0xff] %v10697_v62  ;;  %v3507_v62 = vrot.slane %v3505_v49, 4  ;;  %v1918_v49 = vshll.u32 %v1882_v8, 16  ;;  %v1933_v37 = vshrl.u32 %v1884_v54, 16  ;;  %v1936_v12 = vshll.u32 %v1884_v54, 16 }
 0x29c   : > { %15619 = vst [vmem:[#allocation28_spill] sm:$0xff] %v10711_v59  ;;  %v1922_v59 = vshrl.u32 %v1882_v8, 16  ;;  %v2083_v8 = vor.u32 %v2082_v34, %v2079_v28  ;;  %v3532_v35 = vrot.slane %v3499_v51, 4  ;;  %v10755_v21 = vsel %vm9890_vm15, %v3465_v61, %v3466_v46  ;;  %v15631_v34 = vld [vmem:[#allocation39_spill] sm:$0xff]  ;;  %v1885_v54 = vld [vmem:[#allocation2 + $0x10] sm:$0xf] }
 0x29d   : > { %3122 = vrot.lane.b32.xlu2 %v15622_v39, %s9454_s22  ;;  %v10746_v19 = vsel %vm9890_vm15, %v3507_v62, %v3508_v27  ;;  %v10751_v39 = vperm.slane %v3561_v48, %v9548_v56  ;;  %v15630_v27 = vld [vmem:[#allocation38_spill] sm:$0xff]  ;;  %v3555_v51 = vsel %vm425_vm2, %v3554_v11, %v15631_v34  ;;  %v10766_v48 = vrot.slane %v1918_v49, 5 }
 0x29e   : > { %3112 = vrot.lane.b32.xlu0 %v15625_v50, %s9454_s22  ;;  %3120 = vrot.lane.b32.xlu1 %v15626_v14, %s9454_s22  ;;  %v3527_v28 = vsel %vm425_vm2, %v3526_v36, %v15630_v27  ;;  %v1886_v50 = vld [vmem:[#allocation2 + $0x14] sm:$0x1]  ;;  %v1924_v14 = vrot.slane %v1922_v59, 4  ;;  %v15632_v46 = vrot.slane %v10332_v20, 5  ;;  %v10771_v26 = vrot.slane %v1915_v41, 4 }
 0x29f   : > { %v10748_v52 = vpop.permute.xlu2 %3899  ;;  %v1938_v36 = vrot.slane %v1936_v12, 5  ;;  %v2084_v27 = vrot.slane %v2083_v8, 4  ;;  %v1928_v11 = vshll.u32 %v1883_v40, 16  ;;  %v10778_v49 = vperm.slane %v3527_v28, %v9548_v56  ;;  %v10785_v41 = vld [vmem:[#allocation2 + $0x50] sm:$0x1] }
 0x2a0   : > { %15627 = vst [vmem:[#allocation29_spill] sm:$0xff] %v10748_v52  ;;  %v10758_v38 = vpop.permute.xlu1 %3903  ;;  %v10760_v62 = vpop.permute.xlu0 %1606  ;;  %v3472_v61 = vrot.slane %v15632_v46, 4  ;;  %v10773_v52 = vrot.slane %v2086_v3, 5  ;;  %v3533_v20 = vsel %vm425_vm2, %v3532_v35, %v10438_v5  ;;  %v10783_v59 = vperm.slane %v3555_v51, %v9548_v56 }
 0x2a1   : > { %15628 = vst [vmem:[#allocation26_spill] sm:$0xff] %v10758_v38  ;;  %v1935_v38 = vrot.slane %v1933_v37, 4  ;;  %v1942_v34 = vshll.u32 %v1885_v54, 16  ;;  %v1957_v3 = vshrl.u32 %v1887_v30, 16  ;;  %v1960_v46 = vshll.u32 %v1887_v30, 16 }
 0x2a2   : > { %15629 = vst [vmem:[#allocation58_spill] sm:$0xff] %v10760_v62  ;;  %v10775_v62 = vld [vmem:[#allocation2 + $0x20] sm:$0x1]  ;;  %v1925_v37 = vor.u32 %v1924_v14, %v10766_v48  ;;  %v1946_v12 = vshrl.u32 %v1885_v54, 16  ;;  %v15634_v8 = vsel %vm9958_vm6, %v10548_v2, %v10351_v45  ;;  %v10796_v5 = vsel %vm9890_vm15, %v3472_v61, %v3473_v18  ;;  %v1890_v18 = vld [vmem:[#allocation2 + $0x24] sm:$0xf] }
 0x2a3   : > { %15633 = vst [vmem:[#allocation38_spill] sm:$0xff] %v10773_v52  ;;  %v1952_v30 = vshll.u32 %v1886_v50, 16  ;;  %v1976_v40 = vshll.u32 %v10775_v62, 16  ;;  %v15635_v28 = vsel %vm9958_vm6, %v10400_v10, %v10301_v13  ;;  %v15636_v45 = vsel %vm9958_vm6, %v10508_v24, %v10460_v15  ;;  %v1888_v24 = vld [vmem:[#allocation2 + $0x1c] sm:$0xf] }
 0x2a4   : > { %v10816_v2 = vperm.slane %v3533_v20, %v9548_v56  ;;  %v1939_v51 = vor.u32 %v1938_v36, %v1935_v38  ;;  %v2089_v62 = vsel %vm9958_vm6, %v2084_v27, %v10773_v52  ;;  %v10821_v54 = vrot.slane %v1928_v11, 5 }
 0x2a5   : > { %3128 = vrot.lane.b32.xlu2 %v15634_v8, %s9454_s22  ;;  %v3540_v10 = vrot.slane %v10778_v49, 4  ;;  %v3568_v50 = vrot.slane %v10783_v59, 4  ;;  %v3501_v15 = vrot.slane %v10785_v41, 5  ;;  %v10828_v14 = vrot.slane %v1942_v34, 5  ;;  %v1893_v8 = vld [vmem:[#allocation2 + $0x30] sm:$0xf] }
 0x2a6   : > { %3118 = vrot.lane.b32.xlu0 %v15635_v28, %s9454_s22  ;;  %3126 = vrot.lane.b32.xlu1 %v15636_v45, %s9454_s22  ;;  %v1959_v36 = vrot.slane %v1957_v3, 4  ;;  %v1962_v20 = vrot.slane %v1960_v46, 5  ;;  %v10834_v27 = vrot.slane %v1925_v37, 4  ;;  %v1948_v11 = vrot.slane %v1946_v12, 4 }
 0x2a7   : > { %v10823_v13 = vpop.permute.xlu2 %3893  ;;  %v1981_v28 = vshrl.u32 %v1890_v18, 16  ;;  %v1984_v45 = vshll.u32 %v1890_v18, 16  ;;  %v10836_v35 = vrot.slane %v2089_v62, 4  ;;  %v10838_v42 = vrot.slane %v1952_v30, 5 }
 0x2a8   : > { %15637 = vst [vmem:[#allocation39_spill] sm:$0xff] %v10823_v13  ;;  %v10830_v61 = vpop.permute.xlu1 %3885  ;;  %v10832_v38 = vpop.permute.xlu0 %3883  ;;  %v3541_v34 = vsel %vm425_vm2, %v10816_v2, %v3540_v10  ;;  %v15640_v41 = vrot.slane %v10386_v17, 5  ;;  %v1966_v3 = vshll.u32 %v1888_v24, 16  ;;  %v3569_v46 = vsel %vm425_vm2, %v10751_v39, %v3568_v50 }
 0x2a9   : > { %15638 = vst [vmem:[#allocation59_spill] sm:$0xff] %v10830_v61  ;;  %v10844_v61 = vrot.slane %v1939_v51, 4  ;;  %v15641_v37 = vrot.slane %v10445_v31, 5  ;;  %v15642_v18 = vrot.slane %v10502_v16, 5  ;;  %v1970_v30 = vshrl.u32 %v1888_v24, 16 }
 0x2aa   : > { %15639 = vst [vmem:[#allocation60_spill] sm:$0xff] %v10832_v38  ;;  %v3479_v52 = vrot.slane %v15640_v41, 4  ;;  %v1963_v38 = vor.u32 %v1962_v20, %v1959_v36  ;;  %v2005_v13 = vshrl.u32 %v1893_v8, 16  ;;  %v2008_v6 = vshll.u32 %v1893_v8, 16 }
 0x2ab   : > { %v3486_v12 = vrot.slane %v15641_v37, 4  ;;  %v3493_v62 = vrot.slane %v15642_v18, 4  ;;  %v1949_v10 = vor.u32 %v1948_v11, %v10828_v14  ;;  %v10856_v17 = vperm.slane %v3541_v34, %v15580_v9 }
 0x2ac   : > { %v15643_v51 = vrot.slane %v10638_v55, 5  ;;  %v1983_v31 = vrot.slane %v1981_v28, 4  ;;  %v1986_v41 = vrot.slane %v1984_v45, 5  ;;  %v15644_v16 = vsel %vm9958_vm6, %v10496_v53, %v10303_v57 }
 0x2ad   : > { %1161 = vrot.lane.b32.xlu2 %v10634_v29, %s9444_s14  ;;  %v15645_v24 = vpack.c.b16 %v10589_v0, %v10589_v0  ;;  %v15646_v29 = vrot.slane %v10703_v43, 5  ;;  %v10878_v20 = vrot.slane %v1966_v3, 5  ;;  %v10887_v0 = vperm.slane %v3569_v46, %v15580_v9  ;;  %v10901_v3 = vld [vmem:[#allocation2 + $0x28] sm:$0xf] }
 0x2ae   : > { %v3500_v50 = vrot.slane %v15643_v51, 4  ;;  %3124 = vrot.lane.b32.xlu0 %v15644_v16, %s9454_s22  ;;  %v15647_v43 = vrot.slane %v10705_v47, 5  ;;  %v15648_v11 = vrot.slane %v10721_v4, 5  ;;  %v1972_v28 = vrot.slane %v1970_v30, 4  ;;  %v1896_v51 = vld [vmem:[#allocation2 + $0x3c] sm:$0xf] }
 0x2af   : > { %1157 = vrot.lane.b32.xlu1 %v15645_v24, %s9446_s16  ;;  %v3481_v55 = vsel %vm9890_vm15, %v3479_v52, %v15646_v29  ;;  %v10884_v53 = vpop.permute.xlu2 %3905  ;;  %v2007_v37 = vrot.slane %v2005_v13, 4  ;;  %v2010_v46 = vrot.slane %v2008_v6, 5  ;;  %v10903_v18 = vrot.slane %v1949_v10, 4  ;;  %v10917_v10 = vld [vmem:[#allocation2 + $0x34] sm:$0xf] }
 0x2b0   : > { %v3488_v52 = vsel %vm9890_vm15, %v3486_v12, %v15647_v43  ;;  %v3495_v8 = vsel %vm9890_vm15, %v3493_v62, %v15648_v11  ;;  %v10897_v45 = vpop.permute.xlu1 %3897  ;;  %v10899_v34 = vpop.permute.xlu0 %3895  ;;  %v10905_v47 = vrot.slane %v1976_v40, 5  ;;  %v3653_v12 = vshrl.u32 %v10856_v17, 16 }
 0x2b1   : > { %v3502_v4 = vsel %vm9890_vm15, %v3500_v50, %v3501_v15  ;;  %v10910_v62 = vrot.slane %v1963_v38, 4  ;;  %v1987_v30 = vor.u32 %v1986_v41, %v1983_v31  ;;  %v1100_v16 = vshrl.u32 %v10592_v58, 16 }
 0x2b2   : > { %v1101_v24 = vshrl.u32 %v10585_v25, 16  ;;  %v3582_v29 = vrot.slane %v3488_v52, 4  ;;  %v3610_v13 = vrot.slane %v3495_v8, 4  ;;  %v3654_v6 = vshrl.u32 %v10887_v0, 16  ;;  %v15656_v52 = vld [vmem:[#allocation50_spill] sm:$0xff] }
 0x2b3   : > { %v3652_v40 = vpack.i.b16 %v10887_v0, %v10856_v17  ;;  %v1990_v43 = vshll.u32 %v10901_v3, 16  ;;  %v1973_v15 = vor.u32 %v1972_v28, %v10878_v20  ;;  %v3588_v38 = vrot.slane %v3502_v4, 4 }
 0x2b4   : > { %v2011_v50 = vor.u32 %v2010_v46, %v2007_v37  ;;  %v2029_v31 = vshrl.u32 %v1896_v51, 16  ;;  %v2032_v41 = vshll.u32 %v1896_v51, 16  ;;  %v15649_v25 = vpack.c.b16 %v10618_v22, %v10618_v22 }
 0x2b5   : > { %v3655_v58 = vpack.i.b16 %v3654_v6, %v3653_v12  ;;  %v1988_v11 = vrot.slane %v1987_v30, 4  ;;  %v15650_v22 = vpack.c.b16 %v10603_v7, %v10603_v7  ;;  %v1102_v28 = vpack.i.b16 %v1101_v24, %v1100_v16  ;;  %v10961_v24 = vld [vmem:[#allocation2 + $0x40] sm:$0xf] }
 0x2b6   : > { %1137 = vrot.lane.b32.xlu2 %v15649_v25, %s9447_s17  ;;  %v3583_v37 = vsel %vm425_vm2, %v3582_v29, %v10709_v60  ;;  %v3611_v46 = vsel %vm425_vm2, %v3610_v13, %v10755_v21  ;;  %v2014_v12 = vshll.u32 %v10917_v10, 16  ;;  %v10946_v51 = vunpack.c.l.b16 %v3652_v40 }
 0x2b7   : > { %1133 = vrot.lane.b32.xlu1 %v10640_v23, %s9444_s14  ;;  %1129 = vrot.lane.b32.xlu0 %v15650_v22, %s9446_s16  ;;  %v10944_v4 = vpop.permute.xlu2 %2587  ;;  %v15652_v23 = vrot.slane %v10746_v19, 4  ;;  %v10951_v6 = vrot.slane %v1990_v43, 5  ;;  %v10953_v7 = vrot.slane %v1973_v15, 4  ;;  %v3589_v21 = vsel %vm425_vm2, %v3588_v38, %v10796_v5  ;;  %v1899_v38 = vld [vmem:[#allocation2 + $0x48] sm:$0xf] }
 0x2b8   : > { %15651 = vst [vmem:[#allocation61_spill] sm:$0xff] %v10944_v4  ;;  %v10955_v16 = vpop.permute.xlu1 %3909  ;;  %v10957_v60 = vpop.permute.xlu0 %3907  ;;  %v2012_v29 = vrot.slane %v2011_v50, 4  ;;  %v2031_v13 = vrot.slane %v2029_v31, 4  ;;  %v2034_v40 = vrot.slane %v2032_v41, 5  ;;  %v10964_v19 = vperm.slane %v3583_v37, %v9548_v56 }
 0x2b9   : > { %v3617_v30 = vsel %vm425_vm2, %v15652_v23, %v3481_v55  ;;  %v3615_v55 = vperm.slane %v3611_v46, %v9548_v56  ;;  %v3566_v43 = vrot.slane %v10751_v39, 4  ;;  %v1993_v15 = vsel %vm9958_vm6, %v1988_v11, %v10951_v6 }
 0x2ba   : > { %v3702_v25 = vunpack.c.l.b16 %v3655_v58  ;;  %v1151_v22 = vunpack.c.l.b16 %v1102_v28  ;;  %v3621_v5 = vperm.slane %v3617_v30, %v9548_v56  ;;  %v10972_v23 = vrot.slane %v2014_v12, 5 }
 0x2bb   : > { %v10977_v31 = vperm.slane %v3589_v21, %v9548_v56  ;;  %v3567_v39 = vsel %vm425_vm2, %v3566_v43, %v10783_v59  ;;  %v2038_v41 = vshll.u32 %v10961_v24, 16  ;;  %v3538_v11 = vrot.slane %v10816_v2, 4 }
 0x2bc   : > { %v2017_v58 = vsel %vm9958_vm6, %v2012_v29, %v10972_v23  ;;  %v2035_v28 = vor.u32 %v2034_v40, %v2031_v13  ;;  %v2151_v37 = vsel %vm425_vm2, %v10836_v35, %v1993_v15  ;;  %v15653_v46 = vpack.c.b16 %v10646_v63, %v10646_v63 }
 0x2bd   : > { %v3596_v12 = vrot.slane %v10964_v19, 4  ;;  %v3624_v59 = vrot.slane %v3615_v55, 4  ;;  %v2053_v30 = vshrl.u32 %v1899_v38, 16  ;;  %v2056_v21 = vshll.u32 %v1899_v38, 16  ;;  %v11017_v38 = vld [vmem:[#allocation2 + $0x4c] sm:$0xf] }
 0x2be   : > { %1149 = vrot.lane.b32.xlu2 %v15653_v46, %s9449_s19  ;;  %v10997_v2 = vpack.c.b16 %v3702_v25, %v3702_v25  ;;  %v10999_v29 = vpack.c.b16 %v1151_v22, %v1151_v22  ;;  %v11002_v35 = vperm.slane %v3567_v39, %v15580_v9  ;;  %v3622_v63 = vrot.slane %v3621_v5, 4 }
 0x2bf   : > { %1145 = vrot.lane.b32.xlu1 %v10644_v33, %s9448_s18  ;;  %1117 = vrot.lane.b32.xlu0 %v10659_v32, %s9448_s18  ;;  %v11004_v13 = vpop.permute.xlu2 %2593  ;;  %v3597_v40 = vsel %vm425_vm2, %v10977_v31, %v3596_v12  ;;  %v11008_v43 = vrot.slane %v2038_v41, 5  ;;  %v2116_v15 = vrot.slane %v2017_v58, 4  ;;  %v11011_v33 = vperm.slane %v2151_v37, %v9548_v56 }
 0x2c0   : > { %15654 = vst [vmem:[#allocation62_spill] sm:$0xff] %v11002_v35  ;;  %v11013_v32 = vpop.permute.xlu1 %2615  ;;  %v3914_v25 = vpop.permute.xlu0 %3913  ;;  %v3539_v22 = vsel %vm425_vm2, %v3538_v11, %v10778_v49  ;;  %v11019_v39 = vrot.slane %v2035_v28, 4  ;;  %v3625_v37 = vsel %vm425_vm2, %v3621_v5, %v3624_v59  ;;  %v3623_v46 = vsel %vm425_vm2, %v3622_v63, %v3615_v55  ;;  %v15660_v63 = vld [vmem:[#allocation28_spill] sm:$0xff] }
 0x2c1   : > { %15655 = vst [vmem:[#allocation63_spill] sm:$0xff] %v11004_v13  ;;  %v2055_v12 = vrot.slane %v2053_v30, 4  ;;  %v2058_v8 = vrot.slane %v2056_v21, 5  ;;  %v11029_v57 = vperm.slane %v3597_v40, %v15580_v9  ;;  %v3552_v49 = vrot.slane %v10856_v17, 4  ;;  %v15661_v40 = vld [vmem:[#allocation51_spill] sm:$0xff] }
 0x2c2   : > { %v3580_v11 = vrot.slane %v10887_v0, 4  ;;  %v3578_v28 = vrot.slane %v11002_v35, 4  ;;  %v1112_v36 = vshrl.u32 %v15656_v52, 16  ;;  %v11036_v41 = vperm.slane %v3539_v22, %v15580_v9 }
 0x2c3   : > { %v2062_v5 = vshll.u32 %v11017_v38, 16  ;;  %v15658_v55 = vsel %vm9958_vm6, %v10771_v26, %v10766_v48  ;;  %v11048_v17 = vperm.slane %v3625_v37, %v15580_v9  ;;  %v3642_v0 = vshrl.u32 %v11002_v35, 16 }
 0x2c4   : > { %15657 = vst [vmem:[#allocation50_spill] sm:$0xff] %v11036_v41  ;;  %v11045_v59 = vsel %vm425_vm2, %v2116_v15, %v15658_v55  ;;  %v3594_v52 = vrot.slane %v10977_v31, 4  ;;  %v11053_v30 = vperm.slane %v3623_v46, %v15580_v9  ;;  %v4021_v21 = vrot.slane %v3914_v25, 4  ;;  %v15662_v15 = vld [vmem:[#allocation55_spill] sm:$0xff]  ;;  %v15664_v31 = vld [vmem:[#allocation56_spill] sm:$0xff] }
 0x2c5   : > { %v1113_v22 = vshrl.u32 %v15661_v40, 16  ;;  %v2041_v26 = vsel %vm9958_vm6, %v11019_v39, %v11008_v43  ;;  %v2059_v48 = vor.u32 %v2058_v8, %v2055_v12  ;;  %v15663_v37 = vpack.c.b16 %v15662_v15, %v15662_v15 }
 0x2c6   : > { %15659 = vst [vmem:[#allocation64_spill] sm:$0xff] %v11053_v30  ;;  %1125 = vrot.lane.b32.xlu2 %v15660_v63, %s9443_s13  ;;  %v15665_v25 = vpack.c.b16 %v15664_v31, %v15664_v31  ;;  %v11071_v46 = vsel %vm425_vm2, 0, %v3552_v49  ;;  %v11074_v55 = vsel %vm425_vm2, 0, %v3580_v11  ;;  %v11077_v63 = vsel %vm425_vm2, 0, %v3578_v28 }
 0x2c7   : > { %1165 = vrot.lane.b32.xlu0 %v15663_v37, %s9447_s17  ;;  %v3677_v8 = vshrl.u32 %v11029_v57, 16  ;;  %v4015_v39 = vrot.slane %v10884_v53, 4  ;;  %v11081_v12 = vpop.permute.xlu2 %2599  ;;  %v3676_v40 = vpack.i.b16 %v11048_v17, %v11029_v57  ;;  %v1114_v15 = vpack.i.b16 %v1113_v22, %v1112_v36 }
 0x2c8   : > { %1121 = vrot.lane.b32.xlu1 %v15665_v25, %s9449_s19  ;;  %v3550_v37 = vrot.slane %v11036_v41, 4  ;;  %v11086_v49 = vpop.permute.xlu1 %3132  ;;  %v3890_v31 = vpop.permute.xlu0 %3889  ;;  %v3678_v11 = vshrl.u32 %v11048_v17, 16  ;;  %v3595_v28 = vsel %vm425_vm2, %v3594_v52, %v10964_v19  ;;  %v3666_v25 = vshrl.u32 %v11053_v30, 16 }
 0x2c9   : > { %15666 = vst [vmem:[#allocation28_spill] sm:$0xff] %v11086_v49  ;;  %v2018_v53 = vshrl.u32 %v10917_v10, 16  ;;  %v4022_v58 = vsel %vm425_vm2, %v4021_v21, %v10897_v45  ;;  %v4016_v50 = vsel %vm425_vm2, %v4015_v39, %v3890_v31  ;;  %v3658_v36 = vpack.i.b16 %v11074_v55, %v11071_v46 }
 0x2ca   : > { %v2060_v22 = vrot.slane %v2059_v48, 4  ;;  %v11099_v44 = vperm.slane %v4016_v50, %v9548_v56  ;;  %v3641_v35 = vshrl.u32 %v11036_v41, 16  ;;  %v3679_v13 = vpack.i.b16 %v3678_v11, %v3677_v8 }
 0x2cb   : > { %v3726_v52 = vunpack.c.l.b16 %v3676_v40  ;;  %v1167_v4 = vunpack.c.l.b16 %v1114_v15  ;;  %v11104_v10 = vsel %vm425_vm2, 0, %v3550_v37  ;;  %v11106_v45 = vrot.slane %v2062_v5, 5  ;;  %v15670_v37 = vld [vmem:[#allocation34_spill] sm:$0xff] }
 0x2cc   : > { %15667 = vst [vmem:[#allocation51_spill] sm:$0xff] %v11099_v44  ;;  %v11109_v21 = vperm.slane %v4022_v58, %v9548_v56  ;;  %v4029_v48 = vrot.slane %v11099_v44, 4  ;;  %v11113_v50 = vperm.slane %v3595_v28, %v15580_v9  ;;  %v2020_v39 = vrot.slane %v2018_v53, 4 }
 0x2cd   : > { %v11117_v8 = vunpack.c.l.b16 %v3658_v36  ;;  %v2065_v40 = vsel %vm9958_vm6, %v2060_v22, %v11106_v45  ;;  %v2042_v5 = vshrl.u32 %v10961_v24, 16  ;;  %v2066_v58 = vshrl.u32 %v11017_v38, 16 }
 0x2ce   : > { %15668 = vst [vmem:[#allocation55_spill] sm:$0xff] %v11113_v50  ;;  %3704 = vrot.lane.b32.xlu2 %v10997_v2, %s9444_s14  ;;  %v11126_v15 = vsel %vm425_vm2, %v11109_v21, %v4029_v48  ;;  %v15671_v2 = vpack.c.b16 %v10946_v51, %v10946_v51  ;;  %v3646_v31 = vpack.i.b16 %v11077_v63, %v11104_v10  ;;  %v3730_v24 = vunpack.c.l.b16 %v3679_v13 }
 0x2cf   : > { %15669 = vst [vmem:[#allocation56_spill] sm:$0xff] %v11126_v15  ;;  %1141 = vrot.lane.b32.xlu0 %v15670_v37, %s9445_s15  ;;  %v11136_v11 = vpack.i.b16 %v3642_v0, %v3641_v35  ;;  %v3993_v38 = vrot.slane %v10955_v16, 4  ;;  %v11139_v28 = vpop.permute.xlu2 %2605  ;;  %v3727_v53 = vpack.c.b16 %v3726_v52, %v3726_v52  ;;  %v2144_v22 = vrot.slane %v2041_v26, 4  ;;  %v1895_v15 = vld [vmem:[#allocation2 + $0x38] sm:$0x1]  ;;  %v15674_v16 = vld [vmem:[#allocation57_spill] sm:$0xff] }
 0x2d0   : > { %3700 = vrot.lane.b32.xlu1 %v15671_v2, %s9446_s16  ;;  %15672 = vst [vmem:[#allocation34_spill] sm:$0xff] %v11139_v28  ;;  %v11142_v48 = vpop.permute.xlu1 %2585  ;;  %v3902_v37 = vpop.permute.xlu0 %3901  ;;  %v1168_v19 = vpack.c.b16 %v1167_v4, %v1167_v4  ;;  %v3665_v51 = vshrl.u32 %v11113_v50, 16  ;;  %v2122_v2 = vrot.slane %v2065_v40, 4  ;;  %v2021_v35 = vor.u32 %v2020_v39, %v10972_v23  ;;  %v15675_v4 = vld [vmem:[#allocation39_spill] sm:$0xff] }
 0x2d1   : > { %15673 = vst [vmem:[#allocation65_spill] sm:$0xff] %v11142_v48  ;;  %v3987_v0 = vrot.slane %v3902_v37, 4  ;;  %v2044_v13 = vrot.slane %v2042_v5, 4  ;;  %v2068_v41 = vrot.slane %v2066_v58, 4  ;;  %v2090_v44 = vshrl.u32 %v15674_v16, 16  ;;  %v15676_v40 = vld [vmem:[#allocation59_spill] sm:$0xff] }
 0x2d2   : > { %v3707_v52 = vpack.c.b16 %v11117_v8, %v11117_v8  ;;  %v3690_v36 = vunpack.c.l.b16 %v3646_v31  ;;  %v3686_v26 = vunpack.c.l.b16 %v11136_v11  ;;  %v11150_v48 = vpack.c.b16 %v3730_v24, %v3730_v24  ;;  %v1901_v37 = vld [vmem:[#allocation2 + $0x50] sm:$0x1]  ;;  %v15682_v16 = vld [vmem:[#allocation38_spill] sm:$0xff] }
 0x2d3   : > { %v3994_v49 = vsel %vm425_vm2, %v3993_v38, %v15675_v4  ;;  %v3988_v28 = vsel %vm425_vm2, %v3987_v0, %v15676_v40  ;;  %v15677_v23 = vsel %vm9958_vm6, %v10844_v61, %v10828_v14  ;;  %v2024_v5 = vshll.u32 %v1895_v15, 16  ;;  %v1898_v38 = vld [vmem:[#allocation2 + $0x44] sm:$0x1] }
 0x2d4   : > { %v2145_v39 = vsel %vm425_vm2, %v2144_v22, %v15677_v23  ;;  %v11163_v8 = vperm.slane %v3988_v28, %v9548_v56  ;;  %v3667_v58 = vpack.i.b16 %v3666_v25, %v3665_v51  ;;  %v3659_v31 = vshrl.u32 %v11071_v46, 16 }
 0x2d5   : > { %v15678_v11 = vsel %vm9958_vm6, %v10910_v62, %v10878_v20  ;;  %v2022_v14 = vrot.slane %v2021_v35, 4  ;;  %v2045_v61 = vor.u32 %v2044_v13, %v11008_v43  ;;  %v2069_v15 = vor.u32 %v2068_v41, %v11106_v45  ;;  %v1904_v35 = vld [vmem:[#allocation2 + $0x5c] sm:$0x1] }
 0x2d6   : > { %v2123_v24 = vsel %vm425_vm2, %v2122_v2, %v15678_v11  ;;  %3728 = vrot.lane.b32.xlu2 %v3727_v53, %s9446_s16  ;;  %v2092_v28 = vrot.slane %v2090_v44, 4  ;;  %v11176_v25 = vperm.slane %v3994_v49, %v9548_v56  ;;  %v4001_v46 = vrot.slane %v11163_v8, 4 }
 0x2d7   : > { %1153 = vrot.lane.b32.xlu0 %v10999_v29, %s9443_s13  ;;  %v11184_v20 = vperm.slane %v11045_v59, %v9548_v56  ;;  %v11187_v62 = vperm.slane %v2145_v39, %v9548_v56  ;;  %v11189_v43 = vpop.permute.xlu2 %2611  ;;  %v15679_v44 = vshrl.u32 %v10901_v3, 16  ;;  %v2026_v49 = vrot.slane %v2024_v5, 5 }
 0x2d8   : > { %1169 = vrot.lane.b32.xlu1 %v1168_v19, %s9445_s15  ;;  %v2048_v45 = vshll.u32 %v1898_v38, 16  ;;  %v2072_v53 = vshll.u32 %v1901_v37, 16  ;;  %v11195_v29 = vsel %vm425_vm2, %v11176_v25, %v4001_v46  ;;  %v11197_v19 = vpop.permute.xlu1 %2591  ;;  %v11199_v22 = vpop.permute.xlu0 %2613  ;;  %v3691_v59 = vpack.c.b16 %v3690_v36, %v3690_v36 }
 0x2d9   : > { %v1996_v41 = vrot.slane %v15679_v44, 4  ;;  %15680 = vst [vmem:[#allocation57_spill] sm:$0xff] %v11195_v29  ;;  %v3647_v51 = vshrl.u32 %v11104_v10, 16  ;;  %v11203_v2 = vperm.slane %v2123_v24, %v9548_v56  ;;  %v2027_v3 = vsel %vm9958_vm6, %v2022_v14, %v2026_v49  ;;  %v1892_v10 = vld [vmem:[#allocation2 + $0x2c] sm:$0x1] }
 0x2da   : > { %15681 = vst [vmem:[#allocation39_spill] sm:$0xff] %v11197_v19  ;;  %v2046_v0 = vrot.slane %v2045_v61, 4  ;;  %v2070_v13 = vrot.slane %v2069_v15, 4  ;;  %v2093_v4 = vor.u32 %v2092_v28, %v15682_v16  ;;  %v3714_v40 = vunpack.c.l.b16 %v3667_v58 }
 0x2db   : > { %v15683_v23 = vshrl.u32 %v11074_v55, 16  ;;  %v2130_v5 = vrot.slane %v11184_v20, 4  ;;  %v2158_v36 = vrot.slane %v11187_v62, 4  ;;  %v1997_v11 = vor.u32 %v1996_v41, %v10951_v6 }
 0x2dc   : > { %v2050_v24 = vrot.slane %v2048_v45, 5  ;;  %v2074_v38 = vrot.slane %v2072_v53, 5  ;;  %v2096_v37 = vshll.u32 %v1904_v35, 16  ;;  %v3687_v46 = vpack.c.b16 %v3686_v26, %v3686_v26 }
 0x2dd   : > { %v3661_v39 = vpack.i.b16 %v15683_v23, %v3659_v31  ;;  %v2131_v14 = vsel %vm425_vm2, %v11203_v2, %v2130_v5  ;;  %v3608_v61 = vrot.slane %v11029_v57, 4  ;;  %v2172_v58 = vrot.slane %v2027_v3, 4 }
 0x2de   : > { %3692 = vrot.lane.b32.xlu2 %v3691_v59, %s9449_s19  ;;  %v2000_v55 = vshll.u32 %v1892_v10, 16  ;;  %v2051_v31 = vsel %vm9958_vm6, %v2046_v0, %v2050_v24  ;;  %v2075_v15 = vsel %vm9958_vm6, %v2070_v13, %v2074_v38  ;;  %v2094_v6 = vrot.slane %v2093_v4, 4 }
 0x2df   : > { %3708 = vrot.lane.b32.xlu0 %v3707_v52, %s9447_s17  ;;  %v3710_v26 = vunpack.c.l.b16 %v3661_v39  ;;  %v15684_v28 = vshrl.u32 %v11077_v63, 16  ;;  %v2159_v57 = vsel %vm425_vm2, %v11011_v33, %v2158_v36  ;;  %v3636_v41 = vrot.slane %v11048_v17, 4  ;;  %v11228_v49 = vpop.permute.xlu2 %3104 }
 0x2e0   : > { %3688 = vrot.lane.b32.xlu1 %v3687_v46, %s9448_s18  ;;  %15685 = vst [vmem:[#allocation59_spill] sm:$0xff] %v11228_v49  ;;  %v3715_v45 = vpack.c.b16 %v3714_v40, %v3714_v40  ;;  %v11231_v53 = vperm.slane %v2131_v14, %v15580_v9  ;;  %v1998_v59 = vrot.slane %v1997_v11, 4  ;;  %v2098_v35 = vrot.slane %v2096_v37, 5  ;;  %v11233_v52 = vpop.permute.xlu1 %2597  ;;  %v11235_v3 = vpop.permute.xlu0 %3130 }
 0x2e1   : > { %v3649_v44 = vpack.i.b16 %v15684_v28, %v3647_v51  ;;  %15686 = vst [vmem:[#allocation38_spill] sm:$0xff] %v11235_v3  ;;  %v3609_v63 = vsel %vm425_vm2, 0, %v3608_v61  ;;  %v15687_v51 = vsel %vm9958_vm6, %v10834_v27, %v10821_v54  ;;  %v2178_v0 = vrot.slane %v2075_v15, 4 }
 0x2e2   : > { %v2173_v17 = vsel %vm425_vm2, %v2172_v58, %v15687_v51  ;;  %v2200_v13 = vrot.slane %v2051_v31, 4  ;;  %v11245_v16 = vperm.slane %v2159_v57, %v15580_v9  ;;  %v3606_v4 = vrot.slane %v11113_v50, 4  ;;  %v15717_v50 = vld [vmem:[#allocation36_spill] sm:$0xff] }
 0x2e3   : > { %v2002_v40 = vrot.slane %v2000_v55, 5  ;;  %v2099_v23 = vsel %vm9958_vm6, %v2094_v6, %v2098_v35  ;;  %v3637_v39 = vsel %vm425_vm2, 0, %v3636_v41  ;;  %v3634_v5 = vrot.slane %v11053_v30, 4 }
 0x2e4   : > { %v15688_v54 = vsel %vm9958_vm6, %v10953_v7, %v10905_v47  ;;  %v15689_v36 = vsel %vm9958_vm6, %v10903_v18, %v10838_v42  ;;  %v2242_v11 = vpack.i.b16 %v11245_v16, %v11231_v53  ;;  %v11269_v38 = vperm.slane %v2173_v17, %v9548_v56 }
 0x2e5   : > { %v2179_v27 = vsel %vm425_vm2, %v2178_v0, %v15688_v54  ;;  %v2201_v10 = vsel %vm425_vm2, %v2200_v13, %v15689_v36  ;;  %v2003_v24 = vsel %vm9958_vm6, %v1998_v59, %v2002_v40  ;;  %v3711_v7 = vpack.c.b16 %v3710_v26, %v3710_v26 }
 0x2e6   : > { %v11272_v47 = vperm.slane %v2201_v10, %v9548_v56  ;;  %v3682_v37 = vpack.i.b16 %v3637_v39, %v3609_v63  ;;  %v2206_v46 = vrot.slane %v2099_v23, 4  ;;  %v2128_v14 = vrot.slane %v11203_v2, 4  ;;  %3716 = vrot.lane.b32.xlu2 %v3715_v45, %s9448_s18 }
 0x2e7   : > { %v3607_v42 = vsel %vm425_vm2, 0, %v3606_v4  ;;  %v11278_v18 = vperm.slane %v2179_v27, %v9548_v56  ;;  %3732 = vrot.lane.b32.xlu0 %v11150_v48, %s9444_s14  ;;  %v3694_v61 = vunpack.c.l.b16 %v3649_v44  ;;  %v3635_v58 = vsel %vm425_vm2, 0, %v3634_v5  ;;  %v11285_v31 = vpop.permute.xlu2 %3110  ;;  %v15693_v27 = vld [vmem:[#allocation21_spill] sm:$0xff] }
 0x2e8   : > { %3712 = vrot.lane.b32.xlu1 %v3711_v7, %s9445_s15  ;;  %v2207_v55 = vsel %vm425_vm2, %v2206_v46, %v2003_v24  ;;  %15690 = vst [vmem:[#allocation66_spill] sm:$0xff] %v11285_v31  ;;  %v2288_v2 = vunpack.c.l.b16 %v2242_v11  ;;  %v3683_v15 = vshrl.u32 %v3609_v63, 16  ;;  %v2186_v6 = vrot.slane %v11269_v38, 4  ;;  %v11289_v28 = vpop.permute.xlu1 %2603  ;;  %v11291_v57 = vpop.permute.xlu0 %2589  ;;  %v15727_v31 = vld [vmem:[#allocation54_spill] sm:$0xff] }
 0x2e9   : > { %v2214_v26 = vrot.slane %v11272_v47, 4  ;;  %v3734_v48 = vunpack.c.l.b16 %v3682_v37  ;;  %v3671_v41 = vshrl.u32 %v3607_v42, 16  ;;  %v2129_v44 = vsel %vm425_vm2, %v2128_v14, %v11184_v20 }
 0x2ea   : > { %v2156_v45 = vrot.slane %v11011_v33, 4  ;;  %v3684_v59 = vshrl.u32 %v3637_v39, 16  ;;  %v2187_v35 = vsel %vm425_vm2, %v11278_v18, %v2186_v6  ;;  %v2211_v63 = vperm.slane %v2207_v55, %v9548_v56  ;;  %v15696_v6 = vld [vmem:[#allocation18_spill] sm:$0xff] }
 0x2eb   : > { %v3670_v51 = vpack.i.b16 %v3635_v58, %v3607_v42  ;;  %v3672_v17 = vshrl.u32 %v3635_v58, 16  ;;  %v2289_v13 = vpack.c.b16 %v2288_v2, %v2288_v2  ;;  %v11303_v23 = vperm.slane %v2129_v44, %v15580_v9  ;;  %v15695_v58 = vld [vmem:[#allocation13_spill] sm:$0xff] }
 0x2ec   : > { %v2157_v0 = vsel %vm425_vm2, %v2156_v45, %v11187_v62  ;;  %v3685_v4 = vpack.i.b16 %v3684_v59, %v3683_v15  ;;  %v2215_v40 = vsel %vm425_vm2, %v2211_v63, %v2214_v26  ;;  %v3695_v20 = vpack.c.b16 %v3694_v61, %v3694_v61 }
 0x2ed   : > { %15691 = vst [vmem:[#allocation67_spill] sm:$0xff] %v11303_v23  ;;  %v3735_v33 = vpack.c.b16 %v3734_v48, %v3734_v48  ;;  %v3673_v39 = vpack.i.b16 %v3672_v17, %v3671_v41  ;;  %v2195_v5 = vperm.slane %v2187_v35, %v15580_v9  ;;  %v11308_v54 = vperm.slane %v2157_v0, %v15580_v9  ;;  %v15697_v17 = vld [vmem:[#allocation9_spill] sm:$0xff] }
 0x2ee   : > { %2290 = vrot.lane.b32.xlu2 %v2289_v13, %s9446_s16  ;;  %v2223_v62 = vperm.slane %v2215_v40, %v15580_v9  ;;  %v1351_v36 = vrot.slane %v15693_v27, 4  ;;  %v3718_v11 = vunpack.c.l.b16 %v3670_v51  ;;  %v3738_v24 = vunpack.c.l.b16 %v3685_v4  ;;  %v15698_v4 = vld [vmem:[#allocation16_spill] sm:$0xff] }
 0x2ef   : > { %15692 = vst [vmem:[#allocation68_spill] sm:$0xff] %v11308_v54  ;;  %3696 = vrot.lane.b32.xlu0 %v3695_v20, %s9443_s13  ;;  %v11314_v10 = vpop.permute.xlu2 %3116  ;;  %v2231_v7 = vshrl.u32 %v11303_v23, 16  ;;  %v3722_v14 = vunpack.c.l.b16 %v3673_v39  ;;  %v2267_v42 = vshrl.u32 %v2195_v5, 16  ;;  %v2232_v61 = vshrl.u32 %v11308_v54, 16 }
 0x2f0   : > { %3736 = vrot.lane.b32.xlu1 %v3735_v33, %s9447_s17  ;;  %15694 = vst [vmem:[#allocation21_spill] sm:$0xff] %v11314_v10  ;;  %v11317_v37 = vpop.permute.xlu1 %2609  ;;  %v11319_v46 = vpop.permute.xlu0 %2595  ;;  %v1329_v55 = vrot.slane %v15695_v58, 4  ;;  %v2268_v2 = vshrl.u32 %v2223_v62, 16  ;;  %v2184_v15 = vrot.slane %v11278_v18, 4  ;;  %v1352_v26 = vsel %vm425_vm2, %v1351_v36, %v15696_v6  ;;  %v15702_v58 = vld [vmem:[#allocation37_spill] sm:$0xff] }
 0x2f1   : > { %v3719_v48 = vpack.c.b16 %v3718_v11, %v3718_v11  ;;  %v3739_v41 = vpack.c.b16 %v3738_v24, %v3738_v24  ;;  %v2233_v44 = vpack.i.b16 %v2232_v61, %v2231_v7  ;;  %v3723_v45 = vpack.c.b16 %v3722_v14, %v3722_v14 }
 0x2f2   : > { %v2266_v59 = vpack.i.b16 %v2223_v62, %v2195_v5  ;;  %v2269_v35 = vpack.i.b16 %v2268_v2, %v2267_v42  ;;  %v2198_v51 = vrot.slane %v2195_v5, 4  ;;  %v1385_v0 = vrot.slane %v15697_v17, 4 }
 0x2f3   : > { %v2142_v13 = vrot.slane %v11231_v53, 4  ;;  %v1330_v40 = vsel %vm425_vm2, %v1329_v55, %v15698_v4  ;;  %v2226_v18 = vrot.slane %v2223_v62, 4  ;;  %v2185_v20 = vsel %vm425_vm2, %v2184_v15, %v11269_v38  ;;  %v15704_v15 = vld [vmem:[#allocation30_spill] sm:$0xff] }
 0x2f4   : > { %v2212_v33 = vrot.slane %v2211_v63, 4  ;;  %v11336_v39 = vperm.slane %v1352_v26, %v9548_v56  ;;  %v2276_v27 = vunpack.c.l.b16 %v2233_v44  ;;  %v2243_v36 = vshrl.u32 %v11231_v53, 16  ;;  %v15701_v63 = vld [vmem:[#allocation25_spill] sm:$0xff]  ;;  %v15705_v26 = vld [vmem:[#allocation42_spill] sm:$0xff] }
 0x2f5   : > { %v2170_v11 = vrot.slane %v11245_v16, 4  ;;  %v2316_v14 = vunpack.c.l.b16 %v2266_v59  ;;  %v2320_v62 = vunpack.c.l.b16 %v2269_v35  ;;  %v11347_v42 = vsel %vm425_vm2, 0, %v2198_v51 }
 0x2f6   : > { %3740 = vrot.lane.b32.xlu2 %v3739_v41, %s9445_s15  ;;  %v2213_v38 = vsel %vm425_vm2, %v2212_v33, %v11272_v47  ;;  %v1301_v61 = vrot.slane %v15701_v63, 4  ;;  %v1379_v55 = vrot.slane %v15702_v58, 4  ;;  %v2143_v53 = vsel %vm425_vm2, 0, %v2142_v13 }
 0x2f7   : > { %3720 = vrot.lane.b32.xlu0 %v3719_v48, %s9449_s19  ;;  %v11338_v5 = vpop.permute.xlu2 %3122  ;;  %v11355_v2 = vperm.slane %v2185_v20, %v15580_v9  ;;  %v1386_v6 = vsel %vm425_vm2, %v1385_v0, %v15704_v15  ;;  %v1357_v48 = vrot.slane %v15705_v26, 4  ;;  %v2244_v41 = vshrl.u32 %v11245_v16, 16  ;;  %v15707_v16 = vld [vmem:[#allocation14_spill] sm:$0xff] }
 0x2f8   : > { %3724 = vrot.lane.b32.xlu1 %v3723_v45, %s9443_s13  ;;  %15699 = vst [vmem:[#allocation13_spill] sm:$0xff] %v11338_v5  ;;  %v11342_v24 = vpop.permute.xlu1 %3102  ;;  %v11344_v7 = vpop.permute.xlu0 %2601  ;;  %v11362_v44 = vsel %vm425_vm2, 0, %v2226_v18  ;;  %v2277_v47 = vpack.c.b16 %v2276_v27, %v2276_v27  ;;  %v2171_v59 = vsel %vm425_vm2, 0, %v2170_v11  ;;  %v11368_v35 = vperm.slane %v2213_v38, %v15580_v9  ;;  %v15708_v27 = vld [vmem:[#allocation23_spill] sm:$0xff] }
 0x2f9   : > { %15700 = vst [vmem:[#allocation18_spill] sm:$0xff] %v11342_v24  ;;  %v2272_v45 = vpack.i.b16 %v11362_v44, %v11347_v42  ;;  %v2317_v51 = vpack.c.b16 %v2316_v14, %v2316_v14  ;;  %v2321_v17 = vpack.c.b16 %v2320_v62, %v2320_v62  ;;  %v2245_v13 = vpack.i.b16 %v2244_v41, %v2243_v36  ;;  %v15709_v36 = vld [vmem:[#allocation24_spill] sm:$0xff]  ;;  %v15710_v62 = vld [vmem:[#allocation31_spill] sm:$0xff] }
 0x2fa   : > { %15703 = vst [vmem:[#allocation9_spill] sm:$0xff] %v11355_v2  ;;  %v2248_v0 = vpack.i.b16 %v2171_v59, %v2143_v53  ;;  %v11371_v4 = vperm.slane %v1330_v40, %v9548_v56  ;;  %v1380_v18 = vsel %vm425_vm2, %v1379_v55, %v15707_v16  ;;  %v2196_v20 = vrot.slane %v11355_v2, 4  ;;  %v15714_v16 = vld [vmem:[#allocation43_spill] sm:$0xff] }
 0x2fb   : > { %15706 = vst [vmem:[#allocation16_spill] sm:$0xff] %v11368_v35  ;;  %v1365_v33 = vrot.slane %v11336_v39, 4  ;;  %v11380_v11 = vsel %vm425_vm2, %v1301_v61, %v15708_v27  ;;  %v11383_v14 = vperm.slane %v1386_v6, %v9548_v56  ;;  %v1358_v40 = vsel %vm425_vm2, %v1357_v48, %v15709_v36 }
 0x2fc   : > { %v1295_v38 = vrot.slane %v15710_v62, 4  ;;  %v2324_v58 = vunpack.c.l.b16 %v2272_v45  ;;  %v2249_v55 = vshrl.u32 %v2143_v53, 16  ;;  %v2224_v15 = vrot.slane %v11368_v35, 4  ;;  %v15716_v62 = vld [vmem:[#allocation58_spill] sm:$0xff] }
 0x2fd   : > { %v11394_v61 = vperm.slane %v1380_v18, %v9548_v56  ;;  %v2292_v48 = vunpack.c.l.b16 %v2245_v13  ;;  %v2296_v41 = vunpack.c.l.b16 %v2248_v0  ;;  %v2197_v45 = vsel %vm425_vm2, 0, %v2196_v20  ;;  %v15715_v18 = vld [vmem:[#allocation53_spill] sm:$0xff] }
 0x2fe   : > { %2278 = vrot.lane.b32.xlu2 %v2277_v47, %s9448_s18  ;;  %v2255_v47 = vshrl.u32 %v11355_v2, 16  ;;  %v2140_v53 = vrot.slane %v11303_v23, 4  ;;  %v1684_v27 = vrot.slane %v15714_v16, 4  ;;  %v1712_v36 = vrot.slane %v15715_v18, 4 }
 0x2ff   : > { %2318 = vrot.lane.b32.xlu0 %v2317_v51, %s9446_s16  ;;  %v11390_v63 = vpop.permute.xlu2 %3128  ;;  %v11402_v51 = vperm.slane %v1358_v40, %v9548_v56  ;;  %v1690_v1 = vrot.slane %v15716_v62, 4  ;;  %v2256_v29 = vshrl.u32 %v11368_v35, 16  ;;  %v2325_v13 = vpack.c.b16 %v2324_v58, %v2324_v58 }
 0x300   : > { %2322 = vrot.lane.b32.xlu1 %v2321_v17, %s9444_s14  ;;  %15711 = vst [vmem:[#allocation25_spill] sm:$0xff] %v11390_v63  ;;  %v11396_v6 = vpop.permute.xlu1 %3108  ;;  %v11398_v26 = vpop.permute.xlu0 %2607  ;;  %v2250_v17 = vshrl.u32 %v2171_v59, 16  ;;  %v2225_v63 = vsel %vm425_vm2, 0, %v2224_v15  ;;  %v2168_v40 = vrot.slane %v11308_v54, 4  ;;  %v2297_v59 = vpack.c.b16 %v2296_v41, %v2296_v41  ;;  %v15719_v15 = vld [vmem:[#allocation45_spill] sm:$0xff]  ;;  %v15721_v41 = vld [vmem:[#allocation44_spill] sm:$0xff] }
 0x301   : > { %15712 = vst [vmem:[#allocation37_spill] sm:$0xff] %v11396_v6  ;;  %v2293_v6 = vpack.c.b16 %v2292_v48, %v2292_v48  ;;  %v2257_v49 = vpack.i.b16 %v2256_v29, %v2255_v47  ;;  %v2260_v20 = vpack.i.b16 %v2225_v63, %v2197_v45  ;;  %v1393_v30 = vrot.slane %v11394_v61, 4  ;;  %v15720_v48 = vld [vmem:[#allocation35_spill] sm:$0xff]  ;;  %v15726_v54 = vld [vmem:[#allocation22_spill] sm:$0xff] }
 0x302   : > { %15713 = vst [vmem:[#allocation30_spill] sm:$0xff] %v11398_v26  ;;  %v2251_v0 = vpack.i.b16 %v2250_v17, %v2249_v55  ;;  %v1323_v16 = vrot.slane %v15717_v50, 4  ;;  %v1366_v18 = vsel %vm425_vm2, %v11402_v51, %v1365_v33  ;;  %v2141_v58 = vsel %vm425_vm2, 0, %v2140_v53  ;;  %v15718_v55 = vld [vmem:[#allocation10_spill] sm:$0xff] }
 0x303   : > { %v1718_v17 = vrot.slane %v15718_v55, 4  ;;  %v1685_v62 = vsel %vm425_vm2, %v1684_v27, %v15719_v15  ;;  %v1713_v29 = vsel %vm425_vm2, %v1712_v36, %v15720_v48  ;;  %v1691_v47 = vsel %vm425_vm2, %v1690_v1, %v15721_v41 }
 0x304   : > { %v2300_v33 = vunpack.c.l.b16 %v2251_v0  ;;  %v2169_v53 = vsel %vm425_vm2, 0, %v2168_v40  ;;  %v2304_v36 = vunpack.c.l.b16 %v2257_v49  ;;  %v2308_v48 = vunpack.c.l.b16 %v2260_v20 }
 0x305   : > { %v2237_v1 = vshrl.u32 %v2141_v58, 16  ;;  %v1394_v0 = vsel %vm425_vm2, %v11383_v14, %v1393_v30  ;;  %v2262_v55 = vshrl.u32 %v2225_v63, 16  ;;  %v11445_v23 = vperm.slane %v1366_v18, %v15580_v9 }
 0x306   : > { %2326 = vrot.lane.b32.xlu2 %v2325_v13, %s9447_s17  ;;  %v2261_v13 = vshrl.u32 %v2197_v45, 16  ;;  %v15725_v45 = vld [vmem:[#allocation20_spill] sm:$0xff]  ;;  %v11448_v49 = vperm.slane %v1685_v62, %v9548_v56  ;;  %v11451_v20 = vperm.slane %v1713_v29, %v9548_v56  ;;  %v1656_v2 = vrot.slane %v15726_v54, 4 }
 0x307   : > { %2294 = vrot.lane.b32.xlu0 %v2293_v6, %s9444_s14  ;;  %v11427_v50 = vpop.permute.xlu2 %1161  ;;  %v1324_v40 = vsel %vm425_vm2, %v1323_v16, %v15725_v45  ;;  %v2238_v6 = vshrl.u32 %v2169_v53, 16  ;;  %v2301_v30 = vpack.c.b16 %v2300_v33, %v2300_v33  ;;  %v2305_v35 = vpack.c.b16 %v2304_v36, %v2304_v36  ;;  %v15728_v33 = vld [vmem:[#allocation17_spill] sm:$0xff] }
 0x308   : > { %2298 = vrot.lane.b32.xlu1 %v2297_v59, %s9447_s17  ;;  %v11432_v27 = vpop.permute.xlu1 %3114  ;;  %v11434_v15 = vpop.permute.xlu0 %3106  ;;  %v15724_v59 = vld [vmem:[#allocation12_spill] sm:$0xff]  ;;  %v2309_v16 = vpack.c.b16 %v2308_v48, %v2308_v48  ;;  %v2236_v63 = vpack.i.b16 %v2169_v53, %v2141_v58  ;;  %v11461_v62 = vperm.slane %v1394_v0, %v15580_v9  ;;  %v11464_v29 = vperm.slane %v1324_v40, %v9548_v56 }
 0x309   : > { %15722 = vst [vmem:[#allocation42_spill] sm:$0xff] %v11432_v27  ;;  %v1296_v41 = vsel %vm425_vm2, %v1295_v38, %v15724_v59  ;;  %v11455_v38 = vperm.slane %v1691_v47, %v9548_v56  ;;  %v2263_v59 = vpack.i.b16 %v2262_v55, %v2261_v13  ;;  %v2239_v45 = vpack.i.b16 %v2238_v6, %v2237_v1  ;;  %v15729_v55 = vld [vmem:[#allocation41_spill] sm:$0xff] }
 0x30a   : > { %15723 = vst [vmem:[#allocation14_spill] sm:$0xff] %v11434_v15  ;;  %v11458_v18 = vperm.slane %v1296_v41, %v9548_v56  ;;  %v1719_v54 = vsel %vm425_vm2, %v1718_v17, %v15727_v31  ;;  %v11471_v47 = vperm.slane %v11380_v11, %v9548_v56  ;;  %v1698_v58 = vrot.slane %v11448_v49, 4 }
 0x30b   : > { %v1628_v53 = vrot.slane %v15728_v33, 4  ;;  %v1726_v13 = vrot.slane %v11451_v20, 4  ;;  %v1657_v36 = vsel %vm425_vm2, %v1656_v2, %v15729_v55  ;;  %v2312_v17 = vunpack.c.l.b16 %v2263_v59  ;;  %v15733_v33 = vld [vmem:[#allocation19_spill] sm:$0xff] }
 0x30c   : > { %v2273_v48 = vshrl.u32 %v11347_v42, 16  ;;  %v1446_v11 = vshrl.u32 %v11445_v23, 16  ;;  %v11485_v1 = vperm.slane %v1719_v54, %v9548_v56  ;;  %v1699_v6 = vsel %vm425_vm2, %v11455_v38, %v1698_v58 }
 0x30d   : > { %v2280_v0 = vunpack.c.l.b16 %v2236_v63  ;;  %v2284_v40 = vunpack.c.l.b16 %v2239_v45  ;;  %v1309_v2 = vrot.slane %v11458_v18, 4  ;;  %v2274_v42 = vshrl.u32 %v11362_v44, 16  ;;  %v15734_v44 = vld [vmem:[#allocation15_spill] sm:$0xff] }
 0x30e   : > { %2302 = vrot.lane.b32.xlu2 %v2301_v30, %s9445_s15  ;;  %v1337_v30 = vrot.slane %v11464_v29, 4  ;;  %v1447_v59 = vshrl.u32 %v11461_v62, 16  ;;  %v1634_v55 = vrot.slane %v15733_v33, 4  ;;  %v1727_v58 = vsel %vm425_vm2, %v11485_v1, %v1726_v13 }
 0x30f   : > { %2306 = vrot.lane.b32.xlu0 %v2305_v35, %s9448_s18  ;;  %v11506_v63 = vperm.slane %v1699_v6, %v15580_v9  ;;  %v2313_v45 = vpack.c.b16 %v2312_v17, %v2312_v17  ;;  %v1662_v27 = vrot.slane %v15734_v44, 4  ;;  %v2281_v24 = vpack.c.b16 %v2280_v0, %v2280_v0  ;;  %v15735_v17 = vld [vmem:[#allocation40_spill] sm:$0xff]  ;;  %v15736_v0 = vld [vmem:[#allocation49_spill] sm:$0xff] }
 0x310   : > { %2310 = vrot.lane.b32.xlu1 %v2309_v16, %s9449_s19  ;;  %v11480_v31 = vpop.permute.xlu2 %1137  ;;  %v11489_v41 = vpop.permute.xlu1 %3120  ;;  %v15732_v16 = vld [vmem:[#allocation32_spill] sm:$0xff]  ;;  %v1448_v15 = vpack.i.b16 %v1447_v59, %v1446_v11  ;;  %v2285_v5 = vpack.c.b16 %v2284_v40, %v2284_v40  ;;  %v1338_v13 = vsel %vm425_vm2, %v11371_v4, %v1337_v30  ;;  %v1363_v11 = vrot.slane %v11402_v51, 4 }
 0x311   : > { %15730 = vst [vmem:[#allocation23_spill] sm:$0xff] %v11489_v41  ;;  %v11491_v35 = vpop.permute.xlu0 %3112  ;;  %v1629_v54 = vsel %vm425_vm2, %v1628_v53, %v15732_v16  ;;  %v2275_v41 = vpack.i.b16 %v2274_v42, %v2273_v48  ;;  %v1445_v53 = vpack.i.b16 %v11461_v62, %v11445_v23  ;;  %v1310_v16 = vsel %vm425_vm2, %v11471_v47, %v1309_v2 }
 0x312   : > { %15731 = vst [vmem:[#allocation24_spill] sm:$0xff] %v11491_v35  ;;  %v11503_v35 = vperm.slane %v1657_v36, %v9548_v56  ;;  %v11516_v36 = vperm.slane %v1727_v58, %v15580_v9  ;;  %v1663_v48 = vsel %vm425_vm2, %v1662_v27, %v15735_v17  ;;  %v11523_v6 = vperm.slane %v1629_v54, %v9548_v56 }
 0x313   : > { %v1635_v40 = vsel %vm425_vm2, %v1634_v55, %v15736_v0  ;;  %v2328_v42 = vunpack.c.l.b16 %v2275_v41  ;;  %v1499_v59 = vunpack.c.l.b16 %v1448_v15  ;;  %v1779_v27 = vshrl.u32 %v11506_v63, 16 }
 0x314   : > { %v1670_v2 = vrot.slane %v11503_v35, 4  ;;  %v1495_v54 = vunpack.c.l.b16 %v1445_v53  ;;  %v1346_v58 = vperm.slane %v1338_v13, %v15580_v9  ;;  %v1335_v55 = vrot.slane %v11371_v4, 4 }
 0x315   : > { %v1642_v15 = vrot.slane %v11523_v6, 4  ;;  %v1639_v41 = vperm.slane %v1635_v40, %v9548_v56  ;;  %v1318_v44 = vperm.slane %v1310_v16, %v15580_v9  ;;  %v2329_v53 = vpack.c.b16 %v2328_v42, %v2328_v42 }
 0x316   : > { %2314 = vrot.lane.b32.xlu2 %v2313_v45, %s9443_s13  ;;  %v1364_v45 = vsel %vm425_vm2, %v1363_v11, %v11336_v39  ;;  %v1500_v0 = vpack.c.b16 %v1499_v59, %v1499_v59  ;;  %v1349_v19 = vrot.slane %v1346_v58, 4  ;;  %v1307_v39 = vrot.slane %v11471_v47, 4 }
 0x317   : > { %2282 = vrot.lane.b32.xlu0 %v2281_v24, %s9449_s19  ;;  %v1667_v24 = vperm.slane %v1663_v48, %v9548_v56  ;;  %v1421_v4 = vpack.i.b16 %v1346_v58, %v1318_v44  ;;  %v1778_v48 = vpack.i.b16 %v11516_v36, %v11506_v63  ;;  %v1336_v16 = vsel %vm425_vm2, %v1335_v55, %v11464_v29 }
 0x318   : > { %2286 = vrot.lane.b32.xlu1 %v2285_v5, %s9443_s13  ;;  %v11530_v30 = vpop.permute.xlu2 %1149  ;;  %v11533_v33 = vpop.permute.xlu1 %3126  ;;  %v1780_v5 = vshrl.u32 %v11516_v36, 16  ;;  %v1643_v11 = vsel %vm425_vm2, %v1639_v41, %v1642_v15  ;;  %v1321_v40 = vrot.slane %v1318_v44, 4  ;;  %v11560_v42 = vperm.slane %v1364_v45, %v15580_v9 }
 0x319   : > { %15737 = vst [vmem:[#allocation31_spill] sm:$0xff] %v11533_v33  ;;  %v11535_v51 = vpop.permute.xlu0 %3118  ;;  %v1671_v17 = vsel %vm425_vm2, %v1667_v24, %v1670_v2  ;;  %v1496_v33 = vpack.c.b16 %v1495_v54, %v1495_v54  ;;  %v1467_v54 = vunpack.c.l.b16 %v1421_v4  ;;  %v1828_v55 = vunpack.c.l.b16 %v1778_v48 }
 0x31a   : > { %15738 = vst [vmem:[#allocation43_spill] sm:$0xff] %v11535_v51  ;;  %v1781_v13 = vpack.i.b16 %v1780_v5, %v1779_v27  ;;  %v1391_v51 = vrot.slane %v11383_v14, 4  ;;  %v11565_v47 = vperm.slane %v1671_v17, %v15580_v9  ;;  %v1423_v5 = vshrl.u32 %v1346_v58, 16 }
 0x31b   : > { %15739 = vst [vmem:[#allocation53_spill] sm:$0xff] %v11560_v42  ;;  %v1640_v45 = vrot.slane %v1639_v41, 4  ;;  %v11580_v15 = vperm.slane %v1643_v11, %v15580_v9  ;;  %v1668_v58 = vrot.slane %v1667_v24, 4  ;;  %v1468_v48 = vpack.c.b16 %v1467_v54, %v1467_v54  ;;  %v15746_v54 = vld [vmem:[#allocation33_spill] sm:$0xff] }
 0x31c   : > { %v1392_v2 = vsel %vm425_vm2, %v1391_v51, %v11394_v61  ;;  %v1832_v59 = vunpack.c.l.b16 %v1781_v13  ;;  %v1308_v61 = vsel %vm425_vm2, %v1307_v39, %v11458_v18  ;;  %v11577_v51 = vperm.slane %v1336_v16, %v15580_v9 }
 0x31d   : > { %v11583_v17 = vperm.slane %v1392_v2, %v15580_v9  ;;  %v11587_v13 = vsel %vm425_vm2, 0, %v1321_v40  ;;  %v1754_v18 = vpack.i.b16 %v11565_v47, %v11580_v15  ;;  %v1829_v39 = vpack.c.b16 %v1828_v55, %v1828_v55 }
 0x31e   : > { %1501 = vrot.lane.b32.xlu2 %v1500_v0, %s9444_s14  ;;  %15741 = vst [vmem:[#allocation36_spill] sm:$0xff] %v11577_v51  ;;  %v1833_v4 = vpack.c.b16 %v1832_v59, %v1832_v59  ;;  %v1375_v11 = vrot.slane %v11560_v42, 4  ;;  %v11595_v2 = vperm.slane %v1308_v61, %v15580_v9  ;;  %v1641_v40 = vsel %vm425_vm2, %v1640_v45, %v11523_v6 }
 0x31f   : > { %2330 = vrot.lane.b32.xlu0 %v2329_v53, %s9445_s15  ;;  %15742 = vst [vmem:[#allocation10_spill] sm:$0xff] %v11583_v17  ;;  %v15743_v53 = vld [vmem:[#allocation26_spill] sm:$0xff]  ;;  %v1724_v59 = vrot.slane %v11485_v1, 4  ;;  %v1403_v6 = vrot.slane %v11583_v17, 4  ;;  %v1696_v61 = vrot.slane %v11455_v38, 4 }
 0x320   : > { %1497 = vrot.lane.b32.xlu1 %v1496_v33, %s9446_s16  ;;  %v11562_v14 = vpop.permute.xlu2 %1125  ;;  %v11572_v33 = vsel %vm425_vm2, 0, %v1349_v19  ;;  %v3959_v0 = vrot.slane %v15743_v53, 4  ;;  %v1422_v19 = vshrl.u32 %v1318_v44, 16  ;;  %15744 = vst [vmem:[#allocation45_spill] sm:$0xff] %v11595_v2  ;;  %v15745_v44 = vld [vmem:[#allocation52_spill] sm:$0xff]  ;;  %v1669_v53 = vsel %vm425_vm2, %v1668_v58, %v11503_v35 }
 0x321   : > { %v11567_v29 = vpop.permute.xlu1 %1157  ;;  %v11569_v27 = vpop.permute.xlu0 %3124  ;;  %v1427_v41 = vpack.i.b16 %v11572_v33, %v11587_v13  ;;  %v3965_v24 = vrot.slane %v15745_v44, 4  ;;  %v1411_v35 = vshrl.u32 %v11577_v51, 16  ;;  %v1800_v44 = vunpack.c.l.b16 %v1754_v18 }
 0x322   : > { %15740 = vst [vmem:[#allocation58_spill] sm:$0xff] %v11569_v27  ;;  %v1424_v16 = vpack.i.b16 %v1423_v5, %v1422_v19  ;;  %v3960_v55 = vsel %vm425_vm2, %v3959_v0, %v15746_v54  ;;  %v15747_v5 = vld [vmem:[#allocation29_spill] sm:$0xff]  ;;  %v1434_v54 = vshrl.u32 %v11560_v42, 16  ;;  %v11625_v38 = vperm.slane %v1669_v53, %v15580_v9 }
 0x323   : > { %v3931_v19 = vrot.slane %v15747_v5, 4  ;;  %v3966_v1 = vsel %vm425_vm2, %v3965_v24, %v10899_v34  ;;  %v3964_v34 = vperm.slane %v3960_v55, %v9548_v56  ;;  %v15750_v24 = vld [vmem:[#allocation60_spill] sm:$0xff]  ;;  %v1410_v5 = vshrl.u32 %v11595_v2, 16 }
 0x324   : > { %15749 = vst [vmem:[#allocation44_spill] sm:$0xff] %v11625_v38  ;;  %v3970_v27 = vperm.slane %v3966_v1, %v9548_v56  ;;  %v3937_v18 = vrot.slane %v10957_v60, 4  ;;  %v1697_v53 = vsel %vm425_vm2, %v1696_v61, %v11448_v49  ;;  %v1682_v1 = vrot.slane %v11565_v47, 4 }
 0x325   : > { %v11643_v60 = vperm.slane %v1641_v40, %v15580_v9  ;;  %v1725_v49 = vsel %vm425_vm2, %v1724_v59, %v11451_v20  ;;  %v11655_v40 = vperm.slane %v1697_v53, %v15580_v9 }
 0x326   : > { %1834 = vrot.lane.b32.xlu2 %v1833_v4, %s9444_s14  ;;  %v1475_v4 = vunpack.c.l.b16 %v1427_v41  ;;  %v3932_v41 = vsel %vm425_vm2, %v3931_v19, %v15750_v24  ;;  %v1801_v19 = vpack.c.b16 %v1800_v44, %v1800_v44  ;;  %v3971_v61 = vrot.slane %v3970_v27, 4 }
 0x327   : > { %1469 = vrot.lane.b32.xlu0 %v1468_v48, %s9446_s16  ;;  %v1471_v48 = vunpack.c.l.b16 %v1424_v16  ;;  %v11634_v16 = vsel %vm425_vm2, 0, %v1403_v6  ;;  %15751 = vst [vmem:[#allocation12_spill] sm:$0xff] %v11643_v60  ;;  %v3936_v6 = vperm.slane %v3932_v41, %v9548_v56  ;;  %v1654_v44 = vrot.slane %v11580_v15, 4 }
 0x328   : > { %1830 = vrot.lane.b32.xlu1 %v1829_v39, %s9446_s16  ;;  %v11613_v45 = vpop.permute.xlu2 %3704  ;;  %v11621_v39 = vsel %vm425_vm2, 0, %v1375_v11  ;;  %v1435_v11 = vshrl.u32 %v11583_v17, 16  ;;  %v1476_v42 = vpack.c.b16 %v1475_v4, %v1475_v4  ;;  %v15752_v4 = vld [vmem:[#allocation27_spill] sm:$0xff]  ;;  %15753 = vst [vmem:[#allocation20_spill] sm:$0xff] %v11655_v40  ;;  %v1743_v17 = vshrl.u32 %v11643_v60, 16 }
 0x329   : > { %15748 = vst [vmem:[#allocation35_spill] sm:$0xff] %v11613_v45  ;;  %v11616_v58 = vpop.permute.xlu1 %1133  ;;  %v11618_v0 = vpop.permute.xlu0 %1129  ;;  %v1412_v45 = vpack.i.b16 %v1411_v35, %v1410_v5  ;;  %v1439_v55 = vpack.i.b16 %v11634_v16, %v11621_v39  ;;  %v1472_v24 = vpack.c.b16 %v1471_v48, %v1471_v48  ;;  %v3938_v35 = vsel %vm425_vm2, %v3937_v18, %v15752_v4 }
 0x32a   : > { %v1436_v10 = vpack.i.b16 %v1435_v11, %v1434_v54  ;;  %v3973_v48 = vrot.slane %v3964_v34, 4  ;;  %v1744_v18 = vshrl.u32 %v11625_v38, 16  ;;  %v11663_v11 = vsel %vm425_vm2, 0, %v1682_v1 }
 0x32b   : > { %v1487_v41 = vunpack.c.l.b16 %v1439_v55  ;;  %v3945_v53 = vrot.slane %v3936_v6, 4  ;;  %v3972_v55 = vsel %vm425_vm2, %v3971_v61, %v3964_v34  ;;  %v1755_v1 = vshrl.u32 %v11580_v15, 16 }
 0x32c   : > { %v1483_v59 = vunpack.c.l.b16 %v1436_v10  ;;  %v3974_v4 = vsel %vm425_vm2, %v3970_v27, %v3973_v48  ;;  %v11674_v10 = vsel %vm425_vm2, 0, %v1654_v44  ;;  %v1745_v27 = vpack.i.b16 %v1744_v18, %v1743_v17  ;;  %v15759_v17 = vld [vmem:[#allocation48_spill] sm:$0xff] }
 0x32d   : > { %v1488_v26 = vpack.c.b16 %v1487_v41, %v1487_v41  ;;  %v1405_v61 = vrot.slane %v11461_v62, 4  ;;  %v11684_v44 = vperm.slane %v3972_v55, %v15580_v9  ;;  %v11687_v15 = vperm.slane %v3974_v4, %v15580_v9 }
 0x32e   : > { %1477 = vrot.lane.b32.xlu2 %v1476_v42, %s9447_s17  ;;  %v1455_v42 = vunpack.c.l.b16 %v1412_v45  ;;  %v3942_v45 = vperm.slane %v3938_v35, %v9548_v56  ;;  %v1484_v3 = vpack.c.b16 %v1483_v59, %v1483_v59  ;;  %v1708_v35 = vrot.slane %v11655_v40, 4 }
 0x32f   : > { %1802 = vrot.lane.b32.xlu0 %v1801_v19, %s9446_s16  ;;  %v1756_v19 = vshrl.u32 %v11565_v47, 16  ;;  %v1760_v47 = vpack.i.b16 %v11663_v11, %v11674_v10  ;;  %v1767_v59 = vshrl.u32 %v11655_v40, 16 }
 0x330   : > { %1473 = vrot.lane.b32.xlu1 %v1472_v24, %s9444_s14  ;;  %v11657_v54 = vpop.permute.xlu2 %3728  ;;  %v11667_v24 = vperm.slane %v1725_v49, %v15580_v9  ;;  %v1377_v49 = vrot.slane %v11445_v23, 4  ;;  %v3943_v34 = vrot.slane %v3942_v45, 4 }
 0x331   : > { %15754 = vst [vmem:[#allocation22_spill] sm:$0xff] %v11657_v54  ;;  %v11659_v5 = vpop.permute.xlu1 %1145  ;;  %v1118_v20 = vpop.permute.xlu0 %1117  ;;  %v1456_v54 = vpack.c.b16 %v1455_v42, %v1455_v42  ;;  %v1757_v48 = vpack.i.b16 %v1756_v19, %v1755_v1  ;;  %v3946_v42 = vsel %vm425_vm2, %v3942_v45, %v3945_v53  ;;  %v1788_v53 = vunpack.c.l.b16 %v1745_v27 }
 0x332   : > { %15755 = vst [vmem:[#allocation54_spill] sm:$0xff] %v11667_v24  ;;  %v1736_v23 = vrot.slane %v11667_v24, 4  ;;  %v11697_v62 = vsel %vm425_vm2, 0, %v1377_v49  ;;  %v3944_v45 = vsel %vm425_vm2, %v3943_v34, %v3936_v6  ;;  %v11708_v55 = vperm.slane %v3946_v42, %v15580_v9 }
 0x333   : > { %v1804_v4 = vunpack.c.l.b16 %v1757_v48  ;;  %v11711_v1 = vsel %vm425_vm2, 0, %v1405_v61  ;;  %v1319_v48 = vrot.slane %v11595_v2, 4  ;;  %v11725_v40 = vperm.slane %v3944_v45, %v15580_v9 }
 0x334   : > { %15757 = vst [vmem:[#allocation41_spill] sm:$0xff] %v11711_v1  ;;  %v1451_v49 = vpack.i.b16 %v11711_v1, %v11697_v62  ;;  %v11717_v27 = vsel %vm425_vm2, 0, %v1736_v23  ;;  %v2723_v23 = vrot.slane %v11013_v32, 4 }
 0x336   : > { %1489 = vrot.lane.b32.xlu2 %v1488_v26, %s9449_s19  ;;  %v1808_v26 = vunpack.c.l.b16 %v1760_v47  ;;  %v1768_v47 = vshrl.u32 %v11667_v24, 16  ;;  %v1789_v24 = vpack.c.b16 %v1788_v53, %v1788_v53  ;;  %v1320_v53 = vsel %vm425_vm2, 0, %v1319_v48 }
 0x337   : > { %1457 = vrot.lane.b32.xlu0 %v1456_v54, %s9448_s18  ;;  %v11703_v54 = vsel %vm425_vm2, 0, %v1708_v35  ;;  %v15758_v35 = vld [vmem:[#allocation47_spill] sm:$0xff] }
 0x338   : > { %1485 = vrot.lane.b32.xlu1 %v1484_v3, %s9448_s18  ;;  %v11694_v41 = vpop.permute.xlu2 %3692  ;;  %v1347_v3 = vrot.slane %v11577_v51, 4  ;;  %v1069_v6 = vpack.i.b16 %v15759_v17, %v15758_v35  ;;  %v1809_v34 = vpack.c.b16 %v1808_v26, %v1808_v26  ;;  %v1769_v42 = vpack.i.b16 %v1768_v47, %v1767_v59 }
 0x339   : > { %15756 = vst [vmem:[#allocation17_spill] sm:$0xff] %v11694_v41  ;;  %v11700_v19 = vpop.permute.xlu0 %1165  ;;  %v1772_v61 = vpack.i.b16 %v11717_v27, %v11703_v54  ;;  %v1805_v51 = vpack.c.b16 %v1804_v4, %v1804_v4  ;;  %v1710_v17 = vrot.slane %v11506_v63, 4  ;;  %v1503_v59 = vunpack.c.l.b16 %v1451_v49 }
 0x33a   : > { %v1122_v18 = vpop.permute.xlu1 %1121  ;;  %v1348_v41 = vsel %vm425_vm2, 0, %v1347_v3  ;;  %v1174_v1 = vsel %vm1171_vm7, %v1069_v6, %v1118_v20  ;;  %v1816_v32 = vunpack.c.l.b16 %v1769_v42  ;;  %v1738_v20 = vrot.slane %v11516_v36, 4  ;;  %v15761_v6 = vld [vmem:[#allocation46_spill] sm:$0xff] }
 0x33b   : > { %v1177_v26 = vsel %vm1175_vm8, %v1174_v1, %v1122_v18  ;;  %v1820_v3 = vunpack.c.l.b16 %v1772_v61  ;;  %v1417_v45 = vshrl.u32 %v1348_v41, 16  ;;  %v4027_v47 = vrot.slane %v11109_v21, 4  ;;  %v15760_v18 = vld [vmem:[#allocation34_spill] sm:$0xff]  ;;  %v15762_v21 = vld [vmem:[#allocation4_spill] sm:$0xff] }
 0x33c   : > { %v2724_v63 = vsel %vm425_vm2, %v2723_v23, %v11081_v12  ;;  %v2661_v1 = vrot.slane %v15760_v18, 4  ;;  %v1680_v49 = vrot.slane %v11625_v38, 4  ;;  %v1180_v48 = vsel %vm1178_vm11, %v1177_v26, %v11562_v14 }
 0x33d   : > { %v11749_v35 = vsel %vm425_vm2, 0, %v1710_v17  ;;  %v1416_v36 = vshrl.u32 %v1320_v53, 16  ;;  %v1504_v12 = vpack.c.b16 %v1503_v59, %v1503_v59  ;;  %v1652_v42 = vrot.slane %v11643_v60, 4  ;;  %v15764_v59 = vld [vmem:[#allocation51_spill] sm:$0xff] }
 0x33e   : > { %1810 = vrot.lane.b32.xlu2 %v1809_v34, %s9447_s17  ;;  %v1093_v34 = vpack.i.b16 %v15762_v21, %v15761_v6  ;;  %v1817_v61 = vpack.c.b16 %v1816_v32, %v1816_v32  ;;  %v1821_v23 = vpack.c.b16 %v1820_v3, %v1820_v3  ;;  %v11755_v18 = vsel %vm425_vm2, 0, %v1738_v20  ;;  %v15763_v6 = vld [vmem:[#allocation28_spill] sm:$0xff] }
 0x33f   : > { %1790 = vrot.lane.b32.xlu0 %v1789_v24, %s9448_s18  ;;  %v1418_v38 = vpack.i.b16 %v1417_v45, %v1416_v36  ;;  %v1183_v14 = vsel %vm1181_vm13, %v1180_v48, %v11618_v0  ;;  %v1784_v17 = vpack.i.b16 %v11755_v18, %v11749_v35  ;;  %v1415_v26 = vpack.i.b16 %v1348_v41, %v1320_v53 }
 0x340   : > { %1806 = vrot.lane.b32.xlu1 %v1805_v51, %s9444_s14  ;;  %v11736_v4 = vpop.permute.xlu2 %3716  ;;  %v1681_v2 = vsel %vm425_vm2, 0, %v1680_v49  ;;  %v3240_v21 = vrot.slane %v15763_v6, 4  ;;  %v4028_v60 = vsel %vm425_vm2, %v4027_v47, %v15764_v59  ;;  %v2667_v32 = vrot.slane %v11199_v22, 4 }
 0x341   : > { %v1142_v51 = vpop.permute.xlu0 %1141  ;;  %v1195_v3 = vsel %vm1171_vm7, %v1093_v34, %v11659_v5  ;;  %v2662_v0 = vsel %vm425_vm2, %v2661_v1, %v11291_v57  ;;  %v1429_v41 = vshrl.u32 %v11572_v33, 16  ;;  %v1653_v53 = vsel %vm425_vm2, 0, %v1652_v42 }
 0x342   : > { %v11743_v24 = vpop.permute.xlu1 %3700  ;;  %v1186_v22 = vsel %vm1184_vm14, %v1183_v14, %v11616_v58  ;;  %v1463_v5 = vunpack.c.l.b16 %v1418_v38  ;;  %v1750_v45 = vshrl.u32 %v1681_v2, 16  ;;  %v1197_v57 = vsel %vm1175_vm8, %v1195_v3, %v11530_v30 }
 0x343   : > { %v1836_v49 = vunpack.c.l.b16 %v1784_v17  ;;  %v1459_v48 = vunpack.c.l.b16 %v1415_v26  ;;  %v1428_v36 = vshrl.u32 %v11587_v13, 16  ;;  %v2668_v33 = vsel %vm425_vm2, %v2667_v32, %v11233_v52 }
 0x344   : > { %v2689_v34 = vrot.slane %v11289_v28, 4  ;;  %v2666_v38 = vperm.slane %v2662_v0, %v9548_v56  ;;  %v1189_v42 = vsel %vm1187_vm3, %v1186_v22, %v11480_v31  ;;  %v1464_v52 = vpack.c.b16 %v1463_v5, %v1463_v5 }
 0x345   : > { %v1837_v17 = vpack.c.b16 %v1836_v49, %v1836_v49  ;;  %v1460_v26 = vpack.c.b16 %v1459_v48, %v1459_v48  ;;  %v1748_v59 = vpack.i.b16 %v1681_v2, %v1653_v53  ;;  %v11797_v32 = vperm.slane %v2724_v63, %v9548_v56 }
 0x346   : > { %1822 = vrot.lane.b32.xlu2 %v1821_v23, %s9449_s19  ;;  %v1192_v23 = vsel %vm15471_vm4, %v1189_v42, %v1142_v51  ;;  %v11800_v31 = vperm.slane %v4028_v60, %v15580_v9  ;;  %v2675_v0 = vrot.slane %v2666_v38, 4  ;;  %v2695_v2 = vrot.slane %v11189_v43, 4  ;;  %v15767_v42 = vld [vmem:[#allocation63_spill] sm:$0xff] }
 0x347   : > { %1505 = vrot.lane.b32.xlu0 %v1504_v12, %s9447_s17  ;;  %v1749_v12 = vshrl.u32 %v1653_v53, 16  ;;  %v2639_v60 = vrot.slane %v11317_v37, 4  ;;  %v4058_v22 = vshrl.u32 %v11708_v55, 16  ;;  %v1440_v49 = vshrl.u32 %v11621_v39, 16 }
 0x348   : > { %1818 = vrot.lane.b32.xlu1 %v1817_v61, %s9448_s18  ;;  %v11777_v20 = vpop.permute.xlu2 %2290  ;;  %v1430_v61 = vpack.i.b16 %v1429_v41, %v1428_v36  ;;  %v15766_v48 = vrot.slane %v11176_v25, 4  ;;  %v1441_v39 = vshrl.u32 %v11634_v16, 16 }
 0x349   : > { %v1154_v1 = vpop.permute.xlu0 %1153  ;;  %v1751_v14 = vpack.i.b16 %v1750_v45, %v1749_v12  ;;  %v2633_v12 = vrot.slane %v11344_v7, 4  ;;  %v2640_v25 = vsel %vm425_vm2, %v2639_v60, %v15767_v42  ;;  %v15768_v7 = vld [vmem:[#allocation38_spill] sm:$0xff] }
 0x34a   : > { %v1170_v47 = vpop.permute.xlu1 %1169  ;;  %v1199_v58 = vsel %vm1178_vm11, %v1197_v57, %v1154_v1  ;;  %v1479_v57 = vunpack.c.l.b16 %v1430_v61  ;;  %v1792_v1 = vunpack.c.l.b16 %v1748_v59  ;;  %v4000_v43 = vsel %vm425_vm2, %v15766_v48, %v11163_v8 }
 0x34b   : > { %v1201_v30 = vsel %vm1181_vm13, %v1199_v58, %v11567_v29  ;;  %v2672_v29 = vperm.slane %v2668_v33, %v9548_v56  ;;  %v1796_v53 = vunpack.c.l.b16 %v1751_v14  ;;  %v4059_v33 = vshrl.u32 %v11687_v15, 16 }
 0x34c   : > { %v1203_v13 = vsel %vm1184_vm14, %v1201_v30, %v11427_v50  ;;  %v15765_v50 = vld [vmem:[#allocation61_spill] sm:$0xff]  ;;  %v2696_v58 = vsel %vm425_vm2, %v2695_v2, %v11319_v46  ;;  %v3955_v61 = vrot.slane %v11725_v40, 4  ;;  %v4057_v14 = vpack.i.b16 %v11687_v15, %v11708_v55 }
 0x34d   : > { %v1205_v28 = vsel %vm1187_vm3, %v1203_v13, %v11700_v19  ;;  %v2690_v3 = vsel %vm425_vm2, %v2689_v34, %v15765_v50  ;;  %v1210_v19 = vunpack.c.l.b16 %v1192_v23  ;;  %v2673_v37 = vrot.slane %v2672_v29, 4 }
 0x34e   : > { %v1207_v51 = vsel %vm15471_vm4, %v1205_v28, %v1170_v47  ;;  %1465 = vrot.lane.b32.xlu2 %v1464_v52, %s9443_s13  ;;  %v11824_v36 = vperm.slane %v2690_v3, %v9548_v56  ;;  %v2676_v34 = vsel %vm425_vm2, %v2672_v29, %v2675_v0  ;;  %v1797_v8 = vpack.c.b16 %v1796_v53, %v1796_v53  ;;  %v15770_v0 = vld [vmem:[#allocation30_spill] sm:$0xff] }
 0x34f   : > { %v1211_v41 = vunpack.c.l.b16 %v1207_v51  ;;  %1838 = vrot.lane.b32.xlu0 %v1837_v17, %s9447_s17  ;;  %v4060_v30 = vpack.i.b16 %v4059_v33, %v4058_v22  ;;  %v1480_v23 = vpack.c.b16 %v1479_v57, %v1479_v57  ;;  %v1793_v13 = vpack.c.b16 %v1792_v1, %v1792_v1  ;;  %v15769_v51 = vld [vmem:[#allocation65_spill] sm:$0xff] }
 0x350   : > { %1461 = vrot.lane.b32.xlu1 %v1460_v26, %s9449_s19  ;;  %v11811_v63 = vpop.permute.xlu2 %3740  ;;  %v1442_v52 = vpack.i.b16 %v1441_v39, %v1440_v49  ;;  %v11838_v46 = vperm.slane %v4000_v43, %v15580_v9  ;;  %v3184_v28 = vrot.slane %v15768_v7, 4  ;;  %v11842_v16 = vperm.slane %v2696_v58, %v9548_v56  ;;  %v15771_v49 = vld [vmem:[#allocation21_spill] sm:$0xff]  ;;  %v15774_v39 = vld [vmem:[#allocation39_spill] sm:$0xff] }
 0x351   : > { %v1212_v5 = vpack.c.b16 %v1211_v41, %v1210_v19  ;;  %v11816_v47 = vpop.permute.xlu0 %3708  ;;  %v3983_v17 = vrot.slane %v11684_v44, 4  ;;  %v2703_v26 = vrot.slane %v11824_v36, 4  ;;  %v11848_v59 = vsel %vm425_vm2, %v2673_v37, %v2666_v38  ;;  %v15777_v7 = vld [vmem:[#allocation13_spill] sm:$0xff] }
 0x352   : > { %v11814_v45 = vpop.permute.xlu1 %3688  ;;  %v11851_v29 = vperm.slane %v2676_v34, %v15580_v9  ;;  %v2634_v50 = vsel %vm425_vm2, %v2633_v12, %v15769_v51  ;;  %v2644_v3 = vperm.slane %v2640_v25, %v9548_v56  ;;  %v2717_v19 = vrot.slane %v15770_v0, 4  ;;  %v15772_v34 = vld [vmem:[#allocation43_spill] sm:$0xff]  ;;  %v15775_v25 = vld [vmem:[#allocation50_spill] sm:$0xff] }
 0x353   : > { %1214 = vst [vmem:[#allocation3] sm:$0xff] %v1212_v5  ;;  %v4107_v2 = vunpack.c.l.b16 %v4060_v30  ;;  %v11862_v38 = vsel %vm425_vm2, 0, %v3955_v61  ;;  %v1491_v22 = vunpack.c.l.b16 %v1442_v52  ;;  %v4103_v5 = vunpack.c.l.b16 %v4057_v14  ;;  %v15778_v0 = vld [vmem:[#allocation31_spill] sm:$0xff] }
 0x354   : > { %v1762_v57 = vshrl.u32 %v11663_v11, 16  ;;  %v1452_v1 = vshrl.u32 %v11697_v62, 16  ;;  %v11874_v48 = vsel %vm425_vm2, %v3240_v21, %v15771_v49  ;;  %v11878_v43 = vsel %vm425_vm2, %v11842_v16, %v2703_v26  ;;  %v15773_v62 = vld [vmem:[#allocation41_spill] sm:$0xff]  ;;  %v15781_v49 = vld [vmem:[#allocation14_spill] sm:$0xff] }
 0x355   : > { %v2638_v37 = vperm.slane %v2634_v50, %v9548_v56  ;;  %v11882_v33 = vsel %vm425_vm2, 0, %v3983_v17  ;;  %v3150_v58 = vrot.slane %v15772_v34, 4  ;;  %v1761_v11 = vshrl.u32 %v11674_v10, 16 }
 0x356   : > { %1798 = vrot.lane.b32.xlu2 %v1797_v8, %s9443_s13  ;;  %v1453_v12 = vshrl.u32 %v15773_v62, 16  ;;  %v4051_v6 = vpack.i.b16 %v11882_v33, %v11862_v38  ;;  %v2645_v21 = vrot.slane %v2644_v3, 4  ;;  %v2718_v42 = vsel %vm425_vm2, %v2717_v19, %v15774_v39  ;;  %v15776_v8 = vld [vmem:[#allocation62_spill] sm:$0xff] }
 0x357   : > { %1481 = vrot.lane.b32.xlu0 %v1480_v23, %s9445_s15  ;;  %v3640_v30 = vpack.i.b16 %v15776_v8, %v15775_v25  ;;  %v4108_v61 = vpack.c.b16 %v4107_v2, %v4107_v2  ;;  %v1492_v23 = vpack.c.b16 %v1491_v22, %v1491_v22  ;;  %v1763_v52 = vpack.i.b16 %v1762_v57, %v1761_v11  ;;  %v15779_v2 = vld [vmem:[#allocation18_spill] sm:$0xff] }
 0x358   : > { %1794 = vrot.lane.b32.xlu1 %v1793_v13, %s9449_s19  ;;  %v11859_v41 = vpop.permute.xlu2 %2278  ;;  %v4104_v13 = vpack.c.b16 %v4103_v5, %v4103_v5  ;;  %v1454_v14 = vpack.i.b16 %v1453_v12, %v1452_v1  ;;  %v3178_v17 = vrot.slane %v15777_v7, 4  ;;  %v11895_v10 = vsel %vm425_vm2, %v2645_v21, %v2638_v37  ;;  %v15780_v57 = vld [vmem:[#allocation42_spill] sm:$0xff] }
 0x359   : > { %v11866_v53 = vpop.permute.xlu0 %3732  ;;  %v2647_v26 = vrot.slane %v2638_v37, 4  ;;  %v3744_v51 = vsel %vm1171_vm7, %v3640_v30, %v11814_v45  ;;  %v11901_v50 = vperm.slane %v2718_v42, %v9548_v56  ;;  %v3156_v19 = vrot.slane %v15778_v0, 4 }
 0x35a   : > { %v11864_v60 = vpop.permute.xlu1 %3712  ;;  %v3151_v22 = vsel %vm425_vm2, %v3150_v58, %v15779_v2  ;;  %v4095_v5 = vunpack.c.l.b16 %v4051_v6  ;;  %v3185_v1 = vsel %vm425_vm2, %v3184_v28, %v15780_v57  ;;  %v3179_v45 = vsel %vm425_vm2, %v3178_v17, %v15781_v49  ;;  %v15782_v58 = vld [vmem:[#allocation17_spill] sm:$0xff] }
 0x35b   : > { %v1773_v34 = vshrl.u32 %v11703_v54, 16  ;;  %v4070_v11 = vshrl.u32 %v11838_v46, 16  ;;  %v3746_v12 = vsel %vm1175_vm8, %v3744_v51, %v15782_v58  ;;  %v1812_v39 = vunpack.c.l.b16 %v1763_v52 }
 0x35c   : > { %v1507_v6 = vunpack.c.l.b16 %v1454_v14  ;;  %v1785_v42 = vshrl.u32 %v11749_v35, 16  ;;  %v11922_v28 = vperm.slane %v3151_v22, %v9548_v56  ;;  %v1774_v8 = vshrl.u32 %v11717_v27, 16 }
 0x35d   : > { %v4071_v54 = vshrl.u32 %v11800_v31, 16  ;;  %v11928_v30 = vperm.slane %v3179_v45, %v9548_v56  ;;  %v1786_v52 = vshrl.u32 %v11755_v18, 16  ;;  %v3957_v17 = vrot.slane %v11708_v55, 4 }
 0x35e   : > { %4109 = vrot.lane.b32.xlu2 %v4108_v61, %s9444_s14  ;;  %v15783_v61 = vld [vmem:[#allocation66_spill] sm:$0xff]  ;;  %v1775_v14 = vpack.i.b16 %v1774_v8, %v1773_v34  ;;  %v2648_v27 = vsel %vm425_vm2, %v2644_v3, %v2647_v26  ;;  %v1813_v51 = vpack.c.b16 %v1812_v39, %v1812_v39  ;;  %v1508_v0 = vpack.c.b16 %v1507_v6, %v1507_v6  ;;  %v15786_v26 = vld [vmem:[#allocation35_spill] sm:$0xff] }
 0x35f   : > { %1493 = vrot.lane.b32.xlu0 %v1492_v23, %s9443_s13  ;;  %v3157_v23 = vsel %vm425_vm2, %v3156_v19, %v15783_v61  ;;  %v4072_v7 = vpack.i.b16 %v4071_v54, %v4070_v11  ;;  %v1787_v2 = vpack.i.b16 %v1786_v52, %v1785_v42  ;;  %v2731_v22 = vrot.slane %v11901_v50, 4  ;;  %v15784_v19 = vld [vmem:[#allocation55_spill] sm:$0xff]  ;;  %v15788_v52 = vld [vmem:[#allocation58_spill] sm:$0xff] }
 0x360   : > { %4105 = vrot.lane.b32.xlu1 %v4104_v13, %s9446_s16  ;;  %v11912_v37 = vpop.permute.xlu2 %2326  ;;  %v4096_v13 = vpack.c.b16 %v4095_v5, %v4095_v5  ;;  %v3164_v57 = vrot.slane %v11922_v28, 4  ;;  %v15785_v5 = vld [vmem:[#allocation64_spill] sm:$0xff]  ;;  %v11944_v18 = vperm.slane %v3185_v1, %v9548_v56  ;;  %v3192_v55 = vrot.slane %v11928_v30, 4 }
 0x361   : > { %v3697_v21 = vpop.permute.xlu0 %3696  ;;  %v3664_v49 = vpack.i.b16 %v15785_v5, %v15784_v19  ;;  %v11948_v3 = vperm.slane %v3157_v23, %v9548_v56  ;;  %v1824_v11 = vunpack.c.l.b16 %v1775_v14  ;;  %v4119_v58 = vunpack.c.l.b16 %v4072_v7 }
 0x362   : > { %v11916_v62 = vpop.permute.xlu1 %3736  ;;  %v3748_v25 = vsel %vm1178_vm11, %v3746_v12, %v3697_v21  ;;  %v11958_v1 = vperm.slane %v2648_v27, %v15580_v9  ;;  %v15787_v12 = vld [vmem:[#allocation23_spill] sm:$0xff]  ;;  %v4046_v8 = vshrl.u32 %v11725_v40, 16  ;;  %v4047_v7 = vshrl.u32 %v11684_v44, 16 }
 0x363   : > { %v3750_v35 = vsel %vm1181_vm13, %v3748_v25, %v11743_v24  ;;  %v3985_v24 = vrot.slane %v11687_v15, 4  ;;  %v3958_v15 = vsel %vm425_vm2, 0, %v3957_v17  ;;  %v3206_v21 = vrot.slane %v15787_v12, 4  ;;  %v15789_v17 = vld [vmem:[#allocation22_spill] sm:$0xff] }
 0x364   : > { %v3752_v45 = vsel %vm1184_vm14, %v3750_v35, %v15786_v26  ;;  %v3759_v39 = vsel %vm1171_vm7, %v3664_v49, %v11736_v4  ;;  %v1840_v25 = vunpack.c.l.b16 %v1787_v2  ;;  %v3165_v54 = vsel %vm425_vm2, %v11948_v3, %v3164_v57 }
 0x365   : > { %v3754_v61 = vsel %vm1187_vm3, %v3752_v45, %v11816_v47  ;;  %v3234_v35 = vrot.slane %v15788_v52, 4  ;;  %v2759_v2 = vpack.i.b16 %v11851_v29, %v11958_v1  ;;  %v4048_v5 = vpack.i.b16 %v4047_v7, %v4046_v8 }
 0x366   : > { %4097 = vrot.lane.b32.xlu2 %v4096_v13, %s9449_s19  ;;  %v3986_v13 = vsel %vm425_vm2, 0, %v3985_v24  ;;  %v3756_v47 = vsel %vm15471_vm4, %v3754_v61, %v11864_v60  ;;  %v1841_v19 = vpack.c.b16 %v1840_v25, %v1840_v25  ;;  %v11983_v49 = vperm.slane %v11895_v10, %v15580_v9  ;;  %v15790_v60 = vld [vmem:[#allocation59_spill] sm:$0xff]  ;;  %v15792_v61 = vld [vmem:[#allocation25_spill] sm:$0xff] }
 0x367   : > { %1814 = vrot.lane.b32.xlu0 %v1813_v51, %s9445_s15  ;;  %v4063_v4 = vpack.i.b16 %v3986_v13, %v3958_v15  ;;  %v1825_v51 = vpack.c.b16 %v1824_v11, %v1824_v11  ;;  %v2732_v24 = vsel %vm425_vm2, %v11797_v32, %v2731_v22  ;;  %v3193_v26 = vsel %vm425_vm2, %v11944_v18, %v3192_v55  ;;  %v15791_v11 = vld [vmem:[#allocation37_spill] sm:$0xff] }
 0x368   : > { %1509 = vrot.lane.b32.xlu1 %v1508_v0, %s9445_s15  ;;  %v11954_v34 = vpop.permute.xlu2 %2302  ;;  %v4120_v0 = vpack.c.b16 %v4119_v58, %v4119_v58  ;;  %v3235_v58 = vsel %vm425_vm2, %v3234_v35, %v15791_v11  ;;  %v3774_v22 = vunpack.c.l.b16 %v3756_v47  ;;  %v4091_v25 = vunpack.c.l.b16 %v4048_v5 }
 0x369   : > { %v3721_v42 = vpop.permute.xlu0 %3720  ;;  %v4064_v8 = vshrl.u32 %v3958_v15, 16  ;;  %v12012_v52 = vperm.slane %v3193_v26, %v15580_v9  ;;  %v12015_v35 = vperm.slane %v3235_v58, %v9548_v56  ;;  %v3162_v7 = vrot.slane %v11948_v3, 4 }
 0x36a   : > { %v3725_v6 = vpop.permute.xlu1 %3724  ;;  %v3761_v23 = vsel %vm1175_vm8, %v3759_v39, %v3721_v42  ;;  %v12003_v39 = vperm.slane %v3165_v54, %v15580_v9  ;;  %v4111_v42 = vunpack.c.l.b16 %v4063_v4  ;;  %v4053_v4 = vshrl.u32 %v11882_v33, 16 }
 0x36b   : > { %v3763_v14 = vsel %vm1178_vm11, %v3761_v23, %v3725_v6  ;;  %v3212_v23 = vrot.slane %v15792_v61, 4  ;;  %v12023_v15 = vperm.slane %v2732_v24, %v15580_v9  ;;  %v12030_v3 = vperm.slane %v11848_v59, %v15580_v9 }
 0x36c   : > { %v3765_v27 = vsel %vm1181_vm13, %v3763_v14, %v15789_v17  ;;  %v4065_v17 = vshrl.u32 %v3986_v13, 16  ;;  %v12034_v33 = vperm.slane %v11878_v43, %v15580_v9  ;;  %v15793_v13 = vld [vmem:[#allocation24_spill] sm:$0xff]  ;;  %v12042_v5 = vperm.slane %v11874_v48, %v9548_v56 }
 0x36d   : > { %v3767_v57 = vsel %vm1184_vm14, %v3765_v27, %v11866_v53  ;;  %v3207_v53 = vsel %vm425_vm2, %v3206_v21, %v15790_v60  ;;  %v3163_v59 = vsel %vm425_vm2, %v3162_v7, %v11922_v28  ;;  %v2785_v60 = vshrl.u32 %v12023_v15, 16 }
 0x36e   : > { %v3769_v45 = vsel %vm1187_vm3, %v3767_v57, %v11916_v62  ;;  %4121 = vrot.lane.b32.xlu2 %v4120_v0, %s9448_s18  ;;  %v2805_v62 = vunpack.c.l.b16 %v2759_v2  ;;  %v12018_v54 = vperm.slane %v3207_v53, %v9548_v56  ;;  %v4112_v0 = vpack.c.b16 %v4111_v42, %v4111_v42 }
 0x36f   : > { %v3771_v10 = vsel %vm15471_vm4, %v3769_v45, %v11811_v63  ;;  %1826 = vrot.lane.b32.xlu0 %v1825_v51, %s9443_s13  ;;  %v4052_v63 = vshrl.u32 %v11862_v38, 16  ;;  %v3190_v38 = vrot.slane %v11944_v18, 4  ;;  %v3276_v51 = vpack.i.b16 %v12012_v52, %v12003_v39 }
 0x370   : > { %1842 = vrot.lane.b32.xlu1 %v1841_v19, %s9445_s15  ;;  %v3775_v55 = vunpack.c.l.b16 %v3771_v10  ;;  %v12000_v12 = vpop.permute.xlu2 %2314  ;;  %v2806_v27 = vpack.c.b16 %v2805_v62, %v2805_v62  ;;  %v4092_v2 = vpack.c.b16 %v4091_v25, %v4091_v25  ;;  %v4066_v47 = vpack.i.b16 %v4065_v17, %v4064_v8 }
 0x371   : > { %v12007_v21 = vpop.permute.xlu0 %2318  ;;  %v4054_v57 = vpack.i.b16 %v4053_v4, %v4052_v63  ;;  %v3213_v18 = vsel %vm425_vm2, %v3212_v23, %v15793_v13  ;;  %v3248_v19 = vrot.slane %v12015_v35, 4  ;;  %v3220_v24 = vrot.slane %v12018_v54, 4 }
 0x372   : > { %v12005_v6 = vpop.permute.xlu1 %2322  ;;  %v3776_v14 = vpack.c.b16 %v3775_v55, %v3774_v22  ;;  %v3191_v43 = vsel %vm425_vm2, %v3190_v38, %v11928_v30  ;;  %v3322_v45 = vunpack.c.l.b16 %v3276_v51  ;;  %v2748_v48 = vshrl.u32 %v11983_v49, 16 }
 0x373   : > { %v12056_v53 = vperm.slane %v3213_v18, %v9548_v56  ;;  %v4115_v58 = vunpack.c.l.b16 %v4066_v47  ;;  %v4099_v10 = vunpack.c.l.b16 %v4054_v57  ;;  %v12063_v22 = vperm.slane %v3163_v59, %v15580_v9 }
 0x374   : > { %3778 = vst [vmem:[#allocation3 + $0x30] sm:$0xff] %v3776_v14  ;;  %v3249_v30 = vsel %vm425_vm2, %v12042_v5, %v3248_v19  ;;  %v2784_v55 = vshrl.u32 %v12034_v33, 16  ;;  %v2749_v62 = vshrl.u32 %v12030_v3, 16  ;;  %v12070_v42 = vperm.slane %v3191_v43, %v15580_v9 }
 0x375   : > { %v3221_v25 = vsel %vm425_vm2, %v12056_v53, %v3220_v24  ;;  %v3323_v8 = vpack.c.b16 %v3322_v45, %v3322_v45  ;;  %v2783_v61 = vpack.i.b16 %v12023_v15, %v12034_v33  ;;  %v12077_v14 = vperm.slane %v3249_v30, %v15580_v9  ;;  %v15794_v24 = vld [vmem:[#allocation16_spill] sm:$0xff] }
 0x376   : > { %2807 = vrot.lane.b32.xlu2 %v2806_v27, %s9446_s16  ;;  %v2786_v63 = vpack.i.b16 %v2785_v60, %v2784_v55  ;;  %v2750_v23 = vpack.i.b16 %v2749_v62, %v2748_v48  ;;  %v4116_v7 = vpack.c.b16 %v4115_v58, %v4115_v58  ;;  %v4100_v17 = vpack.c.b16 %v4099_v10, %v4099_v10 }
 0x377   : > { %4113 = vrot.lane.b32.xlu0 %v4112_v0, %s9447_s17  ;;  %v3265_v4 = vshrl.u32 %v12063_v22, 16  ;;  %v2701_v38 = vrot.slane %v11842_v16, 4  ;;  %v12083_v27 = vperm.slane %v3221_v25, %v15580_v9  ;;  %v3266_v57 = vshrl.u32 %v12070_v42, 16  ;;  %v15795_v16 = vld [vmem:[#allocation9_spill] sm:$0xff] }
 0x378   : > { %4093 = vrot.lane.b32.xlu1 %v4092_v2, %s9448_s18  ;;  %v12051_v26 = vpop.permute.xlu2 %1501  ;;  %v2837_v0 = vunpack.c.l.b16 %v2786_v63  ;;  %v2833_v2 = vunpack.c.l.b16 %v2783_v61  ;;  %v2793_v47 = vunpack.c.l.b16 %v2750_v23  ;;  %v3302_v19 = vshrl.u32 %v12077_v14, 16 }
 0x379   : > { %v12060_v28 = vpop.permute.xlu0 %2294  ;;  %v15796_v59 = vpack.i.b16 %v15794_v24, %v15795_v16  ;;  %v3267_v45 = vpack.i.b16 %v3266_v57, %v3265_v4  ;;  %v2729_v60 = vrot.slane %v11797_v32, 4  ;;  %v2702_v48 = vsel %vm425_vm2, %v2701_v38, %v11824_v36  ;;  %v15798_v4 = vld [vmem:[#allocation67_spill] sm:$0xff] }
 0x37a   : > { %v12058_v11 = vpop.permute.xlu1 %2298  ;;  %v3301_v58 = vshrl.u32 %v12083_v27, 16  ;;  %v2838_v10 = vpack.c.b16 %v2837_v0, %v2837_v0  ;;  %v2834_v30 = vpack.c.b16 %v2833_v2, %v2833_v2  ;;  %v2794_v55 = vpack.c.b16 %v2793_v47, %v2793_v47 }
 0x37b   : > { %v3300_v62 = vpack.i.b16 %v12077_v14, %v12083_v27  ;;  %v2743_v63 = vrot.slane %v12023_v15, 4  ;;  %v2659_v61 = vrot.slane %v11958_v1, 4  ;;  %v3310_v32 = vunpack.c.l.b16 %v3267_v45  ;;  %v15797_v15 = vld [vmem:[#allocation68_spill] sm:$0xff] }
 0x37c   : > { %v2730_v36 = vsel %vm425_vm2, %v2729_v60, %v11901_v50  ;;  %v2715_v23 = vrot.slane %v12034_v33, 4  ;;  %v15799_v38 = vpack.i.b16 %v15797_v15, %v15798_v4  ;;  %v2760_v24 = vshrl.u32 %v11958_v1, 16 }
 0x37d   : > { %v3350_v47 = vunpack.c.l.b16 %v3300_v62  ;;  %v12131_v16 = vperm.slane %v2730_v36, %v15580_v9  ;;  %v3260_v62 = vrot.slane %v12077_v14, 4  ;;  %v3246_v4 = vrot.slane %v12042_v5, 4 }
 0x37e   : > { %3324 = vrot.lane.b32.xlu2 %v3323_v8, %s9446_s16  ;;  %v3303_v8 = vpack.i.b16 %v3302_v19, %v3301_v58  ;;  %v2334_v0 = vsel %vm1171_vm7, %v15799_v38, %v11859_v41  ;;  %v12127_v19 = vsel %vm425_vm2, 0, %v2659_v61  ;;  %v12139_v60 = vsel %vm425_vm2, 0, %v2715_v23 }
 0x37f   : > { %4101 = vrot.lane.b32.xlu0 %v4100_v17, %s9443_s13  ;;  %v12112_v17 = vperm.slane %v2702_v48, %v15580_v9  ;;  %v3351_v58 = vpack.c.b16 %v3350_v47, %v3350_v47  ;;  %v2773_v15 = vshrl.u32 %v12131_v16, 16 }
 0x380   : > { %4117 = vrot.lane.b32.xlu1 %v4116_v7, %s9445_s15  ;;  %v12087_v51 = vpop.permute.xlu2 %1834  ;;  %v2687_v7 = vrot.slane %v11851_v29, 4  ;;  %v3354_v33 = vunpack.c.l.b16 %v3303_v8  ;;  %v2741_v8 = vrot.slane %v12131_v16, 4 }
 0x381   : > { %v2307_v18 = vpop.permute.xlu0 %2306 }
 0x382   : > { %v2311_v13 = vpop.permute.xlu1 %2310  ;;  %v2349_v43 = vsel %vm1171_vm7, %v15796_v59, %v2307_v18  ;;  %v12124_v18 = vsel %vm425_vm2, 0, %v2743_v63  ;;  %v2761_v59 = vshrl.u32 %v11851_v29, 16  ;;  %v12142_v48 = vsel %vm425_vm2, 0, %v2687_v7 }
 0x383   : > { %v2351_v25 = vsel %vm1175_vm8, %v2349_v43, %v2311_v13  ;;  %v2765_v29 = vpack.i.b16 %v12142_v48, %v12127_v19 }
 0x384   : > { %v2353_v50 = vsel %vm1178_vm11, %v2351_v25, %v12000_v12  ;;  %v3311_v12 = vpack.c.b16 %v3310_v32, %v3310_v32 }
 0x385   : > { %v2355_v45 = vsel %vm1181_vm13, %v2353_v50, %v12007_v21  ;;  %v3355_v21 = vpack.c.b16 %v3354_v33, %v3354_v33  ;;  %v2813_v32 = vunpack.c.l.b16 %v2765_v29  ;;  %v2766_v29 = vshrl.u32 %v12127_v19, 16 }
 0x386   : > { %2795 = vrot.lane.b32.xlu2 %v2794_v55, %s9448_s18  ;;  %v2762_v55 = vpack.i.b16 %v2761_v59, %v2760_v24  ;;  %v3278_v19 = vshrl.u32 %v12012_v52, 16 }
 0x387   : > { %2835 = vrot.lane.b32.xlu0 %v2834_v30, %s9446_s16  ;;  %v2814_v33 = vpack.c.b16 %v2813_v32, %v2813_v32 }
 0x388   : > { %2839 = vrot.lane.b32.xlu1 %v2838_v10, %s9444_s14  ;;  %v12121_v2 = vpop.permute.xlu2 %1477  ;;  %v2789_v10 = vpack.i.b16 %v12124_v18, %v12139_v60  ;;  %v2809_v7 = vunpack.c.l.b16 %v2762_v55 }
 0x389   : > { %v2283_v13 = vpop.permute.xlu0 %2282 }
 0x38a   : > { %v2287_v57 = vpop.permute.xlu1 %2286  ;;  %v2336_v41 = vsel %vm1175_vm8, %v2334_v0, %v2283_v13  ;;  %v2841_v61 = vunpack.c.l.b16 %v2789_v10  ;;  %v2742_v0 = vsel %vm425_vm2, 0, %v2741_v8  ;;  %v3204_v10 = vrot.slane %v12012_v52, 4 }
 0x38b   : > { %v2338_v43 = vsel %vm1178_vm11, %v2336_v41, %v2287_v57  ;;  %v2772_v57 = vshrl.u32 %v12112_v17, 16  ;;  %v2779_v52 = vshrl.u32 %v2742_v0, 16 }
 0x38c   : > { %v2340_v1 = vsel %vm1181_vm13, %v2338_v43, %v11777_v20  ;;  %v2357_v20 = vsel %vm1184_vm14, %v2355_v45, %v12005_v6  ;;  %v2842_v13 = vpack.c.b16 %v2841_v61, %v2841_v61  ;;  %v3176_v43 = vrot.slane %v12003_v39, 4 }
 0x38d   : > { %v2342_v30 = vsel %vm1184_vm14, %v2340_v1, %v12060_v28  ;;  %v3232_v28 = vrot.slane %v12083_v27, 4  ;;  %v2359_v6 = vsel %vm1187_vm3, %v2357_v20, %v11912_v37  ;;  %v12173_v27 = vsel %vm425_vm2, 0, %v3260_v62 }
 0x38e   : > { %3312 = vrot.lane.b32.xlu2 %v3311_v12, %s9448_s18  ;;  %v2344_v25 = vsel %vm1187_vm3, %v2342_v30, %v12058_v11  ;;  %v2713_v11 = vrot.slane %v12112_v17, 4  ;;  %v2774_v59 = vpack.i.b16 %v2773_v15, %v2772_v57  ;;  %v3247_v45 = vsel %vm425_vm2, %v3246_v4, %v12015_v35 }
 0x38f   : > { %3352 = vrot.lane.b32.xlu0 %v3351_v58, %s9446_s16  ;;  %v2346_v14 = vsel %vm15471_vm4, %v2344_v25, %v11954_v34  ;;  %v3218_v34 = vrot.slane %v12056_v53, 4  ;;  %v12181_v37 = vsel %vm425_vm2, 0, %v3232_v28  ;;  %v2810_v53 = vpack.c.b16 %v2809_v7, %v2809_v7 }
 0x390   : > { %3356 = vrot.lane.b32.xlu1 %v3355_v21, %s9444_s14  ;;  %v12162_v63 = vpop.permute.xlu2 %1489  ;;  %v2364_v50 = vunpack.c.l.b16 %v2346_v14  ;;  %v2714_v24 = vsel %vm425_vm2, 0, %v2713_v11  ;;  %v3306_v5 = vpack.i.b16 %v12173_v27, %v12181_v37  ;;  %v2821_v62 = vunpack.c.l.b16 %v2774_v59 }
 0x391   : > { %v2331_v23 = vpop.permute.xlu0 %2330  ;;  %v2777_v12 = vpack.i.b16 %v2742_v0, %v2714_v24  ;;  %v3219_v30 = vsel %vm425_vm2, %v3218_v34, %v12018_v54  ;;  %v3277_v25 = vshrl.u32 %v12003_v39, 16  ;;  %v12204_v20 = vperm.slane %v3247_v45, %v15580_v9 }
 0x392   : > { %v12167_v36 = vpop.permute.xlu1 %1497  ;;  %v2361_v38 = vsel %vm15471_vm4, %v2359_v6, %v2331_v23  ;;  %v3358_v58 = vunpack.c.l.b16 %v3306_v5  ;;  %v3177_v8 = vsel %vm425_vm2, 0, %v3176_v43  ;;  %v2767_v28 = vshrl.u32 %v12142_v48, 16 }
 0x393   : > { %v2365_v47 = vunpack.c.l.b16 %v2361_v38  ;;  %v2825_v35 = vunpack.c.l.b16 %v2777_v12  ;;  %v12210_v14 = vperm.slane %v3219_v30, %v15580_v9  ;;  %v3205_v61 = vsel %vm425_vm2, 0, %v3204_v10 }
 0x394   : > { %v3359_v54 = vpack.c.b16 %v3358_v58, %v3358_v58  ;;  %v2768_v32 = vpack.i.b16 %v2767_v28, %v2766_v29  ;;  %v2822_v6 = vpack.c.b16 %v2821_v62, %v2821_v62  ;;  %v3282_v23 = vpack.i.b16 %v3205_v61, %v3177_v8  ;;  %v15800_v29 = vld [vmem:[#allocation56_spill] sm:$0xff]  ;;  %v15801_v62 = vld [vmem:[#allocation57_spill] sm:$0xff] }
 0x395   : > { %v2366_v41 = vpack.c.b16 %v2365_v47, %v2364_v50  ;;  %v2826_v11 = vpack.c.b16 %v2825_v35, %v2825_v35  ;;  %v3279_v39 = vpack.i.b16 %v3278_v19, %v3277_v25  ;;  %v3258_v7 = vrot.slane %v12204_v20, 4 }
 0x396   : > { %2843 = vrot.lane.b32.xlu2 %v2842_v13, %s9447_s17  ;;  %v2817_v15 = vunpack.c.l.b16 %v2768_v32  ;;  %v3290_v4 = vshrl.u32 %v12204_v20, 16  ;;  %v3230_v34 = vrot.slane %v12210_v14, 4  ;;  %v3330_v47 = vunpack.c.l.b16 %v3282_v23 }
 0x397   : > { %2368 = vst [vmem:[#allocation3 + $0x18] sm:$0xff] %v2366_v41  ;;  %2811 = vrot.lane.b32.xlu0 %v2810_v53, %s9444_s14  ;;  %v3326_v57 = vunpack.c.l.b16 %v3279_v39  ;;  %v2778_v13 = vshrl.u32 %v2714_v24, 16  ;;  %v12227_v5 = vsel %vm425_vm2, 0, %v3258_v7  ;;  %v2657_v0 = vrot.slane %v11983_v49, 4 }
 0x398   : > { %2815 = vrot.lane.b32.xlu1 %v2814_v33, %s9447_s17  ;;  %v12192_v1 = vpop.permute.xlu2 %1810  ;;  %v3289_v33 = vshrl.u32 %v12210_v14, 16  ;;  %v2818_v53 = vpack.c.b16 %v2817_v15, %v2817_v15  ;;  %v3231_v59 = vsel %vm425_vm2, 0, %v3230_v34  ;;  %v2685_v43 = vrot.slane %v12030_v3, 4 }
 0x399   : > { %v12200_v55 = vpop.permute.xlu0 %1469  ;;  %v2780_v41 = vpack.i.b16 %v2779_v52, %v2778_v13  ;;  %v3331_v45 = vpack.c.b16 %v3330_v47, %v3330_v47  ;;  %v3327_v58 = vpack.c.b16 %v3326_v57, %v3326_v57  ;;  %v3294_v10 = vpack.i.b16 %v12227_v5, %v3231_v59 }
 0x39a   : > { %v12198_v21 = vpop.permute.xlu1 %1830  ;;  %v3291_v12 = vpack.i.b16 %v3290_v4, %v3289_v33  ;;  %v2658_v24 = vsel %vm425_vm2, 0, %v2657_v0  ;;  %v12237_v30 = vperm.slane %v15800_v29, %v15580_v9  ;;  %v3283_v35 = vshrl.u32 %v3177_v8, 16 }
 0x39b   : > { %v12243_v25 = vperm.slane %v15801_v62, %v15580_v9  ;;  %v2829_v19 = vunpack.c.l.b16 %v2780_v41  ;;  %v3284_v32 = vshrl.u32 %v3205_v61, 16  ;;  %v3342_v39 = vunpack.c.l.b16 %v3294_v10 }
 0x39c   : > { %v2754_v7 = vshrl.u32 %v2658_v24, 16  ;;  %v3174_v52 = vrot.slane %v12063_v22, 4  ;;  %v3202_v34 = vrot.slane %v12070_v42, 4  ;;  %v3296_v10 = vshrl.u32 %v12227_v5, 16 }
 0x39d   : > { %v4081_v8 = vpack.i.b16 %v12237_v30, %v12243_v25  ;;  %v3285_v15 = vpack.i.b16 %v3284_v32, %v3283_v35  ;;  %v2830_v47 = vpack.c.b16 %v2829_v19, %v2829_v19  ;;  %v3343_v13 = vpack.c.b16 %v3342_v39, %v3342_v39 }
 0x39e   : > { %3360 = vrot.lane.b32.xlu2 %v3359_v54, %s9447_s17  ;;  %v3338_v54 = vunpack.c.l.b16 %v3291_v12  ;;  %v3175_v0 = vsel %vm425_vm2, 0, %v3174_v52  ;;  %v4013_v12 = vrot.slane %v12243_v25, 4  ;;  %v3295_v19 = vshrl.u32 %v3231_v59, 16 }
 0x39f   : > { %2823 = vrot.lane.b32.xlu0 %v2822_v6, %s9448_s18  ;;  %v3334_v41 = vunpack.c.l.b16 %v3285_v15  ;;  %v4011_v39 = vrot.slane %v11838_v46, 4  ;;  %v4039_v15 = vrot.slane %v11800_v31, 4 }
 0x3a0   : > { %2827 = vrot.lane.b32.xlu1 %v2826_v11, %s9449_s19  ;;  %v12217_v48 = vpop.permute.xlu2 %1822  ;;  %v2686_v11 = vsel %vm425_vm2, 0, %v2685_v43  ;;  %v3339_v61 = vpack.c.b16 %v3338_v54, %v3338_v54  ;;  %v4041_v43 = vrot.slane %v12237_v30, 4  ;;  %v4014_v54 = vsel %vm425_vm2, 0, %v4013_v12 }
 0x3a1   : > { %v12223_v50 = vpop.permute.xlu0 %1802  ;;  %v2755_v4 = vshrl.u32 %v2686_v11, 16  ;;  %v2753_v57 = vpack.i.b16 %v2686_v11, %v2658_v24  ;;  %v3271_v24 = vshrl.u32 %v3175_v0, 16  ;;  %v12276_v59 = vsel %vm425_vm2, 0, %v4011_v39 }
 0x3a2   : > { %v12221_v38 = vpop.permute.xlu1 %1473  ;;  %v4042_v32 = vsel %vm425_vm2, 0, %v4041_v43 }
 0x3a3   : > { %v2756_v33 = vpack.i.b16 %v2755_v4, %v2754_v7  ;;  %v4088_v7 = vshrl.u32 %v4014_v54, 16  ;;  %v4089_v52 = vshrl.u32 %v4042_v32, 16  ;;  %v3335_v4 = vpack.c.b16 %v3334_v41, %v3334_v41 }
 0x3a4   : > { %v4087_v5 = vpack.i.b16 %v4042_v32, %v4014_v54  ;;  %v2790_v32 = vshrl.u32 %v12139_v60, 16  ;;  %v4131_v60 = vunpack.c.l.b16 %v4081_v8 }
 0x3a5   : > { %v2801_v62 = vunpack.c.l.b16 %v2756_v33 }
 0x3a6   : > { %2819 = vrot.lane.b32.xlu2 %v2818_v53, %s9445_s15  ;;  %v3203_v53 = vsel %vm425_vm2, 0, %v3202_v34 }
 0x3a7   : > { %3328 = vrot.lane.b32.xlu0 %v3327_v58, %s9444_s14  ;;  %v2797_v58 = vunpack.c.l.b16 %v2753_v57  ;;  %v3272_v11 = vshrl.u32 %v3203_v53, 16  ;;  %v3270_v34 = vpack.i.b16 %v3203_v53, %v3175_v0  ;;  %v2802_v33 = vpack.c.b16 %v2801_v62, %v2801_v62 }
 0x3a8   : > { %3332 = vrot.lane.b32.xlu1 %v3331_v45, %s9447_s17  ;;  %v12245_v28 = vpop.permute.xlu2 %1465  ;;  %v4040_v0 = vsel %vm425_vm2, 0, %v4039_v15  ;;  %v4082_v62 = vshrl.u32 %v12243_v25, 16  ;;  %v15803_v25 = vld [vmem:[#allocation36_spill] sm:$0xff] }
 0x3a9   : > { %v12250_v23 = vpop.permute.xlu0 %1457  ;;  %v3273_v57 = vpack.i.b16 %v3272_v11, %v3271_v24  ;;  %v3314_v43 = vunpack.c.l.b16 %v3270_v34  ;;  %v4076_v24 = vshrl.u32 %v12276_v59, 16  ;;  %v4077_v11 = vshrl.u32 %v4040_v0, 16 }
 0x3aa   : > { %v12248_v6 = vpop.permute.xlu1 %1485 }
 0x3ab   : > { %v3318_v54 = vunpack.c.l.b16 %v3273_v57  ;;  %v4078_v34 = vpack.i.b16 %v4077_v11, %v4076_v24 }
 0x3ad   : > { %v3319_v15 = vpack.c.b16 %v3318_v54, %v3318_v54  ;;  %v4132_v54 = vpack.c.b16 %v4131_v60, %v4131_v60  ;;  %v15805_v60 = vld [vmem:[#allocation10_spill] sm:$0xff] }
 0x3ae   : > { %2831 = vrot.lane.b32.xlu2 %v2830_v47, %s9443_s13  ;;  %v3297_v47 = vpack.i.b16 %v3296_v10, %v3295_v19  ;;  %v2791_v10 = vshrl.u32 %v12124_v18, 16  ;;  %v4083_v19 = vshrl.u32 %v12237_v30, 16  ;;  %v15802_v30 = vld [vmem:[#allocation45_spill] sm:$0xff] }
 0x3af   : > { %3340 = vrot.lane.b32.xlu0 %v3339_v61, %s9448_s18  ;;  %v4090_v61 = vpack.i.b16 %v4089_v52, %v4088_v7  ;;  %v3315_v52 = vpack.c.b16 %v3314_v43, %v3314_v43  ;;  %v3308_v43 = vshrl.u32 %v12173_v27, 16  ;;  %v1409_v8 = vpack.i.b16 %v15803_v25, %v15802_v30 }
 0x3b0   : > { %3344 = vrot.lane.b32.xlu1 %v3343_v13, %s9449_s19  ;;  %v12263_v45 = vpop.permute.xlu2 %1798  ;;  %v2798_v13 = vpack.c.b16 %v2797_v58, %v2797_v58  ;;  %v3346_v41 = vunpack.c.l.b16 %v3297_v47  ;;  %v12292_v39 = vpack.i.b16 %v4083_v19, %v4082_v62 }
 0x3b1   : > { %v12268_v35 = vpop.permute.xlu0 %1790 }
 0x3b2   : > { %v12266_v29 = vpop.permute.xlu1 %1806  ;;  %v3347_v7 = vpack.c.b16 %v3346_v41, %v3346_v41  ;;  %v3307_v41 = vshrl.u32 %v12181_v37, 16  ;;  %v4139_v37 = vunpack.c.l.b16 %v4087_v5 }
 0x3b4   : > { %v3309_v62 = vpack.i.b16 %v3308_v43, %v3307_v41  ;;  %v4140_v41 = vpack.c.b16 %v4139_v37, %v4139_v37  ;;  %v4191_v37 = vld [vmem:[#allocation2 + $0x1c] sm:$0xf] }
 0x3b6   : > { %3336 = vrot.lane.b32.xlu2 %v3335_v4, %s9445_s15  ;;  %v2792_v4 = vpack.i.b16 %v2791_v10, %v2790_v32  ;;  %v4143_v32 = vunpack.c.l.b16 %v4090_v61  ;;  %v4187_v61 = vld [vmem:[#allocation2 + $0xc] sm:$0xe] }
 0x3b7   : > { %2799 = vrot.lane.b32.xlu0 %v2798_v13, %s9449_s19 }
 0x3b8   : > { %2803 = vrot.lane.b32.xlu1 %v2802_v33, %s9443_s13  ;;  %v12280_v12 = vpop.permute.xlu2 %4109  ;;  %v2845_v13 = vunpack.c.l.b16 %v2792_v4  ;;  %v4127_v33 = vunpack.c.l.b16 %v4078_v34  ;;  %v12316_v4 = vld [vmem:[#allocation2 + $0x4] sm:$0xf]  ;;  %v15804_v34 = vld [vmem:[#allocation53_spill] sm:$0xff] }
 0x3b9   : > { %v12285_v58 = vpop.permute.xlu0 %1505 }
 0x3ba   : > { %v12283_v53 = vpop.permute.xlu1 %1818  ;;  %v2846_v10 = vpack.c.b16 %v2845_v13, %v2845_v13  ;;  %v4128_v24 = vpack.c.b16 %v4127_v33, %v4127_v33  ;;  %v1433_v13 = vpack.i.b16 %v15805_v60, %v15804_v34  ;;  %v4144_v33 = vpack.c.b16 %v4143_v32, %v4143_v32 }
 0x3be   : > { %3348 = vrot.lane.b32.xlu2 %v3347_v7, %s9443_s13  ;;  %v3362_v7 = vunpack.c.l.b16 %v3309_v62 }
 0x3bf   : > { %3316 = vrot.lane.b32.xlu0 %v3315_v52, %s9449_s19  ;;  %v1513_v52 = vsel %vm1171_vm7, %v1409_v8, %v12250_v23  ;;  %v12326_v23 = vld [vmem:[#allocation2 + $0x10] sm:$0xf]  ;;  %v4186_v8 = vld [vmem:[#allocation2 + $0x8] sm:$0x1] }
 0x3c0   : > { %3320 = vrot.lane.b32.xlu1 %v3319_v15, %s9443_s13  ;;  %v12297_v18 = vpop.permute.xlu2 %4097  ;;  %v3363_v43 = vpack.c.b16 %v3362_v7, %v3362_v7  ;;  %v4241_v25 = vrot.slane %v12326_v23, 5  ;;  %v4237_v60 = vrot.slane %v4186_v8, 5 }
 0x3c1   : > { %v12302_v57 = vpop.permute.xlu0 %1838 }
 0x3c2   : > { %v1462_v47 = vpop.permute.xlu1 %1461 }
 0x3c3   : > { %v1515_v15 = vsel %vm1175_vm8, %v1513_v52, %v1462_v47  ;;  %v4234_v47 = vrot.slane %v12316_v4, 5 }
 0x3c4   : > { %v1517_v5 = vsel %vm1178_vm11, %v1515_v15, %v12245_v28  ;;  %v15807_v15 = vld [vmem:[#allocation44_spill] sm:$0xff] }
 0x3c5   : > { %v4236_v7 = vrot.slane %v4234_v47, 4 }
 0x3c6   : > { %4133 = vrot.lane.b32.xlu2 %v4132_v54, %s9446_s16  ;;  %v4075_v54 = vpack.i.b16 %v4040_v0, %v12276_v59  ;;  %v9172_v59 = vrot.slane %v4187_v61, 9  ;;  %v1519_v0 = vsel %vm1181_vm13, %v1517_v5, %v12200_v55  ;;  %v15806_v55 = vld [vmem:[#allocation12_spill] sm:$0xff]  ;;  %v4190_v5 = vld [vmem:[#allocation2 + $0x18] sm:$0xe] }
 0x3c7   : > { %2847 = vrot.lane.b32.xlu0 %v2846_v10, %s9445_s15  ;;  %v1528_v10 = vsel %vm1171_vm7, %v1433_v13, %v12248_v6  ;;  %v1742_v34 = vpack.i.b16 %v15807_v15, %v15806_v55  ;;  %v15809_v55 = vld [vmem:[#allocation20_spill] sm:$0xff]  ;;  %v15810_v15 = vld [vmem:[#allocation54_spill] sm:$0xff] }
 0x3c8   : > { %4129 = vrot.lane.b32.xlu1 %v4128_v24, %s9443_s13  ;;  %v12311_v19 = vpop.permute.xlu2 %4121  ;;  %v1530_v28 = vsel %vm1175_vm8, %v1528_v10, %v12162_v63  ;;  %v4123_v30 = vunpack.c.l.b16 %v4075_v54  ;;  %v1521_v63 = vsel %vm1184_vm14, %v1519_v0, %v12221_v38  ;;  %v4192_v0 = vld [vmem:[#allocation2 + $0x20] sm:$0x1] }
 0x3c9   : > { %v1482_v27 = vpop.permute.xlu0 %1481  ;;  %v1846_v54 = vsel %vm1171_vm7, %v1742_v34, %v12268_v35  ;;  %v1523_v10 = vsel %vm1187_vm3, %v1521_v63, %v12121_v2  ;;  %v1766_v34 = vpack.i.b16 %v15810_v15, %v15809_v55  ;;  %v4199_v55 = vld [vmem:[#allocation2 + $0x3c] sm:$0xe] }
 0x3ca   : > { %v1795_v11 = vpop.permute.xlu1 %1794  ;;  %v4124_v13 = vpack.c.b16 %v4123_v30, %v4123_v30  ;;  %v1525_v35 = vsel %vm15471_vm4, %v1523_v10, %v1482_v27  ;;  %v4251_v27 = vrot.slane %v4192_v0, 5  ;;  %v4195_v0 = vld [vmem:[#allocation2 + $0x2c] sm:$0x1] }
 0x3cb   : > { %v1848_v38 = vsel %vm1175_vm8, %v1846_v54, %v1795_v11  ;;  %v4135_v11 = vunpack.c.l.b16 %v12292_v39  ;;  %v12387_v54 = vld [vmem:[#allocation2 + $0x34] sm:$0xf] }
 0x3cc   : > { %v1850_v2 = vsel %vm1178_vm11, %v1848_v38, %v12263_v45  ;;  %v1861_v45 = vsel %vm1171_vm7, %v1766_v34, %v12283_v53  ;;  %v4201_v34 = vld [vmem:[#allocation2 + $0x44] sm:$0x1] }
 0x3cd   : > { %v4136_v39 = vpack.c.b16 %v4135_v11, %v4135_v11 }
 0x3ce   : > { %4145 = vrot.lane.b32.xlu2 %v4144_v33, %s9445_s15 }
 0x3cf   : > { %3364 = vrot.lane.b32.xlu0 %v3363_v43, %s9445_s15  ;;  %v4242_v43 = vsel %vm9890_vm15, %v9172_v59, %v4241_v25 }
 0x3d0   : > { %4141 = vrot.lane.b32.xlu1 %v4140_v41, %s9447_s17  ;;  %v12331_v24 = vpop.permute.xlu2 %2807  ;;  %v4248_v41 = vrot.slane %v4191_v37, 5 }
 0x3d1   : > { %v1494_v62 = vpop.permute.xlu0 %1493 }
 0x3d2   : > { %v12335_v6 = vpop.permute.xlu1 %4105  ;;  %v1532_v32 = vsel %vm1178_vm11, %v1530_v28, %v1494_v62  ;;  %v4250_v30 = vrot.slane %v4248_v41, 4 }
 0x3d3   : > { %v1534_v52 = vsel %vm1181_vm13, %v1532_v32, %v12167_v36  ;;  %v4238_v36 = vsel %vm9890_vm15, %v4236_v7, %v4237_v60  ;;  %v9173_v32 = vrot.slane %v4190_v5, 9  ;;  %v1543_v7 = vunpack.c.l.b16 %v1525_v35 }
 0x3d4   : > { %v1536_v61 = vsel %vm1184_vm14, %v1534_v52, %v12051_v26  ;;  %v12374_v52 = vld [vmem:[#allocation2 + $0x28] sm:$0xf]  ;;  %v4252_v60 = vsel %vm9890_vm15, %v4250_v30, %v4251_v27  ;;  %v4262_v35 = vrot.slane %v12387_v54, 5  ;;  %v4200_v30 = vld [vmem:[#allocation2 + $0x40] sm:$0xf] }
 0x3d5   : > { %v1538_v62 = vsel %vm1187_vm3, %v1536_v61, %v12285_v58  ;;  %v1852_v58 = vsel %vm1181_vm13, %v1850_v2, %v12223_v50  ;;  %v4184_v50 = vld [vmem:[#allocation2] sm:$0xe]  ;;  %v4269_v27 = vrot.slane %v4200_v30, 5  ;;  %v4207_v54 = vld [vmem:[#allocation2 + $0x5c] sm:$0x1] }
 0x3d6   : > { %4292 = vrot.lane.b32.xlu2 %v4242_v43, %s9454_s22  ;;  %v4196_v43 = vld [vmem:[#allocation2 + $0x30] sm:$0xe]  ;;  %v1854_v61 = vsel %vm1184_vm14, %v1852_v58, %v12266_v29 }
 0x3d7   : > { %4125 = vrot.lane.b32.xlu0 %v4124_v13, %s9449_s19  ;;  %v4249_v13 = vsel %vm9890_vm15, %v9173_v32, %v4248_v41  ;;  %v1863_v41 = vsel %vm1175_vm8, %v1861_v45, %v12217_v48  ;;  %v9175_v5 = vrot.slane %v4196_v43, 9  ;;  %v1856_v29 = vsel %vm1187_vm3, %v1854_v61, %v12192_v1  ;;  %v4203_v43 = vld [vmem:[#allocation2 + $0x4c] sm:$0xf] }
 0x3d8   : > { %4290 = vrot.lane.b32.xlu1 %v4238_v36, %s9454_s22  ;;  %v12366_v59 = vpop.permute.xlu2 %3324  ;;  %v4255_v36 = vrot.slane %v12374_v52, 5  ;;  %v4258_v32 = vrot.slane %v4195_v0, 5  ;;  %v9176_v45 = vrot.slane %v4199_v55, 9  ;;  %v4276_v23 = vrot.slane %v4203_v43, 5 }
 0x3d9   : > { %v1815_v26 = vpop.permute.xlu0 %1814  ;;  %v4264_v52 = vrot.slane %v4262_v35, 4 }
 0x3da   : > { %v1510_v28 = vpop.permute.xlu1 %1509  ;;  %v4257_v11 = vrot.slane %v4255_v36, 4  ;;  %v1858_v48 = vsel %vm15471_vm4, %v1856_v29, %v1815_v26  ;;  %v4204_v29 = vld [vmem:[#allocation2 + $0x50] sm:$0x1] }
 0x3db   : > { %v1540_v8 = vsel %vm15471_vm4, %v1538_v62, %v1510_v28  ;;  %v9171_v62 = vrot.slane %v4184_v50, 9  ;;  %v1876_v26 = vunpack.c.l.b16 %v1858_v48  ;;  %v4278_v48 = vrot.slane %v4276_v23, 4 }
 0x3dc   : > { %v1544_v37 = vunpack.c.l.b16 %v1540_v8 }
 0x3de   : > { %v1545_v63 = vpack.c.b16 %v1544_v37, %v1543_v7  ;;  %4298 = vrot.lane.b32.xlu2 %v4252_v60, %s9454_s22  ;;  %v4263_v37 = vsel %vm9890_vm15, %v9175_v5, %v4262_v35  ;;  %v4243_v60 = vrot.slane %v4241_v25, 4  ;;  %v4206_v5 = vld [vmem:[#allocation2 + $0x58] sm:$0xf]  ;;  %v4193_v25 = vld [vmem:[#allocation2 + $0x24] sm:$0xe] }
 0x3df   : > { %4137 = vrot.lane.b32.xlu0 %v4136_v39, %s9444_s14  ;;  %v4271_v39 = vrot.slane %v4269_v27, 4  ;;  %v4283_v30 = vrot.slane %v4206_v5, 5 }
 0x3e0   : > { %1547 = vst [vmem:[#allocation3 + $0x8] sm:$0xff] %v1545_v63  ;;  %4296 = vrot.lane.b32.xlu1 %v4249_v13, %s9454_s22  ;;  %v12394_v53 = vpop.permute.xlu2 %2795  ;;  %v4272_v13 = vrot.slane %v4201_v34, 5 }
 0x3e1   : > { %v1827_v10 = vpop.permute.xlu0 %1826  ;;  %v4285_v35 = vrot.slane %v4283_v30, 4 }
 0x3e2   : > { %v1843_v38 = vpop.permute.xlu1 %1842  ;;  %v1865_v28 = vsel %vm1178_vm11, %v1863_v41, %v1827_v10  ;;  %v4273_v61 = vsel %vm9890_vm15, %v4271_v39, %v4272_v13  ;;  %v4270_v41 = vsel %vm9890_vm15, %v9176_v45, %v4269_v27  ;;  %v4205_v10 = vld [vmem:[#allocation2 + $0x54] sm:$0xe]  ;;  %v4286_v13 = vrot.slane %v4207_v54, 5 }
 0x3e3   : > { %v1867_v2 = vsel %vm1181_vm13, %v1865_v28, %v12198_v21  ;;  %v4235_v21 = vsel %vm9890_vm15, %v9171_v62, %v4234_v47  ;;  %v4189_v47 = vld [vmem:[#allocation2 + $0x14] sm:$0x1] }
 0x3e4   : > { %v1869_v8 = vsel %vm1184_vm14, %v1867_v2, %v12087_v51  ;;  %v4259_v51 = vsel %vm9890_vm15, %v4257_v11, %v4258_v32  ;;  %v4244_v50 = vrot.slane %v4189_v47, 5  ;;  %v9178_v11 = vrot.slane %v4205_v10, 9 }
 0x3e5   : > { %v1871_v7 = vsel %vm1187_vm3, %v1869_v8, %v12302_v57  ;;  %v9174_v2 = vrot.slane %v4193_v25, 9  ;;  %v4279_v8 = vrot.slane %v4204_v29, 5  ;;  %v2747_v29 = vpack.i.b16 %v12030_v3, %v11983_v49 }
 0x3e6   : > { %v1873_v1 = vsel %vm15471_vm4, %v1871_v7, %v1843_v38  ;;  %4304 = vrot.lane.b32.xlu2 %v4263_v37, %s9454_s22  ;;  %v4245_v38 = vsel %vm9890_vm15, %v4243_v60, %v4244_v50  ;;  %v4284_v32 = vsel %vm9890_vm15, %v9178_v11, %v4283_v30  ;;  %v4287_v50 = vsel %vm9890_vm15, %v4285_v35, %v4286_v13 }
 0x3e7   : > { %v1877_v57 = vunpack.c.l.b16 %v1873_v1  ;;  %4288 = vrot.lane.b32.xlu0 %v4235_v21, %s9454_s22  ;;  %v4256_v7 = vsel %vm9890_vm15, %v9174_v2, %v4255_v36  ;;  %v4280_v37 = vsel %vm9890_vm15, %v4278_v48, %v4279_v8  ;;  %v4198_v21 = vld [vmem:[#allocation2 + $0x38] sm:$0x1]  ;;  %v2771_v30 = vpack.i.b16 %v12131_v16, %v12112_v17 }
 0x3e8   : > { %4302 = vrot.lane.b32.xlu1 %v4259_v51, %s9454_s22  ;;  %v12425_v15 = vpop.permute.xlu2 %3312  ;;  %v2851_v2 = vsel %vm1171_vm7, %v2747_v29, %v12394_v53  ;;  %v3264_v49 = vpack.i.b16 %v12070_v42, %v12063_v22  ;;  %v3288_v16 = vpack.i.b16 %v12204_v20, %v12210_v14 }
 0x3e9   : > { %v1878_v58 = vpack.c.b16 %v1877_v57, %v1876_v26  ;;  %v12429_v63 = vpop.permute.xlu0 %4113  ;;  %v4265_v26 = vrot.slane %v4198_v21, 5  ;;  %v4202_v57 = vld [vmem:[#allocation2 + $0x48] sm:$0xe] }
 0x3ea   : > { %v12427_v4 = vpop.permute.xlu1 %4093  ;;  %v3368_v53 = vsel %vm1171_vm7, %v3264_v49, %v12425_v15 }
 0x3eb   : > { %1880 = vst [vmem:[#allocation3 + $0x10] sm:$0xff] %v1878_v58  ;;  %v4266_v36 = vsel %vm9890_vm15, %v4264_v52, %v4265_v26  ;;  %v9177_v58 = vrot.slane %v4202_v57, 9 }
 0x3ed   : > { %v4277_v39 = vsel %vm9890_vm15, %v9177_v58, %v4276_v23 }
 0x3ee   : > { %4310 = vrot.lane.b32.xlu2 %v4273_v61, %s9454_s22 }
 0x3ef   : > { %4294 = vrot.lane.b32.xlu0 %v4245_v38, %s9454_s22 }
 0x3f0   : > { %4308 = vrot.lane.b32.xlu1 %v4270_v41, %s9454_s22  ;;  %v12442_v0 = vpop.permute.xlu2 %2843 }
 0x3f1   : > { %v12446_v62 = vpop.permute.xlu0 %4101 }
 0x3f2   : > { %v12444_v28 = vpop.permute.xlu1 %4117 }
 0x3f6   : > { %4316 = vrot.lane.b32.xlu2 %v4284_v32, %s9454_s22 }
 0x3f7   : > { %4300 = vrot.lane.b32.xlu0 %v4256_v7, %s9454_s22 }
 0x3f8   : > { %4314 = vrot.lane.b32.xlu1 %v4280_v37, %s9454_s22  ;;  %v12459_v51 = vpop.permute.xlu2 %3360 }
 0x3f9   : > { %v2836_v1 = vpop.permute.xlu0 %2835 }
 0x3fa   : > { %v2840_v27 = vpop.permute.xlu1 %2839 }
 0x3ff   : > { %4306 = vrot.lane.b32.xlu0 %v4266_v36, %s9454_s22 }
 0x400   : > { %v2820_v47 = vpop.permute.xlu2 %2819 }
 0x401   : > { %v3353_v34 = vpop.permute.xlu0 %3352 }
 0x402   : > { %v3357_v55 = vpop.permute.xlu1 %3356 }
 0x407   : > { %4312 = vrot.lane.b32.xlu0 %v4277_v39, %s9454_s22 }
 0x408   : > { %v2832_v43 = vpop.permute.xlu2 %2831 }
 0x409   : > { %v2812_v45 = vpop.permute.xlu0 %2811 }
 0x40a   : > { %v2816_v60 = vpop.permute.xlu1 %2815 }
 0x40f   : > { %4318 = vrot.lane.b32.xlu0 %v4287_v50, %s9454_s22 }
 0x410   : > { %v3337_v41 = vpop.permute.xlu2 %3336 }
 0x411   : > { %v2824_v38 = vpop.permute.xlu0 %2823 }
 0x412   : > { %v2828_v61 = vpop.permute.xlu1 %2827  ;;  %v2866_v32 = vsel %vm1171_vm7, %v2771_v30, %v2824_v38 }
 0x413   : > { %v2868_v52 = vsel %vm1175_vm8, %v2866_v32, %v2828_v61 }
 0x414   : > { %v2870_v17 = vsel %vm1178_vm11, %v2868_v52, %v2832_v43 }
 0x415   : > { %v2872_v22 = vsel %vm1181_vm13, %v2870_v17, %v2836_v1 }
 0x416   : > { %v2874_v14 = vsel %vm1184_vm14, %v2872_v22, %v2840_v27 }
 0x417   : > { %v2876_v13 = vsel %vm1187_vm3, %v2874_v14, %v12442_v0 }
 0x418   : > { %v3349_v11 = vpop.permute.xlu2 %3348 }
 0x419   : > { %v3329_v5 = vpop.permute.xlu0 %3328 }
 0x41a   : > { %v3333_v10 = vpop.permute.xlu1 %3332 }
 0x420   : > { %v4134_v37 = vpop.permute.xlu2 %4133 }
 0x421   : > { %v3341_v23 = vpop.permute.xlu0 %3340 }
 0x422   : > { %v3345_v25 = vpop.permute.xlu1 %3344  ;;  %v3383_v57 = vsel %vm1171_vm7, %v3288_v16, %v3341_v23 }
 0x428   : > { %v4146_v20 = vpop.permute.xlu2 %4145 }
 0x429   : > { %v2800_v8 = vpop.permute.xlu0 %2799 }
 0x42a   : > { %v2804_v48 = vpop.permute.xlu1 %2803  ;;  %v2853_v7 = vsel %vm1175_vm8, %v2851_v2, %v2800_v8 }
 0x42b   : > { %v2855_v21 = vsel %vm1178_vm11, %v2853_v7, %v2804_v48 }
 0x42c   : > { %v2857_v3 = vsel %vm1181_vm13, %v2855_v21, %v12331_v24  ;;  %v3385_v24 = vsel %vm1175_vm8, %v3383_v57, %v3345_v25 }
 0x42d   : > { %v2859_v58 = vsel %vm1184_vm14, %v2857_v3, %v2812_v45  ;;  %v3387_v35 = vsel %vm1178_vm11, %v3385_v24, %v3349_v11 }
 0x42e   : > { %v2861_v54 = vsel %vm1187_vm3, %v2859_v58, %v2816_v60  ;;  %v3389_v27 = vsel %vm1181_vm13, %v3387_v35, %v3353_v34 }
 0x42f   : > { %v2863_v45 = vsel %vm15471_vm4, %v2861_v54, %v2820_v47  ;;  %v3391_v23 = vsel %vm1184_vm14, %v3389_v27, %v3357_v55  ;;  %v4045_v47 = vpack.i.b16 %v11684_v44, %v11725_v40  ;;  %v4069_v44 = vpack.i.b16 %v11800_v31, %v11838_v46 }
 0x430   : > { %v2881_v60 = vunpack.c.l.b16 %v2863_v45  ;;  %v4293_v0 = vpop.permute.xlu2 %4292 }
 0x431   : > { %v3317_v36 = vpop.permute.xlu0 %3316  ;;  %v4149_v30 = vsel %vm1171_vm7, %v4045_v47, %v12427_v4 }
 0x432   : > { %v3321_v26 = vpop.permute.xlu1 %3320  ;;  %v3370_v39 = vsel %vm1175_vm8, %v3368_v53, %v3317_v36  ;;  %v4151_v55 = vsel %vm1175_vm8, %v4149_v30, %v12297_v18 }
 0x433   : > { %v3372_v42 = vsel %vm1178_vm11, %v3370_v39, %v3321_v26  ;;  %v4153_v40 = vsel %vm1178_vm11, %v4151_v55, %v12446_v62 }
 0x434   : > { %v3374_v15 = vsel %vm1181_vm13, %v3372_v42, %v12366_v59 }
 0x435   : > { %v3376_v43 = vsel %vm1184_vm14, %v3374_v15, %v3329_v5  ;;  %v3393_v5 = vsel %vm1187_vm3, %v3391_v23, %v12459_v51  ;;  %v4155_v51 = vsel %vm1181_vm13, %v4153_v40, %v12335_v6 }
 0x436   : > { %v3378_v59 = vsel %vm1187_vm3, %v3376_v43, %v3333_v10  ;;  %v4157_v18 = vsel %vm1184_vm14, %v4155_v51, %v12280_v12 }
 0x437   : > { %v3380_v11 = vsel %vm15471_vm4, %v3378_v59, %v3337_v41  ;;  %v4164_v41 = vsel %vm1171_vm7, %v4069_v44, %v12311_v19  ;;  %v4159_v52 = vsel %vm1187_vm3, %v4157_v18, %v12429_v63 }
 0x438   : > { %v3398_v2 = vunpack.c.l.b16 %v3380_v11  ;;  %v4299_v32 = vpop.permute.xlu2 %4298  ;;  %v4161_v6 = vsel %vm15471_vm4, %v4159_v52, %v12444_v28 }
 0x439   : > { %v2848_v1 = vpop.permute.xlu0 %2847  ;;  %v4179_v12 = vunpack.c.l.b16 %v4161_v6 }
 0x43a   : > { %v4130_v50 = vpop.permute.xlu1 %4129  ;;  %v2878_v61 = vsel %vm15471_vm4, %v2876_v13, %v2848_v1 }
 0x43b   : > { %v2882_v38 = vunpack.c.l.b16 %v2878_v61 }
 0x43d   : > { %v2883_v25 = vpack.c.b16 %v2882_v38, %v2881_v60 }
 0x43f   : > { %2885 = vst [vmem:[#allocation3 + $0x20] sm:$0xff] %v2883_v25 }
 0x440   : > { %v4305_v3 = vpop.permute.xlu2 %4304 }
 0x441   : > { %v3365_v29 = vpop.permute.xlu0 %3364  ;;  %v4336_v15 = vrot.slane %v4305_v3, 4 }
 0x442   : > { %v3395_v34 = vsel %vm15471_vm4, %v3393_v5, %v3365_v29  ;;  %v4142_v48 = vpop.permute.xlu1 %4141 }
 0x443   : > { %v3399_v10 = vunpack.c.l.b16 %v3395_v34 }
 0x445   : > { %v3400_v8 = vpack.c.b16 %v3399_v10, %v3398_v2 }
 0x447   : > { %3402 = vst [vmem:[#allocation3 + $0x28] sm:$0xff] %v3400_v8 }
 0x448   : > { %v4311_v63 = vpop.permute.xlu2 %4310 }
 0x449   : > { %v4126_v4 = vpop.permute.xlu0 %4125  ;;  %v4420_v5 = vrot.slane %v4311_v63, 4 }
 0x44a   : > { %v4166_v7 = vsel %vm1175_vm8, %v4164_v41, %v4126_v4  ;;  %v4291_v21 = vpop.permute.xlu1 %4290 }
 0x44b   : > { %v4168_v62 = vsel %vm1178_vm11, %v4166_v7, %v4130_v50 }
 0x44c   : > { %v4170_v31 = vsel %vm1181_vm13, %v4168_v62, %v4134_v37 }
 0x450   : > { %v4317_v58 = vpop.permute.xlu2 %4316 }
 0x451   : > { %v4138_v46 = vpop.permute.xlu0 %4137  ;;  %v4370_v22 = vrot.slane %v4317_v58, 4 }
 0x452   : > { %v4172_v19 = vsel %vm1184_vm14, %v4170_v31, %v4138_v46  ;;  %v4297_v26 = vpop.permute.xlu1 %4296 }
 0x453   : > { %v4174_v49 = vsel %vm1187_vm3, %v4172_v19, %v4142_v48 }
 0x454   : > { %v4176_v17 = vsel %vm15471_vm4, %v4174_v49, %v4146_v20 }
 0x455   : > { %v4180_v16 = vunpack.c.l.b16 %v4176_v17 }
 0x457   : > { %v4181_v53 = vpack.c.b16 %v4180_v16, %v4179_v12 }
 0x459   : > { %4183 = vst [vmem:[#allocation3 + $0x38] sm:$0xff] %v4181_v53  ;;  %v4289_v36 = vpop.permute.xlu0 %4288 }
 0x45a   : > { %v4303_v37 = vpop.permute.xlu1 %4302  ;;  %v4337_v45 = vsel %vm425_vm2, %v4336_v15, %v4289_v36 }
 0x45b   : > { %v4341_v50 = vperm.slane %v4337_v45, %v9548_v56 }
 0x45d   : > { %v4350_v59 = vrot.slane %v4341_v50, 4 }
 0x461   : > { %v4295_v57 = vpop.permute.xlu0 %4294 }
 0x462   : > { %v4309_v28 = vpop.permute.xlu1 %4308  ;;  %v4421_v10 = vsel %vm425_vm2, %v4420_v5, %v4295_v57 }
 0x463   : > { %v4364_v24 = vrot.slane %v4309_v28, 4 }
 0x465   : > { %v4365_v20 = vsel %vm425_vm2, %v4364_v24, %v4293_v0 }
 0x466   : > { %v4369_v13 = vperm.slane %v4365_v20, %v9548_v56 }
 0x468   : > { %v4378_v47 = vrot.slane %v4369_v13, 4 }
 0x469   : > { %v4301_v39 = vpop.permute.xlu0 %4300 }
 0x46a   : > { %v4371_v42 = vsel %vm425_vm2, %v4370_v22, %v4301_v39  ;;  %v4315_v1 = vpop.permute.xlu1 %4314 }
 0x46b   : > { %v4375_v54 = vperm.slane %v4371_v42, %v9548_v56  ;;  %v4398_v60 = vrot.slane %v4315_v1, 4 }
 0x46d   : > { %v4376_v35 = vrot.slane %v4375_v54, 4  ;;  %v4399_v0 = vsel %vm425_vm2, %v4398_v60, %v4299_v32  ;;  %v4379_v2 = vsel %vm425_vm2, %v4375_v54, %v4378_v47 }
 0x46e   : > { %v4403_v48 = vperm.slane %v4399_v0, %v9548_v56  ;;  %v4387_v41 = vperm.slane %v4379_v2, %v15580_v9 }
 0x46f   : > { %v4377_v43 = vsel %vm425_vm2, %v4376_v35, %v4369_v13 }
 0x470   : > { %v12548_v27 = vperm.slane %v4377_v43, %v15580_v9  ;;  %v4404_v31 = vrot.slane %v4403_v48, 4  ;;  %v4464_v63 = vshrl.u32 %v4387_v41, 16  ;;  %v4390_v57 = vrot.slane %v4387_v41, 4 }
 0x471   : > { %v4307_v14 = vpop.permute.xlu0 %4306 }
 0x472   : > { %v4392_v11 = vrot.slane %v4307_v14, 4  ;;  %v4388_v34 = vrot.slane %v12548_v27, 4  ;;  %v4452_v62 = vshrl.u32 %v12548_v27, 16  ;;  %v4391_v45 = vsel %vm425_vm2, 0, %v4390_v57 }
 0x474   : > { %v4393_v40 = vsel %vm425_vm2, %v4392_v11, %v4291_v21  ;;  %v4389_v32 = vsel %vm425_vm2, 0, %v4388_v34  ;;  %v4425_v21 = vperm.slane %v4421_v10, %v9548_v56 }
 0x475   : > { %v4397_v46 = vperm.slane %v4393_v40, %v9548_v56  ;;  %v4458_v3 = vshrl.u32 %v4389_v32, 16 }
 0x476   : > { %v4434_v60 = vrot.slane %v4425_v21, 4 }
 0x479   : > { %v4313_v61 = vpop.permute.xlu0 %4312 }
 0x47a   : > { %v4342_v38 = vrot.slane %v4313_v61, 4 }
 0x47c   : > { %v4343_v25 = vsel %vm425_vm2, %v4342_v38, %v4297_v26  ;;  %v4406_v38 = vrot.slane %v4397_v46, 4 }
 0x47d   : > { %v4347_v23 = vperm.slane %v4343_v25, %v9548_v56 }
 0x47e   : > { %v4407_v2 = vsel %vm425_vm2, %v4403_v48, %v4406_v38 }
 0x47f   : > { %v4348_v29 = vrot.slane %v4347_v23, 4  ;;  %v4351_v30 = vsel %vm425_vm2, %v4347_v23, %v4350_v59  ;;  %v4470_v23 = vshrl.u32 %v4391_v45, 16 }
 0x480   : > { %v4359_v51 = vperm.slane %v4351_v30, %v15580_v9 }
 0x481   : > { %v4349_v55 = vsel %vm425_vm2, %v4348_v29, %v4341_v50  ;;  %v4319_v8 = vpop.permute.xlu0 %4318 }
 0x482   : > { %v12561_v44 = vperm.slane %v4349_v55, %v15580_v9  ;;  %v4426_v4 = vrot.slane %v4319_v8, 4  ;;  %v4362_v17 = vrot.slane %v4359_v51, 4  ;;  %v4463_v26 = vshrl.u32 %v4359_v51, 16 }
 0x483   : > { %v4462_v24 = vpack.i.b16 %v4387_v41, %v4359_v51 }
 0x484   : > { %v4427_v7 = vsel %vm425_vm2, %v4426_v4, %v4303_v37  ;;  %v4451_v18 = vshrl.u32 %v12561_v44, 16  ;;  %v4360_v52 = vrot.slane %v12561_v44, 4  ;;  %v4405_v37 = vsel %vm425_vm2, %v4404_v31, %v4397_v46 }
 0x485   : > { %v4431_v6 = vperm.slane %v4427_v7, %v9548_v56  ;;  %v4363_v54 = vsel %vm425_vm2, 0, %v4362_v17  ;;  %v4465_v15 = vpack.i.b16 %v4464_v63, %v4463_v26  ;;  %v12581_v35 = vperm.slane %v4405_v37, %v15580_v9 }
 0x486   : > { %v4453_v19 = vpack.i.b16 %v4452_v62, %v4451_v18  ;;  %v4361_v49 = vsel %vm425_vm2, 0, %v4360_v52  ;;  %v4468_v1 = vpack.i.b16 %v4391_v45, %v4363_v54  ;;  %v4508_v43 = vunpack.c.l.b16 %v4462_v24  ;;  %v4680_v45 = vld [vmem:[%s15412_s5] sm:$0xff] }
 0x487   : > { %v4432_v12 = vrot.slane %v4431_v6, 4  ;;  %v4456_v16 = vpack.i.b16 %v4389_v32, %v4361_v49  ;;  %v4457_v53 = vshrl.u32 %v4361_v49, 16  ;;  %v4469_v50 = vshrl.u32 %v4363_v54, 16 }
 0x488   : > { %v4496_v36 = vunpack.c.l.b16 %v4453_v19  ;;  %v4512_v25 = vunpack.c.l.b16 %v4465_v15  ;;  %v4416_v47 = vrot.slane %v12581_v35, 4  ;;  %v4435_v0 = vsel %vm425_vm2, %v4431_v6, %v4434_v60 }
 0x489   : > { %v4433_v58 = vsel %vm425_vm2, %v4432_v12, %v4425_v21  ;;  %v4500_v39 = vunpack.c.l.b16 %v4456_v16  ;;  %v4459_v22 = vpack.i.b16 %v4458_v3, %v4457_v53  ;;  %v4516_v11 = vunpack.c.l.b16 %v4468_v1 }
 0x48a   : > { %v12577_v28 = vperm.slane %v4433_v58, %v15580_v9  ;;  %v4497_v42 = vpack.c.b16 %v4496_v36, %v4496_v36  ;;  %v4475_v5 = vshrl.u32 %v12581_v35, 16  ;;  %v4509_v29 = vpack.c.b16 %v4508_v43, %v4508_v43 }
 0x48b   : > { %v4501_v14 = vpack.c.b16 %v4500_v39, %v4500_v39  ;;  %v4504_v20 = vunpack.c.l.b16 %v4459_v22  ;;  %v4471_v30 = vpack.i.b16 %v4470_v23, %v4469_v50  ;;  %v4513_v10 = vpack.c.b16 %v4512_v25, %v4512_v25 }
 0x48c   : > { %4498 = vrot.lane.b32.xlu1 %v4497_v42, %s9448_s18  ;;  %v4444_v61 = vrot.slane %v12577_v28, 4  ;;  %v4476_v59 = vshrl.u32 %v12577_v28, 16  ;;  %v4443_v8 = vperm.slane %v4435_v0, %v15580_v9  ;;  %v4417_v40 = vsel %vm425_vm2, 0, %v4416_v47 }
 0x48d   : > { %4502 = vrot.lane.b32.xlu2 %v4501_v14, %s9449_s19  ;;  %v4505_v13 = vpack.c.b16 %v4504_v20, %v4504_v20  ;;  %v4517_v51 = vpack.c.b16 %v4516_v11, %v4516_v11  ;;  %v4520_v41 = vunpack.c.l.b16 %v4471_v30  ;;  %v4415_v7 = vperm.slane %v4407_v2, %v15580_v9 }
 0x48e   : > { %v4445_v34 = vsel %vm425_vm2, 0, %v4444_v61  ;;  %v4477_v55 = vpack.i.b16 %v4476_v59, %v4475_v5  ;;  %v4481_v48 = vshrl.u32 %v4417_v40, 16  ;;  %v4446_v62 = vrot.slane %v4443_v8, 4 }
 0x48f   : > { %4506 = vrot.lane.b32.xlu0 %v4505_v13, %s9443_s13  ;;  %v4480_v4 = vpack.i.b16 %v4445_v34, %v4417_v40  ;;  %v4482_v32 = vshrl.u32 %v4445_v34, 16  ;;  %v4488_v21 = vshrl.u32 %v4443_v8, 16  ;;  %v4521_v31 = vpack.c.b16 %v4520_v41, %v4520_v41  ;;  %v9217_v13 = vld [vmem:[%s15410_s3 + $0x8] sm:$0xff] }
 0x490   : > { %v4524_v18 = vunpack.c.l.b16 %v4477_v55  ;;  %v4418_v6 = vrot.slane %v4415_v7, 4  ;;  %v4486_v49 = vpack.i.b16 %v4443_v8, %v4415_v7  ;;  %v4487_v3 = vshrl.u32 %v4415_v7, 16 }
 0x491   : > { %v4528_v52 = vunpack.c.l.b16 %v4480_v4  ;;  %v4483_v46 = vpack.i.b16 %v4482_v32, %v4481_v48  ;;  %v4447_v17 = vsel %vm425_vm2, 0, %v4446_v62  ;;  %v4450_v59 = vpack.i.b16 %v12548_v27, %v12561_v44 }
 0x492   : > { %v4525_v19 = vpack.c.b16 %v4524_v18, %v4524_v18  ;;  %v4489_v16 = vpack.i.b16 %v4488_v21, %v4487_v3  ;;  %v4419_v26 = vsel %vm425_vm2, 0, %v4418_v6  ;;  %v4536_v36 = vunpack.c.l.b16 %v4486_v49  ;;  %v9290_v6 = vld [vmem:[#allocation3 + $0x34] sm:$0xf0]  ;;  %v9205_v49 = vld [vmem:[#allocation3 + $0x30] sm:$0xf] }
 0x493   : > { %v4529_v12 = vpack.c.b16 %v4528_v52, %v4528_v52  ;;  %v4532_v53 = vunpack.c.l.b16 %v4483_v46  ;;  %v4494_v63 = vshrl.u32 %v4447_v17, 16  ;;  %v4493_v37 = vshrl.u32 %v4419_v26, 16  ;;  %v9289_v3 = vld [vmem:[#allocation3 + $0x34] sm:$0xf] }
 0x494   : > { %4510 = vrot.lane.b32.xlu1 %v4509_v29, %s9446_s16  ;;  %v4540_v57 = vunpack.c.l.b16 %v4489_v16  ;;  %v4492_v39 = vpack.i.b16 %v4447_v17, %v4419_v26  ;;  %v4537_v22 = vpack.c.b16 %v4536_v36, %v4536_v36  ;;  %v4474_v5 = vpack.i.b16 %v12577_v28, %v12581_v35  ;;  %v4688_v28 = vld [vmem:[%s15413_s6] sm:$0xff]  ;;  %v9288_v16 = vld [vmem:[#allocation3 + $0x24] sm:$0xf0] }
 0x495   : > { %4514 = vrot.lane.b32.xlu2 %v4513_v10, %s9444_s14  ;;  %v4533_v58 = vpack.c.b16 %v4532_v53, %v4532_v53  ;;  %v4495_v42 = vpack.i.b16 %v4494_v63, %v4493_v37  ;;  %v9206_v17 = vor.u32 %v9290_v6, %v9205_v49  ;;  %v9199_v53 = vld [vmem:[#allocation3 + $0x28] sm:$0xf0]  ;;  %v9197_v26 = vld [vmem:[#allocation3 + $0x20] sm:$0xf]  ;;  %v9287_v36 = vld [vmem:[#allocation3 + $0x24] sm:$0xf] }
 0x496   : > { %v4541_v24 = vpack.c.b16 %v4540_v57, %v4540_v57  ;;  %v4544_v54 = vunpack.c.l.b16 %v4492_v39  ;;  %v9198_v63 = vor.u32 %v9288_v16, %v9197_v26  ;;  %v9202_v57 = vor.u32 %v9287_v36, %v9199_v53  ;;  %v9189_v37 = vld [vmem:[#allocation3 + $0x10] sm:$0xf]  ;;  %v9286_v39 = vld [vmem:[#allocation3 + $0x14] sm:$0xf0] }
 0x497   : > { %4518 = vrot.lane.b32.xlu0 %v4517_v51, %s9447_s17  ;;  %v4548_v14 = vunpack.c.l.b16 %v4495_v42  ;;  %v9190_v42 = vor.u32 %v9286_v39, %v9189_v37 }
 0x498   : > { %v4545_v20 = vpack.c.b16 %v4544_v54, %v4544_v54  ;;  %v9284_v54 = vld [vmem:[#allocation3 + $0x4] sm:$0xf0] }
 0x499   : > { %v4549_v15 = vpack.c.b16 %v4548_v14, %v4548_v14  ;;  %v9183_v14 = vld [vmem:[#allocation3 + $0x8] sm:$0xf0] }
 0x49c   : > { %4522 = vrot.lane.b32.xlu1 %v4521_v31, %s9445_s15 }
 0x49d   : > { %4526 = vrot.lane.b32.xlu2 %v4525_v19, %s9448_s18  ;;  %v9207_v19 = vld [vmem:[#allocation3 + $0x38] sm:$0xf0] }
 0x49f   : > { %4530 = vrot.lane.b32.xlu0 %v4529_v12, %s9449_s19  ;;  %v9210_v12 = vor.u32 %v9289_v3, %v9207_v19 }
 0x4a4   : > { %4534 = vrot.lane.b32.xlu1 %v4533_v58, %s9443_s13  ;;  %v9285_v58 = vld [vmem:[#allocation3 + $0x14] sm:$0xf] }
 0x4a5   : > { %4538 = vrot.lane.b32.xlu2 %v4537_v22, %s9446_s16  ;;  %v9191_v22 = vld [vmem:[#allocation3 + $0x18] sm:$0xf0] }
 0x4a7   : > { %4542 = vrot.lane.b32.xlu0 %v4541_v24, %s9444_s14  ;;  %v9194_v24 = vor.u32 %v9285_v58, %v9191_v22 }
 0x4ac   : > { %4546 = vrot.lane.b32.xlu1 %v4545_v20, %s9447_s17  ;;  %v9181_v20 = vld [vmem:[#allocation3] sm:$0xf] }
 0x4ad   : > { %4550 = vrot.lane.b32.xlu2 %v4549_v15, %s9445_s15  ;;  %v9283_v15 = vld [vmem:[#allocation3 + $0x4] sm:$0xf] }
 0x4af   : > { %4683 = vperm.xlu0 %9320, %v4680_v45   ;;  %v9182_v45 = vor.u32 %v9284_v54, %v9181_v20 }
 0x4b4   : > { %4691 = vperm.xlu1 %9356, %v4688_v28  }
 0x4b7   : > { %4762 = vperm.xlu0 %9320, %v9217_v13   ;;  %v9186_v13 = vor.u32 %v9283_v15, %v9183_v14 }
 0x4e7   : > { %v4503_v1 = vpop.permute.xlu2 %4502 }
 0x4ef   : > { %v4515_v50 = vpop.permute.xlu2 %4514 }
 0x4f7   : > { %v4527_v25 = vpop.permute.xlu2 %4526 }
 0x4f8   : > { %v4569_v30 = vsel %vm1171_vm7, %v4474_v5, %v4527_v25 }
 0x4fe   : > { %v4499_v43 = vpop.permute.xlu1 %4498 }
 0x4ff   : > { %v4554_v47 = vsel %vm1171_vm7, %v4450_v59, %v4499_v43  ;;  %v4539_v29 = vpop.permute.xlu2 %4538 }
 0x500   : > { %v4556_v11 = vsel %vm1175_vm8, %v4554_v47, %v4503_v1  ;;  %v4589_v1 = vld [vmem:[%s15411_s4] sm:$0xf]  ;;  %v9216_v47 = vld [vmem:[%s15409_s2 + $0x8] sm:$0xff] }
 0x501   : > { %v4507_v61 = vpop.permute.xlu0 %4506  ;;  %4753 = vperm.xlu2 %9357, %v9216_v47  }
 0x502   : > { %v4558_v34 = vsel %vm1178_vm11, %v4556_v11, %v4507_v61 }
 0x506   : > { %v4511_v60 = vpop.permute.xlu1 %4510 }
 0x507   : > { %v4560_v10 = vsel %vm1181_vm13, %v4558_v34, %v4511_v60  ;;  %v4551_v32 = vpop.permute.xlu2 %4550 }
 0x508   : > { %v4562_v44 = vsel %vm1184_vm14, %v4560_v10, %v4515_v50 }
 0x509   : > { %v4519_v38 = vpop.permute.xlu0 %4518 }
 0x50a   : > { %v4564_v51 = vsel %vm1187_vm3, %v4562_v44, %v4519_v38  ;;  %v9425_v44 = vld [vmem:[%s9517_s8] sm:$0xff] }
 0x50e   : > { %v4523_v23 = vpop.permute.xlu1 %4522 }
 0x50f   : > { %v4566_v35 = vsel %vm15471_vm4, %v4564_v51, %v4523_v23  ;;  %v282_v51 = vunpack.c.h.bf16 %v9425_v44 }
 0x510   : > { %v4584_v48 = vunpack.c.l.b16 %v4566_v35 }
 0x511   : > { %v4531_v0 = vpop.permute.xlu0 %4530 }
 0x512   : > { %v4571_v55 = vsel %vm1175_vm8, %v4569_v30, %v4531_v0  ;;  %v9428_v52 = vpack.c.b16 %v4584_v48, %v4584_v48 }
 0x514   : > { %v4649_v31 = vsel %vm319_vm0, %v9428_v52, 0  ;;  %v9213_v52 = vld [vmem:[%s15408_s1 + $0x4] sm:$0xf] }
 0x515   : > { %4657 = vmatpush.bf16.msrb.mxu2 %v4649_v31 }
 0x516   : > { %v4535_v2 = vpop.permute.xlu1 %4534 }
 0x517   : > { %v4573_v27 = vsel %vm1178_vm11, %v4571_v55, %v4535_v2 }
 0x518   : > { %v4575_v8 = vsel %vm1181_vm13, %v4573_v27, %v4539_v29 }
 0x519   : > { %v4543_v40 = vpop.permute.xlu0 %4542  ;;  %4658 = vmatpush.bf16.msrb.mxu2 %v9206_v17 }
 0x51a   : > { %v4577_v4 = vsel %vm1184_vm14, %v4575_v8, %v4543_v40  ;;  %v281_v8 = vunpack.c.l.bf16 %v9425_v44 }
 0x51d   : > { %4659 = vmatpush.bf16.msrb.mxu2 %v9198_v63 }
 0x51e   : > { %v4547_v41 = vpop.permute.xlu1 %4546 }
 0x51f   : > { %v4579_v7 = vsel %vm1187_vm3, %v4577_v4, %v4547_v41 }
 0x520   : > { %v4581_v18 = vsel %vm15471_vm4, %v4579_v7, %v4551_v32  ;;  %vm4644_vm4 = vcmask 588800  }
 0x521   : > { %v4585_v62 = vunpack.c.l.b16 %v4581_v18  ;;  %4660 = vmatpush.bf16.msrb.mxu2 %v9190_v42  ;;  %v4684_v43 = vpop.permute.xlu0 %4683 }
 0x523   : > { %v9429_v21 = vpack.c.b16 %v4585_v62, %v4585_v62 }
 0x525   : > { %v4652_v46 = vsel %vm319_vm0, %v9429_v21, 0  ;;  %4661 = vmatpush.bf16.msrb.mxu2 %v9182_v45 }
 0x526   : > { %4670 = vmatpush.bf16.msrb.mxu3 %v4652_v46  ;;  %v4692_v50 = vpop.permute.xlu1 %4691 }
 0x528   : > { %9211 = vmatmul.msk.bf16.vlgmr.msrb.gmra.mxu2 %vm4644_vm4, %v4589_v1 }
 0x529   : > { %v4763_v19 = vpop.permute.xlu0 %4762 }
 0x52a   : > { %4671 = vmatpush.bf16.msrb.mxu3 %v9210_v12 }
 0x52e   : > { %4672 = vmatpush.bf16.msrb.mxu3 %v9202_v57 }
 0x532   : > { %4673 = vmatpush.bf16.msrb.mxu3 %v9194_v24 }
 0x536   : > { %4674 = vmatpush.bf16.msrb.mxu3 %v9186_v13 }
 0x539   : > { %9212 = vmatmul.msk.bf16.vlgmr.msrb.gmra.mxu3 %vm4644_vm4, %v4589_v1 }
 0x55b   : > { %v4754_v21 = vpop.permute.xlu2 %4753 }
 0x5ab   : > { %v4663_v61 = vpop.f32.mrf.mxu2 }
 0x5ac   : > { %v4686_v38 = vmul.f32 %v4684_v43, %v4663_v61 }
 0x5ae   : > { %v4694_v59 = vadd.f32 %v4692_v50, %v4686_v38 }
 0x5b0   : > { %v4696_v0 = vsub.f32 0.0, %v4694_v59 }
 0x5b2   : > { %v4698_v5 = vmul.f32 1.442695, %v4696_v0 }
 0x5b3   : > { %v4665_v30 = vpop.f32.mrf.mxu2 }
 0x5b4   : > { %9401 = vpow2.f32 %v4698_v5 }
 0x5ba   : > { %v9402_v2 = vpop.eup %9401 }
 0x5bb   : > { %v4702_v55 = vadd.f32 1.0, %v9402_v2 }
 0x5bc   : > { %v4676_v60 = vpop.f32.mrf.mxu3 }
 0x5bd   : > { %v4687_v25 = vmul.f32 %v4684_v43, %v4676_v60 }
 0x5bf   : > { %v4695_v23 = vadd.f32 %v4692_v50, %v4687_v25 }
 0x5c1   : > { %v4697_v11 = vsub.f32 0.0, %v4695_v23 }
 0x5c3   : > { %v4700_v29 = vmul.f32 1.442695, %v4697_v11 }
 0x5c4   : > { %v4678_v34 = vpop.f32.mrf.mxu3 }
 0x5c5   : > { %9403 = vpow2.f32 %v4700_v29 }
 0x5c6   : > { %9405 = vrcp.f32 %v4702_v55 }
 0x5cb   : > { %v9404_v10 = vpop.eup %9403 }
 0x5cc   : > { %v4703_v27 = vadd.f32 1.0, %v9404_v10  ;;  %v9406_v40 = vpop.eup %9405 }
 0x5cd   : > { %v4706_v35 = vmul.f32 %v9406_v40, %v4694_v59 }
 0x5ce   : > { %9407 = vrcp.f32 %v4703_v27 }
 0x5cf   : > { %v12648_v41 = vadd.f32 %v4706_v35, %v281_v8 }
 0x5d1   : > { %15811 = vst [vmem:[#allocation32_spill] sm:$0xff] %v12648_v41  ;;  %v4712_v7 = vpack.c.bf16 %v12648_v41, %v12648_v41 }
 0x5d3   : > { %v4718_v48 = vsel %vm319_vm0, %v4712_v7, 0 }
 0x5d4   : > { %v9408_v28 = vpop.eup %9407  ;;  %4730 = vmatpush.bf16.msra.mxu0 %v4718_v48 }
 0x5d5   : > { %v4707_v4 = vmul.f32 %v9408_v28, %v4695_v23 }
 0x5d7   : > { %v12650_v32 = vadd.f32 %v4707_v4, %v282_v51  ;;  %9214 = vmatmul.msk.bf16.vlgmr.msra.gmra.mxu0 %vm315_vm1, %v9213_v52 }
 0x5d9   : > { %15812 = vst [vmem:[#allocation19_spill] sm:$0xff] %v12650_v32  ;;  %v4713_v18 = vpack.c.bf16 %v12650_v32, %v12650_v32 }
 0x5db   : > { %v4721_v62 = vsel %vm319_vm0, %v4713_v18, 0 }
 0x5dc   : > { %4743 = vmatpush.bf16.msra.mxu1 %v4721_v62 }
 0x5df   : > { %9215 = vmatmul.msk.bf16.vlgmr.msra.gmra.mxu1 %vm315_vm1, %v9213_v52  ;;  %vm15940_vm1 = vcmask 916480  }
 0x654   : > { %v4732_v31 = vpop.f32.mrf.mxu0 }
 0x655   : > { %v4756_v46 = vmul.f32 %v4754_v21, %v4732_v31 }
 0x657   : > { %v4765_v3 = vadd.f32 %v4763_v19, %v4756_v46 }
 0x659   : > { %v4767_v12 = vsub.f32 0.0, %v4765_v3 }
 0x65b   : > { %v4769_v53 = vmul.f32 1.442695, %v4767_v12 }
 0x65c   : > { %v4745_v6 = vpop.f32.mrf.mxu1  ;;  %v4734_v36 = vpop.f32.mrf.mxu0 }
 0x65d   : > { %v4757_v49 = vmul.f32 %v4754_v21, %v4745_v6  ;;  %9409 = vpow2.f32 %v4769_v53 }
 0x65f   : > { %v4766_v17 = vadd.f32 %v4763_v19, %v4757_v49 }
 0x661   : > { %v4768_v16 = vsub.f32 0.0, %v4766_v17 }
 0x663   : > { %v4771_v26 = vmul.f32 1.442695, %v4768_v16  ;;  %v9410_v57 = vpop.eup %9409 }
 0x664   : > { %v4747_v63 = vpop.f32.mrf.mxu1  ;;  %v4773_v58 = vadd.f32 1.0, %v9410_v57 }
 0x665   : > { %9411 = vpow2.f32 %v4771_v26 }
 0x666   : > { %9413 = vrcp.f32 %v4773_v58 }
 0x66b   : > { %v9412_v37 = vpop.eup %9411 }
 0x66c   : > { %v4774_v39 = vadd.f32 1.0, %v9412_v37  ;;  %v9414_v22 = vpop.eup %9413 }
 0x66d   : > { %v4777_v24 = vmul.f32 %v9414_v22, %v4765_v3 }
 0x66e   : > { %9415 = vrcp.f32 %v4774_v39 }
 0x66f   : > { %v4825_v59 = vrot.slane %v4777_v24, 4 }
 0x674   : > { %v9416_v42 = vpop.eup %9415 }
 0x675   : > { %v4778_v54 = vmul.f32 %v9416_v42, %v4766_v17 }
 0x677   : > { %v9368_v14 = vpack.i.bf16 %v4778_v54, %v4777_v24  ;;  %v4937_v38 = vrot.slane %v4778_v54, 4 }
 0x679   : > { %9369 = vrot.lane.b32.xlu0 %v9368_v14, %s9444_s14  ;;  %9364 = vrot.lane.b32.xlu2 %v9368_v14, %s9447_s17 }
 0x67a   : > { %9359 = vrot.lane.b32.xlu1 %v9368_v14, %s9445_s15 }
 0x681   : > { %9384 = vrot.lane.b32.xlu0 %v9368_v14, %s9449_s19  ;;  %9379 = vrot.lane.b32.xlu2 %v9368_v14, %s9443_s13 }
 0x682   : > { %9374 = vrot.lane.b32.xlu1 %v9368_v14, %s9446_s16 }
 0x68a   : > { %9389 = vrot.lane.b32.xlu1 %v9368_v14, %s9448_s18 }
 0x6d3   : > { %v9365_v20 = vpop.permute.xlu2 %9364 }
 0x6d4   : > { %v9367_v1 = vunpack.i.h.bf16 %v9365_v20  ;;  %v9366_v50 = vunpack.i.l.bf16 %v9365_v20 }
 0x6d6   : > { %v4935_v47 = vrot.slane %v9367_v1, 4  ;;  %v4938_v0 = vsel %vm425_vm2, %v9367_v1, %v4937_v38  ;;  %v4823_v11 = vrot.slane %v9366_v50, 4  ;;  %v4826_v5 = vsel %vm425_vm2, %v9366_v50, %v4825_v59 }
 0x6d7   : > { %v12676_v44 = vperm.slane %v4938_v0, %v9548_v56  ;;  %v12679_v8 = vperm.slane %v4826_v5, %v9548_v56 }
 0x6d8   : > { %v4936_v27 = vsel %vm425_vm2, %v4935_v47, %v4778_v54  ;;  %v4824_v51 = vsel %vm425_vm2, %v4823_v11, %v4777_v24 }
 0x6d9   : > { %v12691_v52 = vperm.slane %v4936_v27, %v9548_v56  ;;  %v4997_v6 = vrot.slane %v12676_v44, 4  ;;  %v12695_v19 = vperm.slane %v4824_v51, %v9548_v56  ;;  %v4885_v26 = vrot.slane %v12679_v8, 4 }
 0x6db   : > { %v9380_v40 = vpop.permute.xlu2 %9379 }
 0x6dc   : > { %v9382_v21 = vunpack.i.h.bf16 %v9380_v40  ;;  %v9381_v31 = vunpack.i.l.bf16 %v9380_v40 }
 0x6de   : > { %v4973_v37 = vrot.slane %v9382_v21, 4  ;;  %v4861_v58 = vrot.slane %v9381_v31, 4 }
 0x6eb   : > { %v9370_v15 = vpop.permute.xlu0 %9369 }
 0x6ec   : > { %v9372_v45 = vunpack.i.h.bf16 %v9370_v15  ;;  %v9360_v13 = vpop.permute.xlu1 %9359  ;;  %v9371_v61 = vunpack.i.l.bf16 %v9370_v15 }
 0x6ed   : > { %v9362_v43 = vunpack.i.h.bf16 %v9360_v13  ;;  %v9361_v60 = vunpack.i.l.bf16 %v9360_v13 }
 0x6ee   : > { %v4947_v25 = vrot.slane %v9372_v45, 4  ;;  %v4835_v29 = vrot.slane %v9371_v61, 4 }
 0x6ef   : > { %v4949_v23 = vrot.slane %v9362_v43, 4  ;;  %v4837_v30 = vrot.slane %v9361_v60, 4 }
 0x6f0   : > { %v4948_v34 = vsel %vm425_vm2, %v4947_v25, %v9362_v43  ;;  %v4836_v35 = vsel %vm425_vm2, %v4835_v29, %v9361_v60 }
 0x6f1   : > { %v4950_v2 = vsel %vm425_vm2, %v9372_v45, %v4949_v23  ;;  %v12683_v28 = vperm.slane %v4948_v34, %v9548_v56  ;;  %v4838_v4 = vsel %vm425_vm2, %v9371_v61, %v4837_v30  ;;  %v12699_v12 = vperm.slane %v4836_v35, %v9548_v56 }
 0x6f2   : > { %v12688_v7 = vperm.slane %v4950_v2, %v9548_v56  ;;  %v12702_v16 = vperm.slane %v4838_v4, %v9548_v56 }
 0x6f3   : > { %v9385_v10 = vpop.permute.xlu0 %9384  ;;  %v4983_v17 = vrot.slane %v12683_v28, 4  ;;  %v4871_v13 = vrot.slane %v12699_v12, 4 }
 0x6f4   : > { %v9375_v55 = vpop.permute.xlu1 %9374  ;;  %v9387_v18 = vunpack.i.h.bf16 %v9385_v10  ;;  %v9386_v48 = vunpack.i.l.bf16 %v9385_v10  ;;  %v4998_v36 = vsel %vm425_vm2, %v12688_v7, %v4997_v6  ;;  %v4886_v1 = vsel %vm425_vm2, %v12702_v16, %v4885_v26 }
 0x6f5   : > { %v9377_v62 = vunpack.i.h.bf16 %v9375_v55  ;;  %v9376_v46 = vunpack.i.l.bf16 %v9375_v55  ;;  %v4984_v15 = vsel %vm425_vm2, %v4983_v17, %v12691_v52  ;;  %v12719_v45 = vperm.slane %v4998_v36, %v15580_v9 }
 0x6f6   : > { %v4847_v49 = vrot.slane %v9386_v48, 4  ;;  %v4959_v63 = vrot.slane %v9387_v18, 4  ;;  %v12739_v29 = vperm.slane %v4886_v1, %v15580_v9  ;;  %v4872_v10 = vsel %vm425_vm2, %v4871_v13, %v12695_v19 }
 0x6f7   : > { %v4961_v3 = vrot.slane %v9377_v62, 4  ;;  %v4849_v53 = vrot.slane %v9376_v46, 4  ;;  %v4878_v6 = vperm.slane %v4872_v10, %v15580_v9 }
 0x6f8   : > { %v4848_v24 = vsel %vm425_vm2, %v4847_v49, %v9376_v46  ;;  %v4960_v43 = vsel %vm425_vm2, %v4959_v63, %v9377_v62  ;;  %v5045_v62 = vrot.slane %v12719_v45, 4  ;;  %v4933_v46 = vrot.slane %v12739_v29, 4 }
 0x6f9   : > { %v4962_v57 = vsel %vm425_vm2, %v9387_v18, %v4961_v3  ;;  %v4850_v22 = vsel %vm425_vm2, %v9386_v48, %v4849_v53  ;;  %v4854_v25 = vperm.slane %v4848_v24, %v9548_v56  ;;  %v4966_v40 = vperm.slane %v4960_v43, %v9548_v56 }
 0x6fa   : > { %v12709_v39 = vperm.slane %v4962_v57, %v9548_v56  ;;  %v12714_v54 = vperm.slane %v4850_v22, %v9548_v56  ;;  %v4990_v18 = vperm.slane %v4984_v15, %v15580_v9  ;;  %v4985_v53 = vrot.slane %v12691_v52, 4 }
 0x6fb   : > { %v4897_v48 = vrot.slane %v4854_v25, 4  ;;  %v5009_v57 = vrot.slane %v4966_v40, 4 }
 0x6fc   : > { %v9390_v42 = vpop.permute.xlu1 %9389  ;;  %v5021_v38 = vrot.slane %v12709_v39, 4  ;;  %v4909_v47 = vrot.slane %v12714_v54, 4  ;;  %v5033_v22 = vrot.slane %v4990_v18, 4 }
 0x6fd   : > { %v9392_v14 = vunpack.i.h.bf16 %v9390_v42  ;;  %v9391_v20 = vunpack.i.l.bf16 %v9390_v42 }
 0x6ff   : > { %v4971_v50 = vrot.slane %v9392_v14, 4  ;;  %v4974_v61 = vsel %vm425_vm2, %v9392_v14, %v4973_v37  ;;  %v4859_v60 = vrot.slane %v9391_v20, 4  ;;  %v4862_v23 = vsel %vm425_vm2, %v9391_v20, %v4861_v58 }
 0x700   : > { %v12729_v59 = vperm.slane %v4974_v61, %v9548_v56  ;;  %v12736_v5 = vperm.slane %v4862_v23, %v9548_v56  ;;  %v4921_v20 = vrot.slane %v4878_v6, 4 }
 0x701   : > { %v4972_v0 = vsel %vm425_vm2, %v4971_v50, %v9382_v21  ;;  %v4860_v11 = vsel %vm425_vm2, %v4859_v60, %v9381_v31 }
 0x702   : > { %v4978_v30 = vperm.slane %v4972_v0, %v9548_v56  ;;  %v4866_v34 = vperm.slane %v4860_v11, %v9548_v56  ;;  %v5022_v2 = vsel %vm425_vm2, %v12729_v59, %v5021_v38  ;;  %v4910_v55 = vsel %vm425_vm2, %v12736_v5, %v4909_v47 }
 0x703   : > { %v12750_v27 = vperm.slane %v5022_v2, %v15580_v9  ;;  %v12754_v4 = vperm.slane %v4910_v55, %v15580_v9  ;;  %v4873_v2 = vrot.slane %v12695_v19, 4 }
 0x704   : > { %v5007_v51 = vrot.slane %v4978_v30, 4  ;;  %v4895_v35 = vrot.slane %v4866_v34, 4  ;;  %v4898_v49 = vsel %vm425_vm2, %v4866_v34, %v4897_v48  ;;  %v5010_v15 = vsel %vm425_vm2, %v4978_v30, %v5009_v57 }
 0x705   : > { %v5046_v17 = vsel %vm425_vm2, %v12750_v27, %v5045_v62  ;;  %v4934_v36 = vsel %vm425_vm2, %v12754_v4, %v4933_v46  ;;  %v12771_v42 = vperm.slane %v4898_v49, %v15580_v9  ;;  %v5018_v0 = vperm.slane %v5010_v15, %v15580_v9 }
 0x706   : > { %v4896_v21 = vsel %vm425_vm2, %v4895_v35, %v4854_v25  ;;  %v5008_v31 = vsel %vm425_vm2, %v5007_v51, %v4966_v40  ;;  %v5062_v26 = vpack.c.bf16 %v5046_v17, %v5046_v17  ;;  %v5061_v37 = vpack.c.bf16 %v4934_v36, %v4934_v36 }
 0x707   : > { %v5014_v3 = vperm.slane %v5008_v31, %v15580_v9  ;;  %v4902_v63 = vperm.slane %v4896_v21, %v15580_v9  ;;  %v4986_v51 = vsel %vm425_vm2, %v12683_v28, %v4985_v53  ;;  %v4874_v48 = vsel %vm425_vm2, %v12699_v12, %v4873_v2 }
 0x708   : > { %v5191_v24 = vshrl.u32 %v5062_v26, 16  ;;  %v5183_v13 = vshrl.u32 %v5061_v37, 16  ;;  %v5194_v50 = vshll.u32 %v5062_v26, 16  ;;  %v5186_v25 = vshll.u32 %v5061_v37, 16 }
 0x709   : > { %v5031_v58 = vrot.slane %v5014_v3, 4  ;;  %v4919_v14 = vrot.slane %v4902_v63, 4  ;;  %v5034_v1 = vsel %vm425_vm2, %v5014_v3, %v5033_v22  ;;  %v4922_v47 = vsel %vm425_vm2, %v4902_v63, %v4921_v20 }
 0x70a   : > { %v5193_v43 = vrot.slane %v5191_v24, 7  ;;  %v5185_v38 = vrot.slane %v5183_v13, 7  ;;  %v5050_v35 = vpack.c.bf16 %v5034_v1, %v5034_v1  ;;  %v5035_v46 = vrot.slane %v5018_v0, 4 }
 0x70b   : > { %v5032_v52 = vsel %vm425_vm2, %v5031_v58, %v4990_v18  ;;  %v4920_v60 = vsel %vm425_vm2, %v4919_v14, %v4878_v6  ;;  %v5049_v18 = vpack.c.bf16 %v4922_v47, %v4922_v47  ;;  %v4923_v6 = vrot.slane %v12771_v42, 4 }
 0x70c   : > { %v5048_v61 = vpack.c.bf16 %v5032_v52, %v5032_v52  ;;  %v5047_v23 = vpack.c.bf16 %v4920_v60, %v4920_v60  ;;  %v5198_v11 = vrot.slane %v5193_v43, 4  ;;  %v5196_v34 = vor.u32 %v5194_v50, %v5193_v43 }
 0x70d   : > { %v5188_v10 = vor.u32 %v5186_v25, %v5185_v38  ;;  %v5189_v55 = vrot.slane %v5185_v38, 4  ;;  %v4994_v49 = vperm.slane %v4986_v51, %v15580_v9  ;;  %v4882_v3 = vperm.slane %v4874_v48, %v15580_v9 }
 0x70e   : > { %v5072_v30 = vshrl.u32 %v5048_v61, 16  ;;  %v5064_v40 = vshrl.u32 %v5047_v23, 16  ;;  %5245 = vrot.lane.b32.xlu1 %v5198_v11, %s9452_s20  ;;  %v5075_v28 = vshll.u32 %v5048_v61, 16  ;;  %v5089_v17 = vshrl.u32 %v5050_v35, 16 }
 0x70f   : > { %5241 = vrot.lane.b32.xlu2 %v5188_v10, %s9452_s20  ;;  %v5197_v21 = vsel %vm9677_vm5, %v5189_v55, %v5196_v34  ;;  %v5081_v53 = vshrl.u32 %v5049_v18, 16  ;;  %v5067_v12 = vshll.u32 %v5047_v23, 16  ;;  %v5036_v57 = vsel %vm425_vm2, %v5035_v46, %v4994_v49 }
 0x710   : > { %v5074_v31 = vrot.slane %v5072_v30, 7  ;;  %v5066_v19 = vrot.slane %v5064_v40, 7  ;;  %5243 = vrot.lane.b32.xlu0 %v5197_v21, %s9452_s20  ;;  %v4924_v37 = vsel %vm425_vm2, %v4923_v6, %v4882_v3  ;;  %v5019_v58 = vrot.slane %v12729_v59, 4 }
 0x711   : > { %v4907_v22 = vrot.slane %v12736_v5, 4  ;;  %v5091_v14 = vrot.slane %v5089_v17, 7  ;;  %v5083_v20 = vrot.slane %v5081_v53, 7  ;;  %v5052_v13 = vpack.c.bf16 %v5036_v57, %v5036_v57 }
 0x712   : > { %v5070_v26 = vrot.slane %v5066_v19, 4  ;;  %v5077_v36 = vor.u32 %v5075_v28, %v5074_v31  ;;  %v5079_v63 = vrot.slane %v5074_v31, 4  ;;  %v5069_v24 = vor.u32 %v5067_v12, %v5066_v19 }
 0x713   : > { %v5051_v52 = vpack.c.bf16 %v4924_v37, %v4924_v37  ;;  %v5092_v1 = vshll.u32 %v5050_v35, 16  ;;  %v4995_v43 = vrot.slane %v12688_v7, 4  ;;  %v5037_v59 = vrot.slane %v4994_v49, 4 }
 0x714   : > { %v5078_v15 = vsel %vm9677_vm5, %v5070_v26, %v5077_v36  ;;  %v4908_v5 = vsel %vm425_vm2, %v4907_v22, %v12714_v54  ;;  %v5020_v50 = vsel %vm425_vm2, %v5019_v58, %v12709_v39  ;;  %v4883_v61 = vrot.slane %v12702_v16, 4 }
 0x715   : > { %v5087_v60 = vrot.slane %v5083_v20, 4  ;;  %v5094_v38 = vor.u32 %v5092_v1, %v5091_v14  ;;  %v4925_v25 = vrot.slane %v4882_v3, 4  ;;  %v5084_v23 = vshll.u32 %v5049_v18, 16 }
 0x716   : > { %5203 = vrot.lane.b32.xlu1 %v5079_v63, %s9452_s20  ;;  %v5106_v47 = vshrl.u32 %v5052_v13, 16  ;;  %v5098_v11 = vshrl.u32 %v5051_v52, 16  ;;  %v5038_v34 = vsel %vm425_vm2, %v5018_v0, %v5037_v59  ;;  %v4914_v30 = vperm.slane %v4908_v5, %v15580_v9 }
 0x717   : > { %5199 = vrot.lane.b32.xlu2 %v5069_v24, %s9452_s20  ;;  %v5026_v7 = vperm.slane %v5020_v50, %v15580_v9  ;;  %v5096_v2 = vrot.slane %v5091_v14, 4  ;;  %v4926_v54 = vsel %vm425_vm2, %v12771_v42, %v4925_v25  ;;  %v5086_v10 = vor.u32 %v5084_v23, %v5083_v20 }
 0x718   : > { %5201 = vrot.lane.b32.xlu0 %v5078_v15, %s9452_s20  ;;  %v4996_v16 = vsel %vm425_vm2, %v4995_v43, %v12676_v44  ;;  %v5095_v39 = vsel %vm9677_vm5, %v5087_v60, %v5094_v38  ;;  %v5054_v55 = vpack.c.bf16 %v5038_v34, %v5038_v34  ;;  %v5108_v0 = vrot.slane %v5106_v47, 7 }
 0x719   : > { %v5100_v40 = vrot.slane %v5098_v11, 7  ;;  %v5053_v51 = vpack.c.bf16 %v4926_v54, %v4926_v54  ;;  %v4884_v35 = vsel %vm425_vm2, %v4883_v61, %v12679_v8  ;;  %v5039_v42 = vrot.slane %v5026_v7, 4 }
 0x71a   : > { %v4927_v18 = vrot.slane %v4914_v30, 4  ;;  %v5109_v48 = vshll.u32 %v5052_v13, 16  ;;  %v5123_v44 = vshrl.u32 %v5054_v55, 16  ;;  %v5002_v21 = vperm.slane %v4996_v16, %v15580_v9 }
 0x71b   : > { %v4890_v31 = vperm.slane %v4884_v35, %v15580_v9  ;;  %v5101_v19 = vshll.u32 %v5051_v52, 16  ;;  %v5104_v46 = vrot.slane %v5100_v40, 4  ;;  %v5115_v28 = vshrl.u32 %v5053_v51, 16 }
 0x71c   : > { %v5111_v6 = vor.u32 %v5109_v48, %v5108_v0  ;;  %v5113_v49 = vrot.slane %v5108_v0, 4  ;;  %v5040_v3 = vsel %vm425_vm2, %v5039_v42, %v5002_v21  ;;  %v5125_v53 = vrot.slane %v5123_v44, 7 }
 0x71d   : > { %v4928_v17 = vsel %vm425_vm2, %v4927_v18, %v4890_v31  ;;  %v5103_v8 = vor.u32 %v5101_v19, %v5100_v40  ;;  %v5117_v26 = vrot.slane %v5115_v28, 7  ;;  %v5056_v36 = vpack.c.bf16 %v5040_v3, %v5040_v3 }
 0x71e   : > { %5209 = vrot.lane.b32.xlu1 %v5096_v2, %s9452_s20  ;;  %v5112_v12 = vsel %vm9677_vm5, %v5104_v46, %v5111_v6  ;;  %v5055_v63 = vpack.c.bf16 %v4928_v17, %v4928_v17  ;;  %v5126_v57 = vshll.u32 %v5054_v55, 16  ;;  %v5041_v37 = vrot.slane %v5002_v21, 4 }
 0x71f   : > { %5205 = vrot.lane.b32.xlu2 %v5086_v10, %s9452_s20  ;;  %v5118_v58 = vshll.u32 %v5053_v51, 16  ;;  %v4929_v24 = vrot.slane %v4890_v31, 4  ;;  %v5121_v14 = vrot.slane %v5117_v26, 4  ;;  %v5140_v20 = vshrl.u32 %v5056_v36, 16 }
 0x720   : > { %5207 = vrot.lane.b32.xlu0 %v5095_v39, %s9452_s20  ;;  %v5128_v22 = vor.u32 %v5126_v57, %v5125_v53  ;;  %v5132_v15 = vshrl.u32 %v5055_v63, 16  ;;  %v5042_v13 = vsel %vm425_vm2, %v5026_v7, %v5041_v37  ;;  %v5130_v52 = vrot.slane %v5125_v53, 4 }
 0x721   : > { %v4930_v1 = vsel %vm425_vm2, %v4914_v30, %v4929_v24  ;;  %v5120_v43 = vor.u32 %v5118_v58, %v5117_v26  ;;  %v5058_v59 = vpack.c.bf16 %v5042_v13, %v5042_v13  ;;  %v5142_v50 = vrot.slane %v5140_v20, 7  ;;  %v5278_v58 = vld [vmem:[#allocation2 + $0xc] sm:$0xf] }
 0x722   : > { %v5129_v5 = vsel %vm9677_vm5, %v5121_v14, %v5128_v22  ;;  %v5134_v61 = vrot.slane %v5132_v15, 7  ;;  %v5057_v60 = vpack.c.bf16 %v4930_v1, %v4930_v1  ;;  %v5043_v38 = vrot.slane %v12750_v27, 4  ;;  %v5324_v14 = vld [vmem:[#allocation2 + $0x5c] sm:$0x1] }
 0x723   : > { %v4931_v25 = vrot.slane %v12754_v4, 4  ;;  %v5143_v23 = vshll.u32 %v5056_v36, 16  ;;  %v5157_v47 = vshrl.u32 %v5058_v59, 16  ;;  %v5135_v11 = vshll.u32 %v5055_v63, 16  ;;  %v5271_v36 = vld [vmem:[#allocation2] sm:$0xf] }
 0x724   : > { %v5138_v34 = vrot.slane %v5134_v61, 4  ;;  %v5149_v7 = vshrl.u32 %v5057_v60, 16  ;;  %v5147_v2 = vrot.slane %v5142_v50, 4  ;;  %v5044_v54 = vsel %vm425_vm2, %v5043_v38, %v12719_v45  ;;  %v5292_v38 = vld [vmem:[#allocation2 + $0x24] sm:$0xf] }
 0x725   : > { %v5145_v30 = vor.u32 %v5143_v23, %v5142_v50  ;;  %v4932_v10 = vsel %vm425_vm2, %v4931_v25, %v12739_v29  ;;  %v5137_v16 = vor.u32 %v5135_v11, %v5134_v61  ;;  %v5159_v27 = vrot.slane %v5157_v47, 7  ;;  %v5275_v50 = vld [vmem:[#allocation2 + $0x8] sm:$0x1] }
 0x726   : > { %5215 = vrot.lane.b32.xlu1 %v5113_v49, %s9452_s20  ;;  %v5151_v39 = vrot.slane %v5149_v7, 7  ;;  %v5060_v55 = vpack.c.bf16 %v5044_v54, %v5044_v54  ;;  %v5059_v0 = vpack.c.bf16 %v4932_v10, %v4932_v10  ;;  %v5160_v40 = vshll.u32 %v5058_v59, 16 }
 0x727   : > { %5211 = vrot.lane.b32.xlu2 %v5103_v8, %s9452_s20  ;;  %v5146_v4 = vsel %vm9677_vm5, %v5138_v34, %v5145_v30  ;;  %v5152_v51 = vshll.u32 %v5057_v60, 16  ;;  %v5164_v18 = vrot.slane %v5159_v27, 4  ;;  %v5320_v8 = vld [vmem:[#allocation2 + $0x54] sm:$0xf] }
 0x728   : > { %5213 = vrot.lane.b32.xlu0 %v5112_v12, %s9452_s20  ;;  %v5155_v45 = vrot.slane %v5151_v39, 4  ;;  %v5162_v35 = vor.u32 %v5160_v40, %v5159_v27  ;;  %v5174_v42 = vshrl.u32 %v5060_v55, 16  ;;  %v5166_v29 = vshrl.u32 %v5059_v0, 16  ;;  %v5282_v34 = vld [vmem:[#allocation2 + $0x14] sm:$0x1] }
 0x729   : > { %v5154_v48 = vor.u32 %v5152_v51, %v5151_v39  ;;  %v5177_v19 = vshll.u32 %v5060_v55, 16  ;;  %v5169_v46 = vshll.u32 %v5059_v0, 16  ;;  %v5289_v39 = vld [vmem:[#allocation2 + $0x20] sm:$0x1]  ;;  %v5306_v40 = vld [vmem:[#allocation2 + $0x3c] sm:$0xf] }
 0x72a   : > { %v5163_v44 = vsel %vm9677_vm5, %v5155_v45, %v5162_v35  ;;  %v5176_v21 = vrot.slane %v5174_v42, 7  ;;  %v5168_v31 = vrot.slane %v5166_v29, 7 }
 0x72c   : > { %v5172_v6 = vrot.slane %v5168_v31, 4  ;;  %v5179_v28 = vor.u32 %v5177_v19, %v5176_v21  ;;  %v5181_v49 = vrot.slane %v5176_v21, 4  ;;  %v5171_v3 = vor.u32 %v5169_v46, %v5168_v31  ;;  %v5313_v21 = vld [vmem:[#allocation2 + $0x48] sm:$0xf] }
 0x72e   : > { %5221 = vrot.lane.b32.xlu1 %v5130_v52, %s9452_s20  ;;  %v5180_v17 = vsel %vm9677_vm5, %v5172_v6, %v5179_v28  ;;  %v5285_v52 = vld [vmem:[#allocation2 + $0x18] sm:$0xf]  ;;  %vm15941_vm5 = vmmov %vm15940_vm1 }
 0x72f   : > { %5217 = vrot.lane.b32.xlu2 %v5120_v43, %s9452_s20 }
 0x730   : > { %5219 = vrot.lane.b32.xlu0 %v5129_v5, %s9452_s20 }
 0x736   : > { %5227 = vrot.lane.b32.xlu1 %v5147_v2, %s9452_s20  ;;  %v5299_v2 = vld [vmem:[#allocation2 + $0x30] sm:$0xf] }
 0x737   : > { %5223 = vrot.lane.b32.xlu2 %v5137_v16, %s9452_s20 }
 0x738   : > { %5225 = vrot.lane.b32.xlu0 %v5146_v4, %s9452_s20 }
 0x73e   : > { %5233 = vrot.lane.b32.xlu1 %v5164_v18, %s9452_s20  ;;  %v5296_v18 = vld [vmem:[#allocation2 + $0x2c] sm:$0x1] }
 0x73f   : > { %5229 = vrot.lane.b32.xlu2 %v5154_v48, %s9452_s20 }
 0x740   : > { %5231 = vrot.lane.b32.xlu0 %v5163_v44, %s9452_s20 }
 0x746   : > { %5239 = vrot.lane.b32.xlu1 %v5181_v49, %s9452_s20  ;;  %v5303_v49 = vld [vmem:[#allocation2 + $0x38] sm:$0x1] }
 0x747   : > { %5235 = vrot.lane.b32.xlu2 %v5171_v3, %s9452_s20 }
 0x748   : > { %5237 = vrot.lane.b32.xlu0 %v5180_v17, %s9452_s20 }
 0x769   : > { %v5242_v53 = vpop.permute.xlu2 %5241 }
 0x76a   : > { %v5321_v26 = vsel %vm9821_vm12, %v5242_v53, %v5320_v8 }
 0x76b   : > { %5322 = vst [vmem:[#allocation2 + $0x54] sm:$0xf] %v5321_v26 }
 0x771   : > { %v5200_v63 = vpop.permute.xlu2 %5199 }
 0x772   : > { %v5272_v57 = vsel %vm9821_vm12, %v5200_v63, %v5271_v36  ;;  %v5610_v37 = vld [vmem:[#allocation2 + $0x54] sm:$0xf]  ;;  %v5310_v36 = vld [vmem:[#allocation2 + $0x44] sm:$0x1] }
 0x773   : > { %5273 = vst [vmem:[#allocation2] sm:$0xf] %v5272_v57  ;;  %5656 = vrot.lane.b32.xlu0 %v5610_v37, %s9453_s21  ;;  %v5943_v24 = vld [vmem:[#allocation2 + $0x54] sm:$0xf] }
 0x779   : > { %v5206_v62 = vpop.permute.xlu2 %5205 }
 0x77a   : > { %v5279_v22 = vsel %vm9821_vm12, %v5206_v62, %v5278_v58  ;;  %v5596_v42 = vld [vmem:[#allocation2] sm:$0xf] }
 0x77b   : > { %5280 = vst [vmem:[#allocation2 + $0xc] sm:$0xf] %v5279_v22  ;;  %5989 = vrot.lane.b32.xlu0 %v5943_v24, %s9454_s22  ;;  %v5317_v22 = vld [vmem:[#allocation2 + $0x50] sm:$0x1] }
 0x780   : > { %v5246_v20 = vpop.permute.xlu1 %5245 }
 0x781   : > { %v5325_v13 = vsel %vm9784_vm9, %v5246_v20, %v5324_v14  ;;  %v5212_v1 = vpop.permute.xlu2 %5211 }
 0x782   : > { %5326 = vst [vmem:[#allocation2 + $0x5c] sm:$0x1] %v5325_v13  ;;  %v5286_v43 = vsel %vm9821_vm12, %v5212_v1, %v5285_v52  ;;  %v5244_v59 = vpop.permute.xlu0 %5243  ;;  %v5598_v5 = vld [vmem:[#allocation2 + $0xc] sm:$0xf] }
 0x783   : > { %5287 = vst [vmem:[#allocation2 + $0x18] sm:$0xf] %v5286_v43  ;;  %5632 = vrot.lane.b32.xlu0 %v5598_v5, %s9453_s21  ;;  %v5931_v1 = vld [vmem:[#allocation2 + $0xc] sm:$0xf] }
 0x784   : > { %5323 = vst.msk [vmem:[#allocation2 + $0x58] sm:$0xf] %vm876_vm10, %v5244_v59  ;;  %v5929_v59 = vld [vmem:[#allocation2] sm:$0xf] }
 0x788   : > { %v5204_v61 = vpop.permute.xlu1 %5203 }
 0x789   : > { %v5276_v60 = vsel %vm9784_vm9, %v5204_v61, %v5275_v50  ;;  %v5218_v25 = vpop.permute.xlu2 %5217 }
 0x78a   : > { %5277 = vst [vmem:[#allocation2 + $0x8] sm:$0x1] %v5276_v60  ;;  %v5293_v23 = vsel %vm9821_vm12, %v5218_v25, %v5292_v38  ;;  %v5202_v47 = vpop.permute.xlu0 %5201  ;;  %v5600_v29 = vld [vmem:[#allocation2 + $0x18] sm:$0xf] }
 0x78b   : > { %5294 = vst [vmem:[#allocation2 + $0x24] sm:$0xf] %v5293_v23  ;;  %v5611_v11 = vld [vmem:[#allocation2 + $0x58] sm:$0xf] }
 0x78c   : > { %5274 = vst.msk [vmem:[#allocation2 + $0x4] sm:$0xf] %vm876_vm10, %v5202_v47  ;;  %5658 = vrot.lane.b32.xlu1 %v5611_v11, %s9453_s21  ;;  %v5944_v27 = vld [vmem:[#allocation2 + $0x58] sm:$0xf] }
 0x78d   : > { %v5933_v60 = vld [vmem:[#allocation2 + $0x18] sm:$0xf] }
 0x78e   : > { %v8581_v11 = vld [vmem:[#allocation2 + $0x58] sm:$0xf] }
 0x790   : > { %v5210_v30 = vpop.permute.xlu1 %5209 }
 0x791   : > { %v5283_v7 = vsel %vm9784_vm9, %v5210_v30, %v5282_v34  ;;  %v5224_v54 = vpop.permute.xlu2 %5223  ;;  %v8580_v34 = vld [vmem:[#allocation2 + $0x54] sm:$0xe]  ;;  %v8658_v30 = vrot.slane %v8581_v11, 5 }
 0x792   : > { %5284 = vst [vmem:[#allocation2 + $0x14] sm:$0x1] %v5283_v7  ;;  %v5300_v10 = vsel %vm9821_vm12, %v5224_v54, %v5299_v2  ;;  %v5208_v16 = vpop.permute.xlu0 %5207  ;;  %v5602_v53 = vld [vmem:[#allocation2 + $0x24] sm:$0xf]  ;;  %v9241_v7 = vrot.slane %v8580_v34, 9 }
 0x793   : > { %5301 = vst [vmem:[#allocation2 + $0x30] sm:$0xf] %v5300_v10  ;;  %v5597_v4 = vld [vmem:[#allocation2 + $0x4] sm:$0xf] }
 0x794   : > { %5281 = vst.msk [vmem:[#allocation2 + $0x10] sm:$0xf] %vm876_vm10, %v5208_v16  ;;  %5991 = vrot.lane.b32.xlu1 %v5944_v27, %s9454_s22  ;;  %5630 = vrot.lane.b32.xlu2 %v5597_v4, %s9453_s21  ;;  %v5930_v5 = vld [vmem:[#allocation2 + $0x4] sm:$0xf]  ;;  %v8659_v2 = vsel %vm9890_vm15, %v9241_v7, %v8658_v30  ;;  %v12934_v27 = vld [vmem:[#allocation2 + $0x58] sm:$0xf] }
 0x795   : > { %v5935_v38 = vld [vmem:[#allocation2 + $0x24] sm:$0xf] }
 0x798   : > { %v5216_v55 = vpop.permute.xlu1 %5215 }
 0x799   : > { %v5290_v0 = vsel %vm9784_vm9, %v5216_v55, %v5289_v39  ;;  %v5230_v51 = vpop.permute.xlu2 %5229  ;;  %v8175_v55 = vld [vmem:[#allocation2 + $0x54] sm:$0xe] }
 0x79a   : > { %5291 = vst [vmem:[#allocation2 + $0x20] sm:$0x1] %v5290_v0  ;;  %v5307_v45 = vsel %vm9821_vm12, %v5230_v51, %v5306_v40  ;;  %v5214_v35 = vpop.permute.xlu0 %5213  ;;  %v5604_v26 = vld [vmem:[#allocation2 + $0x30] sm:$0xf]  ;;  %v8253_v0 = vrot.slane %v12934_v27, 5  ;;  %v9233_v51 = vrot.slane %v8175_v55, 9 }
 0x79b   : > { %5308 = vst [vmem:[#allocation2 + $0x3c] sm:$0xf] %v5307_v45  ;;  %v5599_v6 = vld [vmem:[#allocation2 + $0x10] sm:$0xf]  ;;  %v13026_v55 = vld [vmem:[#allocation2 + $0x4] sm:$0xf] }
 0x79c   : > { %5288 = vst.msk [vmem:[#allocation2 + $0x1c] sm:$0xf] %vm876_vm10, %v5214_v35  ;;  %5628 = vrot.lane.b32.xlu1 %v5596_v42, %s9453_s21  ;;  %5636 = vrot.lane.b32.xlu2 %v5600_v29, %s9453_s21  ;;  %v5932_v50 = vld [vmem:[#allocation2 + $0x10] sm:$0xf]  ;;  %v8254_v42 = vsel %vm9890_vm15, %v9233_v51, %v8253_v0  ;;  %v8177_v51 = vld [vmem:[#allocation2 + $0x5c] sm:$0x1] }
 0x79d   : > { %v5937_v61 = vld [vmem:[#allocation2 + $0x30] sm:$0xf] }
 0x79e   : > { %v8571_v4 = vld [vmem:[#allocation2 + $0x30] sm:$0xe] }
 0x79f   : > { %v9238_v40 = vrot.slane %v8571_v4, 9  ;;  %v12948_v29 = vld [vmem:[#allocation2 + $0x10] sm:$0xf]  ;;  %v13023_v4 = vld [vmem:[#allocation2 + $0x4] sm:$0xf] }
 0x7a0   : > { %v5222_v48 = vpop.permute.xlu1 %5221 }
 0x7a1   : > { %v5297_v44 = vsel %vm9784_vm9, %v5222_v48, %v5296_v18  ;;  %v5236_v31 = vpop.permute.xlu2 %5235 }
 0x7a2   : > { %5298 = vst [vmem:[#allocation2 + $0x2c] sm:$0x1] %v5297_v44  ;;  %v5314_v19 = vsel %vm9821_vm12, %v5236_v31, %v5313_v21  ;;  %v5220_v46 = vpop.permute.xlu0 %5219  ;;  %v5606_v62 = vld [vmem:[#allocation2 + $0x3c] sm:$0xf]  ;;  %v8562_v44 = vld [vmem:[#allocation2 + $0xc] sm:$0xe]  ;;  %vm16002_vm12 = vmmov %vm15940_vm1 }
 0x7a3   : > { %5315 = vst [vmem:[#allocation2 + $0x48] sm:$0xf] %v5314_v19  ;;  %v5601_v28 = vld [vmem:[#allocation2 + $0x1c] sm:$0xf]  ;;  %v8565_v21 = vld [vmem:[#allocation2 + $0x18] sm:$0xe] }
 0x7a4   : > { %5295 = vst.msk [vmem:[#allocation2 + $0x28] sm:$0xf] %vm876_vm10, %v5220_v46  ;;  %5634 = vrot.lane.b32.xlu1 %v5599_v6, %s9453_s21  ;;  %5638 = vrot.lane.b32.xlu0 %v5601_v28, %s9453_s21  ;;  %v5934_v15 = vld [vmem:[#allocation2 + $0x1c] sm:$0xf]  ;;  %v8616_v31 = vrot.slane %v12948_v29, 5  ;;  %v9235_v28 = vrot.slane %v8562_v44, 9 }
 0x7a5   : > { %v5939_v54 = vld [vmem:[#allocation2 + $0x3c] sm:$0xf]  ;;  %v8559_v44 = vld [vmem:[#allocation2] sm:$0xe] }
 0x7a6   : > { %v12950_v18 = vld [vmem:[#allocation2 + $0x1c] sm:$0xf] }
 0x7a7   : > { %v8623_v19 = vrot.slane %v12950_v18, 5 }
 0x7a8   : > { %v5228_v3 = vpop.permute.xlu1 %5227 }
 0x7a9   : > { %v5304_v17 = vsel %vm9784_vm9, %v5228_v3, %v5303_v49  ;;  %v9236_v49 = vrot.slane %v8565_v21, 9  ;;  %v8609_v21 = vrot.slane %v13026_v55, 5 }
 0x7aa   : > { %5305 = vst [vmem:[#allocation2 + $0x38] sm:$0x1] %v5304_v17  ;;  %v5226_v8 = vpop.permute.xlu0 %5225  ;;  %v5608_v52 = vld [vmem:[#allocation2 + $0x48] sm:$0xf]  ;;  %v8617_v17 = vsel %vm9890_vm15, %v9235_v28, %v8616_v31  ;;  %v8256_v28 = vrot.slane %v8177_v51, 5 }
 0x7ab   : > { %5302 = vst.msk [vmem:[#allocation2 + $0x34] sm:$0xf] %vm876_vm10, %v5226_v8  ;;  %v5603_v12 = vld [vmem:[#allocation2 + $0x28] sm:$0xf]  ;;  %v8624_v8 = vsel %vm9890_vm15, %v9236_v49, %v8623_v19 }
 0x7ac   : > { %5640 = vrot.lane.b32.xlu1 %v5602_v53, %s9453_s21  ;;  %5642 = vrot.lane.b32.xlu2 %v5603_v12, %s9453_s21  ;;  %v5936_v23 = vld [vmem:[#allocation2 + $0x28] sm:$0xf]  ;;  %v12972_v12 = vld [vmem:[#allocation2 + $0x1c] sm:$0xf] }
 0x7ad   : > { %5644 = vrot.lane.b32.xlu0 %v5604_v26, %s9453_s21  ;;  %v5941_v10 = vld [vmem:[#allocation2 + $0x48] sm:$0xf] }
 0x7ae   : > { %v8577_v46 = vld [vmem:[#allocation2 + $0x48] sm:$0xe] }
 0x7af   : > { %v9240_v3 = vrot.slane %v8577_v46, 9 }
 0x7b0   : > { %v5234_v63 = vpop.permute.xlu1 %5233 }
 0x7b1   : > { %v5311_v57 = vsel %vm9784_vm9, %v5234_v63, %v5310_v36  ;;  %v8160_v36 = vld [vmem:[#allocation2 + $0x18] sm:$0xe]  ;;  %v8574_v63 = vld [vmem:[#allocation2 + $0x3c] sm:$0xe]  ;;  %v8573_v51 = vld [vmem:[#allocation2 + $0x38] sm:$0x1] }
 0x7b2   : > { %5312 = vst [vmem:[#allocation2 + $0x44] sm:$0x1] %v5311_v57  ;;  %v5232_v37 = vpop.permute.xlu0 %5231  ;;  %v5605_v58 = vld [vmem:[#allocation2 + $0x34] sm:$0xf]  ;;  %v8218_v57 = vrot.slane %v12972_v12, 5 }
 0x7b3   : > { %5309 = vst.msk [vmem:[#allocation2 + $0x40] sm:$0xf] %vm876_vm10, %v5232_v37  ;;  %v5938_v47 = vld [vmem:[#allocation2 + $0x34] sm:$0xf] }
 0x7b4   : > { %5646 = vrot.lane.b32.xlu1 %v5605_v58, %s9453_s21  ;;  %5648 = vrot.lane.b32.xlu2 %v5606_v62, %s9453_s21  ;;  %v12931_v16 = vld [vmem:[#allocation2 + $0x34] sm:$0xf]  ;;  %v8582_v58 = vld [vmem:[#allocation2 + $0x5c] sm:$0x1]  ;;  %v8660_v62 = vrot.slane %v8658_v30, 4 }
 0x7b5   : > { %v8637_v39 = vrot.slane %v12931_v16, 5 }
 0x7b7   : > { %v8638_v45 = vsel %vm9890_vm15, %v9238_v40, %v8637_v39  ;;  %v8154_v40 = vld [vmem:[#allocation2] sm:$0xe] }
 0x7b8   : > { %v5240_v24 = vpop.permute.xlu1 %5239  ;;  %v9226_v46 = vrot.slane %v8154_v40, 9 }
 0x7b9   : > { %v5318_v14 = vsel %vm9784_vm9, %v5240_v24, %v5317_v22  ;;  %v9228_v22 = vrot.slane %v8160_v36, 9  ;;  %v9239_v24 = vrot.slane %v8574_v63, 9  ;;  %v13051_v36 = vld [vmem:[#allocation2 + $0x34] sm:$0xf]  ;;  %v8567_v63 = vld [vmem:[#allocation2 + $0x20] sm:$0x1]  ;;  %vm15978_vm9 = vmmov %vm15940_vm1 }
 0x7ba   : > { %5319 = vst [vmem:[#allocation2 + $0x50] sm:$0x1] %v5318_v14  ;;  %v5238_v20 = vpop.permute.xlu0 %5237  ;;  %v5607_v13 = vld [vmem:[#allocation2 + $0x40] sm:$0xf] }
 0x7bb   : > { %5316 = vst.msk [vmem:[#allocation2 + $0x4c] sm:$0xf] %vm876_vm10, %v5238_v20  ;;  %5650 = vrot.lane.b32.xlu0 %v5607_v13, %s9453_s21  ;;  %v5940_v25 = vld [vmem:[#allocation2 + $0x40] sm:$0xf]  ;;  %v8661_v20 = vrot.slane %v8582_v58, 5  ;;  %v8219_v13 = vsel %vm9890_vm15, %v9228_v22, %v8218_v57  ;;  %v8625_v22 = vrot.slane %v8623_v19, 4  ;;  %vm15981_vm10 = vmmov %vm15940_vm1 }
 0x7bc   : > { %5652 = vrot.lane.b32.xlu1 %v5608_v52, %s9453_s21  ;;  %v12974_v26 = vld [vmem:[#allocation2 + $0x40] sm:$0xf]  ;;  %v8163_v58 = vld [vmem:[#allocation2 + $0x24] sm:$0xe]  ;;  %v8158_v19 = vld [vmem:[#allocation2 + $0x10] sm:$0xf] }
 0x7bd   : > { %v8644_v37 = vrot.slane %v12974_v26, 5  ;;  %v8211_v40 = vrot.slane %v8158_v19, 5  ;;  %v8162_v19 = vld [vmem:[#allocation2 + $0x20] sm:$0x1] }
 0x7bf   : > { %v8645_v52 = vsel %vm9890_vm15, %v9239_v24, %v8644_v37 }
 0x7c2   : > { %v5609_v43 = vld [vmem:[#allocation2 + $0x4c] sm:$0xf] }
 0x7c3   : > { %5965 = vrot.lane.b32.xlu0 %v5931_v1, %s9454_s22  ;;  %5654 = vrot.lane.b32.xlu2 %v5609_v43, %s9453_s21  ;;  %v5942_v35 = vld [vmem:[#allocation2 + $0x4c] sm:$0xf]  ;;  %v8662_v1 = vsel %vm9890_vm15, %v8660_v62, %v8661_v20  ;;  %v12993_v43 = vld [vmem:[#allocation2 + $0x40] sm:$0xf]  ;;  %v8166_v20 = vld [vmem:[#allocation2 + $0x30] sm:$0xe] }
 0x7c4   : > { %5961 = vrot.lane.b32.xlu1 %v5929_v59, %s9454_s22  ;;  %v12953_v48 = vld [vmem:[#allocation2 + $0x4c] sm:$0xf] }
 0x7c5   : > { %v8651_v6 = vrot.slane %v12953_v48, 5  ;;  %v12995_v59 = vld [vmem:[#allocation2 + $0x4c] sm:$0xf] }
 0x7c7   : > { %v8652_v53 = vsel %vm9890_vm15, %v9240_v3, %v8651_v6  ;;  %v9234_v3 = vrot.slane %v8559_v44, 9 }
 0x7c9   : > { %v8610_v27 = vsel %vm9890_vm15, %v9234_v3, %v8609_v21 }
 0x7cb   : > { %5971 = vrot.lane.b32.xlu0 %v5934_v15, %s9454_s22  ;;  %5963 = vrot.lane.b32.xlu2 %v5930_v5, %s9454_s22  ;;  %v12998_v15 = vld [vmem:[#allocation2 + $0x28] sm:$0xf]  ;;  %v8169_v5 = vld [vmem:[#allocation2 + $0x3c] sm:$0xe] }
 0x7cc   : > { %5967 = vrot.lane.b32.xlu1 %v5932_v50, %s9454_s22  ;;  %v8172_v50 = vld [vmem:[#allocation2 + $0x48] sm:$0xe]  ;;  %v9231_v11 = vrot.slane %v8169_v5, 9  ;;  %v9230_v5 = vrot.slane %v8166_v20, 9 }
 0x7cd   : > { %v9232_v34 = vrot.slane %v8172_v50, 9 }
 0x7d3   : > { %5977 = vrot.lane.b32.xlu0 %v5937_v61, %s9454_s22  ;;  %5969 = vrot.lane.b32.xlu2 %v5933_v60, %s9454_s22  ;;  %v8239_v60 = vrot.slane %v12993_v43, 5 }
 0x7d4   : > { %5973 = vrot.lane.b32.xlu1 %v5935_v38, %s9454_s22  ;;  %v8246_v38 = vrot.slane %v12995_v59, 5  ;;  %v8570_v59 = vld [vmem:[#allocation2 + $0x2c] sm:$0x1] }
 0x7d5   : > { %v8240_v7 = vsel %vm9890_vm15, %v9231_v11, %v8239_v60 }
 0x7db   : > { %5983 = vrot.lane.b32.xlu0 %v5940_v25, %s9454_s22  ;;  %5975 = vrot.lane.b32.xlu2 %v5936_v23, %s9454_s22  ;;  %v8568_v25 = vld [vmem:[#allocation2 + $0x24] sm:$0xe] }
 0x7dc   : > { %5979 = vrot.lane.b32.xlu1 %v5938_v47, %s9454_s22  ;;  %v8630_v47 = vrot.slane %v12998_v15, 5  ;;  %v9237_v30 = vrot.slane %v8568_v25, 9 }
 0x7e3   : > { %8691 = vrot.lane.b32.xlu0 %v8659_v2, %s9454_s22  ;;  %5981 = vrot.lane.b32.xlu2 %v5939_v54, %s9454_s22  ;;  %v8247_v2 = vsel %vm9890_vm15, %v9232_v34, %v8246_v38 }
 0x7e4   : > { %5985 = vrot.lane.b32.xlu1 %v5941_v10, %s9454_s22  ;;  %v8631_v10 = vsel %vm9890_vm15, %v9237_v30, %v8630_v47  ;;  %v8576_v30 = vld [vmem:[#allocation2 + $0x44] sm:$0x1] }
 0x7e5   : > { %v13004_v23 = vpop.permute.xlu0 %5656  ;;  %v8647_v44 = vrot.slane %v8576_v30, 5  ;;  %v8220_v30 = vrot.slane %v8218_v57, 4  ;;  %v8159_v57 = vld [vmem:[#allocation2 + $0x14] sm:$0x1] }
 0x7eb   : > { %8679 = vrot.lane.b32.xlu0 %v8638_v45, %s9454_s22  ;;  %5987 = vrot.lane.b32.xlu2 %v5942_v35, %s9454_s22  ;;  %v8204_v35 = vrot.slane %v13023_v4, 5 }
 0x7ec   : > { %8286 = vrot.lane.b32.xlu1 %v8254_v42, %s9453_s21  ;;  %v8255_v42 = vrot.slane %v8253_v0, 4  ;;  %v8164_v0 = vld [vmem:[#allocation2 + $0x28] sm:$0xf] }
 0x7ed   : > { %v13034_v49 = vpop.permute.xlu0 %5989  ;;  %v8225_v24 = vrot.slane %v8164_v0, 5  ;;  %v8248_v0 = vrot.slane %v8246_v38, 4 }
 0x7ee   : > { %v12979_v14 = vpop.permute.xlu2 %5630  ;;  %15816 = vst [vmem:[#allocation15_spill] sm:$0xff] %v13034_v49 }
 0x7f3   : > { %8667 = vrot.lane.b32.xlu0 %v8617_v17, %s9454_s22  ;;  %8671 = vrot.lane.b32.xlu2 %v8624_v8, %s9454_s22  ;;  %v8205_v17 = vsel %vm9890_vm15, %v9226_v46, %v8204_v35  ;;  %v8257_v8 = vsel %vm9890_vm15, %v8255_v42, %v8256_v28  ;;  %v8639_v42 = vrot.slane %v8637_v39, 4  ;;  %v8640_v28 = vrot.slane %v8573_v51, 5  ;;  %v8174_v39 = vld [vmem:[#allocation2 + $0x50] sm:$0x1] }
 0x7f4   : > { %8687 = vrot.lane.b32.xlu1 %v8652_v53, %s9454_s22  ;;  %v8249_v20 = vrot.slane %v8174_v39, 5  ;;  %v8633_v51 = vrot.slane %v8570_v59, 5 }
 0x7f5   : > { %v13062_v11 = vpop.permute.xlu0 %5632  ;;  %v8641_v26 = vsel %vm9890_vm15, %v8639_v42, %v8640_v28  ;;  %v8221_v42 = vrot.slane %v8162_v19, 5 }
 0x7f6   : > { %v13015_v54 = vpop.permute.xlu2 %5636 }
 0x7f7   : > { %v8222_v12 = vsel %vm9890_vm15, %v8220_v30, %v8221_v42  ;;  %v7286_v42 = vld [vmem:[#allocation2 + $0x58] sm:$0xf] }
 0x7fb   : > { %8266 = vrot.lane.b32.xlu0 %v8219_v13, %s9453_s21  ;;  %8683 = vrot.lane.b32.xlu2 %v8645_v52, %s9454_s22  ;;  %v8232_v13 = vrot.slane %v13051_v36, 5  ;;  %v8626_v52 = vrot.slane %v8567_v63, 5  ;;  %v8653_v63 = vrot.slane %v8651_v6, 4  ;;  %v8165_v6 = vld [vmem:[#allocation2 + $0x2c] sm:$0x1] }
 0x7fc   : > { %8693 = vrot.lane.b32.xlu1 %v8662_v1, %s9454_s22  ;;  %v9229_v1 = vrot.slane %v8163_v58, 9  ;;  %v8564_v58 = vld [vmem:[#allocation2 + $0x14] sm:$0x1] }
 0x7fd   : > { %v8627_v50 = vsel %vm9890_vm15, %v8625_v22, %v8626_v52  ;;  %v8233_v18 = vsel %vm9890_vm15, %v9230_v5, %v8232_v13  ;;  %v8618_v22 = vrot.slane %v8616_v31, 4  ;;  %v8250_v5 = vsel %vm9890_vm15, %v8248_v0, %v8249_v20  ;;  %v6770_v20 = vld [vmem:[#allocation2 + $0x5c] sm:$0x1] }
 0x7fe   : > { %v13000_v61 = vpop.permute.xlu1 %5658  ;;  %v8226_v25 = vsel %vm9890_vm15, %v9229_v1, %v8225_v24  ;;  %v8619_v1 = vrot.slane %v8564_v58, 5  ;;  %v8241_v0 = vrot.slane %v8239_v60, 4  ;;  %v6959_v60 = vshll.u32 %v6770_v20, 16 }
 0x7ff   : > { %v8234_v30 = vrot.slane %v8232_v13, 4 }
 0x800   : > { %v8620_v48 = vsel %vm9890_vm15, %v8618_v22, %v8619_v1  ;;  %v8214_v22 = vrot.slane %v8159_v57, 5  ;;  %v6961_v57 = vrot.slane %v6959_v60, 5 }
 0x803   : > { %8278 = vrot.lane.b32.xlu0 %v8240_v7, %s9453_s21  ;;  %8282 = vrot.lane.b32.xlu2 %v8247_v2, %s9453_s21  ;;  %v8157_v7 = vld [vmem:[#allocation2 + $0xc] sm:$0xe] }
 0x804   : > { %8675 = vrot.lane.b32.xlu1 %v8631_v10, %s9454_s22  ;;  %v8646_v10 = vrot.slane %v8644_v37, 4  ;;  %v9227_v46 = vrot.slane %v8157_v7, 9  ;;  %v8579_v37 = vld [vmem:[#allocation2 + $0x50] sm:$0x1]  ;;  %v6769_v7 = vld [vmem:[#allocation2 + $0x58] sm:$0xf] }
 0x805   : > { %v8654_v52 = vrot.slane %v8579_v37, 5  ;;  %v6949_v28 = vshll.u32 %v6769_v7, 16  ;;  %v8611_v37 = vrot.slane %v8609_v21, 4  ;;  %v7285_v21 = vld [vmem:[#allocation2 + $0x54] sm:$0xf] }
 0x806   : > { %v13028_v45 = vpop.permute.xlu1 %5991  ;;  %v13042_v53 = vpop.permute.xlu2 %5642  ;;  %v8648_v3 = vsel %vm9890_vm15, %v8646_v10, %v8647_v44  ;;  %v8228_v10 = vrot.slane %v8165_v6, 5  ;;  %v8168_v6 = vld [vmem:[#allocation2 + $0x38] sm:$0x1] }
 0x80b   : > { %8258 = vrot.lane.b32.xlu0 %v8205_v17, %s9453_s21  ;;  %8288 = vrot.lane.b32.xlu2 %v8257_v8, %s9453_s21  ;;  %v8212_v17 = vsel %vm9890_vm15, %v9227_v46, %v8211_v40 }
 0x80c   : > { %8663 = vrot.lane.b32.xlu1 %v8610_v27, %s9454_s22 }
 0x80e   : > { %v13053_v62 = vpop.permute.xlu1 %5628  ;;  %v13071_v34 = vpop.permute.xlu2 %5648 }
 0x813   : > { %8673 = vrot.lane.b32.xlu0 %v8627_v50, %s9454_s22  ;;  %8270 = vrot.lane.b32.xlu2 %v8226_v25, %s9453_s21  ;;  %v8655_v50 = vsel %vm9890_vm15, %v8653_v63, %v8654_v52  ;;  %v8227_v25 = vrot.slane %v8225_v24, 4  ;;  %v8213_v24 = vrot.slane %v8211_v40, 4  ;;  %v13138_v63 = vrot.slane %v6949_v28, 5  ;;  %v6751_v28 = vld [vmem:[#allocation2 + $0x10] sm:$0xf] }
 0x814   : > { %8274 = vrot.lane.b32.xlu1 %v8233_v18, %s9453_s21  ;;  %v8632_v18 = vrot.slane %v8630_v47, 4  ;;  %v6805_v20 = vshll.u32 %v6751_v28, 16 }
 0x815   : > { %v8229_v44 = vsel %vm9890_vm15, %v8227_v25, %v8228_v10  ;;  %v8215_v40 = vsel %vm9890_vm15, %v8213_v24, %v8214_v22  ;;  %v8235_v24 = vrot.slane %v8168_v6, 5  ;;  %v7470_v22 = vshrl.u32 %v7286_v42, 16 }
 0x816   : > { %v13073_v2 = vpop.permute.xlu1 %5634  ;;  %v13083_v8 = vpop.permute.xlu0 %5638  ;;  %v8634_v46 = vsel %vm9890_vm15, %v8632_v18, %v8633_v51 }
 0x817   : > { %v8236_v4 = vsel %vm9890_vm15, %v8234_v30, %v8235_v24  ;;  %v7287_v24 = vld [vmem:[#allocation2 + $0x5c] sm:$0x1] }
 0x81b   : > { %8685 = vrot.lane.b32.xlu0 %v8648_v3, %s9454_s22  ;;  %8262 = vrot.lane.b32.xlu2 %v8212_v17, %s9453_s21  ;;  %v6953_v3 = vshrl.u32 %v6769_v7, 16  ;;  %v8561_v17 = vld [vmem:[#allocation2 + $0x8] sm:$0x1] }
 0x81c   : > { %8681 = vrot.lane.b32.xlu1 %v8641_v26, %s9454_s22  ;;  %v8171_v26 = vld [vmem:[#allocation2 + $0x44] sm:$0x1]  ;;  %v8612_v52 = vrot.slane %v8561_v17, 5  ;;  %v8156_v7 = vld [vmem:[#allocation2 + $0x8] sm:$0x1]  ;;  %v8206_v17 = vrot.slane %v8204_v35, 4 }
 0x81d   : > { %v13090_v16 = vpop.permute.xlu2 %5654  ;;  %v6955_v58 = vrot.slane %v6953_v3, 4  ;;  %v8242_v1 = vrot.slane %v8171_v26, 5  ;;  %v6748_v26 = vld [vmem:[#allocation2 + $0x4] sm:$0xf] }
 0x81e   : > { %v13092_v27 = vpop.permute.xlu1 %5640  ;;  %v6785_v35 = vshrl.u32 %v6748_v26, 16 }
 0x81f   : > { %v13109_v29 = vpop.permute.xlu0 %5644  ;;  %v8243_v55 = vsel %vm9890_vm15, %v8241_v0, %v8242_v1  ;;  %v6956_v43 = vor.u32 %v6955_v58, %v13138_v63  ;;  %v7466_v58 = vshll.u32 %v7286_v42, 16  ;;  %v8207_v1 = vrot.slane %v8156_v7, 5 }
 0x821   : > { %v7468_v6 = vrot.slane %v7466_v58, 5 }
 0x823   : > { %8284 = vrot.lane.b32.xlu0 %v8250_v5, %s9453_s21  ;;  %8689 = vrot.lane.b32.xlu2 %v8655_v50, %s9454_s22  ;;  %v6747_v5 = vld [vmem:[#allocation2] sm:$0xf]  ;;  %v6768_v50 = vld [vmem:[#allocation2 + $0x54] sm:$0xf] }
 0x824   : > { %8669 = vrot.lane.b32.xlu1 %v8620_v48, %s9454_s22  ;;  %v8613_v48 = vsel %vm9890_vm15, %v8611_v37, %v8612_v52  ;;  %v6772_v59 = vshrl.u32 %v6747_v5, 16  ;;  %v6775_v25 = vshll.u32 %v6747_v5, 16  ;;  %v6940_v18 = vshrl.u32 %v6768_v50, 16 }
 0x825   : > { %v13111_v31 = vpop.permute.xlu2 %5963  ;;  %v6943_v19 = vshll.u32 %v6768_v50, 16  ;;  %v6809_v52 = vshrl.u32 %v6751_v28, 16  ;;  %v6781_v5 = vshll.u32 %v6748_v26, 16  ;;  %v6787_v28 = vrot.slane %v6785_v35, 4 }
 0x826   : > { %15817 = vst [vmem:[#allocation40_spill] sm:$0xff] %v13111_v31  ;;  %v13113_v38 = vpop.permute.xlu1 %5646  ;;  %v6774_v36 = vrot.slane %v6772_v59, 4  ;;  %v6777_v13 = vrot.slane %v6775_v25, 5  ;;  %v6942_v37 = vrot.slane %v6940_v18, 4  ;;  %v13169_v59 = vrot.slane %v6805_v20, 5 }
 0x827   : > { %v6945_v0 = vrot.slane %v6943_v19, 5  ;;  %v6811_v25 = vrot.slane %v6809_v52, 4  ;;  %v7472_v18 = vrot.slane %v7470_v22, 4  ;;  %v6783_v7 = vrot.slane %v6781_v5, 5  ;;  %v6749_v20 = vld [vmem:[#allocation2 + $0x8] sm:$0x1] }
 0x828   : > { %v6778_v60 = vor.u32 %v6777_v13, %v6774_v36  ;;  %v6750_v13 = vld [vmem:[#allocation2 + $0xc] sm:$0xf]  ;;  %v7476_v52 = vshll.u32 %v7287_v24, 16 }
 0x829   : > { %v6812_v26 = vor.u32 %v6811_v25, %v13169_v59  ;;  %v7473_v36 = vor.u32 %v7472_v18, %v7468_v6  ;;  %v6799_v35 = vshll.u32 %v6750_v13, 16  ;;  %v6791_v18 = vshll.u32 %v6749_v20, 16 }
 0x82b   : > { %8272 = vrot.lane.b32.xlu0 %v8229_v44, %s9453_s21  ;;  %8677 = vrot.lane.b32.xlu2 %v8634_v46, %s9454_s22  ;;  %v7457_v44 = vshrl.u32 %v7285_v21, 16  ;;  %v7460_v46 = vshll.u32 %v7285_v21, 16  ;;  %v6946_v21 = vor.u32 %v6945_v0, %v6942_v37 }
 0x82c   : > { %8268 = vrot.lane.b32.xlu1 %v8222_v12, %s9453_s21  ;;  %v6957_v12 = vrot.slane %v6956_v43, 4  ;;  %v8208_v43 = vsel %vm9890_vm15, %v8206_v17, %v8207_v1  ;;  %v6756_v17 = vld [vmem:[#allocation2 + $0x24] sm:$0xf]  ;;  %v6788_v1 = vor.u32 %v6787_v28, %v6783_v7  ;;  %v7478_v28 = vrot.slane %v7476_v52, 5 }
 0x82d   : > { %v13128_v15 = vpop.permute.xlu0 %5650  ;;  %v13130_v47 = vpop.permute.xlu2 %5969  ;;  %v7459_v50 = vrot.slane %v7457_v44, 4  ;;  %v6844_v5 = vshrl.u32 %v6756_v17, 16 }
 0x82e   : > { %15818 = vst [vmem:[#allocation49_spill] sm:$0xff] %v13130_v47  ;;  %v13132_v39 = vpop.permute.xlu1 %5652 }
 0x833   : > { %8264 = vrot.lane.b32.xlu0 %v8215_v40, %s9453_s21  ;;  %8665 = vrot.lane.b32.xlu2 %v8613_v48, %s9454_s22  ;;  %v7462_v40 = vrot.slane %v7460_v46, 5  ;;  %v6752_v46 = vld [vmem:[#allocation2 + $0x14] sm:$0x1] }
 0x834   : > { %8280 = vrot.lane.b32.xlu1 %v8243_v55, %s9453_s21  ;;  %v6962_v55 = vsel %vm9958_vm6, %v6957_v12, %v6961_v57  ;;  %v6779_v12 = vrot.slane %v6778_v60, 4  ;;  %v6947_v57 = vrot.slane %v6946_v21, 4  ;;  %v6815_v22 = vshll.u32 %v6752_v46, 16 }
 0x835   : > { %v13152_v10 = vpop.permute.xlu0 %5965  ;;  %v13154_v51 = vpop.permute.xlu2 %5975  ;;  %v7463_v42 = vor.u32 %v7462_v40, %v7459_v50  ;;  %v6847_v50 = vshll.u32 %v6756_v17, 16  ;;  %v6753_v40 = vld [vmem:[#allocation2 + $0x18] sm:$0xf] }
 0x836   : > { %15819 = vst [vmem:[#allocation26_spill] sm:$0xff] %v13152_v10  ;;  %v13156_v3 = vpop.permute.xlu1 %5961  ;;  %v6784_v37 = vsel %vm9958_vm6, %v6779_v12, %v6783_v7  ;;  %v6952_v0 = vsel %vm9958_vm6, %v6947_v57, %v13138_v63  ;;  %v6813_v63 = vrot.slane %v6812_v26, 4  ;;  %v6817_v25 = vrot.slane %v6815_v22, 5  ;;  %v6757_v57 = vld [vmem:[#allocation2 + $0x28] sm:$0xf] }
 0x837   : > { %15820 = vst [vmem:[#allocation52_spill] sm:$0xff] %v13156_v3  ;;  %v7464_v58 = vrot.slane %v7463_v42, 4  ;;  %v6820_v7 = vshrl.u32 %v6753_v40, 16  ;;  %v6823_v42 = vshll.u32 %v6753_v40, 16  ;;  %v6789_v12 = vrot.slane %v6788_v1, 4 }
 0x838   : > { %v6849_v24 = vrot.slane %v6847_v50, 5  ;;  %v6760_v26 = vld [vmem:[#allocation2 + $0x34] sm:$0xf]  ;;  %v6853_v22 = vshll.u32 %v6757_v57, 16  ;;  %v5334_v10 = vld [vmem:[#allocation2 + $0x28] sm:$0xf] }
 0x839   : > { %v6822_v20 = vrot.slane %v6820_v7, 4  ;;  %v6825_v40 = vrot.slane %v6823_v42, 5  ;;  %v6877_v1 = vshll.u32 %v6760_v26, 16  ;;  %v6881_v32 = vshrl.u32 %v6760_v26, 16 }
 0x83b   : > { %6993 = vrot.lane.b32.xlu0 %v6962_v55, %s9453_s21  ;;  %8276 = vrot.lane.b32.xlu2 %v8236_v4, %s9453_s21  ;;  %v7469_v55 = vsel %vm9958_vm6, %v7464_v58, %v7468_v6  ;;  %v6796_v4 = vshrl.u32 %v6750_v13, 16  ;;  %v6846_v6 = vrot.slane %v6844_v5, 4  ;;  %v6801_v13 = vrot.slane %v6799_v35, 5 }
 0x83c   : > { %8260 = vrot.lane.b32.xlu1 %v8208_v43, %s9453_s21  ;;  %v7474_v43 = vrot.slane %v7473_v36, 4  ;;  %v6818_v36 = vsel %vm9958_vm6, %v6813_v63, %v6817_v25  ;;  %v6793_v58 = vrot.slane %v6791_v18, 5  ;;  %v6855_v25 = vrot.slane %v6853_v22, 5  ;;  %v6755_v22 = vld [vmem:[#allocation2 + $0x20] sm:$0x1] }
 0x83d   : > { %v13171_v19 = vpop.permute.xlu0 %5971  ;;  %v13173_v30 = vpop.permute.xlu2 %5981  ;;  %v6798_v17 = vrot.slane %v6796_v4, 4  ;;  %v6850_v50 = vor.u32 %v6849_v24, %v6846_v6  ;;  %v6857_v4 = vshrl.u32 %v6757_v57, 16  ;;  %v6826_v18 = vor.u32 %v6825_v40, %v6822_v20  ;;  %v6759_v57 = vld [vmem:[#allocation2 + $0x30] sm:$0xf]  ;;  %v6761_v24 = vld [vmem:[#allocation2 + $0x38] sm:$0x1] }
 0x83e   : > { %15822 = vst [vmem:[#allocation33_spill] sm:$0xff] %v13171_v19  ;;  %v13175_v44 = vpop.permute.xlu1 %5967  ;;  %v6794_v5 = vsel %vm9958_vm6, %v6789_v12, %v6793_v58  ;;  %v6758_v20 = vld [vmem:[#allocation2 + $0x2c] sm:$0x1] }
 0x83f   : > { %v6802_v35 = vor.u32 %v6801_v13, %v6798_v17  ;;  %v6859_v6 = vrot.slane %v6857_v4, 4  ;;  %v6765_v17 = vld [vmem:[#allocation2 + $0x48] sm:$0xf]  ;;  %v6827_v58 = vrot.slane %v6826_v18, 4  ;;  %v6839_v18 = vshll.u32 %v6755_v22, 16 }
 0x840   : > { %v6916_v4 = vshrl.u32 %v6765_v17, 16 }
 0x841   : > { %v6803_v12 = vrot.slane %v6802_v35, 4  ;;  %v6919_v35 = vshll.u32 %v6765_v17, 16  ;;  %v6841_v22 = vrot.slane %v6839_v18, 5 }
 0x843   : > { %6963 = vrot.lane.b32.xlu0 %v6784_v37, %s9453_s21  ;;  %6991 = vrot.lane.b32.xlu2 %v6952_v0, %s9453_s21  ;;  %v6754_v37 = vld [vmem:[#allocation2 + $0x1c] sm:$0xf]  ;;  %v7479_v0 = vsel %vm9958_vm6, %v7474_v43, %v7478_v28  ;;  %v13209_v28 = vrot.slane %v6877_v1, 5 }
 0x844   : > { %7508 = vrot.lane.b32.xlu1 %v7469_v55, %s9454_s22  ;;  %v6829_v55 = vshll.u32 %v6754_v37, 16  ;;  %v6833_v52 = vshrl.u32 %v6754_v37, 16  ;;  %v6883_v37 = vrot.slane %v6881_v32, 4  ;;  %v6762_v1 = vld [vmem:[#allocation2 + $0x3c] sm:$0xf] }
 0x845   : > { %v13188_v60 = vpop.permute.xlu0 %5977  ;;  %v13190_v21 = vpop.permute.xlu2 %5987 }
 0x846   : > { %15823 = vst [vmem:[#allocation29_spill] sm:$0xff] %v13188_v60  ;;  %v13192_v46 = vpop.permute.xlu1 %5973  ;;  %v6831_v42 = vrot.slane %v6829_v55, 5  ;;  %v6835_v26 = vrot.slane %v6833_v52, 4  ;;  %v6884_v40 = vor.u32 %v6883_v37, %v13209_v28  ;;  %v6868_v55 = vshrl.u32 %v6759_v57, 16  ;;  %v7264_v60 = vld [vmem:[#allocation2] sm:$0xf] }
 0x847   : > { %15824 = vst [vmem:[#allocation60_spill] sm:$0xff] %v13192_v46  ;;  %v6871_v52 = vshll.u32 %v6759_v57, 16  ;;  %v6892_v57 = vshrl.u32 %v6762_v1, 16 }
 0x848   : > { %v6836_v32 = vor.u32 %v6835_v26, %v6831_v42 }
 0x84b   : > { %6969 = vrot.lane.b32.xlu0 %v6818_v36, %s9453_s21  ;;  %7510 = vrot.lane.b32.xlu2 %v7479_v0, %s9454_s22  ;;  %v6851_v36 = vrot.slane %v6850_v50, 4  ;;  %v6808_v0 = vsel %vm9958_vm6, %v6803_v12, %v13169_v59  ;;  %v6860_v50 = vor.u32 %v6859_v6, %v6855_v25  ;;  %v6887_v59 = vshll.u32 %v6761_v24, 16  ;;  %v6766_v12 = vld [vmem:[#allocation2 + $0x4c] sm:$0xf]  ;;  %v6763_v6 = vld [vmem:[#allocation2 + $0x40] sm:$0xf] }
 0x84c   : > { %6965 = vrot.lane.b32.xlu1 %v6794_v5, %s9453_s21  ;;  %v6832_v5 = vsel %vm9958_vm6, %v6827_v58, %v6831_v42  ;;  %v6870_v42 = vrot.slane %v6868_v55, 4  ;;  %v6918_v58 = vrot.slane %v6916_v4, 4  ;;  %v6925_v47 = vshll.u32 %v6766_v12, 16 }
 0x84d   : > { %v13203_v63 = vpop.permute.xlu0 %5983  ;;  %v13205_v43 = vpop.permute.xlu2 %8671  ;;  %v6856_v13 = vsel %vm9958_vm6, %v6851_v36, %v6855_v25  ;;  %v6863_v36 = vshll.u32 %v6758_v20, 16  ;;  %v6873_v25 = vrot.slane %v6871_v52, 5  ;;  %v6861_v17 = vrot.slane %v6860_v50, 4 }
 0x84e   : > { %15825 = vst [vmem:[#allocation27_spill] sm:$0xff] %v13205_v43  ;;  %v13207_v7 = vpop.permute.xlu1 %5979  ;;  %v6837_v43 = vrot.slane %v6836_v32, 4  ;;  %v6889_v24 = vrot.slane %v6887_v59, 5  ;;  %v6905_v3 = vshrl.u32 %v6763_v6, 16  ;;  %v6929_v50 = vshrl.u32 %v6766_v12, 16 }
 0x84f   : > { %v6865_v20 = vrot.slane %v6863_v36, 5  ;;  %v6874_v32 = vor.u32 %v6873_v25, %v6870_v42  ;;  %v7289_v4 = vshrl.u32 %v7264_v60, 16  ;;  %v7267_v59 = vld [vmem:[#allocation2 + $0xc] sm:$0xf]  ;;  %v7268_v12 = vld [vmem:[#allocation2 + $0x10] sm:$0xf] }
 0x851   : > { %v6866_v55 = vsel %vm9958_vm6, %v6861_v17, %v6865_v20  ;;  %v6875_v25 = vrot.slane %v6874_v32, 4  ;;  %v7322_v32 = vshll.u32 %v7268_v12, 16 }
 0x853   : > { %6975 = vrot.lane.b32.xlu0 %v6856_v13, %s9453_s21  ;;  %6967 = vrot.lane.b32.xlu2 %v6808_v0, %s9453_s21  ;;  %v6895_v13 = vshll.u32 %v6762_v1, 16  ;;  %v6885_v0 = vrot.slane %v6884_v40, 4  ;;  %v6842_v40 = vsel %vm9958_vm6, %v6837_v43, %v6841_v22  ;;  %v6927_v43 = vrot.slane %v6925_v47, 5 }
 0x854   : > { %6971 = vrot.lane.b32.xlu1 %v6832_v5, %s9453_s21  ;;  %v6921_v5 = vrot.slane %v6919_v35, 5  ;;  %v7292_v35 = vshll.u32 %v7264_v60, 16  ;;  %v7291_v22 = vrot.slane %v7289_v4, 4  ;;  %v6880_v20 = vsel %vm9958_vm6, %v6875_v25, %v13209_v28 }
 0x855   : > { %v13222_v37 = vpop.permute.xlu0 %8691  ;;  %v13224_v26 = vpop.permute.xlu2 %8683  ;;  %v6897_v46 = vrot.slane %v6895_v13, 5  ;;  %v6890_v1 = vsel %vm9958_vm6, %v6885_v0, %v6889_v24  ;;  %v6907_v0 = vrot.slane %v6905_v3, 4  ;;  %v7316_v24 = vshll.u32 %v7267_v59, 16  ;;  %v6764_v3 = vld [vmem:[#allocation2 + $0x44] sm:$0x1] }
 0x856   : > { %15826 = vst [vmem:[#allocation47_spill] sm:$0xff] %v13222_v37  ;;  %v13226_v41 = vpop.permute.xlu1 %5985  ;;  %v6894_v37 = vrot.slane %v6892_v57, 4  ;;  %v6922_v52 = vor.u32 %v6921_v5, %v6918_v58  ;;  %v6931_v58 = vrot.slane %v6929_v50, 4  ;;  %v7313_v5 = vshrl.u32 %v7267_v59, 16 }
 0x857   : > { %15827 = vst [vmem:[#allocation48_spill] sm:$0xff] %v13224_v26  ;;  %v6901_v26 = vshll.u32 %v6763_v6, 16  ;;  %v7265_v6 = vld [vmem:[#allocation2 + $0x4] sm:$0xf]  ;;  %v7294_v60 = vrot.slane %v7292_v35, 5  ;;  %v7318_v4 = vrot.slane %v7316_v24, 5 }
 0x858   : > { %15828 = vst [vmem:[#allocation34_spill] sm:$0xff] %v13226_v41  ;;  %v6898_v57 = vor.u32 %v6897_v46, %v6894_v37  ;;  %v6923_v17 = vrot.slane %v6922_v52, 4  ;;  %v6932_v50 = vor.u32 %v6931_v58, %v6927_v43  ;;  %v7315_v28 = vrot.slane %v7313_v5, 4  ;;  %v7271_v58 = vld [vmem:[#allocation2 + $0x1c] sm:$0xf] }
 0x859   : > { %v6903_v13 = vrot.slane %v6901_v26, 5  ;;  %v6767_v26 = vld [vmem:[#allocation2 + $0x50] sm:$0x1]  ;;  %v6911_v35 = vshll.u32 %v6764_v3, 16  ;;  %v7295_v59 = vor.u32 %v7294_v60, %v7291_v22  ;;  %v7273_v60 = vld [vmem:[#allocation2 + $0x24] sm:$0xf] }
 0x85a   : > { %v6928_v47 = vsel %vm9958_vm6, %v6923_v17, %v6927_v43  ;;  %v6899_v46 = vrot.slane %v6898_v57, 4  ;;  %v6935_v57 = vshll.u32 %v6767_v26, 16  ;;  %v7266_v17 = vld [vmem:[#allocation2 + $0x8] sm:$0x1]  ;;  %v6933_v5 = vrot.slane %v6932_v50, 4 }
 0x85b   : > { %6981 = vrot.lane.b32.xlu0 %v6890_v1, %s9453_s21  ;;  %6973 = vrot.lane.b32.xlu2 %v6842_v40, %s9453_s21  ;;  %v6908_v37 = vor.u32 %v6907_v0, %v6903_v13  ;;  %v7298_v1 = vshll.u32 %v7265_v6, 16  ;;  %v7302_v40 = vshrl.u32 %v7265_v6, 16  ;;  %v7269_v6 = vld [vmem:[#allocation2 + $0x14] sm:$0x1]  ;;  %v7319_v24 = vor.u32 %v7318_v4, %v7315_v28  ;;  %v7274_v28 = vld [vmem:[#allocation2 + $0x28] sm:$0xf] }
 0x85c   : > { %6977 = vrot.lane.b32.xlu1 %v6866_v55, %s9453_s21  ;;  %v7326_v55 = vshrl.u32 %v7268_v12, 16  ;;  %v6904_v52 = vsel %vm9958_vm6, %v6899_v46, %v6903_v13  ;;  %v6913_v46 = vrot.slane %v6911_v35, 5  ;;  %v7296_v3 = vrot.slane %v7295_v59, 4  ;;  %v7277_v4 = vld [vmem:[#allocation2 + $0x34] sm:$0xf] }
 0x85d   : > { %v13237_v18 = vpop.permute.xlu0 %8679  ;;  %v13239_v36 = vpop.permute.xlu2 %8282  ;;  %v6909_v25 = vrot.slane %v6908_v37, 4  ;;  %v7304_v43 = vrot.slane %v7302_v40, 4  ;;  %v6937_v22 = vrot.slane %v6935_v57, 5  ;;  %v7332_v26 = vshll.u32 %v7269_v6, 16  ;;  %v7276_v6 = vld [vmem:[#allocation2 + $0x30] sm:$0xf] }
 0x85e   : > { %15829 = vst [vmem:[#allocation46_spill] sm:$0xff] %v13237_v18  ;;  %v13241_v42 = vpop.permute.xlu1 %8286  ;;  %v7324_v18 = vrot.slane %v7322_v32, 5  ;;  %v7328_v13 = vrot.slane %v7326_v55, 4  ;;  %v7346_v37 = vshll.u32 %v7271_v58, 16  ;;  %v7320_v50 = vrot.slane %v7319_v24, 4 }
 0x85f   : > { %15830 = vst [vmem:[#allocation4_spill] sm:$0xff] %v13239_v36  ;;  %v6938_v55 = vsel %vm9958_vm6, %v6933_v5, %v6937_v22  ;;  %v7361_v35 = vshrl.u32 %v7273_v60, 16  ;;  %v7364_v59 = vshll.u32 %v7273_v60, 16  ;;  %v7398_v5 = vshrl.u32 %v7277_v4, 16 }
 0x860   : > { %15831 = vst [vmem:[#allocation28_spill] sm:$0xff] %v13241_v42  ;;  %v7270_v42 = vld [vmem:[#allocation2 + $0x18] sm:$0xf]  ;;  %v7329_v32 = vor.u32 %v7328_v13, %v7324_v18  ;;  %v7385_v60 = vshrl.u32 %v7276_v6, 16 }
 0x861   : > { %v7337_v57 = vshrl.u32 %v7270_v42, 16 }
 0x863   : > { %6979 = vrot.lane.b32.xlu2 %v6880_v20, %s9453_s21  ;;  %6987 = vrot.lane.b32.xlu0 %v6928_v47, %s9453_s21  ;;  %v7300_v47 = vrot.slane %v7298_v1, 5 }
 0x864   : > { %6983 = vrot.lane.b32.xlu1 %v6904_v52, %s9453_s21  ;;  %v7308_v52 = vshll.u32 %v7266_v17, 16  ;;  %v7334_v17 = vrot.slane %v7332_v26, 5  ;;  %v7363_v26 = vrot.slane %v7361_v35, 4 }
 0x865   : > { %v13253_v0 = vpop.permute.xlu0 %8667  ;;  %v13257_v20 = vpop.permute.xlu2 %8288  ;;  %v7301_v1 = vsel %vm9958_vm6, %v7296_v3, %v7300_v47  ;;  %v7305_v40 = vor.u32 %v7304_v43, %v7300_v47  ;;  %v13268_v47 = vrot.slane %v7346_v37, 5  ;;  %v7330_v43 = vrot.slane %v7329_v32, 4 }
 0x866   : > { %15832 = vst [vmem:[#allocation51_spill] sm:$0xff] %v13253_v0  ;;  %v13255_v12 = vpop.permute.xlu1 %8687  ;;  %v7350_v0 = vshrl.u32 %v7271_v58, 16  ;;  %v7310_v13 = vrot.slane %v7308_v52, 5  ;;  %v7394_v3 = vshll.u32 %v7277_v4, 16  ;;  %v7366_v52 = vrot.slane %v7364_v59, 5 }
 0x867   : > { %15833 = vst [vmem:[#allocation61_spill] sm:$0xff] %v13255_v12  ;;  %v6914_v12 = vsel %vm9958_vm6, %v6909_v25, %v6913_v46  ;;  %v7340_v25 = vshll.u32 %v7270_v42, 16  ;;  %v7306_v58 = vrot.slane %v7305_v40, 4  ;;  %v7272_v46 = vld [vmem:[#allocation2 + $0x20] sm:$0x1]  ;;  %v7339_v37 = vrot.slane %v7337_v57, 4 }
 0x868   : > { %15834 = vst [vmem:[#allocation63_spill] sm:$0xff] %v13257_v20  ;;  %v7388_v20 = vshll.u32 %v7276_v6, 16  ;;  %v7356_v40 = vshll.u32 %v7272_v46, 16  ;;  %v7335_v4 = vsel %vm9958_vm6, %v7330_v43, %v7334_v17  ;;  %v7278_v6 = vld [vmem:[#allocation2 + $0x38] sm:$0x1]  ;;  %v7387_v59 = vrot.slane %v7385_v60, 4 }
 0x869   : > { %v7342_v36 = vrot.slane %v7340_v25, 5  ;;  %v7367_v57 = vor.u32 %v7366_v52, %v7363_v26  ;;  %v7275_v17 = vld [vmem:[#allocation2 + $0x2c] sm:$0x1] }
 0x86b   : > { %6985 = vrot.lane.b32.xlu2 %v6914_v12, %s9453_s21  ;;  %7480 = vrot.lane.b32.xlu0 %v7301_v1, %s9454_s22  ;;  %v7352_v12 = vrot.slane %v7350_v0, 4  ;;  %v7370_v1 = vshll.u32 %v7274_v28, 16  ;;  %v7325_v0 = vsel %vm9958_vm6, %v7320_v50, %v7324_v18  ;;  %v7390_v18 = vrot.slane %v7388_v20, 5 }
 0x86c   : > { %6989 = vrot.lane.b32.xlu1 %v6938_v55, %s9453_s21  ;;  %v7374_v55 = vshrl.u32 %v7274_v28, 16  ;;  %v7311_v28 = vsel %vm9958_vm6, %v7306_v58, %v7310_v13  ;;  %v7343_v25 = vor.u32 %v7342_v36, %v7339_v37  ;;  %v7404_v13 = vshll.u32 %v7278_v6, 16  ;;  %s278_s21 = scalar_lea.vmem %s15414_s7, %s9281_s28 }
 0x86d   : > { %v13270_v24 = vpop.permute.xlu0 %8266  ;;  %v13274_v42 = vpop.permute.xlu2 %8270  ;;  %v7353_v32 = vor.u32 %v7352_v12, %v13268_v47  ;;  %v7372_v35 = vrot.slane %v7370_v1, 5  ;;  %v7282_v12 = vld [vmem:[#allocation2 + $0x48] sm:$0xf]  ;;  %v7358_v58 = vrot.slane %v7356_v40, 5  ;;  %v7279_v1 = vld [vmem:[#allocation2 + $0x3c] sm:$0xf] }
 0x86e   : > { %15835 = vst [vmem:[#allocation38_spill] sm:$0xff] %v13270_v24  ;;  %v13272_v22 = vpop.permute.xlu1 %8693  ;;  %v7376_v50 = vrot.slane %v7374_v55, 4  ;;  %v7380_v24 = vshll.u32 %v7275_v17, 16  ;;  %v7368_v60 = vrot.slane %v7367_v57, 4  ;;  %v7344_v20 = vrot.slane %v7343_v25, 4 }
 0x86f   : > { %15836 = vst [vmem:[#allocation65_spill] sm:$0xff] %v13272_v22  ;;  %v13283_v22 = vrot.slane %v7394_v3, 5  ;;  %v7354_v43 = vrot.slane %v7353_v32, 4  ;;  %v7283_v3 = vld [vmem:[#allocation2 + $0x4c] sm:$0xf]  ;;  %v7436_v55 = vshll.u32 %v7282_v12, 16 }
 0x870   : > { %15837 = vst [vmem:[#allocation30_spill] sm:$0xff] %v13274_v42  ;;  %v7400_v42 = vrot.slane %v7398_v5, 4  ;;  %v7391_v5 = vor.u32 %v7390_v18, %v7387_v59  ;;  %v7406_v52 = vrot.slane %v7404_v13, 5  ;;  %v7442_v37 = vshll.u32 %v7283_v3, 16  ;;  %v13302_v59 = vld [vmem:[#allocation2 + $0x50] sm:$0x1] }
 0x871   : > { %v7359_v36 = vsel %vm9958_vm6, %v7354_v43, %v7358_v58  ;;  %v7446_v32 = vshrl.u32 %v7283_v3, 16  ;;  %v7373_v40 = vsel %vm9958_vm6, %v7368_v60, %v7372_v35  ;;  %v7409_v18 = vshrl.u32 %v7279_v1, 16  ;;  %v7280_v43 = vld [vmem:[#allocation2 + $0x40] sm:$0xf]  ;;  %v5342_v13 = vld [vmem:[#allocation2 + $0x58] sm:$0xf] }
 0x872   : > { %v7401_v46 = vor.u32 %v7400_v42, %v13283_v22  ;;  %v7392_v57 = vrot.slane %v7391_v5, 4  ;;  %v7382_v17 = vrot.slane %v7380_v24, 5  ;;  %v7412_v58 = vshll.u32 %v7279_v1, 16  ;;  %v5339_v1 = vld [vmem:[#allocation2 + $0x48] sm:$0xf] }
 0x873   : > { %7484 = vrot.lane.b32.xlu2 %v7325_v0, %s9454_s22  ;;  %7486 = vrot.lane.b32.xlu0 %v7335_v4, %s9454_s22  ;;  %v7377_v0 = vor.u32 %v7376_v50, %v7372_v35  ;;  %v7433_v4 = vshrl.u32 %v7282_v12, 16  ;;  %v5336_v50 = vld [vmem:[#allocation2 + $0x34] sm:$0xf]  ;;  %v7438_v35 = vrot.slane %v7436_v55, 5  ;;  %v13307_v3 = vrot.slane %v7442_v37, 5 }
 0x874   : > { %7482 = vrot.lane.b32.xlu1 %v7311_v28, %s9454_s22  ;;  %v7349_v28 = vsel %vm9958_vm6, %v7344_v20, %v13268_v47  ;;  %v7402_v6 = vrot.slane %v7401_v46, 4  ;;  %v5338_v47 = vld [vmem:[#allocation2 + $0x40] sm:$0xf]  ;;  %v5340_v46 = vld [vmem:[#allocation2 + $0x4c] sm:$0xf]  ;;  %v7448_v60 = vrot.slane %v7446_v32, 4  ;;  %v7397_v24 = vsel %vm9958_vm6, %v7392_v57, %v13283_v22 }
 0x875   : > { %v13289_v41 = vpop.permute.xlu0 %8278  ;;  %v13295_v42 = vpop.permute.xlu2 %8262  ;;  %v7378_v25 = vrot.slane %v7377_v0, 4  ;;  %v7435_v12 = vrot.slane %v7433_v4, 4  ;;  %v7452_v20 = vshll.u32 %v13302_v59, 16  ;;  %v7411_v0 = vrot.slane %v7409_v18, 4  ;;  %v5335_v55 = vld [vmem:[#allocation2 + $0x30] sm:$0xf] }
 0x876   : > { %15838 = vst [vmem:[#allocation21_spill] sm:$0xff] %v13289_v41  ;;  %v13291_v26 = vpop.permute.xlu1 %8675  ;;  %v7407_v5 = vsel %vm9958_vm6, %v7402_v6, %v7406_v52  ;;  %v7418_v4 = vshll.u32 %v7280_v43, 16  ;;  %v5405_v32 = vrot.slane %v5340_v46, 4  ;;  %v5332_v41 = vld [vmem:[#allocation2 + $0x1c] sm:$0xf]  ;;  %v5433_v52 = vrot.slane %v5342_v13, 4 }
 0x877   : > { %15839 = vst [vmem:[#allocation43_spill] sm:$0xff] %v13291_v26  ;;  %v5399_v26 = vrot.slane %v5336_v50, 4  ;;  %v7383_v59 = vsel %vm9958_vm6, %v7378_v25, %v7382_v17  ;;  %v7414_v50 = vrot.slane %v7412_v58, 5  ;;  %v5343_v57 = vrot.slane %v5335_v55, 4 }
 0x878   : > { %15840 = vst [vmem:[#allocation41_spill] sm:$0xff] %v13295_v42  ;;  %v5427_v42 = vrot.slane %v5338_v47, 4  ;;  %v5406_v6 = vsel %vm425_vm2, %v5405_v32, %v5332_v41  ;;  %v7439_v19 = vor.u32 %v7438_v35, %v7435_v12  ;;  %v7420_v47 = vrot.slane %v7418_v4, 5  ;;  %v5327_v35 = vld [vmem:[#allocation2] sm:$0xf] }
 0x879   : > { %v13325_v46 = vperm.slane %v5406_v6, %v9548_v56  ;;  %v5434_v12 = vsel %vm425_vm2, %v5433_v52, %v5334_v10  ;;  %v5344_v4 = vsel %vm425_vm2, %v5343_v57, %v5327_v35  ;;  %v7281_v10 = vld [vmem:[#allocation2 + $0x44] sm:$0x1]  ;;  %v5341_v57 = vld [vmem:[#allocation2 + $0x54] sm:$0xf] }
 0x87a   : > { %v7440_v32 = vrot.slane %v7439_v19, 4  ;;  %v7428_v35 = vshll.u32 %v7281_v10, 16 }
 0x87b   : > { %7490 = vrot.lane.b32.xlu2 %v7359_v36, %s9454_s22  ;;  %7492 = vrot.lane.b32.xlu0 %v7373_v40, %s9454_s22  ;;  %v5328_v36 = vld [vmem:[#allocation2 + $0x4] sm:$0xf]  ;;  %v7422_v40 = vshrl.u32 %v7280_v43, 16  ;;  %v5349_v43 = vrot.slane %v5339_v1, 4 }
 0x87c   : > { %7488 = vrot.lane.b32.xlu1 %v7349_v28, %s9454_s22  ;;  %v5330_v28 = vld [vmem:[#allocation2 + $0x10] sm:$0xf]  ;;  %v5400_v37 = vsel %vm425_vm2, %v5399_v26, %v5328_v36  ;;  %v7449_v26 = vor.u32 %v7448_v60, %v13307_v3  ;;  %v7415_v60 = vor.u32 %v7414_v50, %v7411_v0  ;;  %v5331_v36 = vld [vmem:[#allocation2 + $0x18] sm:$0xf]  ;;  %v5348_v0 = vperm.slane %v5344_v4, %v9548_v56  ;;  %v5329_v4 = vld [vmem:[#allocation2 + $0xc] sm:$0xf] }
 0x87d   : > { %v13319_v22 = vperm.slane %v5400_v37, %v9548_v56  ;;  %v5428_v18 = vsel %vm425_vm2, %v5427_v42, %v5330_v28  ;;  %v13327_v25 = vpop.permute.xlu0 %8258  ;;  %v7424_v41 = vrot.slane %v7422_v40, 4  ;;  %v13338_v58 = vpop.permute.xlu2 %8689  ;;  %v5350_v1 = vsel %vm425_vm2, %v5349_v43, %v5331_v36  ;;  %v5337_v37 = vld [vmem:[#allocation2 + $0x3c] sm:$0xf] }
 0x87e   : > { %15841 = vst [vmem:[#allocation39_spill] sm:$0xff] %v13327_v25  ;;  %v13329_v17 = vpop.permute.xlu1 %8663  ;;  %v13335_v13 = vperm.slane %v5428_v18, %v9548_v56  ;;  %v7450_v40 = vrot.slane %v7449_v26, 4  ;;  %v5354_v43 = vperm.slane %v5350_v1, %v9548_v56  ;;  %v5357_v26 = vrot.slane %v5348_v0, 4  ;;  %v7784_v25 = vld [vmem:[#allocation2 + $0xc] sm:$0xe] }
 0x87f   : > { %15842 = vst [vmem:[#allocation50_spill] sm:$0xff] %v13329_v17  ;;  %v5413_v42 = vrot.slane %v13319_v22, 4  ;;  %v7425_v50 = vor.u32 %v7424_v41, %v7420_v47  ;;  %v5371_v19 = vrot.slane %v5337_v37, 4  ;;  %v5377_v1 = vrot.slane %v5341_v57, 4 }
 0x880   : > { %15843 = vst [vmem:[#allocation62_spill] sm:$0xff] %v13338_v58  ;;  %v5441_v55 = vrot.slane %v13335_v13, 4  ;;  %v7430_v57 = vrot.slane %v7428_v35, 5  ;;  %v7781_v58 = vld [vmem:[#allocation2] sm:$0xe] }
 0x883   : > { %7496 = vrot.lane.b32.xlu2 %v7397_v24, %s9454_s22  ;;  %7498 = vrot.lane.b32.xlu0 %v7407_v5, %s9454_s22  ;;  %v5414_v24 = vsel %vm425_vm2, %v13325_v46, %v5413_v42  ;;  %v5438_v5 = vperm.slane %v5434_v12, %v9548_v56  ;;  %v7445_v42 = vsel %vm9958_vm6, %v7440_v32, %v13307_v3  ;;  %v7416_v12 = vrot.slane %v7415_v60, 4 }
 0x884   : > { %7494 = vrot.lane.b32.xlu1 %v7383_v59, %s9454_s22  ;;  %v13348_v28 = vperm.slane %v5414_v24, %v15580_v9  ;;  %v7454_v59 = vrot.slane %v7452_v20, 5  ;;  %v5333_v24 = vld [vmem:[#allocation2 + $0x24] sm:$0xf]  ;;  %v5372_v60 = vsel %vm425_vm2, %v5371_v19, %v5329_v4  ;;  %v5411_v32 = vrot.slane %v13325_v46, 4 }
 0x885   : > { %v5442_v52 = vsel %vm425_vm2, %v5438_v5, %v5441_v55  ;;  %v5358_v55 = vsel %vm425_vm2, %v5354_v43, %v5357_v26  ;;  %v7421_v3 = vsel %vm9958_vm6, %v7416_v12, %v7420_v47  ;;  %v5378_v47 = vsel %vm425_vm2, %v5377_v1, %v5333_v24  ;;  %v13380_v12 = vpop.permute.xlu2 %8677 }
 0x886   : > { %v13353_v6 = vperm.slane %v5442_v52, %v15580_v9  ;;  %v5494_v18 = vshrl.u32 %v13348_v28, 16  ;;  %v7455_v20 = vsel %vm9958_vm6, %v7450_v40, %v7454_v59  ;;  %v7426_v40 = vrot.slane %v7425_v50, 4  ;;  %v13373_v59 = vpop.permute.xlu0 %8673  ;;  %v13375_v52 = vpop.permute.xlu1 %8274  ;;  %15846 = vst [vmem:[#allocation18_spill] sm:$0xff] %v13380_v12 }
 0x887   : > { %15844 = vst [vmem:[#allocation13_spill] sm:$0xff] %v13373_v59  ;;  %v5366_v26 = vperm.slane %v5358_v55, %v15580_v9  ;;  %v5382_v50 = vperm.slane %v5378_v47, %v9548_v56 }
 0x888   : > { %v5493_v41 = vpack.i.b16 %v13353_v6, %v13348_v28  ;;  %v5495_v36 = vshrl.u32 %v13353_v6, 16  ;;  %15845 = vst [vmem:[#allocation31_spill] sm:$0xff] %v13375_v52  ;;  %v7431_v46 = vsel %vm9958_vm6, %v7426_v40, %v7430_v57 }
 0x889   : > { %v5369_v55 = vrot.slane %v5366_v26, 4  ;;  %v5470_v1 = vshrl.u32 %v5366_v26, 16 }
 0x88a   : > { %v5543_v10 = vunpack.c.l.b16 %v5493_v41  ;;  %v5496_v37 = vpack.i.b16 %v5495_v36, %v5494_v18  ;;  %v5412_v41 = vsel %vm425_vm2, %v5411_v32, %v13319_v22  ;;  %v5439_v36 = vrot.slane %v5438_v5, 4 }
 0x88b   : > { %7504 = vrot.lane.b32.xlu2 %v7445_v42, %s9454_s22  ;;  %7506 = vrot.lane.b32.xlu0 %v7455_v20, %s9454_s22  ;;  %v5376_v42 = vperm.slane %v5372_v60, %v9548_v56  ;;  %v13389_v24 = vperm.slane %v5412_v41, %v15580_v9 }
 0x88c   : > { %7500 = vrot.lane.b32.xlu1 %v7421_v3, %s9454_s22  ;;  %v5547_v19 = vunpack.c.l.b16 %v5496_v37  ;;  %v5544_v18 = vpack.c.b16 %v5543_v10, %v5543_v10  ;;  %v5355_v3 = vrot.slane %v5354_v43, 4  ;;  %v5440_v37 = vsel %vm425_vm2, %v5439_v36, %v13335_v13 }
 0x88d   : > { %v5385_v20 = vrot.slane %v5376_v42, 4  ;;  %15847 = vst [vmem:[#allocation42_spill] sm:$0xff] %v13389_v24  ;;  %v13398_v40 = vperm.slane %v5440_v37, %v15580_v9  ;;  %v13401_v43 = vsel %vm425_vm2, 0, %v5369_v55  ;;  %v5423_v32 = vrot.slane %v13389_v24, 4  ;;  %v13414_v41 = vpop.permute.xlu2 %8665 }
 0x88e   : > { %v5548_v35 = vpack.c.b16 %v5547_v19, %v5547_v19  ;;  %v5356_v47 = vsel %vm425_vm2, %v5355_v3, %v5348_v0  ;;  %v5482_v57 = vshrl.u32 %v13389_v24, 16  ;;  %v5704_v19 = vrot.slane %v13071_v34, 4  ;;  %15851 = vst [vmem:[#allocation55_spill] sm:$0xff] %v13414_v41 }
 0x88f   : > { %v5386_v4 = vsel %vm425_vm2, %v5382_v50, %v5385_v20  ;;  %15848 = vst [vmem:[#allocation14_spill] sm:$0xff] %v13398_v40  ;;  %v13407_v20 = vpop.permute.xlu0 %8685  ;;  %v5483_v0 = vshrl.u32 %v13398_v40, 16  ;;  %v13420_v55 = vperm.slane %v5356_v47, %v15580_v9  ;;  %v13423_v3 = vsel %vm425_vm2, 0, %v5423_v32 }
 0x890   : > { %v5394_v60 = vperm.slane %v5386_v4, %v15580_v9  ;;  %15849 = vst [vmem:[#allocation17_spill] sm:$0xff] %v13407_v20 }
 0x891   : > { %15852 = vst [vmem:[#allocation64_spill] sm:$0xff] %v13420_v55 }
 0x892   : > { %v5471_v22 = vshrl.u32 %v5394_v60, 16  ;;  %v5469_v5 = vpack.i.b16 %v5394_v60, %v5366_v26  ;;  %v5397_v10 = vrot.slane %v5394_v60, 4  ;;  %v5383_v60 = vrot.slane %v5382_v50, 4 }
 0x893   : > { %7502 = vrot.lane.b32.xlu2 %v7431_v46, %s9454_s22  ;;  %5545 = vrot.lane.b32.xlu0 %v5544_v18, %s9446_s16  ;;  %v13409_v46 = vpop.permute.xlu1 %8681 }
 0x894   : > { %5549 = vrot.lane.b32.xlu1 %v5548_v35, %s9444_s14  ;;  %v5472_v13 = vpack.i.b16 %v5471_v22, %v5470_v1  ;;  %15850 = vst [vmem:[#allocation66_spill] sm:$0xff] %v13409_v46  ;;  %v5515_v26 = vunpack.c.l.b16 %v5469_v5  ;;  %v13412_v18 = vsel %vm425_vm2, 0, %v5397_v10  ;;  %v5451_v35 = vrot.slane %v13398_v40, 4  ;;  %v7803_v46 = vld [vmem:[#allocation2 + $0x58] sm:$0xf] }
 0x895   : > { %v5475_v4 = vpack.i.b16 %v13412_v18, %v13401_v43  ;;  %v5484_v22 = vpack.i.b16 %v5483_v0, %v5482_v57  ;;  %v5705_v5 = vsel %vm425_vm2, %v5704_v19, %v13062_v11  ;;  %v5384_v47 = vsel %vm425_vm2, %v5383_v60, %v5376_v42  ;;  %v7787_v40 = vld [vmem:[#allocation2 + $0x18] sm:$0xe] }
 0x896   : > { %v5519_v36 = vunpack.c.l.b16 %v5472_v13  ;;  %v5516_v34 = vpack.c.b16 %v5515_v26, %v5515_v26  ;;  %v13430_v10 = vsel %vm425_vm2, 0, %v5451_v35  ;;  %v13437_v50 = vperm.slane %v5384_v47, %v15580_v9 }
 0x897   : > { %v5523_v37 = vunpack.c.l.b16 %v5475_v4  ;;  %v5487_v13 = vpack.i.b16 %v13430_v10, %v13423_v3  ;;  %v5458_v57 = vshrl.u32 %v13420_v55, 16  ;;  %v5425_v11 = vrot.slane %v13348_v28, 4 }
 0x898   : > { %v5520_v1 = vpack.c.b16 %v5519_v36, %v5519_v36  ;;  %15853 = vst [vmem:[#allocation35_spill] sm:$0xff] %v13437_v50  ;;  %v5453_v19 = vrot.slane %v13353_v6, 4  ;;  %v13443_v26 = vperm.slane %v5705_v5, %v9548_v56  ;;  %v5531_v42 = vunpack.c.l.b16 %v5484_v22  ;;  %v13455_v6 = vpop.permute.xlu0 %8284 }
 0x899   : > { %v5524_v32 = vpack.c.b16 %v5523_v37, %v5523_v37  ;;  %v5459_v36 = vshrl.u32 %v13437_v50, 16  ;;  %v13448_v4 = vsel %vm425_vm2, 0, %v5425_v11  ;;  %v5710_v0 = vrot.slane %v13004_v23, 4  ;;  %15855 = vst [vmem:[#allocation58_spill] sm:$0xff] %v13455_v6 }
 0x89a   : > { %15854 = vst [vmem:[#allocation23_spill] sm:$0xff] %v13443_v26  ;;  %v13452_v60 = vsel %vm425_vm2, 0, %v5453_v19  ;;  %v5367_v22 = vrot.slane %v13420_v55, 4  ;;  %v5395_v5 = vrot.slane %v13437_v50, 4  ;;  %v5766_v23 = vrot.slane %v13000_v61, 4 }
 0x89b   : > { %5517 = vrot.lane.b32.xlu2 %v5516_v34, %s9446_s16  ;;  %5521 = vrot.lane.b32.xlu0 %v5520_v1, %s9444_s14  ;;  %v5535_v34 = vunpack.c.l.b16 %v5487_v13  ;;  %v5460_v35 = vpack.i.b16 %v5459_v36, %v5458_v57  ;;  %v13457_v1 = vpop.permute.xlu1 %8669  ;;  %v5499_v37 = vpack.i.b16 %v13452_v60, %v13448_v4  ;;  %v5532_v13 = vpack.c.b16 %v5531_v42, %v5531_v42  ;;  %v13472_v42 = vld [vmem:[#allocation2 + $0x34] sm:$0xf] }
 0x89c   : > { %5525 = vrot.lane.b32.xlu1 %v5524_v32, %s9447_s17  ;;  %15856 = vst [vmem:[#allocation22_spill] sm:$0xff] %v13457_v1  ;;  %v13465_v32 = vpop.permute.xlu2 %8276  ;;  %v5738_v19 = vrot.slane %v13090_v16, 4  ;;  %v5368_v36 = vsel %vm425_vm2, 0, %v5367_v22  ;;  %v5396_v28 = vsel %vm425_vm2, 0, %v5395_v5  ;;  %v13476_v22 = vld [vmem:[#allocation2 + $0x10] sm:$0xf] }
 0x89d   : > { %15857 = vst [vmem:[#allocation59_spill] sm:$0xff] %v13465_v32  ;;  %v5503_v57 = vunpack.c.l.b16 %v5460_v35  ;;  %v5536_v6 = vpack.c.b16 %v5535_v34, %v5535_v34  ;;  %v5464_v59 = vshrl.u32 %v5368_v36, 16  ;;  %v5465_v61 = vshrl.u32 %v5396_v28, 16  ;;  %v7793_v32 = vld [vmem:[#allocation2 + $0x30] sm:$0xe] }
 0x89e   : > { %v5551_v12 = vunpack.c.l.b16 %v5499_v37  ;;  %v5463_v47 = vpack.i.b16 %v5396_v28, %v5368_v36  ;;  %v7782_v35 = vld [vmem:[#allocation2 + $0x4] sm:$0xf]  ;;  %v7788_v5 = vld [vmem:[#allocation2 + $0x1c] sm:$0xf]  ;;  %v13480_v34 = vsel %vm425_vm2, %v5766_v23, %v13042_v53  ;;  %v7791_v37 = vld [vmem:[#allocation2 + $0x28] sm:$0xf] }
 0x89f   : > { %v5504_v17 = vpack.c.b16 %v5503_v57, %v5503_v57  ;;  %v5466_v16 = vpack.i.b16 %v5465_v61, %v5464_v59  ;;  %v7796_v28 = vld [vmem:[#allocation2 + $0x3c] sm:$0xe]  ;;  %v13482_v57 = vld [vmem:[#allocation2 + $0x40] sm:$0xf]  ;;  %v7802_v36 = vld [vmem:[#allocation2 + $0x54] sm:$0xe] }
 0x8a0   : > { %v7799_v59 = vld [vmem:[#allocation2 + $0x48] sm:$0xe]  ;;  %v7800_v61 = vld [vmem:[#allocation2 + $0x4c] sm:$0xf]  ;;  %v9222_v11 = vrot.slane %v7793_v32, 9  ;;  %v15478_v41 = vrot.slane %v13472_v42, 5  ;;  %v5552_v1 = vpack.c.b16 %v5551_v12, %v5551_v12 }
 0x8a1   : > { %v9218_v53 = vrot.slane %v7781_v58, 9  ;;  %v7831_v23 = vrot.slane %v7782_v35, 5  ;;  %v7845_v24 = vrot.slane %v7788_v5, 5  ;;  %v7852_v50 = vrot.slane %v7791_v37, 5  ;;  %v7790_v12 = vld [vmem:[#allocation2 + $0x24] sm:$0xe] }
 0x8a2   : > { %v15479_v58 = vrot.slane %v13482_v57, 5  ;;  %v9224_v35 = vrot.slane %v7799_v59, 9  ;;  %v9225_v5 = vrot.slane %v7802_v36, 9  ;;  %v7880_v37 = vrot.slane %v7803_v46, 5 }
 0x8a3   : > { %5533 = vrot.lane.b32.xlu0 %v5532_v13, %s9448_s18  ;;  %5505 = vrot.lane.b32.xlu2 %v5504_v17, %s9448_s18  ;;  %v5507_v13 = vunpack.c.l.b16 %v5463_v47  ;;  %v5511_v17 = vunpack.c.l.b16 %v5466_v16  ;;  %v7838_v47 = vrot.slane %v13476_v22, 5  ;;  %v13496_v32 = vpop.permute.xlu1 %8268  ;;  %v9223_v16 = vrot.slane %v7796_v28, 9 }
 0x8a4   : > { %5537 = vrot.lane.b32.xlu1 %v5536_v6, %s9449_s19  ;;  %v13486_v6 = vsel %vm425_vm2, %v5710_v0, %v13092_v27  ;;  %v7860_v27 = vsel %vm9890_vm15, %v9222_v11, %v15478_v41  ;;  %v13494_v0 = vpop.permute.xlu0 %8272  ;;  %15859 = vst [vmem:[#allocation25_spill] sm:$0xff] %v13496_v32  ;;  %v7873_v22 = vrot.slane %v7800_v61, 5  ;;  %v13504_v11 = vsel %vm425_vm2, %v5738_v19, %v13083_v8 }
 0x8a5   : > { %v5508_v20 = vpack.c.b16 %v5507_v13, %v5507_v13  ;;  %15858 = vst [vmem:[#allocation37_spill] sm:$0xff] %v13494_v0  ;;  %v13499_v13 = vpop.permute.xlu2 %6991  ;;  %v5512_v55 = vpack.c.b16 %v5511_v17, %v5511_v17  ;;  %v7901_v52 = vrot.slane %v7860_v27, 4  ;;  %v9219_v41 = vrot.slane %v7784_v25, 9  ;;  %v7789_v25 = vld [vmem:[#allocation2 + $0x20] sm:$0x1] }
 0x8a6   : > { %15860 = vst [vmem:[#allocation24_spill] sm:$0xff] %v13499_v13  ;;  %v7867_v28 = vsel %vm9890_vm15, %v9223_v16, %v15479_v58  ;;  %v7874_v59 = vsel %vm9890_vm15, %v9224_v35, %v7873_v22  ;;  %v9220_v46 = vrot.slane %v7787_v40, 9  ;;  %v9221_v36 = vrot.slane %v7790_v12, 9 }
 0x8a7   : > { %v7881_v8 = vsel %vm9890_vm15, %v9225_v5, %v7880_v37  ;;  %v7907_v17 = vrot.slane %v7874_v59, 4  ;;  %v7929_v61 = vrot.slane %v7867_v28, 4  ;;  %v7839_v27 = vsel %vm9890_vm15, %v9219_v41, %v7838_v47 }
 0x8a8   : > { %v7833_v35 = vrot.slane %v7831_v23, 4  ;;  %v7847_v5 = vrot.slane %v7845_v24, 4  ;;  %v7854_v28 = vrot.slane %v7852_v50, 4  ;;  %v7848_v13 = vrot.slane %v7789_v25, 5 }
 0x8a9   : > { %v7930_v16 = vsel %vm425_vm2, %v7929_v61, %v7839_v27  ;;  %v7840_v61 = vrot.slane %v7838_v47, 4  ;;  %v7804_v47 = vld [vmem:[#allocation2 + $0x5c] sm:$0x1]  ;;  %v15864_v0 = vrot.slane %v13472_v42, 5 }
 0x8ab   : > { %5509 = vrot.lane.b32.xlu0 %v5508_v20, %s9449_s19  ;;  %5553 = vrot.lane.b32.xlu2 %v5552_v1, %s9447_s17  ;;  %v7832_v20 = vsel %vm9890_vm15, %v9218_v53, %v7831_v23  ;;  %v7853_v1 = vsel %vm9890_vm15, %v9221_v36, %v7852_v50  ;;  %v7783_v53 = vld [vmem:[#allocation2 + $0x8] sm:$0x1]  ;;  %v7792_v50 = vld [vmem:[#allocation2 + $0x2c] sm:$0x1] }
 0x8ac   : > { %5513 = vrot.lane.b32.xlu1 %v5512_v55, %s9443_s13  ;;  %v7902_v19 = vsel %vm425_vm2, %v7901_v52, %v7832_v20  ;;  %v7846_v55 = vsel %vm9890_vm15, %v9220_v46, %v7845_v24  ;;  %v7935_v52 = vrot.slane %v7881_v8, 4  ;;  %v7875_v20 = vrot.slane %v7873_v22, 4  ;;  %v7795_v8 = vld [vmem:[#allocation2 + $0x38] sm:$0x1]  ;;  %v13542_v27 = vpop.permute.xlu0 %8264  ;;  %v13544_v22 = vpop.permute.xlu1 %8280 }
 0x8ad   : > { %v13527_v40 = vperm.slane %v7902_v19, %v9548_v56  ;;  %v7908_v12 = vsel %vm425_vm2, %v7907_v17, %v7846_v55  ;;  %v13536_v46 = vperm.slane %v7930_v16, %v9548_v56  ;;  %v7786_v19 = vld [vmem:[#allocation2 + $0x14] sm:$0x1]  ;;  %v7834_v17 = vrot.slane %v7783_v53, 5  ;;  %15861 = vst [vmem:[#allocation16_spill] sm:$0xff] %v13542_v27  ;;  %v7801_v16 = vld [vmem:[#allocation2 + $0x50] sm:$0x1] }
 0x8ae   : > { %v13532_v41 = vperm.slane %v7908_v12, %v9548_v56  ;;  %v7936_v36 = vsel %vm425_vm2, %v7935_v52, %v7853_v1  ;;  %v7882_v55 = vrot.slane %v7880_v37, 4  ;;  %15862 = vst [vmem:[#allocation9_spill] sm:$0xff] %v13544_v22  ;;  %v7798_v37 = vld [vmem:[#allocation2 + $0x44] sm:$0x1]  ;;  %v7841_v58 = vrot.slane %v7786_v19, 5 }
 0x8af   : > { %v7915_v59 = vrot.slane %v13527_v40, 4  ;;  %v7940_v24 = vperm.slane %v7936_v36, %v9548_v56  ;;  %v7943_v53 = vrot.slane %v13536_v46, 4  ;;  %v7835_v52 = vsel %vm9890_vm15, %v7833_v35, %v7834_v17 }
 0x8b0   : > { %v7913_v12 = vrot.slane %v13532_v41, 4  ;;  %v7861_v27 = vrot.slane %v15864_v0, 4  ;;  %v7862_v32 = vrot.slane %v7795_v8, 5  ;;  %v15865_v22 = vrot.slane %v13482_v57, 5 }
 0x8b1   : > { %v7916_v23 = vsel %vm425_vm2, %v13532_v41, %v7915_v59  ;;  %v13553_v59 = vpop.permute.xlu2 %7510  ;;  %v7941_v36 = vrot.slane %v7940_v24, 4  ;;  %v7944_v41 = vsel %vm425_vm2, %v7940_v24, %v7943_v53  ;;  %v7842_v35 = vsel %vm9890_vm15, %v7840_v61, %v7841_v58 }
 0x8b2   : > { %v13548_v1 = vperm.slane %v7916_v23, %v15580_v9  ;;  %15863 = vst [vmem:[#allocation68_spill] sm:$0xff] %v13553_v59  ;;  %v7855_v23 = vrot.slane %v7792_v50, 5  ;;  %v7868_v49 = vrot.slane %v15865_v22, 4  ;;  %v13561_v31 = vperm.slane %v7944_v41, %v15580_v9 }
 0x8b3   : > { %v7849_v19 = vsel %vm9890_vm15, %v7847_v5, %v7848_v13  ;;  %v7869_v25 = vrot.slane %v7798_v37, 5  ;;  %v7863_v42 = vsel %vm9890_vm15, %v7861_v27, %v7862_v32  ;;  %v7876_v0 = vrot.slane %v7801_v16, 5 }
 0x8b4   : > { %v7883_v17 = vrot.slane %v7804_v47, 5  ;;  %v5500_v24 = vshrl.u32 %v13448_v4, 16  ;;  %v8027_v57 = vpack.i.b16 %v13561_v31, %v13548_v1  ;;  %v7856_v50 = vsel %vm9890_vm15, %v7854_v28, %v7855_v23  ;;  %v13590_v41 = vpop.permute.xlu1 %8260 }
 0x8b5   : > { %v7870_v58 = vsel %vm9890_vm15, %v7868_v49, %v7869_v25  ;;  %v7957_v8 = vrot.slane %v7863_v42, 4  ;;  %v7877_v13 = vsel %vm9890_vm15, %v7875_v20, %v7876_v0  ;;  %v5501_v61 = vshrl.u32 %v13452_v60, 16  ;;  %v13588_v60 = vpop.permute.xlu0 %6993  ;;  %15867 = vst [vmem:[#allocation56_spill] sm:$0xff] %v13590_v41 }
 0x8b6   : > { %v7884_v32 = vsel %vm9890_vm15, %v7882_v55, %v7883_v17  ;;  %v7985_v5 = vrot.slane %v7870_v58, 4  ;;  %v8073_v4 = vunpack.c.l.b16 %v8027_v57  ;;  %v7963_v22 = vrot.slane %v7877_v13, 4  ;;  %15866 = vst [vmem:[#allocation67_spill] sm:$0xff] %v13588_v60  ;;  %vm16003_vm15 = vmmov %vm15940_vm1 }
 0x8b7   : > { %v7958_v27 = vsel %vm425_vm2, %v7957_v8, %v7835_v52  ;;  %v7991_v53 = vrot.slane %v7884_v32, 4  ;;  %v5502_v49 = vpack.i.b16 %v5501_v61, %v5500_v24  ;;  %v5476_v16 = vshrl.u32 %v13401_v43, 16 }
 0x8b8   : > { %v7962_v28 = vperm.slane %v7958_v27, %v9548_v56  ;;  %v7986_v37 = vsel %vm425_vm2, %v7985_v5, %v7842_v35  ;;  %v8074_v47 = vpack.c.b16 %v8073_v4, %v8073_v4  ;;  %v7964_v20 = vsel %vm425_vm2, %v7963_v22, %v7849_v19 }
 0x8b9   : > { %v7990_v33 = vperm.slane %v7986_v37, %v9548_v56  ;;  %v7992_v55 = vsel %vm425_vm2, %v7991_v53, %v7856_v50  ;;  %v7968_v52 = vperm.slane %v7964_v20, %v9548_v56  ;;  %v5555_v25 = vunpack.c.l.b16 %v5502_v49  ;;  %v13595_v42 = vpop.permute.xlu2 %6967 }
 0x8ba   : > { %v7996_v23 = vperm.slane %v7992_v55, %v9548_v56  ;;  %v5477_v35 = vshrl.u32 %v13412_v18, 16  ;;  %15868 = vst [vmem:[#allocation57_spill] sm:$0xff] %v13595_v42  ;;  %8075 = vrot.lane.b32.xlu2 %v8074_v47, %s9446_s16  ;;  %v7914_v43 = vsel %vm425_vm2, %v7913_v12, %v13527_v40  ;;  %v7942_v19 = vsel %vm425_vm2, %v7941_v36, %v13536_v46 }
 0x8bb   : > { %v7971_v0 = vrot.slane %v7962_v28, 4  ;;  %v7999_v17 = vrot.slane %v7990_v33, 4  ;;  %v7969_v24 = vrot.slane %v7968_v52, 4  ;;  %v5556_v50 = vpack.c.b16 %v5555_v25, %v5555_v25 }
 0x8bc   : > { %v7997_v57 = vrot.slane %v7996_v23, 4  ;;  %v5478_v58 = vpack.i.b16 %v5477_v35, %v5476_v16  ;;  %v13603_v8 = vperm.slane %v7914_v43, %v15580_v9  ;;  %v13606_v18 = vperm.slane %v7942_v19, %v15580_v9 }
 0x8bd   : > { %v7972_v13 = vsel %vm425_vm2, %v7968_v52, %v7971_v0  ;;  %v8000_v32 = vsel %vm425_vm2, %v7996_v23, %v7999_v17  ;;  %v7970_v40 = vsel %vm425_vm2, %v7969_v24, %v7962_v28  ;;  %5557 = vrot.lane.b32.xlu0 %v5556_v50, %s9445_s15  ;;  %v13626_v22 = vperm.slane %v13486_v6, %v9548_v56  ;;  %v6263_v0 = vld [vmem:[#allocation2 + $0x4] sm:$0xf] }
 0x8be   : > { %15869 = vst [vmem:[#allocation45_spill] sm:$0xff] %v13603_v8  ;;  %v7998_v46 = vsel %vm425_vm2, %v7997_v57, %v7990_v33  ;;  %v5527_v12 = vunpack.c.l.b16 %v5478_v58  ;;  %v13614_v36 = vperm.slane %v7972_v13, %v15580_v9  ;;  %v13617_v5 = vperm.slane %v7970_v40, %v15580_v9  ;;  %v6262_v33 = vld [vmem:[#allocation2] sm:$0xf] }
 0x8bf   : > { %15870 = vst [vmem:[#allocation36_spill] sm:$0xff] %v13606_v18  ;;  %v13620_v61 = vperm.slane %v7998_v46, %v15580_v9  ;;  %v7925_v4 = vrot.slane %v13603_v8, 4  ;;  %v7953_v27 = vrot.slane %v13606_v18, 4  ;;  %v13630_v53 = vperm.slane %v13504_v11, %v9548_v56 }
 0x8c0   : > { %15871 = vst [vmem:[#allocation53_spill] sm:$0xff] %v13617_v5  ;;  %v5528_v28 = vpack.c.b16 %v5527_v12, %v5527_v12  ;;  %v13633_v37 = vperm.slane %v8000_v32, %v15580_v9  ;;  %v7981_v49 = vrot.slane %v13617_v5, 4  ;;  %v5488_v20 = vshrl.u32 %v13423_v3, 16  ;;  %v6265_v12 = vld [vmem:[#allocation2 + $0xc] sm:$0xf] }
 0x8c1   : > { %15872 = vst [vmem:[#allocation10_spill] sm:$0xff] %v13620_v61  ;;  %v8009_v16 = vrot.slane %v13620_v61, 4  ;;  %v13638_v47 = vsel %vm425_vm2, 0, %v7925_v4  ;;  %v15874_v6 = vrot.slane %v13109_v29, 4  ;;  %v15875_v55 = vrot.slane %v13113_v38, 4  ;;  %v13665_v38 = vpop.permute.xlu0 %6963  ;;  %v13672_v50 = vpop.permute.xlu2 %6973 }
 0x8c2   : > { %15873 = vst [vmem:[#allocation12_spill] sm:$0xff] %v13626_v22  ;;  %v5760_v23 = vrot.slane %v13128_v15, 4  ;;  %v8051_v25 = vpack.i.b16 %v13633_v37, %v13614_v36  ;;  %v13653_v35 = vsel %vm425_vm2, 0, %v7981_v49  ;;  %5529 = vrot.lane.b32.xlu2 %v5528_v28, %s9445_s15  ;;  %v5489_v29 = vshrl.u32 %v13430_v10, 16  ;;  %v13667_v15 = vpop.permute.xlu1 %7508 }
 0x8c3   : > { %v5677_v11 = vsel %vm425_vm2, %v15874_v6, %v13053_v62  ;;  %v5733_v52 = vsel %vm425_vm2, %v15875_v55, %v12979_v14  ;;  %15876 = vst [vmem:[#allocation44_spill] sm:$0xff] %v13653_v35  ;;  %v13656_v3 = vsel %vm425_vm2, 0, %v8009_v16  ;;  %v13660_v62 = vsel %vm425_vm2, 0, %v7953_v27 }
 0x8c4   : > { %15877 = vst [vmem:[#allocation8_spill] sm:$0xff] %v13656_v3  ;;  %v8045_v14 = vpack.i.b16 %v13656_v3, %v13653_v35  ;;  %v8022_v43 = vshrl.u32 %v13638_v47, 16  ;;  %v8101_v19 = vunpack.c.l.b16 %v8051_v25  ;;  %v6287_v17 = vshrl.u32 %v6262_v33, 16 }
 0x8c5   : > { %15878 = vst [vmem:[#allocation20_spill] sm:$0xff] %v13665_v38  ;;  %v5744_v24 = vrot.slane %v13630_v53, 4  ;;  %v5737_v57 = vperm.slane %v5733_v52, %v9548_v56  ;;  %v5490_v58 = vpack.i.b16 %v5489_v29, %v5488_v20  ;;  %v6290_v10 = vshll.u32 %v6262_v33, 16  ;;  %v6266_v52 = vld [vmem:[#allocation2 + $0x10] sm:$0xf] }
 0x8c6   : > { %15879 = vst [vmem:[#allocation54_spill] sm:$0xff] %v13667_v15  ;;  %v5682_v13 = vrot.slane %v13132_v39, 4  ;;  %v8093_v32 = vunpack.c.l.b16 %v8045_v14  ;;  %v8023_v40 = vshrl.u32 %v13660_v62, 16  ;;  %v8102_v46 = vpack.c.b16 %v8101_v19, %v8101_v19 }
 0x8c7   : > { %15880 = vst [vmem:[#allocation5_spill] sm:$0xff] %v13672_v50  ;;  %v5761_v4 = vsel %vm425_vm2, %v5760_v23, %v13073_v2  ;;  %v5539_v27 = vunpack.c.l.b16 %v5490_v58  ;;  %v6296_v28 = vshll.u32 %v6263_v0, 16  ;;  %v6300_v49 = vshrl.u32 %v6263_v0, 16  ;;  %v6268_v0 = vld [vmem:[#allocation2 + $0x18] sm:$0xf] }
 0x8c8   : > { %v8094_v16 = vpack.c.b16 %v8093_v32, %v8093_v32  ;;  %v8024_v6 = vpack.i.b16 %v8023_v40, %v8022_v43  ;;  %8103 = vrot.lane.b32.xlu0 %v8102_v46, %s9446_s16  ;;  %v6289_v55 = vrot.slane %v6287_v17, 4  ;;  %v6292_v20 = vrot.slane %v6290_v10, 5  ;;  %v6277_v50 = vld [vmem:[#allocation2 + $0x3c] sm:$0xf] }
 0x8c9   : > { %v5540_v39 = vpack.c.b16 %v5539_v27, %v5539_v27  ;;  %v6311_v25 = vshrl.u32 %v6265_v12, 16  ;;  %v6314_v29 = vshll.u32 %v6265_v12, 16  ;;  %v13682_v14 = vperm.slane %v13480_v34, %v9548_v56 }
 0x8ca   : > { %v15881_v2 = vrot.slane %v13443_v26, 4  ;;  %v13689_v43 = vperm.slane %v5677_v11, %v9548_v56  ;;  %v5745_v19 = vsel %vm425_vm2, %v5744_v24, %v5737_v57  ;;  %8095 = vrot.lane.b32.xlu1 %v8094_v16, %s9449_s19  ;;  %v5746_v17 = vrot.slane %v5737_v57, 4 }
 0x8cb   : > { %v13694_v58 = vperm.slane %v5761_v4, %v9548_v56  ;;  %5541 = vrot.lane.b32.xlu2 %v5540_v39, %s9443_s13  ;;  %v13697_v34 = vrot.slane %v6296_v28, 5  ;;  %v6302_v10 = vrot.slane %v6300_v49, 4  ;;  %v5683_v32 = vsel %vm425_vm2, %v5682_v13, %v13015_v54  ;;  %v13706_v28 = vpop.permute.xlu0 %6969  ;;  %v13708_v49 = vpop.permute.xlu1 %6965  ;;  %v13725_v4 = vld [vmem:[#allocation2 + $0x34] sm:$0xf] }
 0x8cc   : > { %v5719_v23 = vsel %vm425_vm2, %v13626_v22, %v15881_v2  ;;  %v8069_v40 = vunpack.c.l.b16 %v8024_v6  ;;  %v6293_v11 = vor.u32 %v6292_v20, %v6289_v55  ;;  %v6320_v46 = vshll.u32 %v6266_v52, 16  ;;  %15883 = vst [vmem:[#allocation6_spill] sm:$0xff] %v13706_v28  ;;  %v13718_v55 = vpop.permute.xlu2 %6979  ;;  %v6269_v20 = vld [vmem:[#allocation2 + $0x1c] sm:$0xf] }
 0x8cd   : > { %v6313_v12 = vrot.slane %v6311_v25, 4  ;;  %v6316_v24 = vrot.slane %v6314_v29, 5  ;;  %v6324_v27 = vshrl.u32 %v6266_v52, 16  ;;  %v6335_v16 = vshrl.u32 %v6268_v0, 16  ;;  %15884 = vst [vmem:[#allocation11_spill] sm:$0xff] %v13708_v49 }
 0x8ce   : > { %v13704_v2 = vperm.slane %v5719_v23, %v15580_v9  ;;  %v6338_v39 = vshll.u32 %v6268_v0, 16  ;;  %v13713_v13 = vsel %vm425_vm2, %v13630_v53, %v5746_v17  ;;  %v13716_v6 = vperm.slane %v5745_v19, %v15580_v9  ;;  %15886 = vst [vmem:[#allocation70_spill] sm:$0xff] %v13718_v55  ;;  %v6274_v52 = vld [vmem:[#allocation2 + $0x30] sm:$0xf]  ;;  %v6271_v53 = vld [vmem:[#allocation2 + $0x24] sm:$0xf] }
 0x8cf   : > { %v6303_v25 = vor.u32 %v6302_v10, %v13697_v34  ;;  %v13723_v23 = vperm.slane %v5683_v32, %v9548_v56  ;;  %v8070_v0 = vpack.c.b16 %v8069_v40, %v8069_v40  ;;  %v13727_v33 = vrot.slane %v6293_v11, 4  ;;  %v13732_v32 = vld [vmem:[#allocation2 + $0x40] sm:$0xf]  ;;  %v13742_v55 = vld [vmem:[#allocation2 + $0x4c] sm:$0xf] }
 0x8d0   : > { %15882 = vst [vmem:[#allocation7_spill] sm:$0xff] %v13704_v2  ;;  %v6317_v17 = vor.u32 %v6316_v24, %v6313_v12  ;;  %v13729_v19 = vrot.slane %v6320_v46, 5  ;;  %v6326_v54 = vrot.slane %v6324_v27, 4  ;;  %v6337_v57 = vrot.slane %v6335_v16, 4  ;;  %v6272_v40 = vld [vmem:[#allocation2 + $0x28] sm:$0xf] }
 0x8d1   : > { %15885 = vst [vmem:[#allocation69_spill] sm:$0xff] %v13716_v6  ;;  %v6340_v10 = vrot.slane %v6338_v39, 5  ;;  %v6344_v49 = vshll.u32 %v6269_v20, 16  ;;  %v6383_v29 = vshrl.u32 %v6274_v52, 16  ;;  %v6386_v28 = vshll.u32 %v6274_v52, 16 }
 0x8d2   : > { %8071 = vrot.lane.b32.xlu1 %v8070_v0, %s9443_s13  ;;  %v13738_v11 = vrot.slane %v6303_v25, 4  ;;  %v6348_v46 = vshrl.u32 %v6269_v20, 16  ;;  %v6392_v12 = vshll.u32 %v13725_v4, 16  ;;  %v6359_v24 = vshrl.u32 %v6271_v53, 16  ;;  %v6280_v39 = vld [vmem:[#allocation2 + $0x48] sm:$0xf] }
 0x8d3   : > { %v6362_v27 = vshll.u32 %v6271_v53, 16  ;;  %v6385_v16 = vrot.slane %v6383_v29, 4  ;;  %v6388_v0 = vrot.slane %v6386_v28, 5  ;;  %v6318_v60 = vrot.slane %v6317_v17, 4  ;;  %v6283_v17 = vld [vmem:[#allocation2 + $0x54] sm:$0xf]  ;;  %v13751_v59 = vpop.permute.xlu0 %6975 }
 0x8d4   : > { %v6327_v52 = vor.u32 %v6326_v54, %v13729_v19  ;;  %v6407_v42 = vshrl.u32 %v6277_v50, 16  ;;  %v6410_v38 = vshll.u32 %v6277_v50, 16  ;;  %v6341_v41 = vor.u32 %v6340_v10, %v6337_v57  ;;  %15887 = vst [vmem:[#allocation71_spill] sm:$0xff] %v13751_v59  ;;  %v13753_v57 = vpop.permute.xlu1 %6971 }
 0x8d5   : > { %v13744_v6 = vrot.slane %v6344_v49, 5  ;;  %v6389_v25 = vor.u32 %v6388_v0, %v6385_v16  ;;  %v6416_v20 = vshll.u32 %v13732_v32, 16  ;;  %v13747_v22 = vrot.slane %v6348_v46, 4  ;;  %v13755_v49 = vld [vmem:[#allocation2 + $0x58] sm:$0xf]  ;;  %v13760_v0 = vpop.permute.xlu2 %6985 }
 0x8d6   : > { %v13749_v53 = vrot.slane %v6392_v12, 5  ;;  %v6409_v28 = vrot.slane %v6407_v42, 4  ;;  %v6412_v29 = vrot.slane %v6410_v38, 5  ;;  %v6361_v26 = vrot.slane %v6359_v24, 4  ;;  %15888 = vst [vmem:[#allocation72_spill] sm:$0xff] %v13760_v0 }
 0x8d7   : > { %v6364_v54 = vrot.slane %v6362_v27, 5  ;;  %v6390_v2 = vrot.slane %v6389_v25, 4  ;;  %v6431_v50 = vshrl.u32 %v6280_v39, 16  ;;  %v13757_v16 = vrot.slane %v6416_v20, 5 }
 0x8d8   : > { %v6413_v10 = vor.u32 %v6412_v29, %v6409_v28  ;;  %v6434_v46 = vshll.u32 %v6280_v39, 16  ;;  %v6440_v12 = vshll.u32 %v13742_v55, 16  ;;  %v6323_v42 = vsel %vm9958_vm6, %v6318_v60, %v13729_v19 }
 0x8d9   : > { %v13765_v38 = vrot.slane %v6327_v52, 4  ;;  %v6368_v24 = vshll.u32 %v6272_v40, 16  ;;  %v6433_v27 = vrot.slane %v6431_v50, 4  ;;  %v6395_v25 = vsel %vm9958_vm6, %v6390_v2, %v13749_v53 }
 0x8da   : > { %v6414_v28 = vrot.slane %v6413_v10, 4  ;;  %v6436_v20 = vrot.slane %v6434_v46, 5  ;;  %v6455_v29 = vshrl.u32 %v6283_v17, 16  ;;  %v6365_v39 = vor.u32 %v6364_v54, %v6361_v26 }
 0x8db   : > { %v6372_v59 = vshrl.u32 %v6272_v40, 16  ;;  %v6458_v3 = vshll.u32 %v6283_v17, 16  ;;  %v6464_v0 = vshll.u32 %v13755_v49, 16  ;;  %v13774_v52 = vrot.slane %v6440_v12, 5 }
 0x8dc   : > { %v6419_v60 = vsel %vm9958_vm6, %v6414_v28, %v13757_v16  ;;  %v6437_v19 = vor.u32 %v6436_v20, %v6433_v27  ;;  %v6457_v50 = vrot.slane %v6455_v29, 4  ;;  %v6342_v15 = vrot.slane %v6341_v41, 4  ;;  %v13798_v20 = vpop.permute.xlu0 %6981  ;;  %v13800_v29 = vpop.permute.xlu1 %6977 }
 0x8dd   : > { %v6351_v2 = vor.u32 %v13747_v22, %v13744_v6  ;;  %v6460_v10 = vrot.slane %v6458_v3, 5  ;;  %v6494_v46 = vrot.slane %v6395_v25, 4  ;;  %v13778_v35 = vrot.slane %v6368_v24, 5  ;;  %15890 = vst [vmem:[#allocation73_spill] sm:$0xff] %v13798_v20 }
 0x8de   : > { %v6438_v26 = vrot.slane %v6437_v19, 4  ;;  %v6522_v40 = vrot.slane %v6419_v60, 4  ;;  %v8021_v17 = vpack.i.b16 %v13660_v62, %v13638_v47  ;;  %v13782_v54 = vrot.slane %v6372_v59, 4  ;;  %15891 = vst [vmem:[#allocation74_spill] sm:$0xff] %v13800_v29  ;;  %v13810_v60 = vpop.permute.xlu2 %7484 }
 0x8df   : > { %v6461_v28 = vor.u32 %v6460_v10, %v6457_v50  ;;  %v13784_v27 = vrot.slane %v6464_v0, 5  ;;  %v15889_v41 = vsel %vm9958_vm6, %v13727_v33, %v13697_v34  ;;  %v6366_v3 = vrot.slane %v6365_v39, 4 }
 0x8e0   : > { %v6495_v22 = vsel %vm425_vm2, %v6494_v46, %v15889_v41  ;;  %v6443_v12 = vsel %vm9958_vm6, %v6438_v26, %v13774_v52  ;;  %v6523_v59 = vsel %vm425_vm2, %v6522_v40, %v6323_v42  ;;  %v8065_v25 = vunpack.c.l.b16 %v8021_v17 }
 0x8e1   : > { %v6499_v24 = vperm.slane %v6495_v22, %v9548_v56  ;;  %v6462_v47 = vrot.slane %v6461_v28, 4  ;;  %v6500_v62 = vrot.slane %v6443_v12, 4  ;;  %v6527_v0 = vperm.slane %v6523_v59, %v9548_v56 }
 0x8e2   : > { %v6347_v33 = vsel %vm9958_vm6, %v6342_v15, %v13744_v6  ;;  %v6371_v34 = vsel %vm9958_vm6, %v6366_v3, %v13778_v35  ;;  %v6396_v39 = vshrl.u32 %v13725_v4, 16  ;;  %v6420_v42 = vshrl.u32 %v13732_v32, 16 }
 0x8e3   : > { %v6444_v19 = vshrl.u32 %v13742_v55, 16  ;;  %v6467_v50 = vsel %vm9958_vm6, %v6462_v47, %v13784_v27  ;;  %v6501_v10 = vsel %vm425_vm2, %v6500_v62, %v6347_v33  ;;  %v8066_v46 = vpack.c.b16 %v8065_v25, %v8065_v25 }
 0x8e4   : > { %v6468_v15 = vshrl.u32 %v13755_v49, 16  ;;  %v6505_v6 = vperm.slane %v6501_v10, %v9548_v56  ;;  %v6508_v26 = vrot.slane %v6499_v24, 4  ;;  %v6528_v40 = vrot.slane %v6467_v50, 4 }
 0x8e5   : > { %v6536_v4 = vrot.slane %v6527_v0, 4  ;;  %8067 = vrot.lane.b32.xlu0 %v8066_v46, %s9449_s19  ;;  %v8016_v32 = vshrl.u32 %v13603_v8, 16  ;;  %v8017_v55 = vshrl.u32 %v13606_v18, 16  ;;  %v8040_v17 = vshrl.u32 %v13617_v5, 16  ;;  %v6285_v5 = vld [vmem:[#allocation2 + $0x5c] sm:$0x1] }
 0x8e6   : > { %v6509_v28 = vsel %vm425_vm2, %v6505_v6, %v6508_v26  ;;  %v6529_v41 = vsel %vm425_vm2, %v6528_v40, %v6371_v34  ;;  %v6506_v22 = vrot.slane %v6505_v6, 4  ;;  %v8041_v49 = vshrl.u32 %v13620_v61, 16 }
 0x8e7   : > { %v6398_v3 = vrot.slane %v6396_v39, 4  ;;  %v6422_v12 = vrot.slane %v6420_v42, 4  ;;  %v6533_v59 = vperm.slane %v6529_v41, %v9548_v56  ;;  %v8018_v47 = vpack.i.b16 %v8017_v55, %v8016_v32  ;;  %v13844_v55 = vpop.permute.xlu0 %6987  ;;  %v6267_v41 = vld [vmem:[#allocation2 + $0x14] sm:$0x1] }
 0x8e8   : > { %v6446_v62 = vrot.slane %v6444_v19, 4  ;;  %v13828_v25 = vperm.slane %v6509_v28, %v15580_v9  ;;  %v6507_v33 = vsel %vm425_vm2, %v6506_v22, %v6499_v24  ;;  %v8042_v50 = vpack.i.b16 %v8041_v49, %v8040_v17  ;;  %v13846_v17 = vpop.permute.xlu1 %6983  ;;  %v13854_v22 = vpop.permute.xlu2 %7490 }
 0x8e9   : > { %v6537_v10 = vsel %vm425_vm2, %v6533_v59, %v6536_v4  ;;  %v8061_v46 = vunpack.c.l.b16 %v8018_v47  ;;  %v13833_v34 = vperm.slane %v6507_v33, %v15580_v9  ;;  %v6534_v6 = vrot.slane %v6533_v59, 4  ;;  %15892 = vst [vmem:[#allocation75_spill] sm:$0xff] %v13846_v17  ;;  %v6270_v59 = vld [vmem:[#allocation2 + $0x20] sm:$0x1]  ;;  %v6273_v47 = vld [vmem:[#allocation2 + $0x2c] sm:$0x1] }
 0x8ea   : > { %v6375_v39 = vor.u32 %v13782_v54, %v13778_v35  ;;  %v6470_v42 = vrot.slane %v6468_v15, 4  ;;  %v13838_v26 = vperm.slane %v6537_v10, %v15580_v9  ;;  %v8089_v19 = vunpack.c.l.b16 %v8042_v50 }
 0x8eb   : > { %v13840_v40 = vrot.slane %v6351_v2, 4  ;;  %v6399_v24 = vor.u32 %v6398_v3, %v13749_v53  ;;  %v8062_v32 = vpack.c.b16 %v8061_v46, %v8061_v46  ;;  %v6535_v4 = vsel %vm425_vm2, %v6534_v6, %v6527_v0  ;;  %v6264_v2 = vld [vmem:[#allocation2 + $0x8] sm:$0x1] }
 0x8ec   : > { %v6620_v28 = vpack.i.b16 %v13838_v26, %v13828_v25  ;;  %v13851_v35 = vperm.slane %v6535_v4, %v15580_v9  ;;  %v6609_v54 = vshrl.u32 %v13833_v34, 16  ;;  %v8090_v15 = vpack.c.b16 %v8089_v19, %v8089_v19 }
 0x8ed   : > { %v6423_v53 = vor.u32 %v6422_v12, %v13757_v16  ;;  %v6447_v0 = vor.u32 %v6446_v62, %v13774_v52  ;;  %8063 = vrot.lane.b32.xlu2 %v8062_v32, %s9448_s18  ;;  %v8028_v49 = vshrl.u32 %v13548_v1, 16  ;;  %v8029_v3 = vshrl.u32 %v13561_v31, 16  ;;  %v6276_v16 = vld [vmem:[#allocation2 + $0x38] sm:$0x1]  ;;  %v6279_v62 = vld [vmem:[#allocation2 + $0x44] sm:$0x1] }
 0x8ee   : > { %15893 = vst [vmem:[#allocation76_spill] sm:$0xff] %v13851_v35  ;;  %v13861_v33 = vrot.slane %v6375_v39, 4  ;;  %v6471_v50 = vor.u32 %v6470_v42, %v13784_v27  ;;  %v6666_v10 = vunpack.c.l.b16 %v6620_v28  ;;  %v6610_v46 = vshrl.u32 %v13851_v35, 16  ;;  %8091 = vrot.lane.b32.xlu0 %v8090_v15, %s9448_s18  ;;  %v6282_v28 = vld [vmem:[#allocation2 + $0x50] sm:$0x1] }
 0x8ef   : > { %v6400_v12 = vrot.slane %v6399_v24, 4  ;;  %v8030_v52 = vpack.i.b16 %v8029_v3, %v8028_v49  ;;  %v6306_v6 = vshll.u32 %v6264_v2, 16  ;;  %v6330_v19 = vshll.u32 %v6267_v41, 16 }
 0x8f0   : > { %v6667_v32 = vpack.c.b16 %v6666_v10, %v6666_v10  ;;  %v6611_v4 = vpack.i.b16 %v6610_v46, %v6609_v54  ;;  %v6354_v29 = vshll.u32 %v6270_v59, 16  ;;  %v6378_v20 = vshll.u32 %v6273_v47, 16  ;;  %v13867_v10 = vpop.permute.xlu0 %7480  ;;  %v13869_v54 = vpop.permute.xlu1 %6989 }
 0x8f1   : > { %v6424_v17 = vrot.slane %v6423_v53, 4  ;;  %v6448_v39 = vrot.slane %v6447_v0, 4  ;;  %v8077_v61 = vunpack.c.l.b16 %v8030_v52  ;;  %v6402_v27 = vshll.u32 %v6276_v16, 16  ;;  %15894 = vst [vmem:[#allocation77_spill] sm:$0xff] %v13869_v54 }
 0x8f2   : > { %v6472_v42 = vrot.slane %v6471_v50, 4  ;;  %6668 = vrot.lane.b32.xlu1 %v6667_v32, %s9446_s16  ;;  %v6308_v15 = vrot.slane %v6306_v6, 5  ;;  %v6332_v18 = vrot.slane %v6330_v19, 5  ;;  %v6426_v24 = vshll.u32 %v6279_v62, 16  ;;  %v13877_v50 = vpop.permute.xlu2 %7496 }
 0x8f3   : > { %v6654_v49 = vunpack.c.l.b16 %v6611_v4  ;;  %v8078_v3 = vpack.c.b16 %v8077_v61, %v8077_v61  ;;  %v6356_v2 = vrot.slane %v6354_v29, 5  ;;  %v6404_v41 = vrot.slane %v6402_v27, 5 }
 0x8f4   : > { %v6309_v53 = vsel %vm9958_vm6, %v13738_v11, %v6308_v15  ;;  %v6333_v0 = vsel %vm9958_vm6, %v13765_v38, %v6332_v18  ;;  %v6380_v59 = vrot.slane %v6378_v20, 5  ;;  %v6428_v47 = vrot.slane %v6426_v24, 5 }
 0x8f5   : > { %8079 = vrot.lane.b32.xlu2 %v8078_v3, %s9444_s14  ;;  %v6405_v61 = vsel %vm9958_vm6, %v6400_v12, %v6404_v41  ;;  %v6450_v29 = vshll.u32 %v6282_v28, 16  ;;  %v6474_v46 = vshll.u32 %v6285_v5, 16  ;;  %v8052_v16 = vshrl.u32 %v13614_v36, 16 }
 0x8f6   : > { %v6429_v11 = vsel %vm9958_vm6, %v6424_v17, %v6428_v47  ;;  %v6550_v52 = vrot.slane %v6405_v61, 4  ;;  %v8053_v62 = vshrl.u32 %v13633_v37, 16  ;;  %v7017_v18 = vrot.slane %v13844_v55, 4 }
 0x8f7   : > { %v6655_v38 = vpack.c.b16 %v6654_v49, %v6654_v49  ;;  %v6452_v20 = vrot.slane %v6450_v29, 5  ;;  %v6476_v6 = vrot.slane %v6474_v46, 5  ;;  %v6578_v19 = vrot.slane %v6429_v11, 4 }
 0x8f8   : > { %v6381_v12 = vsel %vm9958_vm6, %v13861_v33, %v6380_v59  ;;  %v6551_v5 = vsel %vm425_vm2, %v6550_v52, %v6309_v53  ;;  %v8054_v32 = vpack.i.b16 %v8053_v62, %v8052_v16  ;;  %v13893_v4 = vsel %vm425_vm2, %v7017_v18, %v13753_v57  ;;  %v13919_v47 = vpop.permute.xlu0 %7486  ;;  %v13921_v61 = vpop.permute.xlu1 %7482 }
 0x8f9   : > { %15895 = vst [vmem:[#allocation78_spill] sm:$0xff] %v13893_v4  ;;  %v6453_v17 = vsel %vm9958_vm6, %v6448_v39, %v6452_v20  ;;  %v6477_v55 = vsel %vm9958_vm6, %v6472_v42, %v6476_v6  ;;  %v13900_v27 = vperm.slane %v6551_v5, %v9548_v56  ;;  %v6579_v28 = vsel %vm425_vm2, %v6578_v19, %v6333_v0  ;;  %v15909_v4 = vld [vmem:[#allocation8_spill] sm:$0xff] }
 0x8fa   : > { %6656 = vrot.lane.b32.xlu1 %v6655_v38, %s9448_s18  ;;  %v6556_v33 = vrot.slane %v6453_v17, 4  ;;  %v13905_v15 = vperm.slane %v6579_v28, %v9548_v56  ;;  %v6584_v24 = vrot.slane %v6477_v55, 4  ;;  %v8105_v57 = vunpack.c.l.b16 %v8054_v32 }
 0x8fb   : > { %v13909_v49 = vperm.slane %v13713_v13, %v15580_v9  ;;  %v6093_v39 = vrot.slane %v13203_v63, 4  ;;  %v6357_v42 = vsel %vm9958_vm6, %v13840_v40, %v6356_v2  ;;  %v7927_v3 = vrot.slane %v13548_v1, 4  ;;  %v13932_v2 = vpop.permute.xlu2 %7504  ;;  %vm16016_vm6 = vmmov %vm15940_vm1 }
 0x8fc   : > { %v6557_v41 = vsel %vm425_vm2, %v6556_v33, %v6357_v42  ;;  %v6585_v53 = vsel %vm425_vm2, %v6584_v24, %v6381_v12  ;;  %v6592_v0 = vrot.slane %v13905_v15, 4  ;;  %v8106_v59 = vpack.c.b16 %v8105_v57, %v8105_v57 }
 0x8fd   : > { %v15896_v13 = vrot.slane %v13694_v58, 4  ;;  %v6561_v48 = vperm.slane %v6557_v41, %v9548_v56  ;;  %v6564_v1 = vrot.slane %v13900_v27, 4  ;;  %v13930_v40 = vperm.slane %v6585_v53, %v9548_v56  ;;  %v15900_v53 = vld [vmem:[#allocation40_spill] sm:$0xff] }
 0x8fe   : > { %v15897_v29 = vrot.slane %v13682_v14, 4  ;;  %v15898_v16 = vrot.slane %v13689_v43, 4  ;;  %8107 = vrot.lane.b32.xlu0 %v8106_v59, %s9444_s14  ;;  %v7955_v52 = vrot.slane %v13561_v31, 4  ;;  %v6520_v62 = vrot.slane %v13828_v25, 4 }
 0x8ff   : > { %v5775_v63 = vsel %vm425_vm2, %v13682_v14, %v15896_v13  ;;  %v6565_v18 = vsel %vm425_vm2, %v6561_v48, %v6564_v1  ;;  %v6593_v14 = vsel %vm425_vm2, %v13930_v40, %v6592_v0  ;;  %v6548_v38 = vrot.slane %v13838_v26, 4 }
 0x900   : > { %v13938_v46 = vsel %vm425_vm2, %v15897_v29, %v13694_v58  ;;  %v13944_v11 = vsel %vm425_vm2, %v13723_v23, %v15898_v16  ;;  %v7928_v58 = vsel %vm425_vm2, 0, %v7927_v3  ;;  %v13955_v20 = vperm.slane %v5775_v63, %v15580_v9  ;;  %v13992_v41 = vpop.permute.xlu0 %7492 }
 0x901   : > { %v6094_v6 = vsel %vm425_vm2, %v6093_v39, %v13175_v44  ;;  %v13960_v19 = vperm.slane %v6565_v18, %v15580_v9  ;;  %v13963_v31 = vperm.slane %v6593_v14, %v15580_v9  ;;  %v15899_v12 = vrot.slane %v13028_v45, 4 }
 0x902   : > { %v6037_v32 = vrot.slane %v13173_v30, 4  ;;  %v6065_v17 = vrot.slane %v13207_v7, 4  ;;  %v7956_v55 = vsel %vm425_vm2, 0, %v7955_v52  ;;  %v13975_v24 = vsel %vm425_vm2, 0, %v6520_v62  ;;  %v15901_v52 = vld [vmem:[#allocation33_spill] sm:$0xff] }
 0x903   : > { %v6100_v5 = vsel %vm425_vm2, %v15899_v12, %v13154_v51  ;;  %v6576_v28 = vrot.slane %v13960_v19, 4  ;;  %v6604_v44 = vrot.slane %v13963_v31, 4  ;;  %v8033_v33 = vpack.i.b16 %v7956_v55, %v7928_v58  ;;  %v14002_v63 = vpop.permute.xlu2 %7502 }
 0x904   : > { %v6071_v57 = vrot.slane %v13190_v21, 4  ;;  %v13979_v45 = vperm.slane %v6094_v6, %v9548_v56  ;;  %v13982_v51 = vsel %vm425_vm2, 0, %v6548_v38  ;;  %v7983_v30 = vrot.slane %v13614_v36, 4  ;;  %v13994_v21 = vpop.permute.xlu1 %7488 }
 0x905   : > { %v13986_v7 = vsel %vm425_vm2, 0, %v6576_v28  ;;  %v13989_v39 = vsel %vm425_vm2, 0, %v6604_v44  ;;  %v8081_v42 = vunpack.c.l.b16 %v8033_v33  ;;  %v8011_v3 = vrot.slane %v13633_v37, 4 }
 0x906   : > { %v6066_v0 = vsel %vm425_vm2, %v6065_v17, %v15900_v53  ;;  %v6650_v59 = vpack.i.b16 %v13989_v39, %v13986_v7  ;;  %v6627_v36 = vshrl.u32 %v13975_v24, 16  ;;  %v7984_v13 = vsel %vm425_vm2, 0, %v7983_v30  ;;  %v15902_v30 = vld [vmem:[#allocation26_spill] sm:$0xff] }
 0x907   : > { %v8082_v1 = vpack.c.b16 %v8081_v42, %v8081_v42  ;;  %v8012_v29 = vsel %vm425_vm2, 0, %v8011_v3  ;;  %v7528_v37 = vrot.slane %v13877_v50, 4  ;;  %v8034_v16 = vshrl.u32 %v7928_v58, 16 }
 0x908   : > { %v6072_v62 = vsel %vm425_vm2, %v6071_v57, %v15901_v52  ;;  %v6702_v18 = vunpack.c.l.b16 %v6650_v59  ;;  %v6628_v14 = vshrl.u32 %v13982_v51, 16  ;;  %v8057_v38 = vpack.i.b16 %v8012_v29, %v7984_v13 }
 0x909   : > { %v14010_v6 = vperm.slane %v6066_v0, %v9548_v56  ;;  %8083 = vrot.lane.b32.xlu2 %v8082_v1, %s9447_s17  ;;  %v7529_v12 = vsel %vm425_vm2, %v7528_v37, %v13867_v10  ;;  %v8035_v17 = vshrl.u32 %v7956_v55, 16  ;;  %v6562_v28 = vrot.slane %v6561_v48, 4  ;;  %v15903_v0 = vld [vmem:[#allocation29_spill] sm:$0xff]  ;;  %v14035_v37 = vpop.permute.xlu0 %7498 }
 0x90a   : > { %v6107_v50 = vrot.slane %v13979_v45, 4  ;;  %v6703_v58 = vpack.c.b16 %v6702_v18, %v6702_v18  ;;  %v6629_v44 = vpack.i.b16 %v6628_v14, %v6627_v36  ;;  %v8109_v33 = vunpack.c.l.b16 %v8057_v38 }
 0x90b   : > { %v14017_v57 = vperm.slane %v6100_v5, %v9548_v56  ;;  %v14021_v42 = vsel %vm425_vm2, %v6037_v32, %v15902_v30  ;;  %v8036_v3 = vpack.i.b16 %v8035_v17, %v8034_v16  ;;  %v6563_v53 = vsel %vm425_vm2, %v6562_v28, %v13900_v27  ;;  %v14043_v14 = vpop.permute.xlu2 %5517 }
 0x90c   : > { %v6009_v10 = vrot.slane %v15903_v0, 4  ;;  %v14027_v48 = vperm.slane %v6072_v62, %v9548_v56  ;;  %6704 = vrot.lane.b32.xlu1 %v6703_v58, %s9447_s17  ;;  %v8110_v55 = vpack.c.b16 %v8109_v33, %v8109_v33  ;;  %v14031_v59 = vperm.slane %v6563_v53, %v15580_v9  ;;  %v14037_v27 = vpop.permute.xlu1 %7494 }
 0x90d   : > { %v6079_v5 = vrot.slane %v14010_v6, 4  ;;  %v8085_v36 = vunpack.c.l.b16 %v8036_v3  ;;  %v6590_v32 = vrot.slane %v13930_v40, 4  ;;  %v8058_v1 = vshrl.u32 %v7984_v13, 16 }
 0x90e   : > { %v6108_v16 = vsel %vm425_vm2, %v14017_v57, %v6107_v50  ;;  %v6678_v52 = vunpack.c.l.b16 %v6629_v44  ;;  %8111 = vrot.lane.b32.xlu0 %v8110_v55, %s9447_s17  ;;  %v6574_v62 = vrot.slane %v14031_v59, 4  ;;  %v8059_v18 = vshrl.u32 %v8012_v29, 16  ;;  %v15904_v44 = vld [vmem:[#allocation52_spill] sm:$0xff] }
 0x90f   : > { %v8086_v38 = vpack.c.b16 %v8085_v36, %v8085_v36  ;;  %v6591_v40 = vsel %vm425_vm2, %v6590_v32, %v13905_v15  ;;  %v6644_v13 = vpack.i.b16 %v13963_v31, %v13960_v19  ;;  %v6645_v17 = vshrl.u32 %v13960_v19, 16 }
 0x910   : > { %v7533_v28 = vperm.slane %v7529_v12, %v9548_v56  ;;  %v14052_v50 = vsel %vm425_vm2, 0, %v6574_v62  ;;  %v14055_v58 = vperm.slane %v6591_v40, %v15580_v9  ;;  %v8060_v29 = vpack.i.b16 %v8059_v18, %v8058_v1 }
 0x911   : > { %v14059_v33 = vsel %vm425_vm2, %v6009_v10, %v15904_v44  ;;  %v14062_v15 = vperm.slane %v6108_v16, %v15580_v9  ;;  %8087 = vrot.lane.b32.xlu2 %v8086_v38, %s9445_s15  ;;  %v7534_v19 = vrot.slane %v13932_v2, 4  ;;  %v6646_v12 = vshrl.u32 %v13963_v31, 16  ;;  %v14084_v38 = vpop.permute.xlu0 %7506 }
 0x912   : > { %v6080_v30 = vsel %vm425_vm2, %v14027_v48, %v6079_v5  ;;  %v6679_v3 = vpack.c.b16 %v6678_v52, %v6678_v52  ;;  %v6602_v53 = vrot.slane %v14055_v58, 4  ;;  %v8113_v0 = vunpack.c.l.b16 %v8060_v29  ;;  %v15906_v29 = vld [vmem:[#allocation44_spill] sm:$0xff] }
 0x913   : > { %v6639_v55 = vshrl.u32 %v14052_v50, 16  ;;  %v6694_v10 = vunpack.c.l.b16 %v6644_v13  ;;  %v6647_v36 = vpack.i.b16 %v6646_v12, %v6645_v17  ;;  %v7535_v32 = vsel %vm425_vm2, %v7534_v19, %v13994_v21  ;;  %v14094_v19 = vpop.permute.xlu2 %5505 }
 0x914   : > { %6680 = vrot.lane.b32.xlu1 %v6679_v3, %s9445_s15  ;;  %v7542_v1 = vrot.slane %v7533_v28, 4  ;;  %v14075_v2 = vsel %vm425_vm2, 0, %v6602_v53  ;;  %v8114_v31 = vpack.c.b16 %v8113_v0, %v8113_v0  ;;  %v7539_v5 = vperm.slane %v7535_v32, %v9548_v56  ;;  %v14086_v21 = vpop.permute.xlu1 %7500  ;;  %v15907_v53 = vld [vmem:[#allocation54_spill] sm:$0xff] }
 0x915   : > { %v14079_v16 = vperm.slane %v6080_v30, %v15580_v9  ;;  %v6640_v52 = vshrl.u32 %v14075_v2, 16  ;;  %v5828_v62 = vshrl.u32 %v13955_v20, 16  ;;  %v7612_v18 = vrot.slane %v14002_v63, 4 }
 0x916   : > { %8115 = vrot.lane.b32.xlu0 %v8114_v31, %s9445_s15  ;;  %v5827_v40 = vshrl.u32 %v13909_v49, 16  ;;  %v7540_v13 = vrot.slane %v7539_v5, 4  ;;  %v14091_v17 = vsel %vm425_vm2, %v7539_v5, %v7542_v1  ;;  %v8046_v44 = vshrl.u32 %v15906_v29, 16  ;;  %v15910_v5 = vld [vmem:[#allocation34_spill] sm:$0xff]  ;;  %v15911_v29 = vld [vmem:[#allocation68_spill] sm:$0xff] }
 0x917   : > { %15905 = vst [vmem:[#allocation40_spill] sm:$0xff] %v14091_v17  ;;  %v6641_v12 = vpack.i.b16 %v6640_v52, %v6639_v55  ;;  %v6695_v30 = vpack.c.b16 %v6694_v10, %v6694_v10  ;;  %v6698_v3 = vunpack.c.l.b16 %v6647_v36  ;;  %v7613_v63 = vsel %vm425_vm2, %v7612_v18, %v13919_v47 }
 0x918   : > { %v7562_v0 = vrot.slane %v15907_v53, 4  ;;  %v14100_v32 = vsel %vm425_vm2, %v7540_v13, %v7533_v28  ;;  %v7617_v31 = vperm.slane %v7613_v63, %v9548_v56  ;;  %v8047_v1 = vshrl.u32 %v15909_v4, 16 }
 0x919   : > { %15908 = vst [vmem:[#allocation33_spill] sm:$0xff] %v14100_v32  ;;  %v6015_v17 = vrot.slane %v15910_v5, 4  ;;  %v7618_v54 = vrot.slane %v15911_v29, 4  ;;  %v6690_v8 = vunpack.c.l.b16 %v6641_v12  ;;  %6696 = vrot.lane.b32.xlu2 %v6695_v30, %s9446_s16  ;;  %v5829_v55 = vpack.i.b16 %v5828_v62, %v5827_v40  ;;  %v15913_v5 = vld [vmem:[#allocation60_spill] sm:$0xff]  ;;  %v15914_v29 = vld [vmem:[#allocation15_spill] sm:$0xff] }
 0x91a   : > { %v7563_v47 = vsel %vm425_vm2, %v7562_v0, %v13992_v41  ;;  %v8048_v10 = vpack.i.b16 %v8047_v1, %v8046_v44  ;;  %v6626_v28 = vpack.i.b16 %v13982_v51, %v13975_v24  ;;  %v7584_v36 = vrot.slane %v14035_v37, 4  ;;  %v14122_v37 = vpop.permute.xlu0 %5545 }
 0x91b   : > { %v6691_v52 = vpack.c.b16 %v6690_v8, %v6690_v8  ;;  %v6699_v18 = vpack.c.b16 %v6698_v3, %v6698_v3  ;;  %v7619_v4 = vsel %vm425_vm2, %v7618_v54, %v14037_v27  ;;  %v6621_v13 = vshrl.u32 %v13828_v25, 16  ;;  %v14131_v30 = vpop.permute.xlu2 %5553 }
 0x91c   : > { %v7626_v12 = vrot.slane %v7617_v31, 4  ;;  %v8097_v63 = vunpack.c.l.b16 %v8048_v10  ;;  %v7585_v62 = vsel %vm425_vm2, %v7584_v36, %v13921_v61  ;;  %v7623_v41 = vperm.slane %v7619_v4, %v9548_v56  ;;  %v14124_v54 = vpop.permute.xlu1 %5549 }
 0x91d   : > { %6692 = vrot.lane.b32.xlu1 %v6691_v52, %s9443_s13  ;;  %v5880_v40 = vunpack.c.l.b16 %v5829_v55  ;;  %v7567_v24 = vperm.slane %v7563_v47, %v9548_v56  ;;  %v6160_v8 = vshrl.u32 %v14079_v16, 16  ;;  %v6622_v51 = vshrl.u32 %v13838_v26, 16 }
 0x91e   : > { %6700 = vrot.lane.b32.xlu0 %v6699_v18, %s9444_s14  ;;  %v6674_v25 = vunpack.c.l.b16 %v6626_v28  ;;  %v6161_v61 = vshrl.u32 %v14062_v15, 16  ;;  %v7624_v27 = vrot.slane %v7623_v41, 4  ;;  %v14129_v44 = vsel %vm425_vm2, %v7623_v41, %v7626_v12  ;;  %v15917_v28 = vld [vmem:[#allocation49_spill] sm:$0xff] }
 0x91f   : > { %15912 = vst [vmem:[#allocation26_spill] sm:$0xff] %v14129_v44  ;;  %v14135_v3 = vperm.slane %v13938_v46, %v15580_v9  ;;  %v14139_v26 = vperm.slane %v13944_v11, %v15580_v9  ;;  %v8098_v53 = vpack.c.b16 %v8097_v63, %v8097_v63  ;;  %v6623_v0 = vpack.i.b16 %v6622_v51, %v6621_v13 }
 0x920   : > { %v14143_v1 = vperm.slane %v14021_v42, %v9548_v56  ;;  %v15915_v55 = vrot.slane %v15914_v29, 4  ;;  %v7589_v10 = vperm.slane %v7585_v62, %v9548_v56  ;;  %v14151_v46 = vsel %vm425_vm2, %v7624_v27, %v7617_v31 }
 0x921   : > { %15916 = vst [vmem:[#allocation29_spill] sm:$0xff] %v14151_v46  ;;  %v14155_v11 = vperm.slane %v14059_v33, %v9548_v56  ;;  %v6016_v36 = vsel %vm425_vm2, %v6015_v17, %v15917_v28  ;;  %v7568_v52 = vrot.slane %v7567_v24, 4  ;;  %8099 = vrot.lane.b32.xlu2 %v8098_v53, %s9443_s13  ;;  %v7590_v42 = vrot.slane %v14084_v38, 4 }
 0x922   : > { %v6044_v47 = vsel %vm425_vm2, %v15915_v55, %v15913_v5  ;;  %v5881_v18 = vpack.c.b16 %v5880_v40, %v5880_v40  ;;  %v6675_v4 = vpack.c.b16 %v6674_v25, %v6674_v25  ;;  %v6162_v13 = vpack.i.b16 %v6161_v61, %v6160_v8  ;;  %v15918_v61 = vld [vmem:[#allocation7_spill] sm:$0xff] }
 0x923   : > { %v7556_v12 = vrot.slane %v14086_v21, 4  ;;  %v6670_v63 = vunpack.c.l.b16 %v6623_v0  ;;  %v6638_v31 = vpack.i.b16 %v14075_v2, %v14052_v50  ;;  %v7591_v33 = vsel %vm425_vm2, %v7590_v42, %v13854_v22  ;;  %v14176_v2 = vpop.permute.xlu0 %5521  ;;  %v14185_v0 = vpop.permute.xlu2 %8075 }
 0x924   : > { %v6633_v62 = vshrl.u32 %v14031_v59, 16  ;;  %v7598_v17 = vrot.slane %v7589_v10, 4  ;;  %v5702_v41 = vrot.slane %v14139_v26, 4  ;;  %v7595_v51 = vperm.slane %v7591_v33, %v9548_v56  ;;  %v14178_v8 = vpop.permute.xlu1 %5525 }
 0x925   : > { %v7557_v38 = vsel %vm425_vm2, %v7556_v12, %v13810_v60  ;;  %5882 = vrot.lane.b32.xlu1 %v5881_v18, %s9444_s14  ;;  %v6634_v40 = vshrl.u32 %v14055_v58, 16  ;;  %v6518_v50 = vrot.slane %v13833_v34, 4  ;;  %v6546_v22 = vrot.slane %v13851_v35, 4 }
 0x926   : > { %v7561_v21 = vperm.slane %v7557_v38, %v9548_v56  ;;  %6676 = vrot.lane.b32.xlu0 %v6675_v4, %s9447_s17  ;;  %v6213_v25 = vunpack.c.l.b16 %v6162_v13  ;;  %v5730_v27 = vrot.slane %v15918_v61, 4  ;;  %v7596_v60 = vrot.slane %v7595_v51, 4 }
 0x927   : > { %v14183_v53 = vsel %vm425_vm2, %v7595_v51, %v7598_v17  ;;  %v6671_v5 = vpack.c.b16 %v6670_v63, %v6670_v63  ;;  %v6635_v28 = vpack.i.b16 %v6634_v40, %v6633_v62  ;;  %v6686_v42 = vunpack.c.l.b16 %v6638_v31 }
 0x928   : > { %v14188_v29 = vsel %vm425_vm2, %v7568_v52, %v7561_v21  ;;  %v7570_v55 = vrot.slane %v7561_v21, 4  ;;  %v14191_v18 = vsel %vm425_vm2, 0, %v5702_v41  ;;  %v14194_v4 = vsel %vm425_vm2, %v7596_v60, %v7589_v10  ;;  %v15923_v60 = vld [vmem:[#allocation12_spill] sm:$0xff] }
 0x929   : > { %15919 = vst [vmem:[#allocation52_spill] sm:$0xff] %v14188_v29  ;;  %v6519_v13 = vsel %vm425_vm2, 0, %v6518_v50  ;;  %v14198_v12 = vperm.slane %v6016_v36, %v9548_v56  ;;  %6672 = vrot.lane.b32.xlu2 %v6671_v5, %s9444_s14  ;;  %v6547_v52 = vsel %vm425_vm2, 0, %v6546_v22  ;;  %v6105_v31 = vrot.slane %v14017_v57, 4 }
 0x92a   : > { %15920 = vst [vmem:[#allocation44_spill] sm:$0xff] %v14194_v4  ;;  %v14202_v63 = vsel %vm425_vm2, %v7567_v24, %v7570_v55  ;;  %v6615_v33 = vshrl.u32 %v6519_v13, 16  ;;  %v14207_v62 = vperm.slane %v6044_v47, %v9548_v56  ;;  %v14210_v10 = vsel %vm425_vm2, 0, %v5730_v27  ;;  %v15922_v27 = vld [vmem:[#allocation23_spill] sm:$0xff] }
 0x92b   : > { %15921 = vst [vmem:[#allocation54_spill] sm:$0xff] %v14202_v63  ;;  %v6616_v17 = vshrl.u32 %v6547_v52, 16  ;;  %v6023_v36 = vrot.slane %v14155_v11, 4  ;;  %v6214_v41 = vpack.c.b16 %v6213_v25, %v6213_v25  ;;  %v5808_v51 = vpack.i.b16 %v14210_v10, %v14191_v18  ;;  %v5534_v50 = vpop.permute.xlu0 %5533  ;;  %v15935_v63 = vld [vmem:[#allocation39_spill] sm:$0xff] }
 0x92c   : > { %v6682_v24 = vunpack.c.l.b16 %v6635_v28  ;;  %v6051_v38 = vrot.slane %v14143_v1, 4  ;;  %v6687_v21 = vpack.c.b16 %v6686_v42, %v6686_v42  ;;  %v5784_v57 = vrot.slane %v14135_v3, 4  ;;  %v5538_v22 = vpop.permute.xlu1 %5537  ;;  %v15925_v42 = vld [vmem:[#allocation69_spill] sm:$0xff] }
 0x92d   : > { %v6617_v40 = vpack.i.b16 %v6616_v17, %v6615_v33  ;;  %v6024_v47 = vsel %vm425_vm2, %v14198_v12, %v6023_v36  ;;  %6215 = vrot.lane.b32.xlu1 %v6214_v41, %s9444_s14  ;;  %v15924_v25 = vrot.slane %v15923_v60, 4  ;;  %v6106_v28 = vsel %vm425_vm2, %v6105_v31, %v13979_v45  ;;  %v14232_v17 = vpop.permute.xlu2 %5529 }
 0x92e   : > { %v6052_v55 = vsel %vm425_vm2, %v14207_v62, %v6051_v38  ;;  %6688 = vrot.lane.b32.xlu0 %v6687_v21, %s9449_s19  ;;  %v5756_v33 = vrot.slane %v15925_v42, 4  ;;  %v6077_v36 = vrot.slane %v14027_v48, 4  ;;  %v5856_v41 = vunpack.c.l.b16 %v5808_v51  ;;  %v15927_v51 = vld [vmem:[#allocation31_spill] sm:$0xff] }
 0x92f   : > { %v14224_v5 = vsel %vm425_vm2, %v15924_v25, %v15922_v27  ;;  %v6683_v32 = vpack.c.b16 %v6682_v24, %v6682_v24  ;;  %v6614_v60 = vpack.i.b16 %v6547_v52, %v6519_v13  ;;  %v5688_v27 = vrot.slane %v13723_v23, 4  ;;  %v15928_v23 = vld [vmem:[#allocation64_spill] sm:$0xff]  ;;  %v15929_v52 = vld [vmem:[#allocation35_spill] sm:$0xff] }
 0x930   : > { %v14237_v25 = vperm.slane %v6024_v47, %v15580_v9  ;;  %v6662_v38 = vunpack.c.l.b16 %v6617_v40  ;;  %v14240_v46 = vsel %vm425_vm2, 0, %v5784_v57  ;;  %v14243_v45 = vperm.slane %v6052_v55, %v15580_v9  ;;  %v15930_v57 = vld [vmem:[#allocation42_spill] sm:$0xff] }
 0x931   : > { %v14246_v31 = vperm.slane %v6106_v28, %v15580_v9  ;;  %v6078_v48 = vsel %vm425_vm2, %v6077_v36, %v14010_v6  ;;  %v8306_v13 = vrot.slane %v15927_v51, 4  ;;  %6684 = vrot.lane.b32.xlu2 %v6683_v32, %s9448_s18  ;;  %v5457_v24 = vpack.i.b16 %v15929_v52, %v15928_v23  ;;  %v15931_v47 = vld [vmem:[#allocation14_spill] sm:$0xff]  ;;  %v15933_v52 = vld [vmem:[#allocation4_spill] sm:$0xff] }
 0x932   : > { %v14255_v21 = vsel %vm425_vm2, 0, %v5756_v33  ;;  %v6651_v40 = vshrl.u32 %v13986_v7, 16  ;;  %v5481_v55 = vpack.i.b16 %v15931_v47, %v15930_v57  ;;  %v5857_v28 = vpack.c.b16 %v5856_v41, %v5856_v41  ;;  %v15934_v41 = vld [vmem:[#allocation21_spill] sm:$0xff] }
 0x933   : > { %15926 = vst [vmem:[#allocation8_spill] sm:$0xff] %v14246_v31  ;;  %v5820_v29 = vpack.i.b16 %v14240_v46, %v14255_v21  ;;  %v6658_v6 = vunpack.c.l.b16 %v6614_v60  ;;  %v5826_v36 = vpack.i.b16 %v13955_v20, %v13909_v49  ;;  %v6663_v32 = vpack.c.b16 %v6662_v38, %v6662_v38  ;;  %v5510_v38 = vpop.permute.xlu0 %5509 }
 0x934   : > { %v6035_v51 = vrot.slane %v14237_v25, 4  ;;  %v6652_v23 = vshrl.u32 %v13989_v39, 16  ;;  %v5576_v33 = vsel %vm1171_vm7, %v5481_v55, %v5534_v50  ;;  %v14268_v7 = vperm.slane %v6078_v48, %v15580_v9  ;;  %v5514_v4 = vpop.permute.xlu1 %5513 }
 0x935   : > { %v8312_v57 = vrot.slane %v15933_v52, 4  ;;  %v8334_v47 = vrot.slane %v15934_v41, 4  ;;  %5858 = vrot.lane.b32.xlu1 %v5857_v28, %s9447_s17  ;;  %v5561_v60 = vsel %vm1171_vm7, %v5457_v24, %v14094_v19  ;;  %v8307_v44 = vsel %vm425_vm2, %v8306_v13, %v15935_v63  ;;  %v5542_v55 = vpop.permute.xlu2 %5541 }
 0x936   : > { %15932 = vst [vmem:[#allocation34_spill] sm:$0xff] %v14268_v7  ;;  %6664 = vrot.lane.b32.xlu0 %v6663_v32, %s9443_s13  ;;  %v6063_v39 = vrot.slane %v14243_v45, 4  ;;  %v6653_v50 = vpack.i.b16 %v6652_v23, %v6651_v40  ;;  %v5563_v48 = vsel %vm1175_vm8, %v5561_v60, %v5510_v38  ;;  %v5868_v52 = vunpack.c.l.b16 %v5820_v29  ;;  %v15936_v32 = vld [vmem:[#allocation28_spill] sm:$0xff]  ;;  %v15937_v29 = vld [vmem:[#allocation38_spill] sm:$0xff] }
 0x937   : > { %v6659_v41 = vpack.c.b16 %v6658_v6, %v6658_v6  ;;  %v5578_v28 = vsel %vm1175_vm8, %v5576_v33, %v5538_v22  ;;  %v5565_v35 = vsel %vm1178_vm11, %v5563_v48, %v5514_v4  ;;  %v5876_v19 = vunpack.c.l.b16 %v5826_v36  ;;  %v15938_v22 = vld [vmem:[#allocation41_spill] sm:$0xff] }
 0x938   : > { %v14283_v24 = vsel %vm425_vm2, 0, %v6035_v51  ;;  %v5567_v63 = vsel %vm1181_vm13, %v5565_v35, %v14043_v14  ;;  %v5580_v13 = vsel %vm1178_vm11, %v5578_v28, %v5542_v55  ;;  %v5689_v40 = vsel %vm425_vm2, %v5688_v27, %v13689_v43 }
 0x939   : > { %v8340_v23 = vrot.slane %v15936_v32, 4  ;;  %v8313_v6 = vsel %vm425_vm2, %v8312_v57, %v15937_v29  ;;  %v8335_v4 = vsel %vm425_vm2, %v8334_v47, %v15938_v22  ;;  %6660 = vrot.lane.b32.xlu2 %v6659_v41, %s9449_s19  ;;  %v14297_v36 = vperm.slane %v8307_v44, %v9548_v56 }
 0x93a   : > { %v14300_v35 = vsel %vm425_vm2, 0, %v6063_v39  ;;  %v6159_v14 = vpack.i.b16 %v14062_v15, %v14079_v16  ;;  %v5569_v43 = vsel %vm1184_vm14, %v5567_v63, %v14176_v2  ;;  %v5869_v27 = vpack.c.b16 %v5868_v52, %v5868_v52  ;;  %v15939_v2 = vld [vmem:[#allocation30_spill] sm:$0xff] }
 0x93b   : > { %v6141_v51 = vpack.i.b16 %v14300_v35, %v14283_v24  ;;  %v6706_v33 = vunpack.c.l.b16 %v6653_v50  ;;  %v5582_v57 = vsel %vm1181_vm13, %v5580_v13, %v14122_v37  ;;  %v5877_v47 = vpack.c.b16 %v5876_v19, %v5876_v19  ;;  %v5558_v37 = vpop.permute.xlu0 %5557 }
 0x93c   : > { %v6089_v44 = vrot.slane %v14268_v7, 4  ;;  %v6117_v60 = vrot.slane %v14246_v31, 4  ;;  %v14315_v39 = vperm.slane %v8313_v6, %v9548_v56  ;;  %v8341_v48 = vsel %vm425_vm2, %v8340_v23, %v15939_v2 }
 0x93d   : > { %v14320_v55 = vperm.slane %v8335_v4, %v9548_v56  ;;  %5870 = vrot.lane.b32.xlu1 %v5869_v27, %s9449_s19  ;;  %v5571_v50 = vsel %vm1187_vm3, %v5569_v43, %v14178_v8  ;;  %v8320_v52 = vrot.slane %v14297_v36, 4  ;;  %v6209_v41 = vunpack.c.l.b16 %v6159_v14 }
 0x93e   : > { %5878 = vrot.lane.b32.xlu0 %v5877_v47, %s9446_s16  ;;  %v5573_v28 = vsel %vm15940_vm1, %v5571_v50, %v14232_v17  ;;  %v5584_v19 = vsel %vm1184_vm14, %v5582_v57, %v14124_v54  ;;  %v6189_v63 = vunpack.c.l.b16 %v6141_v51  ;;  %v6707_v13 = vpack.c.b16 %v6706_v33, %v6706_v33 }
 0x93f   : > { %v5802_v32 = vpack.i.b16 %v15918_v61, %v14139_v26  ;;  %v5586_v23 = vsel %vm1187_vm3, %v5584_v19, %v14131_v30  ;;  %v14336_v8 = vsel %vm425_vm2, 0, %v6089_v44  ;;  %v14339_v29 = vsel %vm425_vm2, 0, %v6117_v60 }
 0x940   : > { %v5803_v6 = vshrl.u32 %v14139_v26, 16  ;;  %v5588_v17 = vsel %vm15941_vm5, %v5586_v23, %v5558_v37  ;;  %v14344_v54 = vperm.slane %v5689_v40, %v15580_v9  ;;  %v8348_v22 = vrot.slane %v14320_v55, 4  ;;  %vm16017_vm5 = vmmov %vm15940_vm1 }
 0x941   : > { %6708 = vrot.lane.b32.xlu2 %v6707_v13, %s9445_s15  ;;  %v5591_v4 = vunpack.c.l.b16 %v5573_v28  ;;  %v5592_v14 = vunpack.c.l.b16 %v5588_v17  ;;  %v6049_v30 = vrot.slane %v14207_v62, 4  ;;  %v14350_v43 = vperm.slane %v8341_v48, %v9548_v56 }
 0x942   : > { %v8321_v27 = vsel %vm425_vm2, %v14315_v39, %v8320_v52  ;;  %v5804_v26 = vshrl.u32 %v15918_v61, 16  ;;  %v6190_v51 = vpack.c.b16 %v6189_v63, %v6189_v63  ;;  %v6153_v40 = vpack.i.b16 %v14339_v29, %v14336_v8 }
 0x943   : > { %v5848_v33 = vunpack.c.l.b16 %v5802_v32  ;;  %v5593_v57 = vpack.c.b16 %v5592_v14, %v5591_v4  ;;  %v6021_v47 = vrot.slane %v14198_v12, 4  ;;  %v6210_v44 = vpack.c.b16 %v6209_v41, %v6209_v41  ;;  %v15944_v4 = vld [vmem:[#allocation17_spill] sm:$0xff] }
 0x944   : > { %v5805_v60 = vpack.i.b16 %v5804_v26, %v5803_v6  ;;  %v14360_v62 = vperm.slane %v14224_v5, %v15580_v9  ;;  %v8349_v2 = vsel %vm425_vm2, %v14350_v43, %v8348_v22  ;;  %v14367_v61 = vperm.slane %v8321_v27, %v15580_v9 }
 0x945   : > { %6191 = vrot.lane.b32.xlu1 %v6190_v51, %s9447_s17  ;;  %5595 = vst [vmem:[#allocation3] sm:$0xff] %v5593_v57  ;;  %v6135_v12 = vpack.i.b16 %v14243_v45, %v14237_v25  ;;  %v6050_v48 = vsel %vm425_vm2, %v6049_v30, %v14143_v1  ;;  %v6201_v37 = vunpack.c.l.b16 %v6153_v40  ;;  %v5849_v5 = vpack.c.b16 %v5848_v33, %v5848_v33  ;;  %v15945_v30 = vld [vmem:[#allocation66_spill] sm:$0xff] }
 0x946   : > { %6211 = vrot.lane.b32.xlu0 %v6210_v44, %s9446_s16  ;;  %v5700_v50 = vrot.slane %v14344_v54, 4  ;;  %v6022_v52 = vsel %vm425_vm2, %v6021_v47, %v14155_v11  ;;  %v14377_v41 = vperm.slane %v8349_v2, %v15580_v9  ;;  %v5852_v28 = vunpack.c.l.b16 %v5805_v60  ;;  %v15946_v44 = vld [vmem:[#allocation22_spill] sm:$0xff] }
 0x947   : > { %v5816_v19 = vshrl.u32 %v14135_v3, 16  ;;  %v5728_v63 = vrot.slane %v14360_v62, 4  ;;  %v14383_v13 = vperm.slane %v6050_v48, %v15580_v9  ;;  %v6181_v32 = vunpack.c.l.b16 %v6135_v12 }
 0x948   : > { %v8432_v1 = vpack.i.b16 %v14377_v41, %v14367_v61  ;;  %v5815_v23 = vshrl.u32 %v15925_v42, 16  ;;  %v14389_v11 = vperm.slane %v6022_v52, %v15580_v9  ;;  %v6202_v6 = vpack.c.b16 %v6201_v37, %v6201_v37  ;;  %v14408_v37 = vpop.permute.xlu2 %8063 }
 0x949   : > { %5850 = vrot.lane.b32.xlu2 %v5849_v5, %s9446_s16  ;;  %15942 = vst [vmem:[#allocation68_spill] sm:$0xff] %v14383_v13  ;;  %v14392_v17 = vsel %vm425_vm2, 0, %v5700_v50  ;;  %v5791_v22 = vshrl.u32 %v14344_v54, 16  ;;  %v8795_v14 = vrot.slane %v15944_v4, 4  ;;  %v8767_v27 = vrot.slane %v15945_v30, 4 }
 0x94a   : > { %15943 = vst [vmem:[#allocation60_spill] sm:$0xff] %v14389_v11  ;;  %v5853_v26 = vpack.c.b16 %v5852_v28, %v5852_v28  ;;  %v5817_v51 = vpack.i.b16 %v5816_v19, %v5815_v23  ;;  %v14399_v40 = vsel %vm425_vm2, 0, %v5728_v63  ;;  %v5792_v33 = vshrl.u32 %v14360_v62, 16  ;;  %v15948_v23 = vld [vmem:[#allocation55_spill] sm:$0xff] }
 0x94b   : > { %v5758_v57 = vrot.slane %v13909_v49, 4  ;;  %v5786_v47 = vrot.slane %v13955_v20, 4  ;;  %v8796_v60 = vsel %vm425_vm2, %v8795_v14, %v15946_v44  ;;  %v8478_v2 = vunpack.c.l.b16 %v8432_v1  ;;  %v15947_v1 = vld [vmem:[#allocation65_spill] sm:$0xff] }
 0x94c   : > { %v6182_v12 = vpack.c.b16 %v6181_v32, %v6181_v32  ;;  %v5797_v48 = vshrl.u32 %v14392_v17, 16  ;;  %v5793_v5 = vpack.i.b16 %v5792_v33, %v5791_v22  ;;  %v6033_v50 = vrot.slane %v14389_v11, 4 }
 0x94d   : > { %6203 = vrot.lane.b32.xlu1 %v6202_v6, %s9449_s19  ;;  %v14412_v52 = vsel %vm425_vm2, 0, %v5758_v57  ;;  %v14415_v49 = vsel %vm425_vm2, 0, %v5786_v47  ;;  %v5864_v20 = vunpack.c.l.b16 %v5817_v51  ;;  %v5798_v28 = vshrl.u32 %v14399_v40, 16  ;;  %v15949_v57 = vld [vmem:[#allocation62_spill] sm:$0xff] }
 0x94e   : > { %5854 = vrot.lane.b32.xlu0 %v5853_v26, %s9444_s14  ;;  %v6136_v19 = vshrl.u32 %v14237_v25, 16  ;;  %v8801_v32 = vrot.slane %v15947_v1, 4  ;;  %v8768_v6 = vsel %vm425_vm2, %v8767_v27, %v15948_v23  ;;  %v14426_v22 = vperm.slane %v8796_v60, %v9548_v56  ;;  %v15950_v27 = vld [vmem:[#allocation18_spill] sm:$0xff]  ;;  %v14446_v1 = vpop.permute.xlu1 %8095 }
 0x94f   : > { %v5799_v4 = vpack.i.b16 %v5798_v28, %v5797_v48  ;;  %v6137_v14 = vshrl.u32 %v14243_v45, 16  ;;  %v6061_v30 = vrot.slane %v14383_v13, 4  ;;  %v8479_v26 = vpack.c.b16 %v8478_v2, %v8478_v2 }
 0x950   : > { %v5836_v25 = vunpack.c.l.b16 %v5793_v5  ;;  %v14431_v51 = vsel %vm425_vm2, 0, %v6033_v50  ;;  %v6124_v33 = vshrl.u32 %v14389_v11, 16  ;;  %v8773_v47 = vrot.slane %v15949_v57, 4  ;;  %v15951_v57 = vld [vmem:[#allocation13_spill] sm:$0xff] }
 0x951   : > { %6183 = vrot.lane.b32.xlu2 %v6182_v12, %s9446_s16  ;;  %v8802_v44 = vsel %vm425_vm2, %v8801_v32, %v15950_v27  ;;  %v5865_v12 = vpack.c.b16 %v5864_v20, %v5864_v20  ;;  %v6138_v60 = vpack.i.b16 %v6137_v14, %v6136_v19  ;;  %v14438_v48 = vperm.slane %v8768_v6, %v9548_v56  ;;  %v14458_v14 = vpop.permute.xlu0 %8103  ;;  %v14468_v27 = vpop.permute.xlu2 %8079 }
 0x952   : > { %v6125_v45 = vshrl.u32 %v14383_v13, 16  ;;  %v6091_v2 = vrot.slane %v14079_v16, 4  ;;  %v6119_v5 = vrot.slane %v14062_v15, 4  ;;  %v8809_v50 = vrot.slane %v14426_v22, 4 }
 0x953   : > { %v5844_v28 = vunpack.c.l.b16 %v5799_v4  ;;  %v14449_v20 = vsel %vm425_vm2, 0, %v6061_v30  ;;  %v6130_v19 = vshrl.u32 %v14431_v51, 16  ;;  %v5837_v32 = vpack.c.b16 %v5836_v25, %v5836_v25 }
 0x954   : > { %v6126_v23 = vpack.i.b16 %v6125_v45, %v6124_v33  ;;  %v14453_v6 = vsel %vm425_vm2, 0, %v6091_v2  ;;  %v14456_v16 = vsel %vm425_vm2, 0, %v6119_v5  ;;  %v6185_v15 = vunpack.c.l.b16 %v6138_v60 }
 0x955   : > { %8480 = vrot.lane.b32.xlu1 %v8479_v26, %s9446_s16  ;;  %v6148_v4 = vshrl.u32 %v14268_v7, 16  ;;  %v6149_v26 = vshrl.u32 %v14246_v31, 16  ;;  %v8774_v25 = vsel %vm425_vm2, %v8773_v47, %v15951_v57  ;;  %v6131_v33 = vshrl.u32 %v14449_v20, 16 }
 0x956   : > { %5866 = vrot.lane.b32.xlu0 %v5865_v12, %s9448_s18  ;;  %v14471_v12 = vperm.slane %v8802_v44, %v9548_v56  ;;  %v8781_v60 = vrot.slane %v14438_v48, 4  ;;  %v5845_v45 = vpack.c.b16 %v5844_v28, %v5844_v28  ;;  %v6169_v5 = vunpack.c.l.b16 %v6126_v23 }
 0x957   : > { %v6132_v2 = vpack.i.b16 %v6131_v33, %v6130_v19  ;;  %v14475_v38 = vperm.slane %v8774_v25, %v9548_v56  ;;  %v6186_v57 = vpack.c.b16 %v6185_v15, %v6185_v15  ;;  %v8318_v30 = vrot.slane %v14315_v39, 4  ;;  %v14494_v33 = vpop.permute.xlu1 %8071 }
 0x958   : > { %v8810_v47 = vsel %vm425_vm2, %v14471_v12, %v8809_v50  ;;  %v8346_v44 = vrot.slane %v14350_v43, 4  ;;  %v5809_v28 = vshrl.u32 %v14191_v18, 16  ;;  %v5810_v19 = vshrl.u32 %v14210_v10, 16  ;;  %v15953_v43 = vld [vmem:[#allocation46_spill] sm:$0xff] }
 0x959   : > { %5838 = vrot.lane.b32.xlu2 %v5837_v32, %s9448_s18  ;;  %v6150_v32 = vpack.i.b16 %v6149_v26, %v6148_v4  ;;  %v8782_v63 = vsel %vm425_vm2, %v14475_v38, %v8781_v60  ;;  %v8319_v50 = vsel %vm425_vm2, %v8318_v30, %v14297_v36  ;;  %v14490_v23 = vperm.slane %v8810_v47, %v15580_v9  ;;  %v15952_v4 = vld [vmem:[#allocation48_spill] sm:$0xff]  ;;  %v15954_v36 = vld [vmem:[#allocation51_spill] sm:$0xff] }
 0x95a   : > { %v6177_v39 = vunpack.c.l.b16 %v6132_v2  ;;  %v6170_v15 = vpack.c.b16 %v6169_v5, %v6169_v5  ;;  %v8739_v26 = vrot.slane %v15952_v4, 4  ;;  %v8711_v25 = vrot.slane %v15953_v43, 4  ;;  %v15955_v2 = vld [vmem:[#allocation50_spill] sm:$0xff]  ;;  %v15958_v4 = vld [vmem:[#allocation61_spill] sm:$0xff] }
 0x95b   : > { %v6197_v60 = vunpack.c.l.b16 %v6150_v32  ;;  %v8347_v18 = vsel %vm425_vm2, %v8346_v44, %v14320_v55  ;;  %v14501_v10 = vperm.slane %v8782_v63, %v15580_v9  ;;  %v14509_v47 = vperm.slane %v8319_v50, %v15580_v9  ;;  %v15956_v32 = vld [vmem:[#allocation47_spill] sm:$0xff] }
 0x95c   : > { %v8740_v30 = vsel %vm425_vm2, %v8739_v26, %v15954_v36  ;;  %v8712_v5 = vsel %vm425_vm2, %v8711_v25, %v15955_v2  ;;  %v15957_v44 = vpack.i.b16 %v14415_v49, %v14412_v52  ;;  %v8717_v26 = vrot.slane %v15958_v4, 4  ;;  %v15959_v2 = vld [vmem:[#allocation43_spill] sm:$0xff] }
 0x95d   : > { %5846 = vrot.lane.b32.xlu1 %v5845_v45, %s9443_s13  ;;  %v14496_v45 = vpack.i.b16 %v5810_v19, %v5809_v28  ;;  %v8745_v28 = vrot.slane %v15956_v32, 4  ;;  %v6178_v19 = vpack.c.b16 %v6177_v39, %v6177_v39  ;;  %v8861_v55 = vpack.i.b16 %v14490_v23, %v14501_v10  ;;  %v15960_v4 = vld [vmem:[#allocation27_spill] sm:$0xff] }
 0x95e   : > { %6187 = vrot.lane.b32.xlu0 %v6186_v57, %s9444_s14  ;;  %v14511_v57 = vpop.permute.xlu0 %8067  ;;  %v14523_v43 = vperm.slane %v8347_v18, %v15580_v9  ;;  %v6198_v50 = vpack.c.b16 %v6197_v60, %v6197_v60  ;;  %v5796_v25 = vpack.i.b16 %v14399_v40, %v14392_v17  ;;  %v14528_v39 = vperm.slane %v8740_v30, %v9548_v56 }
 0x95f   : > { %v14531_v36 = vperm.slane %v8712_v5, %v9548_v56  ;;  %v8746_v32 = vsel %vm425_vm2, %v8745_v28, %v15959_v2  ;;  %v8421_v18 = vshrl.u32 %v14509_v47, 16  ;;  %v5821_v60 = vshrl.u32 %v14255_v21, 16 }
 0x960   : > { %v8911_v17 = vunpack.c.l.b16 %v8861_v55  ;;  %v5833_v30 = vshrl.u32 %v14412_v52, 16  ;;  %v5834_v5 = vshrl.u32 %v14415_v49, 16  ;;  %v5840_v31 = vunpack.c.l.b16 %v5796_v25 }
 0x961   : > { %6171 = vrot.lane.b32.xlu2 %v6170_v15, %s9448_s18  ;;  %v5884_v15 = vunpack.c.l.b16 %v15957_v44  ;;  %v5822_v44 = vshrl.u32 %v14240_v46, 16  ;;  %v8422_v28 = vshrl.u32 %v14523_v43, 16  ;;  %v14552_v46 = vperm.slane %v8746_v32, %v9548_v56 }
 0x962   : > { %v14549_v21 = vpack.i.b16 %v5834_v5, %v5833_v30  ;;  %v15961_v55 = vpack.i.b16 %v14456_v16, %v14453_v6  ;;  %v8912_v25 = vpack.c.b16 %v8911_v17, %v8911_v17  ;;  %v6129_v32 = vpack.i.b16 %v14449_v20, %v14431_v51 }
 0x963   : > { %v14516_v63 = vpop.permute.xlu2 %8083  ;;  %v5885_v40 = vpack.c.b16 %v5884_v15, %v5884_v15  ;;  %v14545_v2 = vpack.i.b16 %v5822_v44, %v5821_v60  ;;  %v8423_v49 = vpack.i.b16 %v8422_v28, %v8421_v18  ;;  %v8753_v44 = vrot.slane %v14528_v39, 4 }
 0x964   : > { %v14554_v52 = vpop.permute.xlu1 %6668  ;;  %v6217_v15 = vunpack.c.l.b16 %v15961_v55  ;;  %v6142_v28 = vshrl.u32 %v14283_v24, 16  ;;  %v6166_v55 = vshrl.u32 %v14453_v6, 16  ;;  %v6167_v51 = vshrl.u32 %v14456_v16, 16 }
 0x965   : > { %6179 = vrot.lane.b32.xlu1 %v6178_v19, %s9443_s13  ;;  %v8718_v19 = vsel %vm425_vm2, %v8717_v26, %v15960_v4  ;;  %v8754_v18 = vsel %vm425_vm2, %v14552_v46, %v8753_v44  ;;  %v8466_v4 = vunpack.c.l.b16 %v8423_v49  ;;  %v5860_v16 = vunpack.c.l.b16 %v14496_v45 }
 0x966   : > { %6199 = vrot.lane.b32.xlu0 %v6198_v50, %s9448_s18  ;;  %v8725_v50 = vrot.slane %v14531_v36, 4  ;;  %v8722_v26 = vperm.slane %v8718_v19, %v9548_v56  ;;  %v8092_v30 = vpop.permute.xlu0 %8091  ;;  %v6218_v17 = vpack.c.b16 %v6217_v15, %v6217_v15  ;;  %v8433_v19 = vshrl.u32 %v14367_v61, 16 }
 0x967   : > { %v14582_v15 = vpack.i.b16 %v6167_v51, %v6166_v55  ;;  %v14585_v24 = vperm.slane %v8754_v18, %v15580_v9  ;;  %v8467_v44 = vpack.c.b16 %v8466_v4, %v8466_v4  ;;  %v5861_v55 = vpack.c.b16 %v5860_v16, %v5860_v16 }
 0x968   : > { %v8726_v5 = vsel %vm425_vm2, %v8722_v26, %v8725_v50  ;;  %v6173_v50 = vunpack.c.l.b16 %v6129_v32 }
 0x969   : > { %5886 = vrot.lane.b32.xlu2 %v5885_v40, %s9447_s17  ;;  %v5841_v40 = vpack.c.b16 %v5840_v31, %v5840_v31  ;;  %v6143_v31 = vshrl.u32 %v14300_v35, 16  ;;  %v14576_v20 = vperm.slane %v8726_v5, %v15580_v9  ;;  %v15963_v5 = vld [vmem:[#allocation36_spill] sm:$0xff] }
 0x96a   : > { %v6174_v13 = vpack.c.b16 %v6173_v50, %v6173_v50 }
 0x96b   : > { %v14560_v60 = vpop.permute.xlu2 %8087  ;;  %v14580_v49 = vpack.i.b16 %v6143_v31, %v6142_v28  ;;  %v8737_v28 = vrot.slane %v14576_v20, 4 }
 0x96c   : > { %v14592_v7 = vpop.permute.xlu1 %6656 }
 0x96d   : > { %8913 = vrot.lane.b32.xlu1 %v8912_v25, %s9446_s16  ;;  %v8434_v25 = vshrl.u32 %v14377_v41, 16  ;;  %v14607_v50 = vsel %vm425_vm2, 0, %v8737_v28  ;;  %v5872_v28 = vunpack.c.l.b16 %v14545_v2  ;;  %v8360_v2 = vrot.slane %v14377_v41, 4 }
 0x96e   : > { %5842 = vrot.lane.b32.xlu0 %v5841_v40, %s9449_s19  ;;  %v15962_v40 = vld [vmem:[#allocation45_spill] sm:$0xff] }
 0x96f   : > { %v8435_v35 = vpack.i.b16 %v8434_v25, %v8433_v19  ;;  %v8015_v32 = vpack.i.b16 %v15963_v5, %v15962_v40  ;;  %v8765_v19 = vrot.slane %v14585_v24, 4  ;;  %v8723_v25 = vrot.slane %v8722_v26, 4  ;;  %v15965_v5 = vld [vmem:[#allocation53_spill] sm:$0xff] }
 0x970   : > { %v14601_v45 = vpop.permute.xlu0 %8107  ;;  %v5873_v41 = vpack.c.b16 %v5872_v28, %v5872_v28 }
 0x971   : > { %6219 = vrot.lane.b32.xlu2 %v6218_v17, %s9447_s17  ;;  %v8837_v17 = vpack.i.b16 %v14585_v24, %v14576_v20  ;;  %v8119_v18 = vsel %vm1171_vm7, %v8015_v32, %v14408_v37  ;;  %v8482_v4 = vunpack.c.l.b16 %v8435_v35  ;;  %v15966_v37 = vld [vmem:[#allocation10_spill] sm:$0xff] }
 0x972   : > { %v8121_v31 = vsel %vm1175_vm8, %v8119_v18, %v14511_v57  ;;  %v8039_v32 = vpack.i.b16 %v15966_v37, %v15965_v5  ;;  %v14617_v57 = vsel %vm425_vm2, 0, %v8765_v19  ;;  %v8332_v18 = vrot.slane %v14367_v61, 4  ;;  %v15969_v5 = vld [vmem:[#allocation9_spill] sm:$0xff] }
 0x973   : > { %v14587_v6 = vpop.permute.xlu2 %6696  ;;  %v8883_v51 = vunpack.c.l.b16 %v8837_v17  ;;  %v8123_v35 = vsel %vm1178_vm11, %v8121_v31, %v14494_v33  ;;  %v8483_v11 = vpack.c.b16 %v8482_v4, %v8482_v4  ;;  %v8843_v26 = vpack.i.b16 %v14617_v57, %v14607_v50  ;;  %v15967_v33 = vld [vmem:[#allocation59_spill] sm:$0xff] }
 0x974   : > { %v8134_v16 = vsel %vm1171_vm7, %v8039_v32, %v8092_v30  ;;  %v8362_v4 = vrot.slane %v15967_v33, 4  ;;  %v8779_v19 = vrot.slane %v14475_v38, 4  ;;  %v8390_v37 = vrot.slane %v15969_v5, 4  ;;  %v15970_v32 = vld [vmem:[#allocation56_spill] sm:$0xff] }
 0x975   : > { %8468 = vrot.lane.b32.xlu1 %v8467_v44, %s9448_s18  ;;  %v15964_v44 = vld [vmem:[#allocation63_spill] sm:$0xff]  ;;  %v8884_v31 = vpack.c.b16 %v8883_v51, %v8883_v51  ;;  %v8136_v38 = vsel %vm1175_vm8, %v8134_v16, %v14446_v1  ;;  %v14646_v33 = vsel %vm425_vm2, 0, %v8332_v18  ;;  %v15973_v16 = vld [vmem:[#allocation25_spill] sm:$0xff] }
 0x976   : > { %6175 = vrot.lane.b32.xlu0 %v6174_v13, %s9449_s19  ;;  %v8396_v40 = vrot.slane %v15964_v44, 4  ;;  %v8751_v13 = vrot.slane %v14552_v46, 4  ;;  %v8724_v46 = vsel %vm425_vm2, %v8723_v25, %v14531_v36  ;;  %v15968_v44 = vld [vmem:[#allocation58_spill] sm:$0xff]  ;;  %v8363_v36 = vsel %vm425_vm2, %v8362_v4, %v15970_v32 }
 0x977   : > { %v8368_v30 = vrot.slane %v15968_v44, 4  ;;  %v8891_v25 = vunpack.c.l.b16 %v8843_v26  ;;  %v5888_v4 = vunpack.c.l.b16 %v14549_v21  ;;  %v6154_v44 = vshrl.u32 %v14336_v8, 16 }
 0x979   : > { %5862 = vrot.lane.b32.xlu2 %v5861_v55, %s9445_s15  ;;  %v8807_v55 = vrot.slane %v14471_v12, 4  ;;  %v8125_v12 = vsel %vm1181_vm13, %v8123_v35, %v14185_v0  ;;  %v8780_v0 = vsel %vm425_vm2, %v8779_v19, %v14438_v48  ;;  %v8369_v26 = vsel %vm425_vm2, %v8368_v30, %v15973_v16 }
 0x97a   : > { %v8127_v48 = vsel %vm1184_vm14, %v8125_v12, %v14468_v27  ;;  %v6193_v19 = vunpack.c.l.b16 %v14580_v49  ;;  %v6155_v30 = vshrl.u32 %v14339_v29, 16  ;;  %v14691_v32 = vperm.slane %v8369_v26, %v9548_v56  ;;  %v15980_v26 = vld [vmem:[#allocation75_spill] sm:$0xff] }
 0x97b   : > { %v8100_v17 = vpop.permute.xlu2 %8099  ;;  %v8808_v61 = vsel %vm425_vm2, %v8807_v55, %v14426_v22  ;;  %v8752_v22 = vsel %vm425_vm2, %v8751_v13, %v14528_v39  ;;  %v14651_v55 = vperm.slane %v8724_v46, %v15580_v9  ;;  %v14665_v39 = vsel %vm425_vm2, 0, %v8360_v2  ;;  %v15977_v2 = vld [vmem:[#allocation37_spill] sm:$0xff] }
 0x97c   : > { %v14657_v1 = vperm.slane %v8808_v61, %v15580_v9  ;;  %v14668_v13 = vperm.slane %v8363_v36, %v9548_v56  ;;  %v8438_v18 = vpack.i.b16 %v14665_v39, %v14646_v33  ;;  %v8892_v46 = vpack.c.b16 %v8891_v25, %v8891_v25 }
 0x97d   : > { %8484 = vrot.lane.b32.xlu1 %v8483_v11, %s9444_s14  ;;  %v8138_v11 = vsel %vm1178_vm11, %v8136_v38, %v8100_v17  ;;  %15971 = vst [vmem:[#allocation15_spill] sm:$0xff] %v14651_v55  ;;  %v15974_v17 = vld [vmem:[#allocation16_spill] sm:$0xff]  ;;  %v14682_v5 = vperm.slane %v8752_v22, %v15580_v9  ;;  %v8735_v27 = vrot.slane %v14651_v55, 4  ;;  %v8397_v61 = vsel %vm425_vm2, %v8396_v40, %v15977_v2 }
 0x97e   : > { %v14639_v51 = vpop.permute.xlu1 %6704  ;;  %8885 = vrot.lane.b32.xlu0 %v8884_v31, %s9446_s16  ;;  %15972 = vst [vmem:[#allocation49_spill] sm:$0xff] %v14657_v1  ;;  %v8391_v28 = vsel %vm425_vm2, %v8390_v37, %v15974_v17  ;;  %v8140_v21 = vsel %vm1181_vm13, %v8138_v11, %v14458_v14  ;;  %v5889_v37 = vpack.c.b16 %v5888_v4, %v5888_v4  ;;  %v8376_v49 = vrot.slane %v14668_v13, 4  ;;  %v15982_v2 = vld [vmem:[#allocation20_spill] sm:$0xff] }
 0x97f   : > { %15975 = vst [vmem:[#allocation7_spill] sm:$0xff] %v14682_v5  ;;  %v14686_v14 = vperm.slane %v8780_v0, %v15580_v9  ;;  %v8142_v8 = vsel %vm1184_vm14, %v8140_v21, %v14601_v45  ;;  %v14697_v29 = vperm.slane %v8391_v28, %v9548_v56  ;;  %v8129_v36 = vsel %vm1187_vm3, %v8127_v48, %v14516_v63 }
 0x980   : > { %v8112_v35 = vpop.permute.xlu0 %8111  ;;  %v8486_v40 = vunpack.c.l.b16 %v8438_v18  ;;  %v8131_v38 = vsel %vm15978_vm9, %v8129_v36, %v14560_v60  ;;  %v6194_v25 = vpack.c.b16 %v6193_v19, %v6193_v19  ;;  %v8851_v11 = vshrl.u32 %v14657_v1, 16  ;;  %vm16018_vm9 = vmmov %vm15940_vm1 }
 0x981   : > { %5874 = vrot.lane.b32.xlu2 %v5873_v41, %s9443_s13  ;;  %15976 = vst [vmem:[#allocation23_spill] sm:$0xff] %v14686_v14  ;;  %v6156_v45 = vpack.i.b16 %v6155_v30, %v6154_v44  ;;  %v15979_v41 = vld [vmem:[#allocation70_spill] sm:$0xff]  ;;  %v8144_v4 = vsel %vm1187_vm3, %v8142_v8, %v8112_v35  ;;  %v6221_v16 = vunpack.c.l.b16 %v14582_v15  ;;  %v8826_v63 = vshrl.u32 %v14651_v55, 16 }
 0x982   : > { %v7011_v22 = vrot.slane %v15979_v41, 4  ;;  %v7039_v17 = vrot.slane %v15980_v26, 4  ;;  %v8850_v60 = vshrl.u32 %v14686_v14, 16  ;;  %v8763_v48 = vrot.slane %v14682_v5, 4  ;;  %v15993_v55 = vld [vmem:[#allocation78_spill] sm:$0xff] }
 0x983   : > { %v14676_v31 = vpop.permute.xlu2 %6672  ;;  %v8149_v21 = vunpack.c.l.b16 %v8131_v38  ;;  %v8487_v18 = vpack.c.b16 %v8486_v40, %v8486_v40  ;;  %v8827_v19 = vshrl.u32 %v14682_v5, 16  ;;  %v6205_v15 = vunpack.c.l.b16 %v6156_v45  ;;  %v15983_v38 = vld [vmem:[#allocation57_spill] sm:$0xff]  ;;  %v15984_v45 = vld [vmem:[#allocation24_spill] sm:$0xff] }
 0x984   : > { %v8852_v35 = vpack.i.b16 %v8851_v11, %v8850_v60  ;;  %v14721_v30 = vsel %vm425_vm2, 0, %v8735_v27  ;;  %v7012_v8 = vsel %vm425_vm2, %v7011_v22, %v15982_v2  ;;  %v8404_v40 = vrot.slane %v14697_v29, 4  ;;  %v15986_v2 = vld [vmem:[#allocation72_spill] sm:$0xff] }
 0x985   : > { %8893 = vrot.lane.b32.xlu1 %v8892_v46, %s9447_s17  ;;  %v8828_v41 = vpack.i.b16 %v8827_v19, %v8826_v63  ;;  %v14731_v11 = vsel %vm425_vm2, 0, %v8763_v48  ;;  %v8839_v27 = vshrl.u32 %v14585_v24, 16  ;;  %v7045_v22 = vrot.slane %v15984_v45, 4 }
 0x986   : > { %v14702_v12 = vpop.permute.xlu1 %6680  ;;  %5890 = vrot.lane.b32.xlu0 %v5889_v37, %s9445_s15  ;;  %v8838_v37 = vshrl.u32 %v14576_v20, 16  ;;  %v14735_v20 = vperm.slane %v8397_v61, %v9548_v56  ;;  %v14743_v63 = vperm.slane %v7012_v8, %v9548_v56  ;;  %v6206_v24 = vpack.c.b16 %v6205_v15, %v6205_v15  ;;  %v15987_v15 = vld [vmem:[#allocation73_spill] sm:$0xff]  ;;  %v15988_v8 = vld [vmem:[#allocation67_spill] sm:$0xff] }
 0x987   : > { %v8871_v48 = vunpack.c.l.b16 %v8828_v41 }
 0x988   : > { %v8116_v0 = vpop.permute.xlu0 %8115 }
 0x989   : > { %v8146_v28 = vsel %vm15981_vm10, %v8144_v4, %v8116_v0  ;;  %6195 = vrot.lane.b32.xlu2 %v6194_v25, %s9445_s15  ;;  %v6222_v25 = vpack.c.b16 %v6221_v16, %v6221_v16  ;;  %v7040_v0 = vsel %vm425_vm2, %v7039_v17, %v15983_v38  ;;  %v8377_v4 = vsel %vm425_vm2, %v14691_v32, %v8376_v49  ;;  %vm16027_vm10 = vmmov %vm15940_vm1 }
 0x98a   : > { %v8150_v46 = vunpack.c.l.b16 %v8146_v28  ;;  %v8832_v16 = vshrl.u32 %v14721_v30, 16  ;;  %v8899_v17 = vunpack.c.l.b16 %v8852_v35  ;;  %v8840_v28 = vpack.i.b16 %v8839_v27, %v8838_v37 }
 0x98b   : > { %v14718_v44 = vpop.permute.xlu2 %6684  ;;  %v14748_v61 = vperm.slane %v7040_v0, %v9548_v56  ;;  %v8833_v49 = vshrl.u32 %v14731_v11, 16  ;;  %v7095_v35 = vrot.slane %v15986_v2, 4  ;;  %v7067_v37 = vrot.slane %v15987_v15, 4 }
 0x98c   : > { %v8151_v36 = vpack.c.b16 %v8150_v46, %v8149_v21  ;;  %v8863_v21 = vshrl.u32 %v14490_v23, 16  ;;  %v15985_v46 = vld [vmem:[#allocation71_spill] sm:$0xff]  ;;  %v8862_v0 = vshrl.u32 %v14501_v10, 16  ;;  %v14765_v27 = vperm.slane %v8377_v4, %v15580_v9 }
 0x98d   : > { %8488 = vrot.lane.b32.xlu1 %v8487_v18, %s9447_s17  ;;  %v8405_v18 = vsel %vm425_vm2, %v14735_v20, %v8404_v40  ;;  %v7046_v19 = vsel %vm425_vm2, %v7045_v22, %v15985_v46  ;;  %v8834_v38 = vpack.i.b16 %v8833_v49, %v8832_v16  ;;  %v7025_v40 = vrot.slane %v14743_v63, 4  ;;  %v15991_v49 = vld [vmem:[#allocation11_spill] sm:$0xff] }
 0x98e   : > { %8153 = vst [vmem:[#allocation3 + $0x30] sm:$0xff] %v8151_v36  ;;  %6223 = vrot.lane.b32.xlu0 %v6222_v25, %s9445_s15  ;;  %v7101_v36 = vrot.slane %v15988_v8, 4  ;;  %v15989_v25 = vld [vmem:[#allocation77_spill] sm:$0xff]  ;;  %v8900_v45 = vpack.c.b16 %v8899_v17, %v8899_v17  ;;  %v8887_v46 = vunpack.c.l.b16 %v8840_v28  ;;  %v14771_v2 = vperm.slane %v7046_v19, %v9548_v56  ;;  %v15992_v28 = vld [vmem:[#allocation74_spill] sm:$0xff] }
 0x98f   : > { %v14745_v26 = vpop.permute.xlu1 %6692  ;;  %v7073_v41 = vrot.slane %v15989_v25, 4  ;;  %v8872_v15 = vpack.c.b16 %v8871_v48, %v8871_v48  ;;  %v8864_v8 = vpack.i.b16 %v8863_v21, %v8862_v0  ;;  %v15990_v25 = vld [vmem:[#allocation6_spill] sm:$0xff]  ;;  %v7068_v4 = vsel %vm425_vm2, %v7067_v37, %v15991_v49  ;;  %v15994_v21 = vld [vmem:[#allocation5_spill] sm:$0xff] }
 0x990   : > { %v14750_v60 = vpop.permute.xlu0 %6700  ;;  %v7096_v16 = vsel %vm425_vm2, %v7095_v35, %v15990_v25  ;;  %v8819_v17 = vrot.slane %v14657_v1, 4  ;;  %v14781_v5 = vperm.slane %v8405_v18, %v15580_v9  ;;  %v7102_v19 = vsel %vm425_vm2, %v7101_v36, %v15992_v28 }
 0x991   : > { %6207 = vrot.lane.b32.xlu2 %v6206_v24, %s9443_s13  ;;  %v7053_v24 = vrot.slane %v14748_v61, 4  ;;  %v14787_v48 = vperm.slane %v15993_v55, %v9548_v56  ;;  %v7074_v35 = vsel %vm425_vm2, %v7073_v41, %v15994_v21  ;;  %v8879_v37 = vunpack.c.l.b16 %v8834_v38 }
 0x992   : > { %v8439_v25 = vshrl.u32 %v14646_v33, 16  ;;  %v8791_v18 = vrot.slane %v14686_v14, 4  ;;  %v8456_v36 = vpack.i.b16 %v14781_v5, %v14765_v27  ;;  %v14799_v49 = vperm.slane %v7096_v16, %v9548_v56 }
 0x993   : > { %v14768_v22 = vpop.permute.xlu2 %6660  ;;  %v14802_v55 = vperm.slane %v7068_v4, %v9548_v56  ;;  %v7054_v41 = vsel %vm425_vm2, %v14771_v2, %v7053_v24  ;;  %v8374_v33 = vrot.slane %v14691_v32, 4  ;;  %v8440_v28 = vshrl.u32 %v14665_v39, 16 }
 0x994   : > { %v14813_v16 = vsel %vm425_vm2, 0, %v8819_v17  ;;  %v14816_v4 = vperm.slane %v7102_v19, %v9548_v56  ;;  %v7026_v24 = vsel %vm425_vm2, %v14787_v48, %v7025_v40  ;;  %v14821_v21 = vperm.slane %v7074_v35, %v9548_v56 }
 0x995   : > { %8901 = vrot.lane.b32.xlu1 %v8900_v45, %s9448_s18  ;;  %v8888_v45 = vpack.c.b16 %v8887_v46, %v8887_v46  ;;  %v8402_v46 = vrot.slane %v14735_v20, 4  ;;  %v8441_v20 = vpack.i.b16 %v8440_v28, %v8439_v25  ;;  %v14826_v32 = vsel %vm425_vm2, 0, %v8791_v18 }
 0x996   : > { %8873 = vrot.lane.b32.xlu0 %v8872_v15, %s9448_s18  ;;  %v8915_v15 = vunpack.c.l.b16 %v8864_v8  ;;  %v8880_v8 = vpack.c.b16 %v8879_v37, %v8879_v37  ;;  %v8506_v39 = vunpack.c.l.b16 %v8456_v36  ;;  %v14829_v17 = vperm.slane %v7054_v41, %v15580_v9 }
 0x997   : > { %v14792_v0 = vpop.permute.xlu1 %5882  ;;  %v7109_v19 = vrot.slane %v14799_v49, 4  ;;  %v8855_v56 = vpack.i.b16 %v14813_v16, %v14826_v32  ;;  %v14836_v40 = vperm.slane %v7026_v24, %v15580_v9  ;;  %v8403_v35 = vsel %vm425_vm2, %v8402_v46, %v14697_v29 }
 0x998   : > { %v14806_v38 = vpop.permute.xlu0 %6676  ;;  %v8916_v14 = vpack.c.b16 %v8915_v15, %v8915_v15  ;;  %v8375_v37 = vsel %vm425_vm2, %v8374_v33, %v14668_v13  ;;  %v8490_v41 = vunpack.c.l.b16 %v8441_v20  ;;  %v8507_v15 = vpack.c.b16 %v8506_v39, %v8506_v39 }
 0x999   : > { %8889 = vrot.lane.b32.xlu2 %v8888_v45, %s9444_s14  ;;  %v7081_v45 = vrot.slane %v14802_v55, 4  ;;  %v7110_v25 = vsel %vm425_vm2, %v14816_v4, %v7109_v19  ;;  %v7137_v28 = vpack.i.b16 %v14829_v17, %v14836_v40  ;;  %v8831_v29 = vpack.i.b16 %v14731_v11, %v14721_v30 }
 0x99a   : > { %v15995_v13 = vpack.i.b16 %v14055_v58, %v14031_v59  ;;  %v8903_v24 = vunpack.c.l.b16 %v8855_v56  ;;  %v14862_v20 = vperm.slane %v8403_v35, %v15580_v9  ;;  %v14865_v39 = vperm.slane %v8375_v37, %v15580_v9 }
 0x99b   : > { %v14823_v1 = vpop.permute.xlu2 %6708  ;;  %v7082_v18 = vsel %vm425_vm2, %v14821_v21, %v7081_v45  ;;  %v14868_v30 = vperm.slane %v7110_v25, %v15580_v9  ;;  %v8491_v19 = vpack.c.b16 %v8490_v41, %v8490_v41  ;;  %v7183_v56 = vunpack.c.l.b16 %v7137_v28  ;;  %v15998_v25 = vld [vmem:[#allocation40_spill] sm:$0xff] }
 0x99c   : > { %v6727_v46 = vsel %vm1171_vm7, %v15995_v13, %v14718_v44  ;;  %15996 = vst [vmem:[#allocation12_spill] sm:$0xff] %v14862_v20  ;;  %v14873_v59 = vperm.slane %v7082_v18, %v15580_v9  ;;  %v8358_v44 = vrot.slane %v14523_v43, 4  ;;  %v8875_v37 = vunpack.c.l.b16 %v8831_v29  ;;  %v15999_v41 = vld [vmem:[#allocation76_spill] sm:$0xff] }
 0x99d   : > { %8881 = vrot.lane.b32.xlu1 %v8880_v8, %s9443_s13  ;;  %v8330_v8 = vrot.slane %v14509_v47, 4  ;;  %15997 = vst [vmem:[#allocation69_spill] sm:$0xff] %v14865_v39  ;;  %v8904_v18 = vpack.c.b16 %v8903_v24, %v8903_v24  ;;  %v8386_v29 = vrot.slane %v14865_v39, 4 }
 0x99e   : > { %8917 = vrot.lane.b32.xlu0 %v8916_v14, %s9444_s14  ;;  %v8844_v14 = vshrl.u32 %v14607_v50, 16  ;;  %v8845_v50 = vshrl.u32 %v14617_v57, 16  ;;  %v14892_v57 = vperm.slane %v14183_v53, %v15580_v9  ;;  %v8359_v24 = vsel %vm425_vm2, 0, %v8358_v44 }
 0x99f   : > { %v14848_v36 = vpop.permute.xlu1 %6215  ;;  %v8414_v53 = vrot.slane %v14862_v20, 4 }
 0x9a0   : > { %v6689_v33 = vpop.permute.xlu0 %6688  ;;  %v8846_v13 = vpack.i.b16 %v8845_v50, %v8844_v14  ;;  %v8821_v14 = vrot.slane %v14490_v23, 4 }
 0x9a1   : > { %v6729_v11 = vsel %vm1175_vm8, %v6727_v46, %v6689_v33  ;;  %8508 = vrot.lane.b32.xlu2 %v8507_v15, %s9446_s16  ;;  %v14885_v15 = vperm.slane %v15998_v25, %v15580_v9  ;;  %v16000_v46 = vld [vmem:[#allocation26_spill] sm:$0xff] }
 0x9a2   : > { %v6731_v58 = vsel %vm1178_vm11, %v6729_v11, %v14745_v26  ;;  %v14888_v26 = vsel %vm425_vm2, 0, %v8330_v8  ;;  %v14902_v33 = vperm.slane %v16000_v46, %v15580_v9  ;;  %v8876_v11 = vpack.c.b16 %v8875_v37, %v8875_v37  ;;  %v16001_v25 = vld [vmem:[#allocation54_spill] sm:$0xff] }
 0x9a3   : > { %v6733_v45 = vsel %vm1181_vm13, %v6731_v58, %v14587_v6  ;;  %v14881_v35 = vpop.permute.xlu2 %5850  ;;  %v6608_v6 = vpack.i.b16 %v15999_v41, %v13833_v34  ;;  %v8426_v58 = vpack.i.b16 %v8359_v24, %v14888_v26  ;;  %v14919_v23 = vperm.slane %v16001_v25, %v15580_v9 }
 0x9a4   : > { %v6735_v28 = vsel %vm1184_vm14, %v6733_v45, %v14750_v60  ;;  %v7184_v60 = vpack.c.b16 %v7183_v56, %v7183_v56  ;;  %v8895_v45 = vunpack.c.l.b16 %v8846_v13  ;;  %v7678_v56 = vpack.i.b16 %v14902_v33, %v14892_v57 }
 0x9a5   : > { %8492 = vrot.lane.b32.xlu1 %v8491_v19, %s9445_s15  ;;  %v6712_v34 = vsel %vm1171_vm7, %v6608_v6, %v14592_v7  ;;  %v6737_v19 = vsel %vm1187_vm3, %v6735_v28, %v14639_v51  ;;  %v14926_v37 = vsel %vm425_vm2, 0, %v8386_v29  ;;  %v14935_v13 = vsel %vm425_vm2, 0, %v8821_v14 }
 0x9a6   : > { %8905 = vrot.lane.b32.xlu0 %v8904_v18, %s9449_s19  ;;  %v6714_v50 = vsel %vm1175_vm8, %v6712_v34, %v14768_v22  ;;  %v8793_v22 = vrot.slane %v14501_v10, 4  ;;  %v14932_v18 = vsel %vm425_vm2, 0, %v8414_v53  ;;  %v7654_v41 = vpack.i.b16 %v14919_v23, %v14885_v15 }
 0x9a7   : > { %v14910_v8 = vpop.permute.xlu1 %5858  ;;  %v6739_v6 = vsel %vm16002_vm12, %v6737_v19, %v14823_v1  ;;  %v8470_v10 = vunpack.c.l.b16 %v8426_v58  ;;  %v8896_v53 = vpack.c.b16 %v8895_v45, %v8895_v45  ;;  %v8450_v14 = vpack.i.b16 %v14932_v18, %v14926_v37  ;;  %vm16028_vm12 = vmmov %vm15940_vm1 }
 0x9a8   : > { %v6665_v44 = vpop.permute.xlu0 %6664  ;;  %v7728_v34 = vunpack.c.l.b16 %v7678_v56  ;;  %v14956_v58 = vsel %vm425_vm2, 0, %v8793_v22 }
 0x9a9   : > { %v6716_v7 = vsel %vm1178_vm11, %v6714_v50, %v6665_v44  ;;  %8877 = vrot.lane.b32.xlu2 %v8876_v11, %s9449_s19  ;;  %v6743_v11 = vunpack.c.l.b16 %v6739_v6  ;;  %v8471_v44 = vpack.c.b16 %v8470_v10, %v8470_v10  ;;  %v8498_v56 = vunpack.c.l.b16 %v8450_v14 }
 0x9aa   : > { %v6718_v51 = vsel %vm1181_vm13, %v6716_v7, %v14554_v52  ;;  %v8445_v52 = vshrl.u32 %v14865_v39, 16  ;;  %v8868_v22 = vshrl.u32 %v14956_v58, 16  ;;  %v8428_v10 = vshrl.u32 %v8359_v24, 16 }
 0x9ab   : > { %v6720_v28 = vsel %vm1184_vm14, %v6718_v51, %v14676_v31  ;;  %v14943_v29 = vpop.permute.xlu2 %6183  ;;  %v8446_v31 = vshrl.u32 %v14862_v20, 16  ;;  %v8427_v51 = vshrl.u32 %v14888_v26, 16  ;;  %v8499_v14 = vpack.c.b16 %v8498_v56, %v8498_v56 }
 0x9ac   : > { %v6722_v46 = vsel %vm1187_vm3, %v6720_v28, %v14806_v38  ;;  %v8869_v38 = vshrl.u32 %v14935_v13, 16  ;;  %v7023_v28 = vrot.slane %v14787_v48, 4  ;;  %v8458_v26 = vshrl.u32 %v14781_v5, 16 }
 0x9ad   : > { %7185 = vrot.lane.b32.xlu1 %v7184_v60, %s9446_s16  ;;  %v6724_v1 = vsel %vm16003_vm15, %v6722_v46, %v14702_v12  ;;  %v8447_v45 = vpack.i.b16 %v8446_v31, %v8445_v52  ;;  %v7162_v60 = vshrl.u32 %v14873_v59, 16  ;;  %v7163_v12 = vshrl.u32 %v14868_v30, 16  ;;  %vm16029_vm15 = vmmov %vm15940_vm1 }
 0x9ae   : > { %v6742_v50 = vunpack.c.l.b16 %v6724_v1  ;;  %8897 = vrot.lane.b32.xlu0 %v8896_v53, %s9445_s15  ;;  %v7729_v52 = vpack.c.b16 %v7728_v34, %v7728_v34  ;;  %v8870_v46 = vpack.i.b16 %v8869_v38, %v8868_v22  ;;  %v8457_v31 = vshrl.u32 %v14765_v27, 16 }
 0x9af   : > { %v14959_v19 = vpop.permute.xlu1 %5870  ;;  %v14968_v6 = vpack.i.b16 %v7163_v12, %v7162_v60  ;;  %v8494_v1 = vunpack.c.l.b16 %v8447_v45  ;;  %v7024_v48 = vsel %vm425_vm2, %v7023_v28, %v14743_v63  ;;  %v7121_v56 = vrot.slane %v14868_v30, 4 }
 0x9b0   : > { %v6744_v25 = vpack.c.b16 %v6743_v11, %v6742_v50  ;;  %v14963_v7 = vpop.permute.xlu0 %5878  ;;  %v8429_v11 = vpack.i.b16 %v8428_v10, %v8427_v51  ;;  %v7051_v50 = vrot.slane %v14771_v2, 4  ;;  %v8923_v34 = vunpack.c.l.b16 %v8870_v46 }
 0x9b1   : > { %8472 = vrot.lane.b32.xlu2 %v8471_v44, %s9449_s19  ;;  %v8495_v38 = vpack.c.b16 %v8494_v1, %v8494_v1  ;;  %v8451_v44 = vshrl.u32 %v14926_v37, 16  ;;  %v8459_v45 = vpack.i.b16 %v8458_v26, %v8457_v31  ;;  %v8452_v63 = vshrl.u32 %v14932_v18, 16 }
 0x9b2   : > { %6746 = vst [vmem:[#allocation3 + $0x18] sm:$0xff] %v6744_v25  ;;  %v8474_v12 = vunpack.c.l.b16 %v8429_v11  ;;  %v7093_v25 = vrot.slane %v14873_v59, 4  ;;  %v7052_v2 = vsel %vm425_vm2, %v7051_v50, %v14748_v61  ;;  %v14992_v51 = vperm.slane %v7024_v48, %v15580_v9 }
 0x9b3   : > { %v14971_v53 = vpop.permute.xlu2 %5838  ;;  %v14998_v22 = vsel %vm425_vm2, 0, %v7121_v56  ;;  %v8924_v28 = vpack.c.b16 %v8923_v34, %v8923_v34  ;;  %v8453_v10 = vpack.i.b16 %v8452_v63, %v8451_v44  ;;  %v8510_v46 = vunpack.c.l.b16 %v8459_v45 }
 0x9b4   : > { %v14995_v37 = vsel %vm425_vm2, 0, %v7093_v25  ;;  %v15005_v1 = vperm.slane %v7052_v2, %v15580_v9  ;;  %v8475_v18 = vpack.c.b16 %v8474_v12, %v8474_v12  ;;  %v7126_v31 = vshrl.u32 %v14992_v51, 16  ;;  %v16006_v2 = vld [vmem:[#allocation52_spill] sm:$0xff] }
 0x9b5   : > { %7730 = vrot.lane.b32.xlu1 %v7729_v52, %s9446_s16  ;;  %v8502_v11 = vunpack.c.l.b16 %v8453_v10  ;;  %v8511_v26 = vpack.c.b16 %v8510_v46, %v8510_v46  ;;  %v8867_v50 = vpack.i.b16 %v14935_v13, %v14956_v58  ;;  %v7161_v48 = vpack.i.b16 %v14868_v30, %v14873_v59  ;;  %v16004_v13 = vld [vmem:[#allocation44_spill] sm:$0xff] }
 0x9b6   : > { %8500 = vrot.lane.b32.xlu0 %v8499_v14, %s9449_s19  ;;  %v7127_v44 = vshrl.u32 %v15005_v1, 16  ;;  %v8388_v45 = vrot.slane %v14765_v27, 4  ;;  %v8416_v25 = vrot.slane %v14781_v5, 4  ;;  %v15027_v58 = vperm.slane %v16004_v13, %v15580_v9  ;;  %v16008_v5 = vld [vmem:[#allocation33_spill] sm:$0xff] }
 0x9b7   : > { %v14980_v24 = vpop.permute.xlu1 %6191  ;;  %v8503_v30 = vpack.c.b16 %v8502_v11, %v8502_v11  ;;  %v8919_v56 = vunpack.c.l.b16 %v8867_v50  ;;  %v15045_v46 = vperm.slane %v16008_v5, %v15580_v9 }
 0x9b8   : > { %v14983_v60 = vpop.permute.xlu0 %6211  ;;  %v7128_v12 = vpack.i.b16 %v7127_v44, %v7126_v31  ;;  %16005 = vst [vmem:[#allocation31_spill] sm:$0xff] %v15027_v58  ;;  %v15036_v27 = vsel %vm425_vm2, 0, %v8388_v45  ;;  %v15049_v31 = vsel %vm425_vm2, 0, %v8416_v25  ;;  %v7667_v50 = vshrl.u32 %v15027_v58, 16 }
 0x9b9   : > { %8496 = vrot.lane.b32.xlu2 %v8495_v38, %s9448_s18  ;;  %v7700_v38 = vunpack.c.l.b16 %v7654_v41  ;;  %v15033_v41 = vperm.slane %v16006_v2, %v15580_v9  ;;  %v7215_v45 = vunpack.c.l.b16 %v14968_v6  ;;  %v7554_v25 = vrot.slane %v14885_v15, 4 }
 0x9bb   : > { %v15000_v52 = vpop.permute.xlu2 %6171  ;;  %v7701_v63 = vpack.c.b16 %v7700_v38, %v7700_v38  ;;  %v8462_v38 = vpack.i.b16 %v15049_v31, %v15036_v27  ;;  %v7644_v13 = vshrl.u32 %v15033_v41, 16  ;;  %v15066_v61 = vsel %vm425_vm2, 0, %v7554_v25 }
 0x9bd   : > { %8925 = vrot.lane.b32.xlu1 %v8924_v28, %s9445_s15  ;;  %v16007_v28 = vld [vmem:[#allocation29_spill] sm:$0xff]  ;;  %v8514_v5 = vunpack.c.l.b16 %v8462_v38 }
 0x9be   : > { %8476 = vrot.lane.b32.xlu0 %v8475_v18, %s9443_s13  ;;  %v15040_v10 = vperm.slane %v16007_v28, %v15580_v9  ;;  %v7171_v18 = vunpack.c.l.b16 %v7128_v12 }
 0x9bf   : > { %v15010_v14 = vpop.permute.xlu1 %6203 }
 0x9c0   : > { %v15016_v34 = vpop.permute.xlu0 %5854  ;;  %v7668_v12 = vshrl.u32 %v15040_v10, 16  ;;  %v7172_v2 = vpack.c.b16 %v7171_v18, %v7171_v18 }
 0x9c1   : > { %8512 = vrot.lane.b32.xlu2 %v8511_v26, %s9444_s14  ;;  %v8920_v26 = vpack.c.b16 %v8919_v56, %v8919_v56  ;;  %v7643_v56 = vshrl.u32 %v15045_v46, 16 }
 0x9c3   : > { %v15029_v59 = vpop.permute.xlu2 %5886  ;;  %v7645_v20 = vpack.i.b16 %v7644_v13, %v7643_v56  ;;  %v7079_v13 = vrot.slane %v14821_v21, 4  ;;  %v7065_v21 = vrot.slane %v14829_v17, 4 }
 0x9c5   : > { %8504 = vrot.lane.b32.xlu1 %v8503_v30, %s9443_s13  ;;  %v7582_v30 = vrot.slane %v14919_v23, 4  ;;  %v7688_v25 = vunpack.c.l.b16 %v7645_v20 }
 0x9c6   : > { %7702 = vrot.lane.b32.xlu0 %v7701_v63, %s9446_s16  ;;  %v7669_v63 = vpack.i.b16 %v7668_v12, %v7667_v50  ;;  %v8515_v12 = vpack.c.b16 %v8514_v5, %v8514_v5  ;;  %v8857_v5 = vshrl.u32 %v14813_v16, 16  ;;  %v16010_v16 = vpack.i.b16 %v14998_v22, %v14995_v37 }
 0x9c7   : > { %v15051_v11 = vpop.permute.xlu1 %8480  ;;  %v15069_v6 = vsel %vm425_vm2, 0, %v7582_v30  ;;  %v7680_v30 = vshrl.u32 %v14902_v33, 16  ;;  %v7689_v39 = vpack.c.b16 %v7688_v25, %v7688_v25 }
 0x9c8   : > { %16009 = vst [vmem:[#allocation64_spill] sm:$0xff] %v15051_v11  ;;  %v5867_v44 = vpop.permute.xlu0 %5866  ;;  %v7716_v50 = vunpack.c.l.b16 %v7669_v63  ;;  %v7679_v11 = vshrl.u32 %v14892_v57, 16  ;;  %v7608_v63 = vrot.slane %v15027_v58, 4  ;;  %v5814_v58 = vpack.i.b16 %v14135_v3, %v15925_v42 }
 0x9c9   : > { %8921 = vrot.lane.b32.xlu2 %v8920_v26, %s9447_s17  ;;  %v7216_v26 = vpack.c.b16 %v7215_v45, %v7215_v45  ;;  %v7107_v45 = vrot.slane %v14816_v4, 4  ;;  %v8856_v4 = vshrl.u32 %v14826_v32, 16 }
 0x9ca   : > { %v7681_v20 = vpack.i.b16 %v7680_v30, %v7679_v11  ;;  %v7219_v11 = vunpack.c.l.b16 %v16010_v16  ;;  %v15105_v30 = vsel %vm425_vm2, 0, %v7608_v63 }
 0x9cb   : > { %v15063_v28 = vpop.permute.xlu2 %6219 }
 0x9cc   : > { %v7732_v3 = vunpack.c.l.b16 %v7681_v20  ;;  %v7220_v63 = vpack.c.b16 %v7219_v11, %v7219_v11  ;;  %v5790_v11 = vpack.i.b16 %v14360_v62, %v14344_v54 }
 0x9cd   : > { %7173 = vrot.lane.b32.xlu1 %v7172_v2, %s9448_s18  ;;  %v7717_v2 = vpack.c.b16 %v7716_v50, %v7716_v50  ;;  %v7108_v50 = vsel %vm425_vm2, %v7107_v45, %v14799_v49  ;;  %v7037_v49 = vrot.slane %v14836_v40, 4 }
 0x9ce   : > { %7217 = vrot.lane.b32.xlu0 %v7216_v26, %s9444_s14  ;;  %v7211_v26 = vunpack.c.l.b16 %v7161_v48  ;;  %v7080_v48 = vsel %vm425_vm2, %v7079_v13, %v14802_v55  ;;  %v5909_v55 = vsel %vm1171_vm7, %v5814_v58, %v5867_v44  ;;  %v15119_v13 = vsel %vm425_vm2, 0, %v7065_v21 }
 0x9cf   : > { %v15075_v18 = vpop.permute.xlu1 %5846  ;;  %v15112_v42 = vperm.slane %v7080_v48, %v15580_v9  ;;  %v5911_v44 = vsel %vm1175_vm8, %v5909_v55, %v14959_v19  ;;  %v7733_v48 = vpack.c.b16 %v7732_v3, %v7732_v3 }
 0x9d0   : > { %v15077_v38 = vpop.permute.xlu0 %6187  ;;  %v7212_v32 = vpack.c.b16 %v7211_v26, %v7211_v26  ;;  %v15122_v26 = vperm.slane %v7108_v50, %v15580_v9  ;;  %v8464_v50 = vshrl.u32 %v15049_v31, 16  ;;  %v5894_v31 = vsel %vm1171_vm7, %v5790_v11, %v14971_v53 }
 0x9d1   : > { %8516 = vrot.lane.b32.xlu2 %v8515_v12, %s9447_s17  ;;  %v7636_v12 = vrot.slane %v15040_v10, 4  ;;  %v7091_v19 = vrot.slane %v15112_v42, 4  ;;  %v7138_v11 = vshrl.u32 %v14836_v40, 16 }
 0x9d3   : > { %v15084_v56 = vpop.permute.xlu2 %5862  ;;  %v15152_v62 = vsel %vm425_vm2, 0, %v7091_v19 }
 0x9d5   : > { %7718 = vrot.lane.b32.xlu1 %v7717_v2, %s9448_s18  ;;  %v8858_v2 = vpack.i.b16 %v8857_v5, %v8856_v4  ;;  %v7038_v4 = vsel %vm425_vm2, 0, %v7037_v49 }
 0x9d6   : > { %7690 = vrot.lane.b32.xlu0 %v7689_v39, %s9448_s18  ;;  %v15116_v39 = vsel %vm425_vm2, 0, %v7636_v12  ;;  %v8463_v12 = vshrl.u32 %v15036_v27, 16  ;;  %v7143_v16 = vpack.i.b16 %v15119_v13, %v7038_v4 }
 0x9d7   : > { %v15102_v25 = vpop.permute.xlu1 %6179  ;;  %v7672_v58 = vpack.i.b16 %v15116_v39, %v15105_v30  ;;  %v8907_v20 = vunpack.c.l.b16 %v8858_v2 }
 0x9d8   : > { %v15109_v45 = vpop.permute.xlu0 %6199  ;;  %v8465_v55 = vpack.i.b16 %v8464_v50, %v8463_v12  ;;  %v7139_v12 = vshrl.u32 %v14829_v17, 16 }
 0x9d9   : > { %7213 = vrot.lane.b32.xlu2 %v7212_v32, %s9446_s16  ;;  %v7720_v27 = vunpack.c.l.b16 %v7672_v58  ;;  %v8908_v49 = vpack.c.b16 %v8907_v20, %v8907_v20 }
 0x9da   : > { %v8518_v20 = vunpack.c.l.b16 %v8465_v55 }
 0x9db   : > { %v5875_v5 = vpop.permute.xlu2 %5874 }
 0x9dc   : > { %v5913_v21 = vsel %vm1178_vm11, %v5911_v44, %v5875_v5 }
 0x9dd   : > { %7221 = vrot.lane.b32.xlu1 %v7220_v63, %s9447_s17  ;;  %v5915_v9 = vsel %vm1181_vm13, %v5913_v21, %v14963_v7  ;;  %v7119_v7 = vrot.slane %v15122_v26, 4  ;;  %v7191_v63 = vunpack.c.l.b16 %v7143_v16  ;;  %v16012_v21 = vld [vmem:[#allocation68_spill] sm:$0xff] }
 0x9de   : > { %7734 = vrot.lane.b32.xlu0 %v7733_v48, %s9444_s14  ;;  %v15142_v32 = vsel %vm1184_vm14, %v5915_v9, %v14792_v0  ;;  %v7721_v0 = vpack.c.b16 %v7720_v27, %v7720_v27  ;;  %v16011_v48 = vld [vmem:[#allocation60_spill] sm:$0xff]  ;;  %v7580_v27 = vrot.slane %v15033_v41, 4 }
 0x9df   : > { %v15144_v2 = vpop.permute.xlu1 %8913  ;;  %v7120_v53 = vsel %vm425_vm2, 0, %v7119_v7  ;;  %v6123_v16 = vpack.i.b16 %v16012_v21, %v16011_v48  ;;  %v7192_v50 = vpack.c.b16 %v7191_v63, %v7191_v63  ;;  %v8519_v7 = vpack.c.b16 %v8518_v20, %v8518_v20 }
 0x9e0   : > { %v5843_v3 = vpop.permute.xlu0 %5842  ;;  %v7155_v19 = vpack.i.b16 %v7120_v53, %v15152_v62 }
 0x9e1   : > { %v5896_v54 = vsel %vm1175_vm8, %v5894_v31, %v5843_v3  ;;  %8909 = vrot.lane.b32.xlu2 %v8908_v49, %s9443_s13  ;;  %v6227_v49 = vsel %vm1171_vm7, %v6123_v16, %v15000_v52  ;;  %v7140_v31 = vpack.i.b16 %v7139_v12, %v7138_v11  ;;  %v7552_v3 = vrot.slane %v15045_v46, 4 }
 0x9e2   : > { %v5898_v58 = vsel %vm1178_vm11, %v5896_v54, %v15075_v18  ;;  %v7203_v63 = vunpack.c.l.b16 %v7155_v19  ;;  %v7144_v54 = vshrl.u32 %v7038_v4, 16  ;;  %v15189_v52 = vsel %vm425_vm2, 0, %v7580_v27 }
 0x9e3   : > { %v5900_v44 = vsel %vm1181_vm13, %v5898_v58, %v14881_v35  ;;  %v15158_v5 = vpop.permute.xlu2 %6195  ;;  %v16013_v35 = vpack.i.b16 %v15069_v6, %v15066_v61  ;;  %v7150_v4 = vshrl.u32 %v15112_v42, 16  ;;  %v7187_v21 = vunpack.c.l.b16 %v7140_v31 }
 0x9e4   : > { %v5902_v9 = vsel %vm1184_vm14, %v5900_v44, %v15016_v34  ;;  %v7145_v34 = vshrl.u32 %v15119_v13, 16  ;;  %v7035_v13 = vrot.slane %v14992_v51, 4  ;;  %v15200_v16 = vsel %vm425_vm2, 0, %v7552_v3 }
 0x9e5   : > { %7722 = vrot.lane.b32.xlu1 %v7721_v0, %s9449_s19  ;;  %v7708_v18 = vunpack.c.l.b16 %v16013_v35  ;;  %v15175_v17 = vsel %vm1187_vm3, %v5902_v9, %v14910_v8  ;;  %v7655_v0 = vshrl.u32 %v14885_v15, 16  ;;  %v7656_v8 = vshrl.u32 %v14919_v23, 16 }
 0x9e6   : > { %7193 = vrot.lane.b32.xlu0 %v7192_v50, %s9447_s17  ;;  %v7146_v12 = vpack.i.b16 %v7145_v34, %v7144_v54  ;;  %v7063_v9 = vrot.slane %v15005_v1, 4  ;;  %v7204_v19 = vpack.c.b16 %v7203_v63, %v7203_v63  ;;  %v7151_v35 = vshrl.u32 %v15122_v26, 16  ;;  %v16014_v63 = vld [vmem:[#allocation34_spill] sm:$0xff]  ;;  %v16015_v54 = vld [vmem:[#allocation8_spill] sm:$0xff] }
 0x9e7   : > { %v15181_v55 = vpop.permute.xlu1 %8468  ;;  %v7709_v58 = vpack.c.b16 %v7708_v18, %v7708_v18  ;;  %v15195_v48 = vpack.i.b16 %v7656_v8, %v7655_v0  ;;  %v15214_v18 = vsel %vm425_vm2, 0, %v7035_v13  ;;  %v7156_v11 = vshrl.u32 %v15152_v62, 16 }
 0x9e8   : > { %v6176_v40 = vpop.permute.xlu0 %6175  ;;  %v7195_v34 = vunpack.c.l.b16 %v7146_v12  ;;  %v6147_v0 = vpack.i.b16 %v16015_v54, %v16014_v63  ;;  %v7661_v62 = vshrl.u32 %v15066_v61, 16  ;;  %v7662_v8 = vshrl.u32 %v15069_v6, 16 }
 0x9e9   : > { %v6229_v44 = vsel %vm1175_vm8, %v6227_v49, %v6176_v40  ;;  %8520 = vrot.lane.b32.xlu2 %v8519_v7, %s9445_s15  ;;  %v7188_v49 = vpack.c.b16 %v7187_v21, %v7187_v21  ;;  %v15221_v7 = vsel %vm425_vm2, 0, %v7063_v9  ;;  %v7132_v40 = vshrl.u32 %v15214_v18, 16 }
 0x9ea   : > { %v6231_v20 = vsel %vm1178_vm11, %v6229_v44, %v15102_v25  ;;  %v7648_v25 = vpack.i.b16 %v15189_v52, %v15200_v16  ;;  %v7133_v13 = vshrl.u32 %v15221_v7, 16  ;;  %v7196_v12 = vpack.c.b16 %v7195_v34, %v7195_v34 }
 0x9eb   : > { %v6233_v15 = vsel %vm1181_vm13, %v6231_v20, %v14943_v29  ;;  %v6208_v23 = vpop.permute.xlu2 %6207  ;;  %v6242_v20 = vsel %vm1171_vm7, %v6147_v0, %v15109_v45  ;;  %v7673_v61 = vshrl.u32 %v15105_v30, 16  ;;  %v7674_v45 = vshrl.u32 %v15116_v39, 16 }
 0x9ec   : > { %v6235_v50 = vsel %vm1184_vm14, %v6233_v15, %v15077_v38  ;;  %v7152_v38 = vpack.i.b16 %v7151_v35, %v7150_v4  ;;  %v7692_v3 = vunpack.c.l.b16 %v7648_v25  ;;  %v15236_v4 = vpack.i.b16 %v7662_v8, %v7661_v62 }
 0x9ed   : > { %7710 = vrot.lane.b32.xlu1 %v7709_v58, %s9447_s17  ;;  %v15211_v29 = vsel %vm1187_vm3, %v6235_v50, %v14980_v24  ;;  %v7157_v24 = vshrl.u32 %v7120_v53, 16  ;;  %v7134_v21 = vpack.i.b16 %v7133_v13, %v7132_v40  ;;  %v6244_v6 = vsel %vm1175_vm8, %v6242_v20, %v15010_v14 }
 0x9ee   : > { %7205 = vrot.lane.b32.xlu0 %v7204_v19, %s9449_s19  ;;  %v7199_v44 = vunpack.c.l.b16 %v7152_v38  ;;  %v7693_v15 = vpack.c.b16 %v7692_v3, %v7692_v3  ;;  %v6246_v25 = vsel %vm1178_vm11, %v6244_v6, %v6208_v23  ;;  %v5906_v35 = vsel %vm16016_vm6, %v15175_v17, %v15084_v56 }
 0x9ef   : > { %v15218_v27 = vpop.permute.xlu1 %8484  ;;  %v7158_v58 = vpack.i.b16 %v7157_v24, %v7156_v11  ;;  %v7168_v11 = vshrl.u32 %v14995_v37, 16  ;;  %v7169_v30 = vshrl.u32 %v14998_v22, 16  ;;  %v5919_v14 = vsel %vm1187_vm3, %v15142_v32, %v15029_v59 }
 0x9f0   : > { %v15223_v31 = vpop.permute.xlu0 %8885  ;;  %v7200_v50 = vpack.c.b16 %v7199_v44, %v7199_v44  ;;  %v7179_v34 = vunpack.c.l.b16 %v7134_v21  ;;  %v7650_v39 = vshrl.u32 %v15189_v52, 16  ;;  %v7638_v23 = vrot.slane %v14902_v33, 4 }
 0x9f1   : > { %7189 = vrot.lane.b32.xlu2 %v7188_v49, %s9444_s14  ;;  %v7207_v9 = vunpack.c.l.b16 %v7158_v58  ;;  %v7610_v49 = vrot.slane %v14892_v57, 4  ;;  %v7675_v56 = vpack.i.b16 %v7674_v45, %v7673_v61  ;;  %v7170_v37 = vpack.i.b16 %v7169_v30, %v7168_v11  ;;  %v16020_v11 = vld [vmem:[#allocation7_spill] sm:$0xff] }
 0x9f2   : > { %v6248_v22 = vsel %vm1181_vm13, %v6246_v25, %v14983_v60  ;;  %v5924_v17 = vunpack.c.l.b16 %v5906_v35  ;;  %v7649_v59 = vshrl.u32 %v15200_v16, 16  ;;  %v7704_v57 = vunpack.c.l.b16 %v15195_v48  ;;  %v16019_v35 = vld [vmem:[#allocation15_spill] sm:$0xff] }
 0x9f3   : > { %v15234_v53 = vpop.permute.xlu2 %8889  ;;  %v7208_v32 = vpack.c.b16 %v7207_v9, %v7207_v9  ;;  %v7180_v33 = vpack.c.b16 %v7179_v34, %v7179_v34  ;;  %v7611_v54 = vsel %vm425_vm2, 0, %v7610_v49  ;;  %v6250_v0 = vsel %vm1184_vm14, %v6248_v22, %v14848_v36 }
 0x9f4   : > { %v7651_v63 = vpack.i.b16 %v7650_v39, %v7649_v59  ;;  %v7724_v60 = vunpack.c.l.b16 %v7675_v56  ;;  %v7639_v16 = vsel %vm425_vm2, 0, %v7638_v23  ;;  %v6239_v48 = vsel %vm16017_vm5, %v15211_v29, %v15158_v5  ;;  %vm16026_vm2 = vmmov %vm15940_vm1 }
 0x9f5   : > { %7197 = vrot.lane.b32.xlu1 %v7196_v12, %s9445_s15  ;;  %v7705_v8 = vpack.c.b16 %v7704_v57, %v7704_v57  ;;  %v7685_v58 = vshrl.u32 %v7611_v54, 16  ;;  %v7131_v44 = vpack.i.b16 %v15221_v7, %v15214_v18  ;;  %v6252_v36 = vsel %vm1187_vm3, %v6250_v0, %v15063_v28 }
 0x9f6   : > { %7694 = vrot.lane.b32.xlu0 %v7693_v15, %s9449_s19  ;;  %v7696_v20 = vunpack.c.l.b16 %v7651_v63  ;;  %v7686_v15 = vshrl.u32 %v7639_v16, 16  ;;  %v6257_v21 = vunpack.c.l.b16 %v6239_v48  ;;  %v7725_v5 = vpack.c.b16 %v7724_v60, %v7724_v60 }
 0x9f7   : > { %v15244_v19 = vpop.permute.xlu1 %8893  ;;  %v7175_v9 = vunpack.c.l.b16 %v7131_v44  ;;  %v8825_v30 = vpack.i.b16 %v16020_v11, %v16019_v35  ;;  %v7223_v49 = vunpack.c.l.b16 %v7170_v37  ;;  %v8420_v44 = vpack.i.b16 %v14523_v43, %v14509_v47  ;;  %v16022_v43 = vld [vmem:[#allocation69_spill] sm:$0xff] }
 0x9f8   : > { %v5891_v38 = vpop.permute.xlu0 %5890  ;;  %v7687_v29 = vpack.i.b16 %v7686_v15, %v7685_v58  ;;  %v7697_v45 = vpack.c.b16 %v7696_v20, %v7696_v20 }
 0x9f9   : > { %v5921_v3 = vsel %vm15940_vm1, %v5919_v14, %v5891_v38  ;;  %7201 = vrot.lane.b32.xlu2 %v7200_v50, %s9448_s18  ;;  %v7176_v7 = vpack.c.b16 %v7175_v9, %v7175_v9  ;;  %v7712_v38 = vunpack.c.l.b16 %v15236_v4  ;;  %v7224_v22 = vpack.c.b16 %v7223_v49, %v7223_v49 }
 0x9fa   : > { %v5925_v24 = vunpack.c.l.b16 %v5921_v3  ;;  %v7740_v18 = vunpack.c.l.b16 %v7687_v29 }
 0x9fb   : > { %v15263_v40 = vpop.permute.xlu2 %8508  ;;  %v7713_v23 = vpack.c.b16 %v7712_v38, %v7712_v38 }
 0x9fc   : > { %v5926_v52 = vpack.c.b16 %v5925_v24, %v5924_v17  ;;  %v7741_v34 = vpack.c.b16 %v7740_v18, %v7740_v18  ;;  %v7684_v17 = vpack.i.b16 %v7639_v16, %v7611_v54 }
 0x9fd   : > { %7209 = vrot.lane.b32.xlu1 %v7208_v32, %s9443_s13  ;;  %v9278_v32 = vld [vmem:[%s15413_s6 + $0x8] sm:$0xff] }
 0x9fe   : > { %5928 = vst [vmem:[#allocation3 + $0x8] sm:$0xff] %v5926_v52  ;;  %7181 = vrot.lane.b32.xlu0 %v7180_v33, %s9443_s13  ;;  %v7736_v52 = vunpack.c.l.b16 %v7684_v17 }
 0x9ff   : > { %v15275_v62 = vpop.permute.xlu1 %8488 }
 0xa00   : > { %v6224_v13 = vpop.permute.xlu0 %6223  ;;  %v7737_v54 = vpack.c.b16 %v7736_v52, %v7736_v52 }
 0xa01   : > { %v6254_v12 = vsel %vm16018_vm9, %v6252_v36, %v6224_v13  ;;  %7706 = vrot.lane.b32.xlu2 %v7705_v8, %s9444_s14  ;;  %v8524_v13 = vsel %vm1171_vm7, %v8420_v44, %v15181_v55  ;;  %v9297_v44 = vld [vmem:[#allocation3 + $0x34] sm:$0xf] }
 0xa02   : > { %v6258_v61 = vunpack.c.l.b16 %v6254_v12 }
 0xa03   : > { %v8878_v6 = vpop.permute.xlu2 %8877 }
 0xa04   : > { %v6259_v50 = vpack.c.b16 %v6258_v61, %v6257_v21  ;;  %v16021_v21 = vld [vmem:[#allocation64_spill] sm:$0xff] }
 0xa05   : > { %7726 = vrot.lane.b32.xlu1 %v7725_v5, %s9443_s13 }
 0xa06   : > { %6261 = vst [vmem:[#allocation3 + $0x10] sm:$0xff] %v6259_v50  ;;  %7698 = vrot.lane.b32.xlu0 %v7697_v45, %s9443_s13  ;;  %v16024_v50 = vld [vmem:[#allocation23_spill] sm:$0xff]  ;;  %v16025_v45 = vld [vmem:[#allocation49_spill] sm:$0xff] }
 0xa07   : > { %v8902_v28 = vpop.permute.xlu1 %8901  ;;  %v8849_v18 = vpack.i.b16 %v16025_v45, %v16024_v50  ;;  %v7125_v50 = vpack.i.b16 %v15005_v1, %v14992_v51 }
 0xa08   : > { %v8874_v25 = vpop.permute.xlu0 %8873 }
 0xa09   : > { %7177 = vrot.lane.b32.xlu2 %v7176_v7, %s9449_s19  ;;  %v8929_v14 = vsel %vm1171_vm7, %v8825_v30, %v8874_v25 }
 0xa0a   : > { %v8931_v3 = vsel %vm1175_vm8, %v8929_v14, %v8878_v6  ;;  %v16023_v6 = vld [vmem:[#allocation12_spill] sm:$0xff] }
 0xa0b   : > { %v8473_v39 = vpop.permute.xlu2 %8472  ;;  %v8444_v55 = vpack.i.b16 %v16023_v6, %v16022_v43 }
 0xa0c   : > { %v8526_v20 = vsel %vm1175_vm8, %v8524_v13, %v8473_v39 }
 0xa0d   : > { %7742 = vrot.lane.b32.xlu1 %v7741_v34, %s9445_s15 }
 0xa0e   : > { %7714 = vrot.lane.b32.xlu0 %v7713_v23, %s9445_s15 }
 0xa0f   : > { %v8882_v56 = vpop.permute.xlu1 %8881 }
 0xa10   : > { %v8933_v24 = vsel %vm1178_vm11, %v8931_v3, %v8882_v56  ;;  %v8918_v4 = vpop.permute.xlu0 %8917 }
 0xa11   : > { %v8935_v59 = vsel %vm1181_vm13, %v8933_v24, %v15223_v31  ;;  %7225 = vrot.lane.b32.xlu2 %v7224_v22, %s9445_s15 }
 0xa12   : > { %v8937_v37 = vsel %vm1184_vm14, %v8935_v59, %v15234_v53  ;;  %v9277_v53 = vld [vmem:[%s15412_s5 + $0x8] sm:$0xff] }
 0xa13   : > { %v8497_v57 = vpop.permute.xlu2 %8496  ;;  %v8939_v33 = vsel %vm1187_vm3, %v8937_v37, %v15244_v19 }
 0xa14   : > { %v8539_v7 = vsel %vm1171_vm7, %v8444_v55, %v8497_v57 }
 0xa16   : > { %9068 = vperm.xlu0 %9320, %v9278_v32  }
 0xa17   : > { %v8493_v63 = vpop.permute.xlu1 %8492 }
 0xa18   : > { %v8906_v0 = vpop.permute.xlu0 %8905 }
 0xa19   : > { %7738 = vrot.lane.b32.xlu2 %v7737_v54, %s9447_s17 }
 0xa1b   : > { %v8513_v31 = vpop.permute.xlu2 %8512 }
 0xa1f   : > { %v15308_v60 = vpop.permute.xlu1 %7185 }
 0xa20   : > { %v8898_v16 = vpop.permute.xlu0 %8897 }
 0xa21   : > { %9059 = vperm.xlu2 %9357, %v9277_v53   ;;  %v8941_v39 = vsel %vm16026_vm2, %v8939_v33, %v8898_v16 }
 0xa22   : > { %v8959_v17 = vunpack.c.l.b16 %v8941_v39 }
 0xa23   : > { %v8922_v48 = vpop.permute.xlu2 %8921 }
 0xa24   : > { %v9432_v33 = vpack.c.b16 %v8959_v17, %v8959_v17 }
 0xa27   : > { %v15310_v8 = vpop.permute.xlu1 %7730 }
 0xa28   : > { %v8501_v58 = vpop.permute.xlu0 %8500 }
 0xa29   : > { %v8541_v35 = vsel %vm1175_vm8, %v8539_v7, %v8501_v58 }
 0xa2b   : > { %v8517_v19 = vpop.permute.xlu2 %8516 }
 0xa2f   : > { %v8926_v36 = vpop.permute.xlu1 %8925 }
 0xa30   : > { %v8477_v12 = vpop.permute.xlu0 %8476 }
 0xa31   : > { %v8528_v15 = vsel %vm1178_vm11, %v8526_v20, %v8477_v12 }
 0xa32   : > { %v8530_v61 = vsel %vm1181_vm13, %v8528_v15, %v16021_v21 }
 0xa33   : > { %v8532_v5 = vsel %vm1184_vm14, %v8530_v61, %v15218_v27  ;;  %v15322_v29 = vpop.permute.xlu2 %7213  ;;  %v8944_v27 = vsel %vm1171_vm7, %v8849_v18, %v8902_v28 }
 0xa34   : > { %v8534_v47 = vsel %vm1187_vm3, %v8532_v5, %v15275_v62  ;;  %v8946_v30 = vsel %vm1175_vm8, %v8944_v27, %v8906_v0 }
 0xa35   : > { %v8536_v59 = vsel %vm16028_vm12, %v8534_v47, %v8493_v63 }
 0xa36   : > { %v8554_v32 = vunpack.c.l.b16 %v8536_v59 }
 0xa37   : > { %v8505_v9 = vpop.permute.xlu1 %8504 }
 0xa38   : > { %v15331_v25 = vpop.permute.xlu0 %7702  ;;  %v8543_v11 = vsel %vm1178_vm11, %v8541_v35, %v8505_v9  ;;  %v7149_v9 = vpack.i.b16 %v15122_v26, %v15112_v42 }
 0xa39   : > { %v8545_v14 = vsel %vm1181_vm13, %v8543_v11, %v15263_v40 }
 0xa3a   : > { %v8547_v3 = vsel %vm1184_vm14, %v8545_v14, %v8513_v31  ;;  %v9024_v31 = vsel %vm319_vm0, %v9432_v33, 0 }
 0xa3b   : > { %v8910_v62 = vpop.permute.xlu2 %8909  ;;  %v8549_v40 = vsel %vm1187_vm3, %v8547_v3, %v8517_v19  ;;  %9032 = vmatpush.bf16.msrb.mxu0 %v9024_v31 }
 0xa3c   : > { %v8948_v38 = vsel %vm1178_vm11, %v8946_v30, %v8910_v62 }
 0xa3d   : > { %v8950_v34 = vsel %vm1181_vm13, %v8948_v38, %v15144_v2 }
 0xa3e   : > { %v8952_v49 = vsel %vm1184_vm14, %v8950_v34, %v8918_v4  ;;  %v16030_v34 = vld [vmem:[#allocation31_spill] sm:$0xff] }
 0xa3f   : > { %v7174_v23 = vpop.permute.xlu1 %7173  ;;  %v8954_v28 = vsel %vm1187_vm3, %v8952_v49, %v8922_v48  ;;  %v9269_v48 = vld [vmem:[#allocation3 + $0x30] sm:$0xf]  ;;  %v7666_v39 = vpack.i.b16 %v15040_v10, %v16030_v34 }
 0xa40   : > { %v7218_v56 = vpop.permute.xlu0 %7217  ;;  %v8956_v22 = vsel %vm16027_vm10, %v8954_v28, %v8926_v36  ;;  %v7229_v18 = vsel %vm1171_vm7, %v7125_v50, %v7174_v23  ;;  %v9242_v50 = vld [vmem:[%s15411_s4 + $0x4] sm:$0xf] }
 0xa41   : > { %v8960_v24 = vunpack.c.l.b16 %v8956_v22 }
 0xa43   : > { %v8521_v37 = vpop.permute.xlu2 %8520  ;;  %v9433_v54 = vpack.c.b16 %v8960_v24, %v8960_v24 }
 0xa44   : > { %v8551_v2 = vsel %vm16029_vm15, %v8549_v40, %v8521_v37 }
 0xa45   : > { %v8555_v57 = vunpack.c.l.b16 %v8551_v2  ;;  %v9027_v53 = vsel %vm319_vm0, %v9433_v54, 0  ;;  %vm16031_vm0 = vmmov %vm15940_vm1 }
 0xa46   : > { %9045 = vmatpush.bf16.msrb.mxu1 %v9027_v53  ;;  %vm16032_vm6 = vmmov %vm16031_vm0 }
 0xa47   : > { %v7719_v4 = vpop.permute.xlu1 %7718  ;;  %v8556_v52 = vpack.c.b16 %v8555_v57, %v8554_v32 }
 0xa48   : > { %v7691_v0 = vpop.permute.xlu0 %7690 }
 0xa49   : > { %8558 = vst [vmem:[#allocation3 + $0x38] sm:$0xff] %v8556_v52 }
 0xa4b   : > { %v7190_v63 = vpop.permute.xlu2 %7189 }
 0xa4f   : > { %v7222_v16 = vpop.permute.xlu1 %7221 }
 0xa50   : > { %v7735_v58 = vpop.permute.xlu0 %7734  ;;  %v9298_v19 = vld [vmem:[#allocation3 + $0x34] sm:$0xf0]  ;;  %v9271_v13 = vld [vmem:[#allocation3 + $0x38] sm:$0xf0] }
 0xa51   : > { %v9270_v36 = vor.u32 %v9298_v19, %v9269_v48  ;;  %v9274_v20 = vor.u32 %v9297_v44, %v9271_v13 }
 0xa53   : > { %v7202_v12 = vpop.permute.xlu2 %7201  ;;  %9033 = vmatpush.bf16.msrb.mxu0 %v9270_v36  ;;  %9046 = vmatpush.bf16.msrb.mxu1 %v9274_v20  ;;  %v9253_v36 = vld [vmem:[#allocation3 + $0x10] sm:$0xf]  ;;  %v9293_v20 = vld [vmem:[#allocation3 + $0x14] sm:$0xf] }
 0xa54   : > { %v7244_v45 = vsel %vm1171_vm7, %v7149_v9, %v7202_v12  ;;  %v9294_v12 = vld [vmem:[#allocation3 + $0x14] sm:$0xf0] }
 0xa57   : > { %v7723_v15 = vpop.permute.xlu1 %7722 }
 0xa58   : > { %v7194_v21 = vpop.permute.xlu0 %7193 }
 0xa5b   : > { %v7707_v61 = vpop.permute.xlu2 %7706 }
 0xa5f   : > { %v7711_v5 = vpop.permute.xlu1 %7710 }
 0xa60   : > { %v7206_v47 = vpop.permute.xlu0 %7205 }
 0xa61   : > { %v7246_v7 = vsel %vm1175_vm8, %v7244_v45, %v7206_v47  ;;  %v9247_v47 = vld [vmem:[#allocation3 + $0x8] sm:$0xf0] }
 0xa63   : > { %v7178_v43 = vpop.permute.xlu2 %7177 }
 0xa64   : > { %v7231_v11 = vsel %vm1175_vm8, %v7229_v18, %v7178_v43  ;;  %v9245_v43 = vld [vmem:[#allocation3] sm:$0xf] }
 0xa67   : > { %v7198_v6 = vpop.permute.xlu1 %7197 }
 0xa68   : > { %v7695_v55 = vpop.permute.xlu0 %7694 }
 0xa6b   : > { %v7226_v62 = vpop.permute.xlu2 %7225 }
 0xa6f   : > { %v7210_v35 = vpop.permute.xlu1 %7209 }
 0xa70   : > { %v7248_v27 = vsel %vm1178_vm11, %v7246_v7, %v7210_v35  ;;  %v7182_v30 = vpop.permute.xlu0 %7181 }
 0xa71   : > { %v7250_v38 = vsel %vm1181_vm13, %v7248_v27, %v15322_v29  ;;  %v7233_v42 = vsel %vm1178_vm11, %v7231_v11, %v7182_v30  ;;  %v7642_v29 = vpack.i.b16 %v15033_v41, %v15045_v46 }
 0xa72   : > { %v7235_v51 = vsel %vm1181_vm13, %v7233_v42, %v15308_v60  ;;  %v7252_v1 = vsel %vm1184_vm14, %v7250_v38, %v7218_v56  ;;  %v7761_v60 = vsel %vm1171_vm7, %v7666_v39, %v7719_v4 }
 0xa73   : > { %v7237_v26 = vsel %vm1184_vm14, %v7235_v51, %v7190_v63  ;;  %v7254_v14 = vsel %vm1187_vm3, %v7252_v1, %v7222_v16  ;;  %v7746_v22 = vsel %vm1171_vm7, %v7642_v29, %v7691_v0  ;;  %v7763_v17 = vsel %vm1175_vm8, %v7761_v60, %v7723_v15  ;;  %v7739_v32 = vpop.permute.xlu2 %7738  ;;  %vm16033_vm7 = vmmov %vm16031_vm0  ;;  %v9255_v15 = vld [vmem:[#allocation3 + $0x18] sm:$0xf0] }
 0xa74   : > { %v7239_v49 = vsel %vm1187_vm3, %v7237_v26, %v7194_v21  ;;  %v7256_v23 = vsel %vm16031_vm0, %v7254_v14, %v7226_v62  ;;  %v7748_v10 = vsel %vm1175_vm8, %v7746_v22, %v7695_v55  ;;  %vm16034_vm8 = vmmov %vm16031_vm0  ;;  %v9254_v21 = vor.u32 %v9294_v12, %v9253_v36 }
 0xa75   : > { %v7241_v28 = vsel %vm16032_vm6, %v7239_v49, %v7198_v6  ;;  %v7260_v56 = vunpack.c.l.b16 %v7256_v23  ;;  %v9291_v6 = vld [vmem:[#allocation3 + $0x4] sm:$0xf] }
 0xa76   : > { %v7259_v3 = vunpack.c.l.b16 %v7241_v28  ;;  %v9250_v9 = vor.u32 %v9291_v6, %v9247_v47 }
 0xa77   : > { %v7727_v24 = vpop.permute.xlu1 %7726 }
 0xa78   : > { %v7765_v59 = vsel %vm1178_vm11, %v7763_v17, %v7727_v24  ;;  %v7261_v40 = vpack.c.b16 %v7260_v56, %v7259_v3  ;;  %v7699_v37 = vpop.permute.xlu0 %7698  ;;  %v16035_v56 = vld [vmem:[#allocation32_spill] sm:$0xff]  ;;  %v16036_v17 = vld [vmem:[#allocation19_spill] sm:$0xff] }
 0xa79   : > { %v7767_v41 = vsel %vm1181_vm13, %v7765_v59, %v15310_v8  ;;  %v7750_v46 = vsel %vm1178_vm11, %v7748_v10, %v7699_v37 }
 0xa7a   : > { %7263 = vst [vmem:[#allocation3 + $0x20] sm:$0xff] %v7261_v40  ;;  %v7752_v2 = vsel %vm1181_vm13, %v7750_v46, %v15331_v25  ;;  %v7769_v57 = vsel %vm1184_vm14, %v7767_v41, %v7735_v58 }
 0xa7b   : > { %v7771_v4 = vsel %vm1187_vm3, %v7769_v57, %v7739_v32  ;;  %v7754_v52 = vsel %vm1184_vm14, %v7752_v2, %v7707_v61  ;;  %v9258_v61 = vor.u32 %v9293_v20, %v9255_v15  ;;  %v9060_v45 = vpop.permute.xlu2 %9059 }
 0xa7c   : > { %v7756_v31 = vsel %vm1187_vm3, %v7754_v52, %v7711_v5  ;;  %v9292_v5 = vld [vmem:[#allocation3 + $0x4] sm:$0xf0] }
 0xa7d   : > { %v9246_v55 = vor.u32 %v9292_v5, %v9245_v43 }
 0xa7f   : > { %v7743_v33 = vpop.permute.xlu1 %7742 }
 0xa80   : > { %v7773_v54 = vsel %vm16033_vm7, %v7771_v4, %v7743_v33  ;;  %v7715_v0 = vpop.permute.xlu0 %7714 }
 0xa81   : > { %v7758_v8 = vsel %vm16034_vm8, %v7756_v31, %v7715_v0  ;;  %v7777_v53 = vunpack.c.l.b16 %v7773_v54  ;;  %v9261_v25 = vld [vmem:[#allocation3 + $0x20] sm:$0xf]  ;;  %v9295_v19 = vld [vmem:[#allocation3 + $0x24] sm:$0xf] }
 0xa82   : > { %v7776_v63 = vunpack.c.l.b16 %v7758_v8 }
 0xa84   : > { %v7778_v16 = vpack.c.b16 %v7777_v53, %v7776_v63 }
 0xa86   : > { %7780 = vst [vmem:[#allocation3 + $0x28] sm:$0xff] %v7778_v16 }
 0xa88   : > { %v9069_v11 = vpop.permute.xlu0 %9068 }
 0xa8d   : > { %v9296_v48 = vld [vmem:[#allocation3 + $0x24] sm:$0xf0]  ;;  %v9263_v58 = vld [vmem:[#allocation3 + $0x28] sm:$0xf0] }
 0xa8e   : > { %v9262_v44 = vor.u32 %v9296_v48, %v9261_v25  ;;  %v9266_v13 = vor.u32 %v9295_v19, %v9263_v58 }
 0xa90   : > { %9034 = vmatpush.bf16.msrb.mxu0 %v9262_v44  ;;  %9047 = vmatpush.bf16.msrb.mxu1 %v9266_v13 }
 0xa94   : > { %9035 = vmatpush.bf16.msrb.mxu0 %v9254_v21  ;;  %9048 = vmatpush.bf16.msrb.mxu1 %v9258_v61 }
 0xa98   : > { %9036 = vmatpush.bf16.msrb.mxu0 %v9246_v55  ;;  %9049 = vmatpush.bf16.msrb.mxu1 %v9250_v9 }
 0xa9b   : > { %9275 = vmatmul.msk.bf16.vlgmr.msrb.gmra.mxu0 %vm4644_vm4, %v9242_v50  ;;  %9276 = vmatmul.msk.bf16.vlgmr.msrb.gmra.mxu1 %vm4644_vm4, %v9242_v50 }
 0xb18   : > { %v9038_v18 = vpop.f32.mrf.mxu0  ;;  %v9051_v7 = vpop.f32.mrf.mxu1 }
 0xb19   : > { %v9062_v35 = vmul.f32 %v9060_v45, %v9038_v18  ;;  %v9063_v27 = vmul.f32 %v9060_v45, %v9051_v7 }
 0xb1b   : > { %v9071_v30 = vadd.f32 %v9069_v11, %v9062_v35  ;;  %v9072_v62 = vadd.f32 %v9069_v11, %v9063_v27 }
 0xb1d   : > { %v9073_v38 = vsub.f32 0.0, %v9071_v30  ;;  %v9074_v42 = vsub.f32 0.0, %v9072_v62 }
 0xb1f   : > { %v9075_v51 = vmul.f32 1.442695, %v9073_v38  ;;  %v9077_v1 = vmul.f32 1.442695, %v9074_v42 }
 0xb20   : > { %v9040_v26 = vpop.f32.mrf.mxu0  ;;  %v9053_v14 = vpop.f32.mrf.mxu1 }
 0xb21   : > { %9417 = vpow2.f32 %v9075_v51 }
 0xb22   : > { %9419 = vpow2.f32 %v9077_v1 }
 0xb27   : > { %v9418_v34 = vpop.eup %9417 }
 0xb28   : > { %v9420_v39 = vpop.eup %9419  ;;  %v9079_v49 = vadd.f32 1.0, %v9418_v34 }
 0xb29   : > { %v9080_v23 = vadd.f32 1.0, %v9420_v39 }
 0xb2a   : > { %9421 = vrcp.f32 %v9079_v49 }
 0xb2b   : > { %9423 = vrcp.f32 %v9080_v23 }
 0xb30   : > { %v9422_v29 = vpop.eup %9421 }
 0xb31   : > { %v9424_v28 = vpop.eup %9423  ;;  %v9083_v60 = vmul.f32 %v9422_v29, %v9071_v30 }
 0xb32   : > { %v9084_v3 = vmul.f32 %v9424_v28, %v9072_v62 }
 0xb33   : > { %v9085_v22 = vadd.f32 %v9083_v60, %v16035_v56 }
 0xb34   : > { %v9086_v24 = vadd.f32 %v9084_v3, %v16036_v17 }
 0xb36   : > { %v9087_v10 = vpack.c.bf16 %v9086_v24, %v9085_v22 }
 0xb38   : > { %9088 = vst [vmem:[%s278_s21] sm:$0xff] %v9087_v10 }
 0xb39 PF: > { %s17_s24 = sadd.s32 1, %s9440_s24  }
 0xb3a   : > { %p14_p4 = scmp.ge.s32.totalorder %s17_s24, 4  }
 0xb3c   :  { %16 = sbr.rel (!%p14_p4) target bundleno = 1 (0x1), region = 84 }

</bundles_post_ra>
